<compile_context>
chip_gen: v7x
topology: tpu7x:2x2x1
jax: 0.10.0
libtpu: 0.0.40
codegen_flags: <defaults>
</compile_context>

<pallas_src>
import functools

import jax
import jax.numpy as jnp
import numpy as np
from jax import lax
from jax.experimental import pallas as pl
from jax.experimental.pallas import tpu as pltpu

HIDDEN = 256    # self.hidden_dim in the PyTorch module
_SUBLANE = 8    # f32 sublane tile
_LANE = 128     # lane tile


# -----------------------------------------------------------------------------
# Kernel 1: bidirectional-LSTM "output at last valid timestep", L2-normalized.
# grid=(2,): step 0 = session LSTM, step 1 = item LSTM. "parallel" => the two
# recurrences land on the two TensorCores on v7x; on single-TC chips the grid
# pipeline prefetches step 1's weights under step 0's compute.
# -----------------------------------------------------------------------------
def bi_lstm_last_kernel(x_ref, xlast_ref, valid_ref,
                        wif_ref, whf_ref, bf_ref, wir_ref, br_ref,
                        out_ref):
    TB = x_ref.shape[1]
    B = xlast_ref.shape[1]
    H = whf_ref.shape[1]
    T = TB // B

    x = x_ref[0].astype(jnp.bfloat16)            # (T*B, D), row = t*B + b
    w_ih = wif_ref[0]                            # (D, 4H) bf16
    w_hh = whf_ref[0]                            # (H, 4H) bf16
    b_f = bf_ref[0]                              # (1, 4H) f32
    valid = valid_ref[0]                         # (T*B, 1) f32 in {0,1}

    # Hoisted input projection: one big matmul instead of T tiny ones.
    gx_all = jnp.dot(x, w_ih, preferred_element_type=jnp.float32) + b_f   # (T*B, 4H)

    def cell(gates, c_prev):
        # PyTorch gate order: i, f, g, o
        i = jax.nn.sigmoid(gates[:, 0 * H:1 * H])
        f = jax.nn.sigmoid(gates[:, 1 * H:2 * H])
        g = jnp.tanh(gates[:, 2 * H:3 * H])
        o = jax.nn.sigmoid(gates[:, 3 * H:4 * H])
        c = f * c_prev + i * g
        return o * jnp.tanh(c), c

    h = jnp.zeros((B, H), jnp.float32)
    c = jnp.zeros((B, H), jnp.float32)
    # Fully unrolled recurrence (T small & static); only h @ W_hh is serial.
    # TODO(synk): MXU-resident W_hh (matmul_push_rhs) if the dump shows a
    #             per-step weight push dominating the chain.
    for t in range(T):
        gates = gx_all[t * B:(t + 1) * B, :] + jnp.dot(
            h.astype(jnp.bfloat16), w_hh, preferred_element_type=jnp.float32)
        h_new, c_new = cell(gates, c)
        m = valid[t * B:(t + 1) * B, :]          # precomputed mask: no per-step compare
        h = h + m * (h_new - h)
        c = c + m * (c_new - c)

    # Reverse-direction output at position len-1 = one cell step from zero state.
    g_rev = jnp.dot(xlast_ref[0].astype(jnp.bfloat16), wir_ref[0],
                    preferred_element_type=jnp.float32) + br_ref[0]
    h_bwd, _ = cell(g_rev, jnp.zeros((B, H), jnp.float32))

    # F.normalize over the [fwd | bwd] concat (eps=1e-12 semantics), EUP rsqrt.
    ssum = (jnp.sum(h * h, axis=-1, keepdims=True)
            + jnp.sum(h_bwd * h_bwd, axis=-1, keepdims=True))
    inv = lax.rsqrt(jnp.maximum(ssum, 1e-24))
    out_ref[0, :, 0:H] = h * inv
    out_ref[0, :, H:2 * H] = h_bwd * inv


# -----------------------------------------------------------------------------
# Kernel 2: fc head. normalize(user_emb), then Linear(5H -> C_pad) as three
# tile-aligned partial dots over the pre-normalized features (no concats).
# -----------------------------------------------------------------------------
def fc_head_kernel(last_ref, user_ref, fcw_ref, fcb_ref, out_ref):
    H = user_ref.shape[1]
    user = user_ref[...]
    u_inv = lax.rsqrt(jnp.maximum(jnp.sum(user * user, axis=-1, keepdims=True), 1e-24))
    fcw = fcw_ref[...]                           # (5H, C_pad) bf16

    def pdot(v, rows):
        return jnp.dot(v.astype(jnp.bfloat16), rows, preferred_element_type=jnp.float32)

    out_ref[...] = (pdot(last_ref[0], fcw[0 * H:2 * H, :])       # session [fwd|bwd]
                    + pdot(last_ref[1], fcw[2 * H:4 * H, :])     # item    [fwd|bwd]
                    + pdot(user * u_inv, fcw[4 * H:5 * H, :])    # user
                    + fcb_ref[...])


# -----------------------------------------------------------------------------
# One-time weight packing (outside the per-call jit): pad, stack, cast to bf16.
# -----------------------------------------------------------------------------
def prepare_packed_params(params):
    bf16 = jnp.bfloat16
    s_wif, s_whf, s_bf, s_wir, s_br = params["session_lstm"]
    i_wif, i_whf, i_bf, i_wir, i_br = params["item_lstm"]
    fc_w, fc_b = params["fc"]

    d_pad = max(s_wif.shape[0], i_wif.shape[0])
    d_pad = ((d_pad + _LANE - 1) // _LANE) * _LANE

    def pad_rows(w):
        return jnp.pad(w, ((0, d_pad - w.shape[0]), (0, 0)))

    C = fc_w.shape[1]
    c_pad = ((C + _LANE - 1) // _LANE) * _LANE

    return {
        "w_ih_f": jnp.stack([pad_rows(s_wif), pad_rows(i_wif)]).astype(bf16),
        "w_hh_f": jnp.stack([s_whf, i_whf]).astype(bf16),
        "b_f":    jnp.stack([s_bf, i_bf]).astype(jnp.float32),
        "w_ih_r": jnp.stack([pad_rows(s_wir), pad_rows(i_wir)]).astype(bf16),
        "b_r":    jnp.stack([s_br, i_br]).astype(jnp.float32),
        "fc_w":   jnp.pad(fc_w, ((0, 0), (0, c_pad - C))).astype(bf16),
        "fc_b":   jnp.pad(fc_b, ((0, 0), (0, c_pad - C))).astype(jnp.float32),
    }


# -----------------------------------------------------------------------------
# Wrapper: per-call layout plumbing (pad batch/time/feature, time-major
# flatten, last-step gather, validity mask) + the two pallas_calls.
# -----------------------------------------------------------------------------
def _prep_seq(x_btd, lens, b_pad, t_pad, d_pad):
    B, T, D = x_btd.shape
    lens = jnp.clip(lens.astype(jnp.int32), 1, T)                 # review: clamp lens
    x_p = jnp.pad(x_btd, ((0, b_pad - B), (0, t_pad - T), (0, d_pad - D)))
    lens_p = jnp.pad(lens, (0, b_pad - B), constant_values=1)
    # time-major flattened rows: row = t*b_pad + b
    x_flat = jnp.transpose(x_p, (1, 0, 2)).reshape(t_pad * b_pad, d_pad)
    # x at the last valid timestep of each sequence (wrapper-side gather).
    x_last = jnp.take_along_axis(x_p, (lens_p - 1)[:, None, None], axis=1)[:, 0, :]
    # validity mask, hoisted out of the kernel's serial chain.
    valid = (jnp.arange(t_pad)[:, None] < lens_p[None, :]).astype(jnp.float32)
    valid = valid.reshape(t_pad * b_pad, 1)
    return x_flat, x_last, valid


def context_lstm_forward(session_x, SL, item_x, IL, user_emb, packed, *, num_contexts):
    B = session_x.shape[0]
    H = user_emb.shape[1]
    b_pad = ((B + _SUBLANE - 1) // _SUBLANE) * _SUBLANE
    d_pad = packed["w_ih_f"].shape[1]
    c_pad = packed["fc_w"].shape[1]
    t_pad = max(session_x.shape[1], item_x.shape[1])

    sx, sxl, sv = _prep_seq(session_x, SL, b_pad, t_pad, d_pad)
    ix, ixl, iv = _prep_seq(item_x, IL, b_pad, t_pad, d_pad)
    x_flat = jnp.stack([sx, ix])                  # (2, T*Bp, Dp)
    x_last = jnp.stack([sxl, ixl])                # (2, Bp, Dp)
    valid = jnp.stack([sv, iv])                   # (2, T*Bp, 1)
    user_p = jnp.pad(user_emb, ((0, b_pad - B), (0, 0)))

    def im3(i):
        return (i, 0, 0)

    last_norm = pl.pallas_call(
        bi_lstm_last_kernel,
        out_shape=jax.ShapeDtypeStruct((2, b_pad, 2 * H), jnp.float32),
        grid=(2,),
        in_specs=[
            pl.BlockSpec((1, t_pad * b_pad, d_pad), im3),
            pl.BlockSpec((1, b_pad, d_pad), im3),
            pl.BlockSpec((1, t_pad * b_pad, 1), im3),
            pl.BlockSpec((1, d_pad, 4 * H), im3),
            pl.BlockSpec((1, H, 4 * H), im3),
            pl.BlockSpec((1, 1, 4 * H), im3),
            pl.BlockSpec((1, d_pad, 4 * H), im3),
            pl.BlockSpec((1, 1, 4 * H), im3),
        ],
        out_specs=pl.BlockSpec((1, b_pad, 2 * H), im3),
        compiler_params=pltpu.CompilerParams(dimension_semantics=("parallel",)),
    )(x_flat, x_last, valid,
      packed["w_ih_f"], packed["w_hh_f"], packed["b_f"],
      packed["w_ih_r"], packed["b_r"])

    vmem = pl.BlockSpec(memory_space=pltpu.MemorySpace.VMEM)
    out_pad = pl.pallas_call(
        fc_head_kernel,
        out_shape=jax.ShapeDtypeStruct((b_pad, c_pad), jnp.float32),
        in_specs=[vmem] * 4,
        out_specs=vmem,
    )(last_norm, user_p, packed["fc_w"], packed["fc_b"])

    return out_pad[:B, :num_contexts]


context_lstm_forward_jit = jax.jit(context_lstm_forward, static_argnames=("num_contexts",))


# -----------------------------------------------------------------------------
# Pure-JAX reference (PyTorch f32 semantics) for a sanity check
# -----------------------------------------------------------------------------
def _ref_bi_lstm_last(x, lens, w_ih_f, w_hh_f, b_f, w_ih_r, b_r):
    B, T, D = x.shape
    H = w_hh_f.shape[0]

    def cell(gates, c):
        i = jax.nn.sigmoid(gates[:, :H])
        f = jax.nn.sigmoid(gates[:, H:2 * H])
        g = jnp.tanh(gates[:, 2 * H:3 * H])
        o = jax.nn.sigmoid(gates[:, 3 * H:])
        c = f * c + i * g
        return o * jnp.tanh(c), c

    h = jnp.zeros((B, H)); c = jnp.zeros((B, H)); x_last = jnp.zeros((B, D))
    lens2d = lens.reshape(B, 1)
    for t in range(T):
        x_t = x[:, t, :]
        gates = x_t @ w_ih_f + h @ w_hh_f + b_f
        h_new, c_new = cell(gates, c)
        valid = t < lens2d
        h = jnp.where(valid, h_new, h)
        c = jnp.where(valid, c_new, c)
        x_last = jnp.where(t == lens2d - 1, x_t, x_last)
    h_b, _ = cell(x_last @ w_ih_r + b_r, jnp.zeros((B, H)))
    return jnp.concatenate([h, h_b], axis=-1)


def _ref_forward(session_x, SL, item_x, IL, user_emb, params):
    def l2norm(x):
        n = jnp.sqrt(jnp.sum(x * x, axis=-1, keepdims=True))
        return x / jnp.maximum(n, 1e-12)
    last = _ref_bi_lstm_last(session_x, SL, *params["session_lstm"])
    last2 = _ref_bi_lstm_last(item_x, IL, *params["item_lstm"])
    fc_w, fc_b = params["fc"]
    feat = jnp.concatenate([l2norm(last), l2norm(last2), l2norm(user_emb)], axis=-1)
    return feat @ fc_w + fc_b


# -----------------------------------------------------------------------------
if __name__ == "__main__":
    B = 2
    H = HIDDEN
    emb_dim = 29
    D_s = emb_dim + 3            # session_LSTM input size = emb_dim + 3
    T_s, T_i = 8, 6
    num_contexts = 16

    key = jax.random.PRNGKey(0)
    keys = jax.random.split(key, 24)
    k = 1.0 / np.sqrt(H)

    def u(kk, shape, bound):
        return jax.random.uniform(kk, shape, jnp.float32, -bound, bound)

    params = {
        # (w_ih_f, w_hh_f, b_f, w_ih_r, b_r); b_* = b_ih + b_hh (PyTorch has both)
        "session_lstm": (
            u(keys[0], (D_s, 4 * H), k), u(keys[1], (H, 4 * H), k),
            u(keys[2], (1, 4 * H), k) + u(keys[3], (1, 4 * H), k),
            u(keys[4], (D_s, 4 * H), k),
            u(keys[5], (1, 4 * H), k) + u(keys[6], (1, 4 * H), k),
        ),
        "item_lstm": (
            u(keys[7], (H, 4 * H), k), u(keys[8], (H, 4 * H), k),
            u(keys[9], (1, 4 * H), k) + u(keys[10], (1, 4 * H), k),
            u(keys[11], (H, 4 * H), k),
            u(keys[12], (1, 4 * H), k) + u(keys[13], (1, 4 * H), k),
        ),
        "fc": (
            u(keys[14], (5 * H, num_contexts), 1.0 / np.sqrt(5 * H)),
            u(keys[15], (1, num_contexts), 1.0 / np.sqrt(5 * H)),
        ),
    }

    # Padded variable-length inputs (equivalent of the packed sequences).
    session_x = jax.random.normal(keys[16], (B, T_s, D_s), jnp.float32)
    item_x = jax.random.normal(keys[17], (B, T_i, H), jnp.float32)   # item_emb(padded_seq)
    user_emb = jax.random.normal(keys[18], (B, H), jnp.float32)
    SL = jnp.array([T_s, T_s - 3], jnp.int32)   # session lengths (1 <= len <= T)
    IL = jnp.array([T_i - 2, T_i], jnp.int32)   # item-sequence lengths

    packed = prepare_packed_params(params)      # weights padded/stacked/bf16 ONCE

    pred = context_lstm_forward_jit(session_x, SL, item_x, IL, user_emb, packed,
                                    num_contexts=num_contexts)
    pred = jax.block_until_ready(pred)

    ref = _ref_forward(session_x, SL, item_x, IL, user_emb, params)
    if not np.allclose(np.asarray(pred), np.asarray(ref), rtol=2e-2, atol=2e-2):
        raise AssertionError("Pallas output does not match JAX reference")

    print("KERNEL_OK")
</pallas_src>

<mosaic_0001>
module attributes {stable_mosaic.version = 11 : i64} {
  func.func @fc_head_kernel(%arg0: memref<2x8x512xf32, #tpu.memory_space<vmem>>, %arg1: memref<8x256xf32, #tpu.memory_space<vmem>>, %arg2: memref<1280x128xbf16, #tpu.memory_space<vmem>>, %arg3: memref<1x128xf32, #tpu.memory_space<vmem>>, %arg4: memref<8x128xf32, #tpu.memory_space<vmem>>) attributes {dimension_semantics = [], scalar_prefetch = 0 : i64, scratch_operands = 0 : i64, tpu.core_type = #tpu.core_type<tc>} {
    %c0 = arith.constant 0 : index
    %c0_0 = arith.constant 0 : index
    %0 = vector.load %arg1[%c0, %c0_0] : memref<8x256xf32, #tpu.memory_space<vmem>>, vector<8x256xf32>
    %1 = arith.mulf %0, %0 : vector<8x256xf32>
    %cst = arith.constant dense<0.000000e+00> : vector<8xf32>
    %2 = vector.multi_reduction <add>, %1, %cst [1] : vector<8x256xf32> to vector<8xf32>
    %3 = vector.shape_cast %2 : vector<8xf32> to vector<8x1xf32>
    %cst_1 = arith.constant 1.000000e-24 : f32
    %4 = vector.broadcast %cst_1 : f32 to vector<8x1xf32>
    %5 = arith.maximumf %3, %4 : vector<8x1xf32>
    %6 = math.rsqrt %5 : vector<8x1xf32>
    %c0_2 = arith.constant 0 : index
    %c0_3 = arith.constant 0 : index
    %7 = vector.load %arg2[%c0_2, %c0_3] : memref<1280x128xbf16, #tpu.memory_space<vmem>>, vector<1280x128xbf16>
    %c0_4 = arith.constant 0 : index
    %c0_5 = arith.constant 0 : index
    %c0_6 = arith.constant 0 : index
    %8 = vector.load %arg0[%c0_4, %c0_5, %c0_6] : memref<2x8x512xf32, #tpu.memory_space<vmem>>, vector<1x8x512xf32>
    %9 = vector.shape_cast %8 : vector<1x8x512xf32> to vector<8x512xf32>
    %10 = vector.extract_strided_slice %7 {offsets = [0, 0], sizes = [512, 128], strides = [1, 1]} : vector<1280x128xbf16> to vector<512x128xbf16>
    %11 = arith.truncf %9 : vector<8x512xf32> to vector<8x512xbf16>
    %cst_7 = arith.constant dense<0.000000e+00> : vector<8x128xf32>
    %12 = tpu.matmul %11, %10, %cst_7 {dimension_numbers = #tpu.dot_dimension_numbers<[1], [0], [0], [1], [0, 0, 1, 1], [], []>} : vector<8x512xbf16>, vector<512x128xbf16>, vector<8x128xf32> -> vector<8x128xf32>
    %c1 = arith.constant 1 : index
    %c0_8 = arith.constant 0 : index
    %c0_9 = arith.constant 0 : index
    %13 = vector.load %arg0[%c1, %c0_8, %c0_9] : memref<2x8x512xf32, #tpu.memory_space<vmem>>, vector<1x8x512xf32>
    %14 = vector.shape_cast %13 : vector<1x8x512xf32> to vector<8x512xf32>
    %15 = vector.extract_strided_slice %7 {offsets = [512, 0], sizes = [512, 128], strides = [1, 1]} : vector<1280x128xbf16> to vector<512x128xbf16>
    %16 = arith.truncf %14 : vector<8x512xf32> to vector<8x512xbf16>
    %cst_10 = arith.constant dense<0.000000e+00> : vector<8x128xf32>
    %17 = tpu.matmul %16, %15, %cst_10 {dimension_numbers = #tpu.dot_dimension_numbers<[1], [0], [0], [1], [0, 0, 1, 1], [], []>} : vector<8x512xbf16>, vector<512x128xbf16>, vector<8x128xf32> -> vector<8x128xf32>
    %18 = arith.addf %12, %17 : vector<8x128xf32>
    %19 = vector.broadcast %6 : vector<8x1xf32> to vector<8x256xf32>
    %20 = arith.mulf %0, %19 : vector<8x256xf32>
    %21 = vector.extract_strided_slice %7 {offsets = [1024, 0], sizes = [256, 128], strides = [1, 1]} : vector<1280x128xbf16> to vector<256x128xbf16>
    %22 = arith.truncf %20 : vector<8x256xf32> to vector<8x256xbf16>
    %cst_11 = arith.constant dense<0.000000e+00> : vector<8x128xf32>
    %23 = tpu.matmul %22, %21, %cst_11 {dimension_numbers = #tpu.dot_dimension_numbers<[1], [0], [0], [1], [0, 0, 1, 1], [], []>} : vector<8x256xbf16>, vector<256x128xbf16>, vector<8x128xf32> -> vector<8x128xf32>
    %24 = arith.addf %18, %23 : vector<8x128xf32>
    %c0_12 = arith.constant 0 : index
    %c0_13 = arith.constant 0 : index
    %25 = vector.load %arg3[%c0_12, %c0_13] : memref<1x128xf32, #tpu.memory_space<vmem>>, vector<1x128xf32>
    %26 = vector.broadcast %25 : vector<1x128xf32> to vector<8x128xf32>
    %27 = arith.addf %24, %26 : vector<8x128xf32>
    %c0_14 = arith.constant 0 : index
    %c0_15 = arith.constant 0 : index
    %28 = vector.load %arg4[%c0_14, %c0_15] : memref<8x128xf32, #tpu.memory_space<vmem>>, vector<8x128xf32>
    tpu.vector_store %arg4[%c0_14, %c0_15], %27 {strides = array<i32>} : memref<8x128xf32, #tpu.memory_space<vmem>>, vector<8x128xf32>,
    return
  }
}

module attributes {stable_mosaic.version = 11 : i64} {
  func.func @bi_lstm_last_kernel(%arg0: i32, %arg1: memref<1x64x256xf32, #tpu.memory_space<vmem>>, %arg2: memref<1x8x256xf32, #tpu.memory_space<vmem>>, %arg3: memref<1x64x1xf32, #tpu.memory_space<vmem>>, %arg4: memref<1x256x1024xbf16, #tpu.memory_space<vmem>>, %arg5: memref<1x256x1024xbf16, #tpu.memory_space<vmem>>, %arg6: memref<1x1x1024xf32, #tpu.memory_space<vmem>>, %arg7: memref<1x256x1024xbf16, #tpu.memory_space<vmem>>, %arg8: memref<1x1x1024xf32, #tpu.memory_space<vmem>>, %arg9: memref<1x8x512xf32, #tpu.memory_space<vmem>>) attributes {dimension_semantics = [#tpu.dimension_semantics<parallel>], iteration_bounds = array<i64: 2>, scalar_prefetch = 0 : i64, scratch_operands = 0 : i64, tpu.core_type = #tpu.core_type<tc>, window_params = [{transform_indices = @transform_0, window_bounds = array<i64: 1, 64, 256>}, {transform_indices = @transform_1, window_bounds = array<i64: 1, 8, 256>}, {transform_indices = @transform_2, window_bounds = array<i64: 1, 64, 1>}, {transform_indices = @transform_3, window_bounds = array<i64: 1, 256, 1024>}, {transform_indices = @transform_4, window_bounds = array<i64: 1, 256, 1024>}, {transform_indices = @transform_5, window_bounds = array<i64: 1, 1, 1024>}, {transform_indices = @transform_6, window_bounds = array<i64: 1, 256, 1024>}, {transform_indices = @transform_7, window_bounds = array<i64: 1, 1, 1024>}, {transform_indices = @transform_8, window_bounds = array<i64: 1, 8, 512>}]} {
    %c0 = arith.constant 0 : index
    %c0_0 = arith.constant 0 : index
    %c0_1 = arith.constant 0 : index
    %0 = vector.load %arg1[%c0, %c0_0, %c0_1] : memref<1x64x256xf32, #tpu.memory_space<vmem>>, vector<1x64x256xf32>
    %1 = vector.shape_cast %0 : vector<1x64x256xf32> to vector<64x256xf32>
    %2 = arith.truncf %1 : vector<64x256xf32> to vector<64x256xbf16>
    %c0_2 = arith.constant 0 : index
    %c0_3 = arith.constant 0 : index
    %c0_4 = arith.constant 0 : index
    %3 = vector.load %arg4[%c0_2, %c0_3, %c0_4] : memref<1x256x1024xbf16, #tpu.memory_space<vmem>>, vector<1x256x1024xbf16>
    %4 = vector.shape_cast %3 : vector<1x256x1024xbf16> to vector<256x1024xbf16>
    %c0_5 = arith.constant 0 : index
    %c0_6 = arith.constant 0 : index
    %c0_7 = arith.constant 0 : index
    %5 = vector.load %arg5[%c0_5, %c0_6, %c0_7] : memref<1x256x1024xbf16, #tpu.memory_space<vmem>>, vector<1x256x1024xbf16>
    %6 = vector.shape_cast %5 : vector<1x256x1024xbf16> to vector<256x1024xbf16>
    %c0_8 = arith.constant 0 : index
    %c0_9 = arith.constant 0 : index
    %c0_10 = arith.constant 0 : index
    %7 = vector.load %arg6[%c0_8, %c0_9, %c0_10] : memref<1x1x1024xf32, #tpu.memory_space<vmem>>, vector<1x1x1024xf32>
    %8 = vector.shape_cast %7 : vector<1x1x1024xf32> to vector<1x1024xf32>
    %c0_11 = arith.constant 0 : index
    %c0_12 = arith.constant 0 : index
    %c0_13 = arith.constant 0 : index
    %9 = vector.load %arg3[%c0_11, %c0_12, %c0_13] : memref<1x64x1xf32, #tpu.memory_space<vmem>>, vector<1x64x1xf32>
    %10 = vector.shape_cast %9 : vector<1x64x1xf32> to vector<64x1xf32>
    %cst = arith.constant dense<0.000000e+00> : vector<64x1024xf32>
    %11 = tpu.matmul %2, %4, %cst {dimension_numbers = #tpu.dot_dimension_numbers<[1], [0], [0], [1], [0, 0, 1, 1], [], []>} : vector<64x256xbf16>, vector<256x1024xbf16>, vector<64x1024xf32> -> vector<64x1024xf32>
    %12 = vector.broadcast %8 : vector<1x1024xf32> to vector<64x1024xf32>
    %13 = arith.addf %11, %12 : vector<64x1024xf32>
    %cst_14 = arith.constant 0.000000e+00 : f32
    %14 = vector.broadcast %cst_14 : f32 to vector<8x256xf32>
    %cst_15 = arith.constant 0.000000e+00 : f32
    %15 = vector.broadcast %cst_15 : f32 to vector<8x256xf32>
    %16 = vector.extract_strided_slice %13 {offsets = [0, 0], sizes = [8, 1024], strides = [1, 1]} : vector<64x1024xf32> to vector<8x1024xf32>
    %17 = arith.truncf %14 : vector<8x256xf32> to vector<8x256xbf16>
    %cst_16 = arith.constant dense<0.000000e+00> : vector<8x1024xf32>
    %18 = tpu.matmul %17, %6, %cst_16 {dimension_numbers = #tpu.dot_dimension_numbers<[1], [0], [0], [1], [0, 0, 1, 1], [], []>} : vector<8x256xbf16>, vector<256x1024xbf16>, vector<8x1024xf32> -> vector<8x1024xf32>
    %19 = arith.addf %16, %18 : vector<8x1024xf32>
    %20 = vector.extract_strided_slice %19 {offsets = [0, 0], sizes = [8, 256], strides = [1, 1]} : vector<8x1024xf32> to vector<8x256xf32>
    %21 = arith.negf %20 : vector<8x256xf32>
    %22 = math.exp %21 : vector<8x256xf32>
    %cst_17 = arith.constant 1.000000e+00 : f32
    %23 = vector.broadcast %cst_17 : f32 to vector<8x256xf32>
    %24 = arith.addf %23, %22 : vector<8x256xf32>
    %25 = arith.divf %23, %24 : vector<8x256xf32>
    %26 = vector.extract_strided_slice %19 {offsets = [0, 256], sizes = [8, 256], strides = [1, 1]} : vector<8x1024xf32> to vector<8x256xf32>
    %27 = arith.negf %26 : vector<8x256xf32>
    %28 = math.exp %27 : vector<8x256xf32>
    %cst_18 = arith.constant 1.000000e+00 : f32
    %29 = vector.broadcast %cst_18 : f32 to vector<8x256xf32>
    %30 = arith.addf %29, %28 : vector<8x256xf32>
    %31 = arith.divf %29, %30 : vector<8x256xf32>
    %32 = vector.extract_strided_slice %19 {offsets = [0, 512], sizes = [8, 256], strides = [1, 1]} : vector<8x1024xf32> to vector<8x256xf32>
    %33 = math.tanh %32 : vector<8x256xf32>
    %34 = vector.extract_strided_slice %19 {offsets = [0, 768], sizes = [8, 256], strides = [1, 1]} : vector<8x1024xf32> to vector<8x256xf32>
    %35 = arith.negf %34 : vector<8x256xf32>
    %36 = math.exp %35 : vector<8x256xf32>
    %cst_19 = arith.constant 1.000000e+00 : f32
    %37 = vector.broadcast %cst_19 : f32 to vector<8x256xf32>
    %38 = arith.addf %37, %36 : vector<8x256xf32>
    %39 = arith.divf %37, %38 : vector<8x256xf32>
    %40 = arith.mulf %31, %15 : vector<8x256xf32>
    %41 = arith.mulf %25, %33 : vector<8x256xf32>
    %42 = arith.addf %40, %41 : vector<8x256xf32>
    %43 = math.tanh %42 : vector<8x256xf32>
    %44 = arith.mulf %39, %43 : vector<8x256xf32>
    %45 = vector.extract_strided_slice %10 {offsets = [0, 0], sizes = [8, 1], strides = [1, 1]} : vector<64x1xf32> to vector<8x1xf32>
    %46 = arith.subf %44, %14 : vector<8x256xf32>
    %47 = vector.broadcast %45 : vector<8x1xf32> to vector<8x256xf32>
    %48 = arith.mulf %47, %46 : vector<8x256xf32>
    %49 = arith.addf %14, %48 : vector<8x256xf32>
    %50 = arith.subf %42, %15 : vector<8x256xf32>
    %51 = vector.broadcast %45 : vector<8x1xf32> to vector<8x256xf32>
    %52 = arith.mulf %51, %50 : vector<8x256xf32>
    %53 = arith.addf %15, %52 : vector<8x256xf32>
    %54 = vector.extract_strided_slice %13 {offsets = [8, 0], sizes = [8, 1024], strides = [1, 1]} : vector<64x1024xf32> to vector<8x1024xf32>
    %55 = arith.truncf %49 : vector<8x256xf32> to vector<8x256xbf16>
    %cst_20 = arith.constant dense<0.000000e+00> : vector<8x1024xf32>
    %56 = tpu.matmul %55, %6, %cst_20 {dimension_numbers = #tpu.dot_dimension_numbers<[1], [0], [0], [1], [0, 0, 1, 1], [], []>} : vector<8x256xbf16>, vector<256x1024xbf16>, vector<8x1024xf32> -> vector<8x1024xf32>
    %57 = arith.addf %54, %56 : vector<8x1024xf32>
    %58 = vector.extract_strided_slice %57 {offsets = [0, 0], sizes = [8, 256], strides = [1, 1]} : vector<8x1024xf32> to vector<8x256xf32>
    %59 = arith.negf %58 : vector<8x256xf32>
    %60 = math.exp %59 : vector<8x256xf32>
    %cst_21 = arith.constant 1.000000e+00 : f32
    %61 = vector.broadcast %cst_21 : f32 to vector<8x256xf32>
    %62 = arith.addf %61, %60 : vector<8x256xf32>
    %63 = arith.divf %61, %62 : vector<8x256xf32>
    %64 = vector.extract_strided_slice %57 {offsets = [0, 256], sizes = [8, 256], strides = [1, 1]} : vector<8x1024xf32> to vector<8x256xf32>
    %65 = arith.negf %64 : vector<8x256xf32>
    %66 = math.exp %65 : vector<8x256xf32>
    %cst_22 = arith.constant 1.000000e+00 : f32
    %67 = vector.broadcast %cst_22 : f32 to vector<8x256xf32>
    %68 = arith.addf %67, %66 : vector<8x256xf32>
    %69 = arith.divf %67, %68 : vector<8x256xf32>
    %70 = vector.extract_strided_slice %57 {offsets = [0, 512], sizes = [8, 256], strides = [1, 1]} : vector<8x1024xf32> to vector<8x256xf32>
    %71 = math.tanh %70 : vector<8x256xf32>
    %72 = vector.extract_strided_slice %57 {offsets = [0, 768], sizes = [8, 256], strides = [1, 1]} : vector<8x1024xf32> to vector<8x256xf32>
    %73 = arith.negf %72 : vector<8x256xf32>
    %74 = math.exp %73 : vector<8x256xf32>
    %cst_23 = arith.constant 1.000000e+00 : f32
    %75 = vector.broadcast %cst_23 : f32 to vector<8x256xf32>
    %76 = arith.addf %75, %74 : vector<8x256xf32>
    %77 = arith.divf %75, %76 : vector<8x256xf32>
    %78 = arith.mulf %69, %53 : vector<8x256xf32>
    %79 = arith.mulf %63, %71 : vector<8x256xf32>
    %80 = arith.addf %78, %79 : vector<8x256xf32>
    %81 = math.tanh %80 : vector<8x256xf32>
    %82 = arith.mulf %77, %81 : vector<8x256xf32>
    %83 = vector.extract_strided_slice %10 {offsets = [8, 0], sizes = [8, 1], strides = [1, 1]} : vector<64x1xf32> to vector<8x1xf32>
    %84 = arith.subf %82, %49 : vector<8x256xf32>
    %85 = vector.broadcast %83 : vector<8x1xf32> to vector<8x256xf32>
    %86 = arith.mulf %85, %84 : vector<8x256xf32>
    %87 = arith.addf %49, %86 : vector<8x256xf32>
    %88 = arith.subf %80, %53 : vector<8x256xf32>
    %89 = vector.broadcast %83 : vector<8x1xf32> to vector<8x256xf32>
    %90 = arith.mulf %89, %88 : vector<8x256xf32>
    %91 = arith.addf %53, %90 : vector<8x256xf32>
    %92 = vector.extract_strided_slice %13 {offsets = [16, 0], sizes = [8, 1024], strides = [1, 1]} : vector<64x1024xf32> to vector<8x1024xf32>
    %93 = arith.truncf %87 : vector<8x256xf32> to vector<8x256xbf16>
    %cst_24 = arith.constant dense<0.000000e+00> : vector<8x1024xf32>
    %94 = tpu.matmul %93, %6, %cst_24 {dimension_numbers = #tpu.dot_dimension_numbers<[1], [0], [0], [1], [0, 0, 1, 1], [], []>} : vector<8x256xbf16>, vector<256x1024xbf16>, vector<8x1024xf32> -> vector<8x1024xf32>
    %95 = arith.addf %92, %94 : vector<8x1024xf32>
    %96 = vector.extract_strided_slice %95 {offsets = [0, 0], sizes = [8, 256], strides = [1, 1]} : vector<8x1024xf32> to vector<8x256xf32>
    %97 = arith.negf %96 : vector<8x256xf32>
    %98 = math.exp %97 : vector<8x256xf32>
    %cst_25 = arith.constant 1.000000e+00 : f32
    %99 = vector.broadcast %cst_25 : f32 to vector<8x256xf32>
    %100 = arith.addf %99, %98 : vector<8x256xf32>
    %101 = arith.divf %99, %100 : vector<8x256xf32>
    %102 = vector.extract_strided_slice %95 {offsets = [0, 256], sizes = [8, 256], strides = [1, 1]} : vector<8x1024xf32> to vector<8x256xf32>
    %103 = arith.negf %102 : vector<8x256xf32>
    %104 = math.exp %103 : vector<8x256xf32>
    %cst_26 = arith.constant 1.000000e+00 : f32
    %105 = vector.broadcast %cst_26 : f32 to vector<8x256xf32>
    %106 = arith.addf %105, %104 : vector<8x256xf32>
    %107 = arith.divf %105, %106 : vector<8x256xf32>
    %108 = vector.extract_strided_slice %95 {offsets = [0, 512], sizes = [8, 256], strides = [1, 1]} : vector<8x1024xf32> to vector<8x256xf32>
    %109 = math.tanh %108 : vector<8x256xf32>
    %110 = vector.extract_strided_slice %95 {offsets = [0, 768], sizes = [8, 256], strides = [1, 1]} : vector<8x1024xf32> to vector<8x256xf32>
    %111 = arith.negf %110 : vector<8x256xf32>
    %112 = math.exp %111 : vector<8x256xf32>
    %cst_27 = arith.constant 1.000000e+00 : f32
    %113 = vector.broadcast %cst_27 : f32 to vector<8x256xf32>
    %114 = arith.addf %113, %112 : vector<8x256xf32>
    %115 = arith.divf %113, %114 : vector<8x256xf32>
    %116 = arith.mulf %107, %91 : vector<8x256xf32>
    %117 = arith.mulf %101, %109 : vector<8x256xf32>
    %118 = arith.addf %116, %117 : vector<8x256xf32>
    %119 = math.tanh %118 : vector<8x256xf32>
    %120 = arith.mulf %115, %119 : vector<8x256xf32>
    %121 = vector.extract_strided_slice %10 {offsets = [16, 0], sizes = [8, 1], strides = [1, 1]} : vector<64x1xf32> to vector<8x1xf32>
    %122 = arith.subf %120, %87 : vector<8x256xf32>
    %123 = vector.broadcast %121 : vector<8x1xf32> to vector<8x256xf32>
    %124 = arith.mulf %123, %122 : vector<8x256xf32>
    %125 = arith.addf %87, %124 : vector<8x256xf32>
    %126 = arith.subf %118, %91 : vector<8x256xf32>
    %127 = vector.broadcast %121 : vector<8x1xf32> to vector<8x256xf32>
    %128 = arith.mulf %127, %126 : vector<8x256xf32>
    %129 = arith.addf %91, %128 : vector<8x256xf32>
    %130 = vector.extract_strided_slice %13 {offsets = [24, 0], sizes = [8, 1024], strides = [1, 1]} : vector<64x1024xf32> to vector<8x1024xf32>
    %131 = arith.truncf %125 : vector<8x256xf32> to vector<8x256xbf16>
    %cst_28 = arith.constant dense<0.000000e+00> : vector<8x1024xf32>
    %132 = tpu.matmul %131, %6, %cst_28 {dimension_numbers = #tpu.dot_dimension_numbers<[1], [0], [0], [1], [0, 0, 1, 1], [], []>} : vector<8x256xbf16>, vector<256x1024xbf16>, vector<8x1024xf32> -> vector<8x1024xf32>
    %133 = arith.addf %130, %132 : vector<8x1024xf32>
    %134 = vector.extract_strided_slice %133 {offsets = [0, 0], sizes = [8, 256], strides = [1, 1]} : vector<8x1024xf32> to vector<8x256xf32>
    %135 = arith.negf %134 : vector<8x256xf32>
    %136 = math.exp %135 : vector<8x256xf32>
    %cst_29 = arith.constant 1.000000e+00 : f32
    %137 = vector.broadcast %cst_29 : f32 to vector<8x256xf32>
    %138 = arith.addf %137, %136 : vector<8x256xf32>
    %139 = arith.divf %137, %138 : vector<8x256xf32>
    %140 = vector.extract_strided_slice %133 {offsets = [0, 256], sizes = [8, 256], strides = [1, 1]} : vector<8x1024xf32> to vector<8x256xf32>
    %141 = arith.negf %140 : vector<8x256xf32>
    %142 = math.exp %141 : vector<8x256xf32>
    %cst_30 = arith.constant 1.000000e+00 : f32
    %143 = vector.broadcast %cst_30 : f32 to vector<8x256xf32>
    %144 = arith.addf %143, %142 : vector<8x256xf32>
    %145 = arith.divf %143, %144 : vector<8x256xf32>
    %146 = vector.extract_strided_slice %133 {offsets = [0, 512], sizes = [8, 256], strides = [1, 1]} : vector<8x1024xf32> to vector<8x256xf32>
    %147 = math.tanh %146 : vector<8x256xf32>
    %148 = vector.extract_strided_slice %133 {offsets = [0, 768], sizes = [8, 256], strides = [1, 1]} : vector<8x1024xf32> to vector<8x256xf32>
    %149 = arith.negf %148 : vector<8x256xf32>
    %150 = math.exp %149 : vector<8x256xf32>
    %cst_31 = arith.constant 1.000000e+00 : f32
    %151 = vector.broadcast %cst_31 : f32 to vector<8x256xf32>
    %152 = arith.addf %151, %150 : vector<8x256xf32>
    %153 = arith.divf %151, %152 : vector<8x256xf32>
    %154 = arith.mulf %145, %129 : vector<8x256xf32>
    %155 = arith.mulf %139, %147 : vector<8x256xf32>
    %156 = arith.addf %154, %155 : vector<8x256xf32>
    %157 = math.tanh %156 : vector<8x256xf32>
    %158 = arith.mulf %153, %157 : vector<8x256xf32>
    %159 = vector.extract_strided_slice %10 {offsets = [24, 0], sizes = [8, 1], strides = [1, 1]} : vector<64x1xf32> to vector<8x1xf32>
    %160 = arith.subf %158, %125 : vector<8x256xf32>
    %161 = vector.broadcast %159 : vector<8x1xf32> to vector<8x256xf32>
    %162 = arith.mulf %161, %160 : vector<8x256xf32>
    %163 = arith.addf %125, %162 : vector<8x256xf32>
    %164 = arith.subf %156, %129 : vector<8x256xf32>
    %165 = vector.broadcast %159 : vector<8x1xf32> to vector<8x256xf32>
    %166 = arith.mulf %165, %164 : vector<8x256xf32>
    %167 = arith.addf %129, %166 : vector<8x256xf32>
    %168 = vector.extract_strided_slice %13 {offsets = [32, 0], sizes = [8, 1024], strides = [1, 1]} : vector<64x1024xf32> to vector<8x1024xf32>
    %169 = arith.truncf %163 : vector<8x256xf32> to vector<8x256xbf16>
    %cst_32 = arith.constant dense<0.000000e+00> : vector<8x1024xf32>
    %170 = tpu.matmul %169, %6, %cst_32 {dimension_numbers = #tpu.dot_dimension_numbers<[1], [0], [0], [1], [0, 0, 1, 1], [], []>} : vector<8x256xbf16>, vector<256x1024xbf16>, vector<8x1024xf32> -> vector<8x1024xf32>
    %171 = arith.addf %168, %170 : vector<8x1024xf32>
    %172 = vector.extract_strided_slice %171 {offsets = [0, 0], sizes = [8, 256], strides = [1, 1]} : vector<8x1024xf32> to vector<8x256xf32>
    %173 = arith.negf %172 : vector<8x256xf32>
    %174 = math.exp %173 : vector<8x256xf32>
    %cst_33 = arith.constant 1.000000e+00 : f32
    %175 = vector.broadcast %cst_33 : f32 to vector<8x256xf32>
    %176 = arith.addf %175, %174 : vector<8x256xf32>
    %177 = arith.divf %175, %176 : vector<8x256xf32>
    %178 = vector.extract_strided_slice %171 {offsets = [0, 256], sizes = [8, 256], strides = [1, 1]} : vector<8x1024xf32> to vector<8x256xf32>
    %179 = arith.negf %178 : vector<8x256xf32>
    %180 = math.exp %179 : vector<8x256xf32>
    %cst_34 = arith.constant 1.000000e+00 : f32
    %181 = vector.broadcast %cst_34 : f32 to vector<8x256xf32>
    %182 = arith.addf %181, %180 : vector<8x256xf32>
    %183 = arith.divf %181, %182 : vector<8x256xf32>
    %184 = vector.extract_strided_slice %171 {offsets = [0, 512], sizes = [8, 256], strides = [1, 1]} : vector<8x1024xf32> to vector<8x256xf32>
    %185 = math.tanh %184 : vector<8x256xf32>
    %186 = vector.extract_strided_slice %171 {offsets = [0, 768], sizes = [8, 256], strides = [1, 1]} : vector<8x1024xf32> to vector<8x256xf32>
    %187 = arith.negf %186 : vector<8x256xf32>
    %188 = math.exp %187 : vector<8x256xf32>
    %cst_35 = arith.constant 1.000000e+00 : f32
    %189 = vector.broadcast %cst_35 : f32 to vector<8x256xf32>
    %190 = arith.addf %189, %188 : vector<8x256xf32>
    %191 = arith.divf %189, %190 : vector<8x256xf32>
    %192 = arith.mulf %183, %167 : vector<8x256xf32>
    %193 = arith.mulf %177, %185 : vector<8x256xf32>
    %194 = arith.addf %192, %193 : vector<8x256xf32>
    %195 = math.tanh %194 : vector<8x256xf32>
    %196 = arith.mulf %191, %195 : vector<8x256xf32>
    %197 = vector.extract_strided_slice %10 {offsets = [32, 0], sizes = [8, 1], strides = [1, 1]} : vector<64x1xf32> to vector<8x1xf32>
    %198 = arith.subf %196, %163 : vector<8x256xf32>
    %199 = vector.broadcast %197 : vector<8x1xf32> to vector<8x256xf32>
    %200 = arith.mulf %199, %198 : vector<8x256xf32>
    %201 = arith.addf %163, %200 : vector<8x256xf32>
    %202 = arith.subf %194, %167 : vector<8x256xf32>
    %203 = vector.broadcast %197 : vector<8x1xf32> to vector<8x256xf32>
    %204 = arith.mulf %203, %202 : vector<8x256xf32>
    %205 = arith.addf %167, %204 : vector<8x256xf32>
    %206 = vector.extract_strided_slice %13 {offsets = [40, 0], sizes = [8, 1024], strides = [1, 1]} : vector<64x1024xf32> to vector<8x1024xf32>
    %207 = arith.truncf %201 : vector<8x256xf32> to vector<8x256xbf16>
    %cst_36 = arith.constant dense<0.000000e+00> : vector<8x1024xf32>
    %208 = tpu.matmul %207, %6, %cst_36 {dimension_numbers = #tpu.dot_dimension_numbers<[1], [0], [0], [1], [0, 0, 1, 1], [], []>} : vector<8x256xbf16>, vector<256x1024xbf16>, vector<8x1024xf32> -> vector<8x1024xf32>
    %209 = arith.addf %206, %208 : vector<8x1024xf32>
    %210 = vector.extract_strided_slice %209 {offsets = [0, 0], sizes = [8, 256], strides = [1, 1]} : vector<8x1024xf32> to vector<8x256xf32>
    %211 = arith.negf %210 : vector<8x256xf32>
    %212 = math.exp %211 : vector<8x256xf32>
    %cst_37 = arith.constant 1.000000e+00 : f32
    %213 = vector.broadcast %cst_37 : f32 to vector<8x256xf32>
    %214 = arith.addf %213, %212 : vector<8x256xf32>
    %215 = arith.divf %213, %214 : vector<8x256xf32>
    %216 = vector.extract_strided_slice %209 {offsets = [0, 256], sizes = [8, 256], strides = [1, 1]} : vector<8x1024xf32> to vector<8x256xf32>
    %217 = arith.negf %216 : vector<8x256xf32>
    %218 = math.exp %217 : vector<8x256xf32>
    %cst_38 = arith.constant 1.000000e+00 : f32
    %219 = vector.broadcast %cst_38 : f32 to vector<8x256xf32>
    %220 = arith.addf %219, %218 : vector<8x256xf32>
    %221 = arith.divf %219, %220 : vector<8x256xf32>
    %222 = vector.extract_strided_slice %209 {offsets = [0, 512], sizes = [8, 256], strides = [1, 1]} : vector<8x1024xf32> to vector<8x256xf32>
    %223 = math.tanh %222 : vector<8x256xf32>
    %224 = vector.extract_strided_slice %209 {offsets = [0, 768], sizes = [8, 256], strides = [1, 1]} : vector<8x1024xf32> to vector<8x256xf32>
    %225 = arith.negf %224 : vector<8x256xf32>
    %226 = math.exp %225 : vector<8x256xf32>
    %cst_39 = arith.constant 1.000000e+00 : f32
    %227 = vector.broadcast %cst_39 : f32 to vector<8x256xf32>
    %228 = arith.addf %227, %226 : vector<8x256xf32>
    %229 = arith.divf %227, %228 : vector<8x256xf32>
    %230 = arith.mulf %221, %205 : vector<8x256xf32>
    %231 = arith.mulf %215, %223 : vector<8x256xf32>
    %232 = arith.addf %230, %231 : vector<8x256xf32>
    %233 = math.tanh %232 : vector<8x256xf32>
    %234 = arith.mulf %229, %233 : vector<8x256xf32>
    %235 = vector.extract_strided_slice %10 {offsets = [40, 0], sizes = [8, 1], strides = [1, 1]} : vector<64x1xf32> to vector<8x1xf32>
    %236 = arith.subf %234, %201 : vector<8x256xf32>
    %237 = vector.broadcast %235 : vector<8x1xf32> to vector<8x256xf32>
    %238 = arith.mulf %237, %236 : vector<8x256xf32>
    %239 = arith.addf %201, %238 : vector<8x256xf32>
    %240 = arith.subf %232, %205 : vector<8x256xf32>
    %241 = vector.broadcast %235 : vector<8x1xf32> to vector<8x256xf32>
    %242 = arith.mulf %241, %240 : vector<8x256xf32>
    %243 = arith.addf %205, %242 : vector<8x256xf32>
    %244 = vector.extract_strided_slice %13 {offsets = [48, 0], sizes = [8, 1024], strides = [1, 1]} : vector<64x1024xf32> to vector<8x1024xf32>
    %245 = arith.truncf %239 : vector<8x256xf32> to vector<8x256xbf16>
    %cst_40 = arith.constant dense<0.000000e+00> : vector<8x1024xf32>
    %246 = tpu.matmul %245, %6, %cst_40 {dimension_numbers = #tpu.dot_dimension_numbers<[1], [0], [0], [1], [0, 0, 1, 1], [], []>} : vector<8x256xbf16>, vector<256x1024xbf16>, vector<8x1024xf32> -> vector<8x1024xf32>
    %247 = arith.addf %244, %246 : vector<8x1024xf32>
    %248 = vector.extract_strided_slice %247 {offsets = [0, 0], sizes = [8, 256], strides = [1, 1]} : vector<8x1024xf32> to vector<8x256xf32>
    %249 = arith.negf %248 : vector<8x256xf32>
    %250 = math.exp %249 : vector<8x256xf32>
    %cst_41 = arith.constant 1.000000e+00 : f32
    %251 = vector.broadcast %cst_41 : f32 to vector<8x256xf32>
    %252 = arith.addf %251, %250 : vector<8x256xf32>
    %253 = arith.divf %251, %252 : vector<8x256xf32>
    %254 = vector.extract_strided_slice %247 {offsets = [0, 256], sizes = [8, 256], strides = [1, 1]} : vector<8x1024xf32> to vector<8x256xf32>
    %255 = arith.negf %254 : vector<8x256xf32>
    %256 = math.exp %255 : vector<8x256xf32>
    %cst_42 = arith.constant 1.000000e+00 : f32
    %257 = vector.broadcast %cst_42 : f32 to vector<8x256xf32>
    %258 = arith.addf %257, %256 : vector<8x256xf32>
    %259 = arith.divf %257, %258 : vector<8x256xf32>
    %260 = vector.extract_strided_slice %247 {offsets = [0, 512], sizes = [8, 256], strides = [1, 1]} : vector<8x1024xf32> to vector<8x256xf32>
    %261 = math.tanh %260 : vector<8x256xf32>
    %262 = vector.extract_strided_slice %247 {offsets = [0, 768], sizes = [8, 256], strides = [1, 1]} : vector<8x1024xf32> to vector<8x256xf32>
    %263 = arith.negf %262 : vector<8x256xf32>
    %264 = math.exp %263 : vector<8x256xf32>
    %cst_43 = arith.constant 1.000000e+00 : f32
    %265 = vector.broadcast %cst_43 : f32 to vector<8x256xf32>
    %266 = arith.addf %265, %264 : vector<8x256xf32>
    %267 = arith.divf %265, %266 : vector<8x256xf32>
    %268 = arith.mulf %259, %243 : vector<8x256xf32>
    %269 = arith.mulf %253, %261 : vector<8x256xf32>
    %270 = arith.addf %268, %269 : vector<8x256xf32>
    %271 = math.tanh %270 : vector<8x256xf32>
    %272 = arith.mulf %267, %271 : vector<8x256xf32>
    %273 = vector.extract_strided_slice %10 {offsets = [48, 0], sizes = [8, 1], strides = [1, 1]} : vector<64x1xf32> to vector<8x1xf32>
    %274 = arith.subf %272, %239 : vector<8x256xf32>
    %275 = vector.broadcast %273 : vector<8x1xf32> to vector<8x256xf32>
    %276 = arith.mulf %275, %274 : vector<8x256xf32>
    %277 = arith.addf %239, %276 : vector<8x256xf32>
    %278 = arith.subf %270, %243 : vector<8x256xf32>
    %279 = vector.broadcast %273 : vector<8x1xf32> to vector<8x256xf32>
    %280 = arith.mulf %279, %278 : vector<8x256xf32>
    %281 = arith.addf %243, %280 : vector<8x256xf32>
    %282 = vector.extract_strided_slice %13 {offsets = [56, 0], sizes = [8, 1024], strides = [1, 1]} : vector<64x1024xf32> to vector<8x1024xf32>
    %283 = arith.truncf %277 : vector<8x256xf32> to vector<8x256xbf16>
    %cst_44 = arith.constant dense<0.000000e+00> : vector<8x1024xf32>
    %284 = tpu.matmul %283, %6, %cst_44 {dimension_numbers = #tpu.dot_dimension_numbers<[1], [0], [0], [1], [0, 0, 1, 1], [], []>} : vector<8x256xbf16>, vector<256x1024xbf16>, vector<8x1024xf32> -> vector<8x1024xf32>
    %285 = arith.addf %282, %284 : vector<8x1024xf32>
    %286 = vector.extract_strided_slice %285 {offsets = [0, 0], sizes = [8, 256], strides = [1, 1]} : vector<8x1024xf32> to vector<8x256xf32>
    %287 = arith.negf %286 : vector<8x256xf32>
    %288 = math.exp %287 : vector<8x256xf32>
    %cst_45 = arith.constant 1.000000e+00 : f32
    %289 = vector.broadcast %cst_45 : f32 to vector<8x256xf32>
    %290 = arith.addf %289, %288 : vector<8x256xf32>
    %291 = arith.divf %289, %290 : vector<8x256xf32>
    %292 = vector.extract_strided_slice %285 {offsets = [0, 256], sizes = [8, 256], strides = [1, 1]} : vector<8x1024xf32> to vector<8x256xf32>
    %293 = arith.negf %292 : vector<8x256xf32>
    %294 = math.exp %293 : vector<8x256xf32>
    %cst_46 = arith.constant 1.000000e+00 : f32
    %295 = vector.broadcast %cst_46 : f32 to vector<8x256xf32>
    %296 = arith.addf %295, %294 : vector<8x256xf32>
    %297 = arith.divf %295, %296 : vector<8x256xf32>
    %298 = vector.extract_strided_slice %285 {offsets = [0, 512], sizes = [8, 256], strides = [1, 1]} : vector<8x1024xf32> to vector<8x256xf32>
    %299 = math.tanh %298 : vector<8x256xf32>
    %300 = vector.extract_strided_slice %285 {offsets = [0, 768], sizes = [8, 256], strides = [1, 1]} : vector<8x1024xf32> to vector<8x256xf32>
    %301 = arith.negf %300 : vector<8x256xf32>
    %302 = math.exp %301 : vector<8x256xf32>
    %cst_47 = arith.constant 1.000000e+00 : f32
    %303 = vector.broadcast %cst_47 : f32 to vector<8x256xf32>
    %304 = arith.addf %303, %302 : vector<8x256xf32>
    %305 = arith.divf %303, %304 : vector<8x256xf32>
    %306 = arith.mulf %297, %281 : vector<8x256xf32>
    %307 = arith.mulf %291, %299 : vector<8x256xf32>
    %308 = arith.addf %306, %307 : vector<8x256xf32>
    %309 = math.tanh %308 : vector<8x256xf32>
    %310 = arith.mulf %305, %309 : vector<8x256xf32>
    %311 = vector.extract_strided_slice %10 {offsets = [56, 0], sizes = [8, 1], strides = [1, 1]} : vector<64x1xf32> to vector<8x1xf32>
    %312 = arith.subf %310, %277 : vector<8x256xf32>
    %313 = vector.broadcast %311 : vector<8x1xf32> to vector<8x256xf32>
    %314 = arith.mulf %313, %312 : vector<8x256xf32>
    %315 = arith.addf %277, %314 : vector<8x256xf32>
    %c0_48 = arith.constant 0 : index
    %c0_49 = arith.constant 0 : index
    %c0_50 = arith.constant 0 : index
    %316 = vector.load %arg2[%c0_48, %c0_49, %c0_50] : memref<1x8x256xf32, #tpu.memory_space<vmem>>, vector<1x8x256xf32>
    %317 = vector.shape_cast %316 : vector<1x8x256xf32> to vector<8x256xf32>
    %318 = arith.truncf %317 : vector<8x256xf32> to vector<8x256xbf16>
    %c0_51 = arith.constant 0 : index
    %c0_52 = arith.constant 0 : index
    %c0_53 = arith.constant 0 : index
    %319 = vector.load %arg7[%c0_51, %c0_52, %c0_53] : memref<1x256x1024xbf16, #tpu.memory_space<vmem>>, vector<1x256x1024xbf16>
    %320 = vector.shape_cast %319 : vector<1x256x1024xbf16> to vector<256x1024xbf16>
    %cst_54 = arith.constant dense<0.000000e+00> : vector<8x1024xf32>
    %321 = tpu.matmul %318, %320, %cst_54 {dimension_numbers = #tpu.dot_dimension_numbers<[1], [0], [0], [1], [0, 0, 1, 1], [], []>} : vector<8x256xbf16>, vector<256x1024xbf16>, vector<8x1024xf32> -> vector<8x1024xf32>
    %c0_55 = arith.constant 0 : index
    %c0_56 = arith.constant 0 : index
    %c0_57 = arith.constant 0 : index
    %322 = vector.load %arg8[%c0_55, %c0_56, %c0_57] : memref<1x1x1024xf32, #tpu.memory_space<vmem>>, vector<1x1x1024xf32>
    %323 = vector.shape_cast %322 : vector<1x1x1024xf32> to vector<1x1024xf32>
    %324 = vector.broadcast %323 : vector<1x1024xf32> to vector<8x1024xf32>
    %325 = arith.addf %321, %324 : vector<8x1024xf32>
    %cst_58 = arith.constant 0.000000e+00 : f32
    %326 = vector.broadcast %cst_58 : f32 to vector<8x256xf32>
    %327 = vector.extract_strided_slice %325 {offsets = [0, 0], sizes = [8, 256], strides = [1, 1]} : vector<8x1024xf32> to vector<8x256xf32>
    %328 = arith.negf %327 : vector<8x256xf32>
    %329 = math.exp %328 : vector<8x256xf32>
    %cst_59 = arith.constant 1.000000e+00 : f32
    %330 = vector.broadcast %cst_59 : f32 to vector<8x256xf32>
    %331 = arith.addf %330, %329 : vector<8x256xf32>
    %332 = arith.divf %330, %331 : vector<8x256xf32>
    %333 = vector.extract_strided_slice %325 {offsets = [0, 256], sizes = [8, 256], strides = [1, 1]} : vector<8x1024xf32> to vector<8x256xf32>
    %334 = arith.negf %333 : vector<8x256xf32>
    %335 = math.exp %334 : vector<8x256xf32>
    %cst_60 = arith.constant 1.000000e+00 : f32
    %336 = vector.broadcast %cst_60 : f32 to vector<8x256xf32>
    %337 = arith.addf %336, %335 : vector<8x256xf32>
    %338 = arith.divf %336, %337 : vector<8x256xf32>
    %339 = vector.extract_strided_slice %325 {offsets = [0, 512], sizes = [8, 256], strides = [1, 1]} : vector<8x1024xf32> to vector<8x256xf32>
    %340 = math.tanh %339 : vector<8x256xf32>
    %341 = vector.extract_strided_slice %325 {offsets = [0, 768], sizes = [8, 256], strides = [1, 1]} : vector<8x1024xf32> to vector<8x256xf32>
    %342 = arith.negf %341 : vector<8x256xf32>
    %343 = math.exp %342 : vector<8x256xf32>
    %cst_61 = arith.constant 1.000000e+00 : f32
    %344 = vector.broadcast %cst_61 : f32 to vector<8x256xf32>
    %345 = arith.addf %344, %343 : vector<8x256xf32>
    %346 = arith.divf %344, %345 : vector<8x256xf32>
    %347 = arith.mulf %338, %326 : vector<8x256xf32>
    %348 = arith.mulf %332, %340 : vector<8x256xf32>
    %349 = arith.addf %347, %348 : vector<8x256xf32>
    %350 = math.tanh %349 : vector<8x256xf32>
    %351 = arith.mulf %346, %350 : vector<8x256xf32>
    %352 = arith.mulf %315, %315 : vector<8x256xf32>
    %cst_62 = arith.constant dense<0.000000e+00> : vector<8xf32>
    %353 = vector.multi_reduction <add>, %352, %cst_62 [1] : vector<8x256xf32> to vector<8xf32>
    %354 = vector.shape_cast %353 : vector<8xf32> to vector<8x1xf32>
    %355 = arith.mulf %351, %351 : vector<8x256xf32>
    %cst_63 = arith.constant dense<0.000000e+00> : vector<8xf32>
    %356 = vector.multi_reduction <add>, %355, %cst_63 [1] : vector<8x256xf32> to vector<8xf32>
    %357 = vector.shape_cast %356 : vector<8xf32> to vector<8x1xf32>
    %358 = arith.addf %354, %357 : vector<8x1xf32>
    %cst_64 = arith.constant 1.000000e-24 : f32
    %359 = vector.broadcast %cst_64 : f32 to vector<8x1xf32>
    %360 = arith.maximumf %358, %359 : vector<8x1xf32>
    %361 = math.rsqrt %360 : vector<8x1xf32>
    %362 = vector.broadcast %361 : vector<8x1xf32> to vector<8x256xf32>
    %363 = arith.mulf %315, %362 : vector<8x256xf32>
    %c0_65 = arith.constant 0 : index
    %c0_66 = arith.constant 0 : index
    %c0_67 = arith.constant 0 : index
    %364 = vector.load %arg9[%c0_65, %c0_66, %c0_67] : memref<1x8x512xf32, #tpu.memory_space<vmem>>, vector<1x8x256xf32>
    %365 = vector.shape_cast %364 : vector<1x8x256xf32> to vector<8x256xf32>
    %366 = vector.shape_cast %363 : vector<8x256xf32> to vector<1x8x256xf32>
    tpu.vector_store %arg9[%c0_65, %c0_66, %c0_67], %366 {strides = array<i32>} : memref<1x8x512xf32, #tpu.memory_space<vmem>>, vector<1x8x256xf32>,
    %367 = vector.broadcast %361 : vector<8x1xf32> to vector<8x256xf32>
    %368 = arith.mulf %351, %367 : vector<8x256xf32>
    %c0_68 = arith.constant 0 : index
    %c0_69 = arith.constant 0 : index
    %c256 = arith.constant 256 : index
    %369 = vector.load %arg9[%c0_68, %c0_69, %c256] : memref<1x8x512xf32, #tpu.memory_space<vmem>>, vector<1x8x256xf32>
    %370 = vector.shape_cast %369 : vector<1x8x256xf32> to vector<8x256xf32>
    %371 = vector.shape_cast %368 : vector<8x256xf32> to vector<1x8x256xf32>
    tpu.vector_store %arg9[%c0_68, %c0_69, %c256], %371 {strides = array<i32>} : memref<1x8x512xf32, #tpu.memory_space<vmem>>, vector<1x8x256xf32>,
    return
  }
  func.func @transform_0(%arg0: i32) -> (i32, i32, i32) {
    %c0_i32 = arith.constant 0 : i32
    %c0_i32_0 = arith.constant 0 : i32
    %c0_i32_1 = arith.constant 0 : i32
    return %arg0, %c0_i32, %c0_i32_0 : i32, i32, i32
  }
  func.func @transform_1(%arg0: i32) -> (i32, i32, i32) {
    %c0_i32 = arith.constant 0 : i32
    %c0_i32_0 = arith.constant 0 : i32
    %c0_i32_1 = arith.constant 0 : i32
    return %arg0, %c0_i32, %c0_i32_0 : i32, i32, i32
  }
  func.func @transform_2(%arg0: i32) -> (i32, i32, i32) {
    %c0_i32 = arith.constant 0 : i32
    %c0_i32_0 = arith.constant 0 : i32
    %c0_i32_1 = arith.constant 0 : i32
    return %arg0, %c0_i32, %c0_i32_0 : i32, i32, i32
  }
  func.func @transform_3(%arg0: i32) -> (i32, i32, i32) {
    %c0_i32 = arith.constant 0 : i32
    %c0_i32_0 = arith.constant 0 : i32
    %c0_i32_1 = arith.constant 0 : i32
    return %arg0, %c0_i32, %c0_i32_0 : i32, i32, i32
  }
  func.func @transform_4(%arg0: i32) -> (i32, i32, i32) {
    %c0_i32 = arith.constant 0 : i32
    %c0_i32_0 = arith.constant 0 : i32
    %c0_i32_1 = arith.constant 0 : i32
    return %arg0, %c0_i32, %c0_i32_0 : i32, i32, i32
  }
  func.func @transform_5(%arg0: i32) -> (i32, i32, i32) {
    %c0_i32 = arith.constant 0 : i32
    %c0_i32_0 = arith.constant 0 : i32
    %c0_i32_1 = arith.constant 0 : i32
    return %arg0, %c0_i32, %c0_i32_0 : i32, i32, i32
  }
  func.func @transform_6(%arg0: i32) -> (i32, i32, i32) {
    %c0_i32 = arith.constant 0 : i32
    %c0_i32_0 = arith.constant 0 : i32
    %c0_i32_1 = arith.constant 0 : i32
    return %arg0, %c0_i32, %c0_i32_0 : i32, i32, i32
  }
  func.func @transform_7(%arg0: i32) -> (i32, i32, i32) {
    %c0_i32 = arith.constant 0 : i32
    %c0_i32_0 = arith.constant 0 : i32
    %c0_i32_1 = arith.constant 0 : i32
    return %arg0, %c0_i32, %c0_i32_0 : i32, i32, i32
  }
  func.func @transform_8(%arg0: i32) -> (i32, i32, i32) {
    %c0_i32 = arith.constant 0 : i32
    %c0_i32_0 = arith.constant 0 : i32
    %c0_i32_1 = arith.constant 0 : i32
    return %arg0, %c0_i32, %c0_i32_0 : i32, i32, i32
  }
}

</mosaic_0001>

<bundles_post_ra>
// kernel: context_lstm_forward.3
= control target key start
LH: loop header
LB: loop body
LE: loop exit
PB: predicated region body
PF: predicated region fallthrough
CT: control target
= control target key end

     0   :  { %s1490_s1 = inlined_call_operand.vmem [shape: f32[8,256], index: 1, kind: input, shape index: {}]   ;;  %s1491_s2 = inlined_call_operand.vmem [shape: bf16[1280,128], index: 2, kind: input, shape index: {}]   ;;  %s1492_s0 = inlined_call_operand.vmem [shape: f32[2,8,512], index: 0, kind: input, shape index: {}]   ;;  %s1493_s3 = inlined_call_operand.vmem [shape: f32[1,128], index: 3, kind: input, shape index: {}]   ;;  %s1494_s4 = inlined_call_operand.vmem [shape: f32[8,128], index: 4, kind: output, shape index: {}]  }
   0x1   :  { %v1207_v0 = vld [vmem:[%s1490_s1] sm:$0xff]  ;;  %v1212_v1 = vld [vmem:[%s1490_s1 + $0x8] sm:$0xff]  ;;  %v1105_v13 = vld [vmem:[%s1491_s2 + $0x150] sm:$0xff]  }
   0x2   :  { %v20_v2 = vmul.f32 %v1207_v0, %v1207_v0  ;;  %v21_v3 = vmul.f32 %v1212_v1, %v1212_v1  ;;  %v1097_v4 = vld [vmem:[%s1491_s2 + $0x140] sm:$0xff]   ;;  %v1101_v9 = vld [vmem:[%s1491_s2 + $0x148] sm:$0xff]   ;;  %v1106_v14 = vld [vmem:[%s1491_s2 + $0x110] sm:$0xff]  }
   0x3   :  { %v1098_v5 = vld [vmem:[%s1491_s2 + $0x100] sm:$0xff]   ;;  %987 = vmatprep.subr.bf16.mxu0 %v1097_v4  ;;  %v1102_v10 = vld [vmem:[%s1491_s2 + $0x108] sm:$0xff]   ;;  %v1107_v15 = vld [vmem:[%s1491_s2 + $0x1d0] sm:$0xff]  }
   0x4   :  { %v22_v6 = vadd.f32 %v21_v3, %v20_v2  ;;  %v1099_v7 = vld [vmem:[%s1491_s2 + $0x1c0] sm:$0xff]   ;;  %988 = vmatpush3.bf16.msra.mxu0 %v1098_v5  ;;  %v1103_v11 = vld [vmem:[%s1491_s2 + $0x1c8] sm:$0xff]   ;;  %v1108_v16 = vld [vmem:[%s1491_s2 + $0x190] sm:$0xff]  }
   0x5   :  { %v1100_v8 = vld [vmem:[%s1491_s2 + $0x180] sm:$0xff]   ;;  %1009 = vmatprep.subr.bf16.mxu1 %v1099_v7  ;;  %989 = vmatprep.subr.bf16.mxu0 %v1101_v9  ;;  %v1104_v12 = vld [vmem:[%s1491_s2 + $0x188] sm:$0xff]   ;;  %v1109_v17 = vld [vmem:[%s1491_s2 + $0x158] sm:$0xff]  }
   0x6   :  { %23 = vadd.xlane.f32.xlu0 %v22_v6  ;;  %1010 = vmatpush3.bf16.msra.mxu1 %v1100_v8  ;;  %v1110_v18 = vld [vmem:[%s1491_s2 + $0x118] sm:$0xff]   ;;  %v1113_v21 = vld [vmem:[%s1491_s2 + $0x160] sm:$0xff]   ;;  %v1117_v25 = vld [vmem:[%s1491_s2 + $0x168] sm:$0xff]  }
   0x7   :  { %1011 = vmatprep.subr.bf16.mxu1 %v1103_v11  ;;  %v1111_v19 = vld [vmem:[%s1491_s2 + $0x1d8] sm:$0xff]   ;;  %v1114_v22 = vld [vmem:[%s1491_s2 + $0x120] sm:$0xff]   ;;  %v1118_v26 = vld [vmem:[%s1491_s2 + $0x128] sm:$0xff]  }
   0x8   :  { %990 = vmatpush3.bf16.msra.mxu0 %v1102_v10  ;;  %v1112_v20 = vld [vmem:[%s1491_s2 + $0x198] sm:$0xff]   ;;  %v1115_v23 = vld [vmem:[%s1491_s2 + $0x1e0] sm:$0xff]   ;;  %v1119_v27 = vld [vmem:[%s1491_s2 + $0x1e8] sm:$0xff]  }
   0x9   :  { %991 = vmatprep.subr.bf16.mxu0 %v1105_v13  ;;  %v1116_v24 = vld [vmem:[%s1491_s2 + $0x1a0] sm:$0xff]   ;;  %v1120_v28 = vld [vmem:[%s1491_s2 + $0x1a8] sm:$0xff]   ;;  %v1121_v29 = vld [vmem:[%s1491_s2 + $0x170] sm:$0xff]  }
   0xa   :  { %1012 = vmatpush3.bf16.msra.mxu1 %v1104_v12  ;;  %v1122_v30 = vld [vmem:[%s1491_s2 + $0x130] sm:$0xff]   ;;  %v1125_v33 = vld [vmem:[%s1491_s2 + $0x178] sm:$0xff]   ;;  %v903_v37 = vld [vmem:[%s1492_s0 + $0x28] sm:$0xff] }
   0xb   :  { %1013 = vmatprep.subr.bf16.mxu1 %v1107_v15  ;;  %v1123_v31 = vld [vmem:[%s1491_s2 + $0x1f0] sm:$0xff]   ;;  %v1126_v34 = vld [vmem:[%s1491_s2 + $0x138] sm:$0xff]   ;;  %v201_v38 = vpack.c.bf16 %v903_v37, %v903_v37  ;;  %v1129_v39 = vld [vmem:[%s1491_s2 + $0x40] sm:$0xff]  }
   0xc   :  { %992 = vmatpush3.bf16.msra.mxu0 %v1106_v14  ;;  %v1124_v32 = vld [vmem:[%s1491_s2 + $0x1b0] sm:$0xff]   ;;  %v1127_v35 = vld [vmem:[%s1491_s2 + $0x1f8] sm:$0xff]   ;;  %v902_v40 = vld [vmem:[%s1492_s0 + $0x20] sm:$0xff] }
   0xd   :  { %993 = vmatprep.subr.bf16.mxu0 %v1109_v17  ;;  %v1128_v36 = vld [vmem:[%s1491_s2 + $0x1b8] sm:$0xff]   ;;  %428 = vmatprep.mubr.bf16.mxu0 %v201_v38  ;;  %v200_v41 = vpack.c.bf16 %v902_v40, %v902_v40  ;;  %v1130_v42 = vld [vmem:[%s1491_s2] sm:$0xff]   ;;  %v904_v46 = vld [vmem:[%s1492_s0 + $0x30] sm:$0xff] }
   0xe   :  { %1014 = vmatpush3.bf16.msra.mxu1 %v1108_v16  ;;  %v905_v43 = vld [vmem:[%s1492_s0 + $0x38] sm:$0xff]  ;;  %v1131_v45 = vld [vmem:[%s1491_s2 + $0xc0] sm:$0xff]   ;;  %v202_v47 = vpack.c.bf16 %v904_v46, %v904_v46  ;;  %v1133_v49 = vld [vmem:[%s1491_s2 + $0x48] sm:$0xff]  }
   0xf   :  { %1015 = vmatprep.subr.bf16.mxu1 %v1111_v19  ;;  %v203_v44 = vpack.c.bf16 %v905_v43, %v905_v43  ;;  %v1132_v48 = vld [vmem:[%s1491_s2 + $0x80] sm:$0xff]   ;;  %v1134_v50 = vld [vmem:[%s1491_s2 + $0x8] sm:$0xff]   ;;  %v1137_v53 = vld [vmem:[%s1491_s2 + $0x50] sm:$0xff]  }
  0x10   :  { %994 = vmatpush3.bf16.msra.mxu0 %v1110_v18  ;;  %v1135_v51 = vld [vmem:[%s1491_s2 + $0xc8] sm:$0xff]   ;;  %v1138_v54 = vld [vmem:[%s1491_s2 + $0x10] sm:$0xff]   ;;  %v1141_v57 = vld [vmem:[%s1491_s2 + $0x58] sm:$0xff]  }
  0x11   :  { %995 = vmatprep.subr.bf16.mxu0 %v1113_v21  ;;  %468 = vmatprep.mubr.bf16.mxu1 %v203_v44  ;;  %v1136_v52 = vld [vmem:[%s1491_s2 + $0x88] sm:$0xff]   ;;  %v1139_v55 = vld [vmem:[%s1491_s2 + $0xd0] sm:$0xff]   ;;  %v1142_v58 = vld [vmem:[%s1491_s2 + $0x18] sm:$0xff]  }
  0x12   :  { %1016 = vmatpush3.bf16.msra.mxu1 %v1112_v20  ;;  %v1140_v56 = vld [vmem:[%s1491_s2 + $0x90] sm:$0xff]   ;;  %v1143_v59 = vld [vmem:[%s1491_s2 + $0xd8] sm:$0xff]   ;;  %v1145_v61 = vld [vmem:[%s1491_s2 + $0x60] sm:$0xff]  }
  0x13   :  { %1017 = vmatprep.subr.bf16.mxu1 %v1115_v23  ;;  %v1144_v60 = vld [vmem:[%s1491_s2 + $0x98] sm:$0xff]   ;;  %v1146_v62 = vld [vmem:[%s1491_s2 + $0x20] sm:$0xff]   ;;  %v1149_v3 = vld [vmem:[%s1491_s2 + $0x68] sm:$0xff]  }
  0x14   :  { %996 = vmatpush3.bf16.msra.mxu0 %v1114_v22  ;;  %v1147_v63 = vld [vmem:[%s1491_s2 + $0xe0] sm:$0xff]   ;;  %v1150_v4 = vld [vmem:[%s1491_s2 + $0x28] sm:$0xff]   ;;  %v1153_v7 = vld [vmem:[%s1491_s2 + $0x70] sm:$0xff]  }
  0x15   :  { %997 = vmatprep.subr.bf16.mxu0 %v1117_v25  ;;  %v1148_v2 = vld [vmem:[%s1491_s2 + $0xa0] sm:$0xff]   ;;  %v1151_v5 = vld [vmem:[%s1491_s2 + $0xe8] sm:$0xff]   ;;  %v1154_v8 = vld [vmem:[%s1491_s2 + $0x30] sm:$0xff]  }
  0x16   :  { %1018 = vmatpush3.bf16.msra.mxu1 %v1116_v24  ;;  %v1152_v6 = vld [vmem:[%s1491_s2 + $0xa8] sm:$0xff]   ;;  %v1155_v9 = vld [vmem:[%s1491_s2 + $0xf0] sm:$0xff]   ;;  %v1157_v11 = vld [vmem:[%s1491_s2 + $0x78] sm:$0xff]  }
  0x17   :  { %1019 = vmatprep.subr.bf16.mxu1 %v1119_v27  ;;  %v1156_v10 = vld [vmem:[%s1491_s2 + $0xb0] sm:$0xff]   ;;  %v1158_v12 = vld [vmem:[%s1491_s2 + $0x38] sm:$0xff]   ;;  %v188_v14 = vld [vmem:[%s1492_s0 + $0x8] sm:$0xff] }
  0x18   :  { %998 = vmatpush3.bf16.msra.mxu0 %v1118_v26  ;;  %v1159_v13 = vld [vmem:[%s1491_s2 + $0xf8] sm:$0xff]   ;;  %v192_v15 = vpack.c.bf16 %v188_v14, %v188_v14  ;;  %v187_v17 = vld [vmem:[%s1492_s0] sm:$0xff]  ;;  %v189_v21 = vld [vmem:[%s1492_s0 + $0x10] sm:$0xff] }
  0x19   :  { %999 = vmatprep.subr.bf16.mxu0 %v1121_v29  ;;  %v1160_v16 = vld [vmem:[%s1491_s2 + $0xb8] sm:$0xff]   ;;  %v191_v19 = vpack.c.bf16 %v187_v17, %v187_v17  ;;  %v193_v22 = vpack.c.bf16 %v189_v21, %v189_v21  ;;  %v1161_v23 = vld [vmem:[%s1491_s2 + $0x240] sm:$0xff]   ;;  %v1163_v25 = vld [vmem:[%s1491_s2 + $0x248] sm:$0xff]  }
  0x1a   :  { %1020 = vmatpush3.bf16.msra.mxu1 %v1120_v28  ;;  %v190_v18 = vld [vmem:[%s1492_s0 + $0x18] sm:$0xff]  ;;  %v1162_v24 = vld [vmem:[%s1491_s2 + $0x200] sm:$0xff]   ;;  %v1164_v26 = vld [vmem:[%s1491_s2 + $0x208] sm:$0xff]  }
  0x1b   :  { %1021 = vmatprep.subr.bf16.mxu1 %v1123_v31  ;;  %v194_v20 = vpack.c.bf16 %v190_v18, %v190_v18  ;;  %v1165_v27 = vld [vmem:[%s1491_s2 + $0x250] sm:$0xff]   ;;  %v1167_v29 = vld [vmem:[%s1491_s2 + $0x258] sm:$0xff]   ;;  %v1169_v31 = vld [vmem:[%s1491_s2 + $0x260] sm:$0xff]  }
  0x1c   :  { %1000 = vmatpush3.bf16.msra.mxu0 %v1122_v30  ;;  %v1166_v28 = vld [vmem:[%s1491_s2 + $0x210] sm:$0xff]   ;;  %v1168_v30 = vld [vmem:[%s1491_s2 + $0x218] sm:$0xff]  }
  0x1d   :  { %1001 = vmatprep.subr.bf16.mxu0 %v1125_v33  ;;  %v1171_v33 = vld [vmem:[%s1491_s2 + $0x268] sm:$0xff]   ;;  %v1175_v37 = vld [vmem:[%s1491_s2 + $0x278] sm:$0xff]  }
  0x1e   :  { %1022 = vmatpush3.bf16.msra.mxu1 %v1124_v32  ;;  %v1170_v32 = vld [vmem:[%s1491_s2 + $0x220] sm:$0xff]   ;;  %v1176_v38 = vld [vmem:[%s1491_s2 + $0x238] sm:$0xff]  }
  0x1f   :  { %1023 = vmatprep.subr.bf16.mxu1 %v1127_v35  ;;  %v1173_v35 = vld [vmem:[%s1491_s2 + $0x270] sm:$0xff]  }
  0x20   :  { %1002 = vmatpush3.bf16.msra.mxu0 %v1126_v34  ;;  %v1172_v34 = vld [vmem:[%s1491_s2 + $0x228] sm:$0xff]  }
  0x21   :  { %1031 = vmatprep.subr.bf16.mxu0 %v1129_v39 }
  0x22   :  { %1024 = vmatpush3.bf16.msra.mxu1 %v1128_v36  ;;  %v1174_v36 = vld [vmem:[%s1491_s2 + $0x230] sm:$0xff]  }
  0x23   :  { %429 = vmatmul.mubr.bf16.vlgmr.msra.gmra.mrb[0].mxu0 %v200_v41  ;;  %1053 = vmatprep.subr.bf16.mxu1 %v1131_v45 }
  0x24   :  { %1032 = vmatpush3.bf16.msra.mxu0 %v1130_v42  ;;  %700 = vmatprep.mubr.bf16.mxu0 %v192_v15 }
  0x25   :  { %469 = vmatmul.mubr.bf16.vlgmr.msra.gmra.mrb[0].mxu1 %v202_v47  ;;  %1033 = vmatprep.subr.bf16.mxu0 %v1133_v49 }
  0x26   :  { %1054 = vmatpush3.bf16.msra.mxu1 %v1132_v48  ;;  %740 = vmatprep.mubr.bf16.mxu1 %v194_v20 }
  0x27   :  { %1055 = vmatprep.subr.bf16.mxu1 %v1135_v51 }
  0x28   :  { %1034 = vmatpush3.bf16.msra.mxu0 %v1134_v50 }
  0x29   :  { %1035 = vmatprep.subr.bf16.mxu0 %v1137_v53 }
  0x2a   :  { %1056 = vmatpush3.bf16.msra.mxu1 %v1136_v52 }
  0x2b   :  { %1057 = vmatprep.subr.bf16.mxu1 %v1139_v55 }
  0x2c   :  { %1036 = vmatpush3.bf16.msra.mxu0 %v1138_v54 }
  0x2d   :  { %1037 = vmatprep.subr.bf16.mxu0 %v1141_v57 }
  0x2e   :  { %1058 = vmatpush3.bf16.msra.mxu1 %v1140_v56 }
  0x2f   :  { %1059 = vmatprep.subr.bf16.mxu1 %v1143_v59 }
  0x30   :  { %1038 = vmatpush3.bf16.msra.mxu0 %v1142_v58 }
  0x31   :  { %1039 = vmatprep.subr.bf16.mxu0 %v1145_v61 }
  0x32   :  { %1060 = vmatpush3.bf16.msra.mxu1 %v1144_v60 }
  0x33   :  { %1061 = vmatprep.subr.bf16.mxu1 %v1147_v63 }
  0x34   :  { %1040 = vmatpush3.bf16.msra.mxu0 %v1146_v62 }
  0x35   :  { %1041 = vmatprep.subr.bf16.mxu0 %v1149_v3 }
  0x36   :  { %1062 = vmatpush3.bf16.msra.mxu1 %v1148_v2 }
  0x37   :  { %1063 = vmatprep.subr.bf16.mxu1 %v1151_v5 }
  0x38   :  { %1042 = vmatpush3.bf16.msra.mxu0 %v1150_v4 }
  0x39   :  { %1043 = vmatprep.subr.bf16.mxu0 %v1153_v7 }
  0x3a   :  { %1064 = vmatpush3.bf16.msra.mxu1 %v1152_v6 }
  0x3b   :  { %1065 = vmatprep.subr.bf16.mxu1 %v1155_v9  ;;  %v986_v9 = vld [vmem:[%s1493_s3] ss:$0 sm:$0xff] }
  0x3c   :  { %1044 = vmatpush3.bf16.msra.mxu0 %v1154_v8 }
  0x3d   :  { %1045 = vmatprep.subr.bf16.mxu0 %v1157_v11 }
  0x3e   :  { %1066 = vmatpush3.bf16.msra.mxu1 %v1156_v10 }
  0x3f   :  { %1067 = vmatprep.subr.bf16.mxu1 %v1159_v13 }
  0x40   :  { %1046 = vmatpush3.bf16.msra.mxu0 %v1158_v12 }
  0x41   :  { %1075 = vmatprep.subr.bf16.mxu0 %v1161_v23 }
  0x42   :  { %1068 = vmatpush3.bf16.msra.mxu1 %v1160_v16 }
  0x43   :  { %701 = vmatmul.mubr.bf16.vlgmr.msra.gmra.mrb[4].mxu0 %v191_v19 }
  0x44   :  { %1076 = vmatpush3.bf16.msra.mxu0 %v1162_v24 }
  0x45   :  { %741 = vmatmul.mubr.bf16.vlgmr.msra.gmra.mrb[4].mxu1 %v193_v22  ;;  %1077 = vmatprep.subr.bf16.mxu0 %v1163_v25 }
  0x48   :  { %1078 = vmatpush3.bf16.msra.mxu0 %v1164_v26 }
  0x49   :  { %1079 = vmatprep.subr.bf16.mxu0 %v1165_v27 }
  0x4c   :  { %1080 = vmatpush3.bf16.msra.mxu0 %v1166_v28 }
  0x4d   :  { %1081 = vmatprep.subr.bf16.mxu0 %v1167_v29 }
  0x50   :  { %1082 = vmatpush3.bf16.msra.mxu0 %v1168_v30 }
  0x51   :  { %1083 = vmatprep.subr.bf16.mxu0 %v1169_v31 }
  0x54   :  { %1084 = vmatpush3.bf16.msra.mxu0 %v1170_v32 }
  0x55   :  { %1085 = vmatprep.subr.bf16.mxu0 %v1171_v33 }
  0x58   :  { %1086 = vmatpush3.bf16.msra.mxu0 %v1172_v34 }
  0x59   :  { %1087 = vmatprep.subr.bf16.mxu0 %v1173_v35 }
  0x5c   :  { %1088 = vmatpush3.bf16.msra.mxu0 %v1174_v36 }
  0x5d   :  { %1089 = vmatprep.subr.bf16.mxu0 %v1175_v37 }
  0x60   :  { %1090 = vmatpush3.bf16.msra.mxu0 %v1176_v38 }
  0x93   :  { %v24_v39 = vpop.xlane.xlu0 %23 }
  0x94   :  { %v25_v40 = vmax.f32 %v24_v39, 1e-24 }
  0x96   :  { %1177 = vrsqrt.f32 %v25_v40 }
  0xa0   :  { %v1178_v41 = vpop.eup %1177 }
  0xa1   :  { %v749_v42 = vmul.f32 %v1178_v41, %v1212_v1  ;;  %v748_v43 = vmul.f32 %v1178_v41, %v1207_v0 }
  0xa3   :  { %v751_v44 = vpack.c.bf16 %v749_v42, %v749_v42  ;;  %v750_v45 = vpack.c.bf16 %v748_v43, %v748_v43 }
  0xa5   :  { %880 = vmatprep.mubr.bf16.mxu0 %v751_v44 }
  0xa6   :  { %881 = vmatmul.mubr.bf16.vlgmr.msra.gmra.mrb[8].mxu0 %v750_v45 }
  0xf6   :  { %v1003_v46 = vpop.f32.mrb[0].mxu0 }
  0xf7   :  { %v1004_v47 = vpop.f32.mrb[1].mxu0 }
  0xf8   :  { %v1005_v48 = vadd.f32 %v1004_v47, %v1003_v46  ;;  %v1006_v49 = vpop.f32.mrb[2].mxu0  ;;  %v1025_v50 = vpop.f32.mrb[0].mxu1 }
  0xf9   :  { %v1007_v51 = vpop.f32.mrb[3].mxu0  ;;  %v1026_v52 = vpop.f32.mrb[1].mxu1 }
  0xfa   :  { %v1027_v53 = vadd.f32 %v1026_v52, %v1025_v50  ;;  %v1028_v54 = vpop.f32.mrb[2].mxu1 }
  0xfb   :  { %v1029_v55 = vpop.f32.mrb[3].mxu1 }
  0xfc   :  { %v471_v56 = vadd.f32 %v1027_v53, %v1005_v48 }
 0x116   :  { %v1047_v57 = vpop.f32.mrb[4].mxu0 }
 0x117   :  { %v1048_v58 = vpop.f32.mrb[5].mxu0 }
 0x118   :  { %v1049_v1 = vadd.f32 %v1048_v58, %v1047_v57  ;;  %v1069_v59 = vpop.f32.mrb[4].mxu1  ;;  %v1050_v0 = vpop.f32.mrb[6].mxu0 }
 0x119   :  { %v1070_v60 = vpop.f32.mrb[5].mxu1  ;;  %v1051_v61 = vpop.f32.mrb[7].mxu0 }
 0x11a   :  { %v703_v62 = vadd.f32 %v1049_v1, %v471_v56  ;;  %v1071_v63 = vadd.f32 %v1070_v60, %v1069_v59  ;;  %v1072_v2 = vpop.f32.mrb[6].mxu1 }
 0x11b   :  { %v1073_v3 = vpop.f32.mrb[7].mxu1 }
 0x11c   :  { %v743_v4 = vadd.f32 %v1071_v63, %v703_v62 }
 0x179   :  { %v1091_v5 = vpop.f32.mrb[8].mxu0 }
 0x17a   :  { %v1092_v6 = vpop.f32.mrb[9].mxu0 }
 0x17b   :  { %v1093_v7 = vadd.f32 %v1092_v6, %v1091_v5  ;;  %v1094_v8 = vpop.f32.mrb[10].mxu0 }
 0x17c   :  { %v1095_v10 = vpop.f32.mrb[11].mxu0 }
 0x17d   :  { %v888_v11 = vadd.f32 %v1093_v7, %v743_v4 }
 0x17f   :  { %v896_v12 = vadd.f32 %v986_v9, %v888_v11 }
 0x181   :  { %897 = vst [vmem:[%s1494_s4] sm:$0xff] %v896_v12 }

// kernel: context_lstm_forward.2
= control target key start
LH: loop header
LB: loop body
LE: loop exit
PB: predicated region body
PF: predicated region fallthrough
CT: control target
= control target key end

     0   :  { %13 = vsyncpa [#allocation3], 0  ;;  %s8957_s0 = inlined_call_operand.vmem [shape: f32[2,64,256], index: 0, kind: input, shape index: {}]   ;;  %s8958_s1 = inlined_call_operand.vmem [shape: f32[2,8,256], index: 1, kind: input, shape index: {}]   ;;  %s8959_s2 = inlined_call_operand.vmem [shape: f32[2,64,1], index: 2, kind: input, shape index: {}]   ;;  %s8960_s3 = inlined_call_operand.vmem [shape: bf16[2,256,1024], index: 3, kind: input, shape index: {}]   ;;  %s8961_s4 = inlined_call_operand.hbm [shape: bf16[2,256,1024], index: 4, kind: input, shape index: {}]   ;;  %s8962_s5 = inlined_call_operand.vmem [shape: f32[2,1,1024], index: 5, kind: input, shape index: {}]   ;;  %s8963_s6 = inlined_call_operand.hbm [shape: bf16[2,256,1024], index: 6, kind: input, shape index: {}]   ;;  %s8964_s7 = inlined_call_operand.vmem [shape: f32[2,1,1024], index: 7, kind: input, shape index: {}]   ;;  %s8965_s8 = inlined_call_operand.vmem [shape: f32[2,8,512], index: 8, kind: output, shape index: {}]  }
   0x1   :  { %15 = vsyncpa [#allocation3 + $0x1], 0 }
   0x2   :  { %16 = vsyncpa [#allocation5], 0 }
   0x3   :  { %18 = vsyncpa [#allocation5 + $0x1], 0  ;;  %s6452_s27 = smov 0   ;;  %s6454_s28 = smov 0  }
   0x4   :  { %s6456_s29 = smov 0   ;;  %s6458_s30 = smov 0  }
   0x5 LB: > { %s6471_s9 = sadd.s32 4294967295, %s6400_s30   ;;  %s6474_s10 = sadd.s32 1, %s6400_s30   ;;  %s6400_s30 = sphi %s6458_s30, %s10104_s30   ;;  %s6396_s29 = sphi %s6456_s29, %s10103_s29   ;;  %s6392_s28 = sphi %s6454_s28, %s10102_s28   ;;  %s6388_s27 = sphi %s6452_s27, %s10101_s27  }
   0x6   : > { %s132_s11 = ssub.s32 %s6400_s30, %s6474_s10  ;;  %s135_s12 = sadd.s32 1, %s6396_s29 }
   0x7   : > { %p133_p0 = scmp.eq.s32.totalorder %s132_s11, 0  ;;  %p142_p1 = scmp.ne.s32.totalorder %s6396_s29, %s6392_s28 }
   0x8   : > { %p143_p2 = scmp.eq.s32.totalorder %s6400_s30, 0  ;;  %p148_p3 = scmp.ne.s32.totalorder %s6392_s28, %s6388_s27 }
   0x9   : > { %s6484_s13 = scalar_select %p133_p0, %s6396_s29, %s135_s12  }
   0xa   : > { %p144_p4 = por %p143_p2, %p142_p1  ;;  %p149_p5 = scmp.eq.s32.totalorder %s6471_s9, 0 }
   0xb   : > { %p5974_p6 = scmp.lt.s32.totalorder %s6400_s30, 2  ;;  %s6493_s15 = sand.u32 1, %s6396_s29  }
   0xc   : > { %p6488_p7 = por %p149_p5, %p148_p3  ;;  %s5495_s16 = sshll.u32 %s6493_s15, 10 }
   0xd   : > { %s5956_s17 = sshll.u32 %s6400_s30, 14  ;;  %s312_s21 = scalar_lea.vmem [#allocation2], %s5495_s16 }
   0xe   : > { %s9244_s14 = scalar_select %p6488_p7, 1, 0 }
   0xf   : > { %s6502_s20 = scalar_lea.hbm %s8961_s4, %s5956_s17  ;;  %s319_s22 = sshll.u32 %s312_s21, 4  ;;  %s6506_s22 = int_to_ptr.vmem [resolvable:$true] %s319_s22 }
  0x10   : > { %p6508_p8 = pnand %p5974_p6, %p144_p4  ;;  %s309_s24 = scalar_lea.sflag [#allocation3], %s6493_s15 }
  0x11   : > { %s6302_s25 = scalar_lea.hbm %s6502_s20, 16384  ;;  %s6307_s11 = scalar_lea.hbm %s8961_s4, 32768 }
  0x12   : > { %p6303_p10 = scmp.ne.s32.totalorder %s6502_s20, %s6302_s25  ;;  %p6304_p11 = pneg %p6508_p8 }
  0x13   : > { %p6308_p0 = scmp.lt.u32.totalorder %s6502_s20, %s8961_s4  ;;  %p6309_p1 = scmp.lt.u32.totalorder %s6307_s11, %s6302_s25 }
  0x14   : > { %p6305_p12 = pnand %p6304_p11, %p6303_p10  ;;  %p6311_p3 = scmp.lt.u32.totalorder %s6302_s25, %s6502_s20 }
  0x15   : > { %p6310_p2 = por %p6309_p1, %p6308_p0 }
  0x16   : > { %p6306_p13 = pneg %p6305_p12 }
  0x17   : > { %p6312_p4 = por %p6311_p3, %p6310_p2 }
  0x19   : > { %p6313_p5 = pnand %p6312_p4, %p6306_p13 }
  0x1b   : > { %6316 = shalt.err (!%p6313_p5)
}
  0x1c   : > { %s6317_s19 = scalar_lea.vmem %s6506_s22, 16384  ;;  %s6402_s21 = smov [#allocation2]  }
  0x1d   : > { %p6318_p6 = scmp.ne.s32.totalorder %s6506_s22, %s6317_s19  ;;  %s6322_s26 = sshll.u32 %s6402_s21, 4  ;;  %s6323_s26 = int_to_ptr.vmem [resolvable:$false] %s6322_s26 }
  0x1e   : > { %s6324_s27 = scalar_lea.vmem %s6323_s26, 32768  ;;  %p6325_p9 = scmp.lt.s32.totalorder %s6506_s22, %s6323_s26 }
  0x1f   : > { %p6320_p10 = pnand %p6318_p6, %p6304_p11  ;;  %p6326_p0 = scmp.lt.s32.totalorder %s6324_s27, %s6317_s19 }
  0x21   : > { %p6321_p12 = pneg %p6320_p10  ;;  %p6327_p1 = por %p6326_p0, %p6325_p9 }
  0x23   : > { %p6328_p2 = pnand %p6327_p1, %p6321_p12 }
  0x25   : > { %6331 = shalt.err (!%p6328_p2)
}
  0x26   : > { %s6403_s25 = smov 512   ;;  %s6404_s11 = smov 32  }
  0x27   : > { %5970 = dma.hbm_to_vmem [thread:$0]  (!%p6508_p8), %s6502_s20, 16384, %s6506_s22, %s309_s24, %s6403_s25, %s6403_s25, %s6404_s11  }
  0x28   : > { %p362_p9 = scmp.lt.s32.totalorder %s6400_s30, 3  ;;  %s6550_s19 = scalar_lea.hbm %s8963_s6, %s5956_s17 }
  0x29   : > { %p9246_p13 = scmp.ge.s32.totalorder %s6400_s30, 1  ;;  %s340_s26 = scalar_lea.vmem [#allocation4], %s5495_s16 }
  0x2a   : > { %s347_s27 = sshll.u32 %s340_s26, 4  ;;  %s337_s20 = scalar_lea.sflag [#allocation5], %s6493_s15  ;;  %s6560_s27 = int_to_ptr.vmem [resolvable:$true] %s347_s27 }
  0x2b   : > { %p6554_p3 = pnand %p9246_p13, %p362_p9  ;;  %s6332_s22 = scalar_lea.hbm %s6550_s19, 16384 }
  0x2c   : > { %p6333_p4 = scmp.ne.s32.totalorder %s6550_s19, %s6332_s22  ;;  %s6337_s24 = scalar_lea.hbm %s8963_s6, 32768 }
  0x2d   : > { %p6338_p10 = scmp.lt.u32.totalorder %s6550_s19, %s8963_s6  ;;  %p6339_p12 = scmp.lt.u32.totalorder %s6337_s24, %s6332_s22 }
  0x2e   : > { %p6335_p5 = pnand %p6333_p4, %p6304_p11  ;;  %p6341_p1 = scmp.lt.u32.totalorder %s6332_s22, %s6550_s19 }
  0x2f   : > { %p6340_p0 = por %p6339_p12, %p6338_p10 }
  0x30   : > { %p6336_p6 = pneg %p6335_p5 }
  0x31   : > { %p6342_p2 = por %p6341_p1, %p6340_p0 }
  0x33   : > { %p6343_p9 = pnand %p6342_p2, %p6336_p6 }
  0x35   : > { %6346 = shalt.err (!%p6343_p9)
}
  0x36   : > { %s6347_s16 = scalar_lea.vmem %s6560_s27, 16384  ;;  %s6405_s26 = smov [#allocation4]  }
  0x37   : > { %p6348_p13 = scmp.ne.s32.totalorder %s6560_s27, %s6347_s16  ;;  %s6352_s30 = sshll.u32 %s6405_s26, 4  ;;  %s6353_s30 = int_to_ptr.vmem [resolvable:$false] %s6352_s30 }
  0x38   : > { %s6354_s17 = scalar_lea.vmem %s6353_s30, 32768  ;;  %p6355_p7 = scmp.lt.s32.totalorder %s6560_s27, %s6353_s30 }
  0x39   : > { %p6350_p4 = pnand %p6348_p13, %p6304_p11  ;;  %p6356_p10 = scmp.lt.s32.totalorder %s6354_s17, %s6347_s16 }
  0x3b   : > { %p6351_p5 = pneg %p6350_p4  ;;  %p6357_p12 = por %p6356_p10, %p6355_p7 }
  0x3d   : > { %p6358_p0 = pnand %p6357_p12, %p6351_p5 }
  0x3f   : > { %6361 = shalt.err (!%p6358_p0)
}
  0x40   : > { %5973 = dma.hbm_to_vmem [thread:$0]  (!%p6508_p8), %s6550_s19, 16384, %s6560_s27, %s337_s20, %s6403_s25, %s6403_s25, %s6404_s11  }
  0x41   : > { %366 = sbr.rel (%p6554_p3) target bundleno = 3103 (0xc1f), region = 52 }
  0x48   : > { %s368_s22 = sand.u32 1, %s6392_s28   ;;  %p9248_p7 = scmp.ne.s32.totalorder %s9244_s14, 0 }
  0x49   : > { %s5502_s24 = sshll.u32 %s368_s22, 10  ;;  %s369_s12 = scalar_lea.sflag [#allocation3], %s368_s22 }
  0x4a   : > { %s6594_s18 = scalar_lea.vmem [#allocation2], %s5502_s24 }
  0x4b   : > { %6379 = dma.done.wait (%p9248_p7), %s369_s12, 16384  }
  0x4c   : > { %6381 = vsyncadd (%p9248_p7), %s369_s12, 4294950912  ;;  %s378_s15 = scalar_lea.sflag [#allocation5], %s368_s22  ;;  %s6600_s23 = scalar_lea.vmem [#allocation4], %s5502_s24 }
  0x4d   : > { %6383 = dma.done.wait (%p9248_p7), %s378_s15, 16384  }
  0x4e   : > { %6385 = vsyncadd (%p9248_p7), %s378_s15, 4294950912  ;;  %p447_p8 = scmp.lt.s32.totalorder %s6471_s9, 1 }
  0x50   : > { %s10106_s9 = smov (!%p447_p8, %s6471_s9), 1 }
  0x51   : > { %s5961_s25 = sshll.u32 %s10106_s9, 10  ;;  %s5958_s14 = sshll.u32 %s10106_s9, 7 }
  0x52   : > { %s6614_s21 = scalar_lea.vmem %s8960_s3, %s5961_s25  ;;  %s6646_s16 = scalar_lea.vmem %s8957_s0, %s5958_s14 }
  0x53   : > { %v505_v0 = vld [vmem:[%s6614_s21] sm:$0xff]  ;;  %v506_v2 = vld [vmem:[%s6614_s21 + $0x8] sm:$0xff]  ;;  %v484_v54 = vld [vmem:[%s6646_s16 + $0x18] sm:$0xff]  ;;  %s5960_s26 = sshll.u32 %s10106_s9, 6  ;;  %s5512_s24 = sshll.u32 %s10106_s9, 3 }
  0x54   : > { %v509_v1 = vld [vmem:[%s6614_s21 + $0x20] sm:$0xff]  ;;  %v510_v4 = vld [vmem:[%s6614_s21 + $0x28] sm:$0xff]  ;;  %s7207_s22 = scalar_lea.vmem %s8959_s2, %s5960_s26  ;;  %s470_s15 = scalar_lea.vmem %s8962_s5, %s5512_s24 }
  0x55   : > { %v5517_v3 = vcombine.high %v505_v0, %v509_v1  ;;  %v5516_v5 = vcombine.low %v505_v0, %v509_v1  ;;  %v513_v6 = vld [vmem:[%s6614_s21 + $0x40] sm:$0xff]  ;;  %v5519_v8 = vcombine.high %v506_v2, %v510_v4  ;;  %v5518_v9 = vcombine.low %v506_v2, %v510_v4  ;;  %v514_v11 = vld [vmem:[%s6614_s21 + $0x48] sm:$0xff]  ;;  %s5959_s25 = sshll.u32 %s10106_s9, 4  ;;  %s474_s27 = scalar_lea.vmem %s8964_s7, %s5512_s24 }
  0x56   : > { %v517_v7 = vld [vmem:[%s6614_s21 + $0x60] sm:$0xff]  ;;  %v518_v12 = vld [vmem:[%s6614_s21 + $0x68] sm:$0xff]  ;;  %s5962_s20 = sshll.u32 %s10106_s9, 5 }
  0x57   : > { %v5525_v10 = vcombine.high %v513_v6, %v517_v7  ;;  %v521_v13 = vld [vmem:[%s6614_s21 + $0x80] sm:$0xff]  ;;  %1451 = vmatprep.subr.bf16.mxu0 %v5517_v3  ;;  %v5527_v14 = vcombine.high %v514_v11, %v518_v12  ;;  %v522_v16 = vld [vmem:[%s6614_s21 + $0x88] sm:$0xff]  ;;  %1524 = vmatprep.subr.bf16.mxu1 %v5519_v8  ;;  %v5524_v18 = vcombine.low %v513_v6, %v517_v7  ;;  %s479_s30 = scalar_lea.vmem %s8965_s8, %s5962_s20 }
  0x58   : > { %v525_v15 = vld [vmem:[%s6614_s21 + $0xa0] sm:$0xff]  ;;  %v526_v17 = vld [vmem:[%s6614_s21 + $0xa8] sm:$0xff]  ;;  %1452 = vmatpush1.bf16.msra.mxu0 %v5516_v5  ;;  %1525 = vmatpush1.bf16.msra.mxu1 %v5518_v9  ;;  %v5526_v19 = vcombine.low %v514_v11, %v518_v12 }
  0x59   : > { %1453 = vmatprep.subr.bf16.mxu0 %v5525_v10  ;;  %v5533_v20 = vcombine.high %v521_v13, %v525_v15  ;;  %1526 = vmatprep.subr.bf16.mxu1 %v5527_v14  ;;  %v5535_v21 = vcombine.high %v522_v16, %v526_v17  ;;  %v529_v22 = vld [vmem:[%s6614_s21 + $0xc0] sm:$0xff]  ;;  %v530_v24 = vld [vmem:[%s6614_s21 + $0xc8] sm:$0xff]  ;;  %v5532_v26 = vcombine.low %v521_v13, %v525_v15 }
  0x5a   : > { %v533_v23 = vld [vmem:[%s6614_s21 + $0xe0] sm:$0xff]  ;;  %v534_v25 = vld [vmem:[%s6614_s21 + $0xe8] sm:$0xff]  ;;  %v5534_v27 = vcombine.low %v522_v16, %v526_v17 }
  0x5b   : > { %v5541_v28 = vcombine.high %v529_v22, %v533_v23  ;;  %v5543_v29 = vcombine.high %v530_v24, %v534_v25  ;;  %v537_v30 = vld [vmem:[%s6614_s21 + $0x100] sm:$0xff]  ;;  %v538_v32 = vld [vmem:[%s6614_s21 + $0x108] sm:$0xff]  ;;  %v5540_v34 = vcombine.low %v529_v22, %v533_v23  ;;  %v5542_v35 = vcombine.low %v530_v24, %v534_v25 }
  0x5c   : > { %1454 = vmatpush1.bf16.msra.mxu0 %v5524_v18  ;;  %1527 = vmatpush1.bf16.msra.mxu1 %v5526_v19  ;;  %v541_v31 = vld [vmem:[%s6614_s21 + $0x120] sm:$0xff]  ;;  %v542_v33 = vld [vmem:[%s6614_s21 + $0x128] sm:$0xff] }
  0x5d   : > { %1455 = vmatprep.subr.bf16.mxu0 %v5533_v20  ;;  %1528 = vmatprep.subr.bf16.mxu1 %v5535_v21  ;;  %v5549_v36 = vcombine.high %v537_v30, %v541_v31  ;;  %v5551_v37 = vcombine.high %v538_v32, %v542_v33  ;;  %v545_v38 = vld [vmem:[%s6614_s21 + $0x140] sm:$0xff]  ;;  %v546_v40 = vld [vmem:[%s6614_s21 + $0x148] sm:$0xff]  ;;  %v5548_v42 = vcombine.low %v537_v30, %v541_v31 }
  0x5e   : > { %v549_v39 = vld [vmem:[%s6614_s21 + $0x160] sm:$0xff]  ;;  %v550_v41 = vld [vmem:[%s6614_s21 + $0x168] sm:$0xff]  ;;  %v5550_v43 = vcombine.low %v538_v32, %v542_v33 }
  0x5f   : > { %v5557_v44 = vcombine.high %v545_v38, %v549_v39  ;;  %v5559_v45 = vcombine.high %v546_v40, %v550_v41  ;;  %v553_v46 = vld [vmem:[%s6614_s21 + $0x180] sm:$0xff]  ;;  %v554_v48 = vld [vmem:[%s6614_s21 + $0x188] sm:$0xff]  ;;  %v5556_v50 = vcombine.low %v545_v38, %v549_v39  ;;  %v5558_v51 = vcombine.low %v546_v40, %v550_v41 }
  0x60   : > { %1456 = vmatpush1.bf16.msra.mxu0 %v5532_v26  ;;  %1529 = vmatpush1.bf16.msra.mxu1 %v5534_v27  ;;  %v557_v47 = vld [vmem:[%s6614_s21 + $0x1a0] sm:$0xff]  ;;  %v558_v49 = vld [vmem:[%s6614_s21 + $0x1a8] sm:$0xff] }
  0x61   : > { %1457 = vmatprep.subr.bf16.mxu0 %v5541_v28  ;;  %1530 = vmatprep.subr.bf16.mxu1 %v5543_v29  ;;  %v5565_v52 = vcombine.high %v553_v46, %v557_v47  ;;  %v482_v53 = vld [vmem:[%s6646_s16 + $0x8] sm:$0xff]  ;;  %v5567_v55 = vcombine.high %v554_v48, %v558_v49  ;;  %v561_v56 = vld [vmem:[%s6614_s21 + $0x1c0] sm:$0xff]  ;;  %v5564_v61 = vcombine.low %v553_v46, %v557_v47 }
  0x62   : > { %v565_v57 = vld [vmem:[%s6614_s21 + $0x1e0] sm:$0xff]  ;;  %v6654_v58 = vpack.c.bf16 %v484_v54, %v482_v53  ;;  %v562_v59 = vld [vmem:[%s6614_s21 + $0x1c8] sm:$0xff]  ;;  %v5566_v62 = vcombine.low %v554_v48, %v558_v49 }
  0x63   : > { %v566_v60 = vld [vmem:[%s6614_s21 + $0x1e8] sm:$0xff]  ;;  %v5573_v63 = vcombine.high %v561_v56, %v565_v57  ;;  %v569_v1 = vld [vmem:[%s6614_s21 + $0x200] sm:$0xff]  ;;  %v5572_v5 = vcombine.low %v561_v56, %v565_v57 }
  0x64   : > { %1458 = vmatpush1.bf16.msra.mxu0 %v5540_v34  ;;  %1531 = vmatpush1.bf16.msra.mxu1 %v5542_v35  ;;  %v5575_v0 = vcombine.high %v562_v59, %v566_v60  ;;  %v573_v2 = vld [vmem:[%s6614_s21 + $0x220] sm:$0xff]  ;;  %v570_v3 = vld [vmem:[%s6614_s21 + $0x208] sm:$0xff]  ;;  %v5574_v6 = vcombine.low %v562_v59, %v566_v60 }
  0x65   : > { %1459 = vmatprep.subr.bf16.mxu0 %v5549_v36  ;;  %1532 = vmatprep.subr.bf16.mxu1 %v5551_v37  ;;  %v574_v4 = vld [vmem:[%s6614_s21 + $0x228] sm:$0xff]  ;;  %v5581_v7 = vcombine.high %v569_v1, %v573_v2  ;;  %v577_v9 = vld [vmem:[%s6614_s21 + $0x240] sm:$0xff]  ;;  %v5580_v13 = vcombine.low %v569_v1, %v573_v2  ;;  %v507_v2 = vld [vmem:[%s6614_s21 + $0x10] sm:$0xff] }
  0x66   : > { %1483 = vmatprep.mubr.bf16.mxu0 %v6654_v58  ;;  %1556 = vmatprep.mubr.bf16.mxu1 %v6654_v58  ;;  %v5583_v8 = vcombine.high %v570_v3, %v574_v4  ;;  %v581_v10 = vld [vmem:[%s6614_s21 + $0x260] sm:$0xff]  ;;  %v578_v11 = vld [vmem:[%s6614_s21 + $0x248] sm:$0xff]  ;;  %v5582_v14 = vcombine.low %v570_v3, %v574_v4  ;;  %v511_v3 = vld [vmem:[%s6614_s21 + $0x30] sm:$0xff] }
  0x67   : > { %v582_v12 = vld [vmem:[%s6614_s21 + $0x268] sm:$0xff]  ;;  %v5589_v15 = vcombine.high %v577_v9, %v581_v10  ;;  %v585_v17 = vld [vmem:[%s6614_s21 + $0x280] sm:$0xff]  ;;  %v5588_v21 = vcombine.low %v577_v9, %v581_v10  ;;  %v508_v4 = vld [vmem:[%s6614_s21 + $0x18] sm:$0xff]  ;;  %v5521_v10 = vcombine.high %v507_v2, %v511_v3 }
  0x68   : > { %1460 = vmatpush1.bf16.msra.mxu0 %v5548_v42  ;;  %1533 = vmatpush1.bf16.msra.mxu1 %v5550_v43  ;;  %v5591_v16 = vcombine.high %v578_v11, %v582_v12  ;;  %v589_v18 = vld [vmem:[%s6614_s21 + $0x2a0] sm:$0xff]  ;;  %v586_v19 = vld [vmem:[%s6614_s21 + $0x288] sm:$0xff]  ;;  %v5590_v22 = vcombine.low %v578_v11, %v582_v12  ;;  %v515_v12 = vld [vmem:[%s6614_s21 + $0x50] sm:$0xff] }
  0x69   : > { %1461 = vmatprep.subr.bf16.mxu0 %v5557_v44  ;;  %1534 = vmatprep.subr.bf16.mxu1 %v5559_v45  ;;  %v590_v20 = vld [vmem:[%s6614_s21 + $0x2a8] sm:$0xff]  ;;  %v5597_v23 = vcombine.high %v585_v17, %v589_v18  ;;  %v593_v25 = vld [vmem:[%s6614_s21 + $0x2c0] sm:$0xff]  ;;  %v5596_v29 = vcombine.low %v585_v17, %v589_v18  ;;  %v488_v18 = vld [vmem:[%s6646_s16 + $0x38] sm:$0xff] }
  0x6a   : > { %v5599_v24 = vcombine.high %v586_v19, %v590_v20  ;;  %v597_v26 = vld [vmem:[%s6614_s21 + $0x2e0] sm:$0xff]  ;;  %v594_v27 = vld [vmem:[%s6614_s21 + $0x2c8] sm:$0xff]  ;;  %v5598_v30 = vcombine.low %v586_v19, %v590_v20  ;;  %v5520_v19 = vcombine.low %v507_v2, %v511_v3 }
  0x6b   : > { %v598_v28 = vld [vmem:[%s6614_s21 + $0x2e8] sm:$0xff]  ;;  %v5605_v31 = vcombine.high %v593_v25, %v597_v26  ;;  %v601_v33 = vld [vmem:[%s6614_s21 + $0x300] sm:$0xff]  ;;  %v5604_v37 = vcombine.low %v593_v25, %v597_v26  ;;  %v524_v26 = vld [vmem:[%s6614_s21 + $0x98] sm:$0xff] }
  0x6c   : > { %1462 = vmatpush1.bf16.msra.mxu0 %v5556_v50  ;;  %1535 = vmatpush1.bf16.msra.mxu1 %v5558_v51  ;;  %v5607_v32 = vcombine.high %v594_v27, %v598_v28  ;;  %v605_v34 = vld [vmem:[%s6614_s21 + $0x320] sm:$0xff]  ;;  %v602_v35 = vld [vmem:[%s6614_s21 + $0x308] sm:$0xff]  ;;  %v5606_v38 = vcombine.low %v594_v27, %v598_v28  ;;  %v528_v27 = vld [vmem:[%s6614_s21 + $0xb8] sm:$0xff]  ;;  %v8967_v28 = vmov 0  }
  0x6d   : > { %1463 = vmatprep.subr.bf16.mxu0 %v5565_v52  ;;  %1536 = vmatprep.subr.bf16.mxu1 %v5567_v55  ;;  %v606_v36 = vld [vmem:[%s6614_s21 + $0x328] sm:$0xff]  ;;  %v5613_v39 = vcombine.high %v601_v33, %v605_v34  ;;  %v609_v41 = vld [vmem:[%s6614_s21 + $0x340] sm:$0xff]  ;;  %v5612_v45 = vcombine.low %v601_v33, %v605_v34  ;;  %v5539_v34 = vcombine.high %v524_v26, %v528_v27 }
  0x6e   : > { %v5615_v40 = vcombine.high %v602_v35, %v606_v36  ;;  %v613_v42 = vld [vmem:[%s6614_s21 + $0x360] sm:$0xff]  ;;  %v610_v43 = vld [vmem:[%s6614_s21 + $0x348] sm:$0xff]  ;;  %v5614_v46 = vcombine.low %v602_v35, %v606_v36  ;;  %6010 = vset.pattern.permute.xlu0 %v8967_v28  ;;  %v531_v35 = vld [vmem:[%s6614_s21 + $0xd0] sm:$0xff]  ;;  %6011 = vset.pattern.permute.xlu1 %v8967_v28 }
  0x6f   : > { %v614_v44 = vld [vmem:[%s6614_s21 + $0x368] sm:$0xff]  ;;  %v5621_v47 = vcombine.high %v609_v41, %v613_v42  ;;  %v617_v49 = vld [vmem:[%s6614_s21 + $0x380] sm:$0xff]  ;;  %v5620_v53 = vcombine.low %v609_v41, %v613_v42  ;;  %v535_v36 = vld [vmem:[%s6614_s21 + $0xf0] sm:$0xff] }
  0x70   : > { %1464 = vmatpush1.bf16.msra.mxu0 %v5564_v61  ;;  %1537 = vmatpush1.bf16.msra.mxu1 %v5566_v62  ;;  %v5623_v48 = vcombine.high %v610_v43, %v614_v44  ;;  %v621_v50 = vld [vmem:[%s6614_s21 + $0x3a0] sm:$0xff]  ;;  %v618_v51 = vld [vmem:[%s6614_s21 + $0x388] sm:$0xff]  ;;  %v5622_v54 = vcombine.low %v610_v43, %v614_v44  ;;  %v492_v41 = vld [vmem:[%s6646_s16 + $0x58] sm:$0xff]  ;;  %v5538_v43 = vcombine.low %v524_v26, %v528_v27 }
  0x71   : > { %1465 = vmatprep.subr.bf16.mxu0 %v5573_v63  ;;  %1538 = vmatprep.subr.bf16.mxu1 %v5575_v0  ;;  %v622_v52 = vld [vmem:[%s6614_s21 + $0x3a8] sm:$0xff]  ;;  %v5629_v55 = vcombine.high %v617_v49, %v621_v50  ;;  %v625_v57 = vld [vmem:[%s6614_s21 + $0x3c0] sm:$0xff]  ;;  %v5628_v62 = vcombine.low %v617_v49, %v621_v50  ;;  %v5545_v44 = vcombine.high %v531_v35, %v535_v36  ;;  %v540_v49 = vld [vmem:[%s6614_s21 + $0x118] sm:$0xff] }
  0x72   : > { %v5631_v56 = vcombine.high %v618_v51, %v622_v52  ;;  %v629_v59 = vld [vmem:[%s6614_s21 + $0x3e0] sm:$0xff]  ;;  %v626_v60 = vld [vmem:[%s6614_s21 + $0x3c8] sm:$0xff]  ;;  %v5630_v63 = vcombine.low %v618_v51, %v622_v52  ;;  %v544_v50 = vld [vmem:[%s6614_s21 + $0x138] sm:$0xff]  ;;  %v5544_v51 = vcombine.low %v531_v35, %v535_v36 }
  0x73   : > { %v630_v61 = vld [vmem:[%s6614_s21 + $0x3e8] sm:$0xff]  ;;  %v5637_v0 = vcombine.high %v625_v57, %v629_v59  ;;  %v489_v52 = vld [vmem:[%s6646_s16 + $0x40] sm:$0xff]  ;;  %v5554_v2 = vcombine.low %v540_v49, %v544_v50  ;;  %v571_v27 = vld [vmem:[%s6614_s21 + $0x210] sm:$0xff] }
  0x74   : > { %1466 = vmatpush1.bf16.msra.mxu0 %v5572_v5  ;;  %1539 = vmatpush1.bf16.msra.mxu1 %v5574_v6  ;;  %v5639_v1 = vcombine.high %v626_v60, %v630_v61  ;;  %v512_v5 = vld [vmem:[%s6614_s21 + $0x38] sm:$0xff]  ;;  %v5636_v6 = vcombine.low %v625_v57, %v629_v59  ;;  %v5638_v9 = vcombine.low %v626_v60, %v630_v61  ;;  %v486_v17 = vld [vmem:[%s6646_s16 + $0x28] sm:$0xff]  ;;  %v547_v57 = vld [vmem:[%s6614_s21 + $0x150] sm:$0xff] }
  0x75   : > { %1467 = vmatprep.subr.bf16.mxu0 %v5581_v7  ;;  %1540 = vmatprep.subr.bf16.mxu1 %v5583_v8  ;;  %v481_v7 = vld [vmem:[%s6646_s16] sm:$0xff]  ;;  %v483_v8 = vld [vmem:[%s6646_s16 + $0x10] sm:$0xff]  ;;  %v5523_v11 = vcombine.high %v508_v4, %v512_v5  ;;  %v5522_v20 = vcombine.low %v508_v4, %v512_v5  ;;  %v6708_v25 = vpack.c.bf16 %v488_v18, %v486_v17  ;;  %v548_v60 = vld [vmem:[%s6614_s21 + $0x158] sm:$0xff] }
  0x76   : > { %v551_v59 = vld [vmem:[%s6614_s21 + $0x170] sm:$0xff]  ;;  %v552_v61 = vld [vmem:[%s6614_s21 + $0x178] sm:$0xff] }
  0x77   : > { %v5561_v3 = vcombine.high %v547_v57, %v551_v59  ;;  %v5563_v4 = vcombine.high %v548_v60, %v552_v61  ;;  %v555_v5 = vld [vmem:[%s6614_s21 + $0x190] sm:$0xff] }
  0x78   : > { %1468 = vmatpush1.bf16.msra.mxu0 %v5580_v13  ;;  %1541 = vmatpush1.bf16.msra.mxu1 %v5582_v14  ;;  %v519_v13 = vld [vmem:[%s6614_s21 + $0x70] sm:$0xff]  ;;  %v516_v14 = vld [vmem:[%s6614_s21 + $0x58] sm:$0xff] }
  0x79   : > { %1469 = vmatprep.subr.bf16.mxu0 %v5589_v15  ;;  %1542 = vmatprep.subr.bf16.mxu1 %v5591_v16  ;;  %v6701_v15 = vpack.c.bf16 %v483_v8, %v481_v7  ;;  %v520_v16 = vld [vmem:[%s6614_s21 + $0x78] sm:$0xff]  ;;  %v563_v17 = vld [vmem:[%s6614_s21 + $0x1d0] sm:$0xff] }
  0x7a   : > { %v556_v8 = vld [vmem:[%s6614_s21 + $0x198] sm:$0xff]  ;;  %v567_v18 = vld [vmem:[%s6614_s21 + $0x1f0] sm:$0xff] }
  0x7b   : > { %v579_v36 = vld [vmem:[%s6614_s21 + $0x250] sm:$0xff] }
  0x7c   : > { %1470 = vmatpush1.bf16.msra.mxu0 %v5588_v21  ;;  %1543 = vmatpush1.bf16.msra.mxu1 %v5590_v22  ;;  %v5529_v21 = vcombine.high %v515_v12, %v519_v13  ;;  %v5531_v22 = vcombine.high %v516_v14, %v520_v16 }
  0x7d   : > { %1471 = vmatprep.subr.bf16.mxu0 %v5597_v23  ;;  %1544 = vmatprep.subr.bf16.mxu1 %v5599_v24  ;;  %v523_v23 = vld [vmem:[%s6614_s21 + $0x90] sm:$0xff] }
  0x7e   : > { %v527_v24 = vld [vmem:[%s6614_s21 + $0xb0] sm:$0xff] }
  0x7f   : > { %v5537_v33 = vcombine.high %v523_v23, %v527_v24  ;;  %v5536_v42 = vcombine.low %v523_v23, %v527_v24  ;;  %v5577_v24 = vcombine.high %v563_v17, %v567_v18 }
  0x80   : > { %1472 = vmatpush1.bf16.msra.mxu0 %v5596_v29  ;;  %1545 = vmatpush1.bf16.msra.mxu1 %v5598_v30  ;;  %v5528_v29 = vcombine.low %v515_v12, %v519_v13  ;;  %v485_v30 = vld [vmem:[%s6646_s16 + $0x20] sm:$0xff]  ;;  %v495_v12 = vld [vmem:[%s6646_s16 + $0x70] sm:$0xff]  ;;  %v5562_v13 = vcombine.low %v548_v60, %v552_v61 }
  0x81   : > { %1473 = vmatprep.subr.bf16.mxu0 %v5605_v31  ;;  %1546 = vmatprep.subr.bf16.mxu1 %v5607_v32  ;;  %v487_v31 = vld [vmem:[%s6646_s16 + $0x30] sm:$0xff]  ;;  %v5530_v32 = vcombine.low %v516_v14, %v520_v16 }
  0x84   : > { %1474 = vmatpush1.bf16.msra.mxu0 %v5604_v37  ;;  %1547 = vmatpush1.bf16.msra.mxu1 %v5606_v38  ;;  %v532_v37 = vld [vmem:[%s6614_s21 + $0xd8] sm:$0xff] }
  0x85   : > { %1475 = vmatprep.subr.bf16.mxu0 %v5613_v39  ;;  %1548 = vmatprep.subr.bf16.mxu1 %v5615_v40  ;;  %v536_v38 = vld [vmem:[%s6614_s21 + $0xf8] sm:$0xff]  ;;  %v6723_v39 = vpack.c.bf16 %v487_v31, %v485_v30  ;;  %v490_v40 = vld [vmem:[%s6646_s16 + $0x48] sm:$0xff] }
  0x86   : > { %v572_v30 = vld [vmem:[%s6614_s21 + $0x218] sm:$0xff] }
  0x87   : > { %v576_v31 = vld [vmem:[%s6614_s21 + $0x238] sm:$0xff] }
  0x88   : > { %1476 = vmatpush1.bf16.msra.mxu0 %v5612_v45  ;;  %1549 = vmatpush1.bf16.msra.mxu1 %v5614_v46  ;;  %v5547_v45 = vcombine.high %v532_v37, %v536_v38  ;;  %v539_v46 = vld [vmem:[%s6614_s21 + $0x110] sm:$0xff]  ;;  %v5587_v35 = vcombine.high %v572_v30, %v576_v31 }
  0x89   : > { %1477 = vmatprep.subr.bf16.mxu0 %v5621_v47  ;;  %1550 = vmatprep.subr.bf16.mxu1 %v5623_v48  ;;  %v543_v47 = vld [vmem:[%s6614_s21 + $0x130] sm:$0xff]  ;;  %v6730_v48 = vpack.c.bf16 %v492_v41, %v490_v40  ;;  %v584_v40 = vld [vmem:[%s6614_s21 + $0x278] sm:$0xff] }
  0x8c   : > { %1478 = vmatpush1.bf16.msra.mxu0 %v5620_v53  ;;  %1551 = vmatpush1.bf16.msra.mxu1 %v5622_v54  ;;  %v491_v53 = vld [vmem:[%s6646_s16 + $0x50] sm:$0xff]  ;;  %v5546_v54 = vcombine.low %v532_v37, %v536_v38  ;;  %v580_v38 = vld [vmem:[%s6614_s21 + $0x258] sm:$0xff] }
  0x8d   : > { %1479 = vmatprep.subr.bf16.mxu0 %v5629_v55  ;;  %1552 = vmatprep.subr.bf16.mxu1 %v5631_v56  ;;  %v5553_v55 = vcombine.high %v539_v46, %v543_v47  ;;  %v5555_v56 = vcombine.high %v540_v49, %v544_v50  ;;  %v583_v37 = vld [vmem:[%s6614_s21 + $0x270] sm:$0xff]  ;;  %v592_v49 = vld [vmem:[%s6614_s21 + $0x2b8] sm:$0xff] }
  0x8e   : > { %v5592_v50 = vcombine.low %v579_v36, %v583_v37 }
  0x90   : > { %1480 = vmatpush1.bf16.msra.mxu0 %v5628_v62  ;;  %1553 = vmatpush1.bf16.msra.mxu1 %v5630_v63  ;;  %v6744_v62 = vpack.c.bf16 %v491_v53, %v489_v52  ;;  %v494_v63 = vld [vmem:[%s6646_s16 + $0x68] sm:$0xff]  ;;  %v595_v53 = vld [vmem:[%s6614_s21 + $0x2d0] sm:$0xff] }
  0x91   : > { %1481 = vmatprep.subr.bf16.mxu0 %v5637_v0  ;;  %1554 = vmatprep.subr.bf16.mxu1 %v5639_v1  ;;  %v496_v0 = vld [vmem:[%s6646_s16 + $0x78] sm:$0xff]  ;;  %v5552_v1 = vcombine.low %v539_v46, %v543_v47  ;;  %v591_v46 = vld [vmem:[%s6614_s21 + $0x2b0] sm:$0xff] }
  0x92   : > { %v6750_v7 = vpack.c.bf16 %v496_v0, %v494_v63  ;;  %v588_v47 = vld [vmem:[%s6614_s21 + $0x298] sm:$0xff]  ;;  %v603_v63 = vld [vmem:[%s6614_s21 + $0x310] sm:$0xff] }
  0x93   : > { %v5603_v52 = vcombine.high %v588_v47, %v592_v49  ;;  %v607_v0 = vld [vmem:[%s6614_s21 + $0x330] sm:$0xff] }
  0x94   : > { %1482 = vmatpush1.bf16.msra.mxu0 %v5636_v6  ;;  %1555 = vmatpush1.bf16.msra.mxu1 %v5638_v9  ;;  %v559_v6 = vld [vmem:[%s6614_s21 + $0x1b0] sm:$0xff]  ;;  %v560_v9 = vld [vmem:[%s6614_s21 + $0x1b8] sm:$0xff] }
  0x95   : > { %1597 = vmatprep.subr.bf16.mxu0 %v5521_v10  ;;  %1670 = vmatprep.subr.bf16.mxu1 %v5523_v11  ;;  %v5560_v10 = vcombine.low %v547_v57, %v551_v59  ;;  %v493_v11 = vld [vmem:[%s6646_s16 + $0x60] sm:$0xff]  ;;  %v5569_v14 = vcombine.high %v555_v5, %v559_v6  ;;  %v5571_v16 = vcombine.high %v556_v8, %v560_v9 }
  0x96   : > { %v5570_v23 = vcombine.low %v556_v8, %v560_v9  ;;  %v5602_v59 = vcombine.low %v588_v47, %v592_v49  ;;  %v611_v8 = vld [vmem:[%s6614_s21 + $0x350] sm:$0xff]  ;;  %v642_v47 = vld [vmem:[%s6594_s18 + $0x48] sm:$0xff] }
  0x97   : > { %1484 = vmatmul.mubr.bf16.vlgmr.msra.gmra.mrb[0].mxu0 %v6701_v15  ;;  %1557 = vmatmul.mubr.bf16.vlgmr.msra.gmra.mrb[0].mxu1 %v6701_v15  ;;  %v615_v9 = vld [vmem:[%s6614_s21 + $0x370] sm:$0xff]  ;;  %v646_v49 = vld [vmem:[%s6594_s18 + $0x68] sm:$0xff] }
  0x98   : > { %1598 = vmatpush1.bf16.msra.mxu0 %v5520_v19  ;;  %1671 = vmatpush1.bf16.msra.mxu1 %v5522_v20  ;;  %v564_v19 = vld [vmem:[%s6614_s21 + $0x1d8] sm:$0xff] }
  0x99   : > { %1599 = vmatprep.subr.bf16.mxu0 %v5529_v21  ;;  %1672 = vmatprep.subr.bf16.mxu1 %v5531_v22  ;;  %v568_v20 = vld [vmem:[%s6614_s21 + $0x1f8] sm:$0xff]  ;;  %v6764_v21 = vpack.c.bf16 %v495_v12, %v493_v11  ;;  %v5568_v22 = vcombine.low %v555_v5, %v559_v6  ;;  %v5617_v5 = vcombine.high %v603_v63, %v607_v0 }
  0x9a   : > { %1493 = vmatprep.mubr.bf16.mxu0 %v6708_v25  ;;  %1566 = vmatprep.mubr.bf16.mxu1 %v6708_v25  ;;  %v5579_v26 = vcombine.high %v564_v19, %v568_v20  ;;  %v616_v11 = vld [vmem:[%s6614_s21 + $0x378] sm:$0xff]  ;;  %v5616_v12 = vcombine.low %v603_v63, %v607_v0  ;;  %v657_v63 = vld [vmem:[%s6594_s18 + $0xc0] sm:$0xff]  ;;  %v658_v0 = vld [vmem:[%s6594_s18 + $0xc8] sm:$0xff] }
  0x9c   : > { %1600 = vmatpush1.bf16.msra.mxu0 %v5528_v29  ;;  %1673 = vmatpush1.bf16.msra.mxu1 %v5530_v32  ;;  %v575_v29 = vld [vmem:[%s6614_s21 + $0x230] sm:$0xff]  ;;  %v5576_v32 = vcombine.low %v563_v17, %v567_v18 }
  0x9d   : > { %1601 = vmatprep.subr.bf16.mxu0 %v5537_v33  ;;  %1674 = vmatprep.subr.bf16.mxu1 %v5539_v34  ;;  %v5578_v33 = vcombine.low %v564_v19, %v568_v20  ;;  %v5585_v34 = vcombine.high %v571_v27, %v575_v29  ;;  %v5584_v41 = vcombine.low %v571_v27, %v575_v29  ;;  %v619_v17 = vld [vmem:[%s6614_s21 + $0x390] sm:$0xff]  ;;  %v620_v19 = vld [vmem:[%s6614_s21 + $0x398] sm:$0xff] }
  0x9e   : > { %v623_v18 = vld [vmem:[%s6614_s21 + $0x3b0] sm:$0xff]  ;;  %v624_v20 = vld [vmem:[%s6614_s21 + $0x3b8] sm:$0xff] }
  0x9f   : > { %1494 = vmatmul.mubr.bf16.gmra.mrb[4].mxu0 %v6723_v39  ;;  %1567 = vmatmul.mubr.bf16.gmra.mrb[4].mxu1 %v6723_v39  ;;  %v627_v27 = vld [vmem:[%s6614_s21 + $0x3d0] sm:$0xff] }
  0xa0   : > { %1602 = vmatpush1.bf16.msra.mxu0 %v5536_v42  ;;  %1675 = vmatpush1.bf16.msra.mxu1 %v5538_v43  ;;  %v5586_v42 = vcombine.low %v572_v30, %v576_v31  ;;  %v5593_v43 = vcombine.high %v579_v36, %v583_v37  ;;  %v631_v29 = vld [vmem:[%s6614_s21 + $0x3f0] sm:$0xff]  ;;  %v628_v30 = vld [vmem:[%s6614_s21 + $0x3d8] sm:$0xff]  ;;  %v633_v36 = vld [vmem:[%s6594_s18] sm:$0xff] }
  0xa1   : > { %1603 = vmatprep.subr.bf16.mxu0 %v5545_v44  ;;  %1676 = vmatprep.subr.bf16.mxu1 %v5547_v45  ;;  %v5595_v44 = vcombine.high %v580_v38, %v584_v40  ;;  %v587_v45 = vld [vmem:[%s6614_s21 + $0x290] sm:$0xff]  ;;  %v632_v31 = vld [vmem:[%s6614_s21 + $0x3f8] sm:$0xff]  ;;  %v637_v37 = vld [vmem:[%s6594_s18 + $0x20] sm:$0xff] }
  0xa2   : > { %1503 = vmatprep.mubr.bf16.mxu0 %v6730_v48  ;;  %1576 = vmatprep.mubr.bf16.mxu1 %v6730_v48  ;;  %v5600_v57 = vcombine.low %v587_v45, %v591_v46 }
  0xa4   : > { %1604 = vmatpush1.bf16.msra.mxu0 %v5544_v51  ;;  %1677 = vmatpush1.bf16.msra.mxu1 %v5546_v54  ;;  %v5601_v51 = vcombine.high %v587_v45, %v591_v46  ;;  %v599_v54 = vld [vmem:[%s6614_s21 + $0x2f0] sm:$0xff]  ;;  %v641_v45 = vld [vmem:[%s6594_s18 + $0x40] sm:$0xff] }
  0xa5   : > { %1605 = vmatprep.subr.bf16.mxu0 %v5553_v55  ;;  %1678 = vmatprep.subr.bf16.mxu1 %v5555_v56  ;;  %v596_v55 = vld [vmem:[%s6614_s21 + $0x2d8] sm:$0xff]  ;;  %v5609_v60 = vcombine.high %v595_v53, %v599_v54  ;;  %v645_v46 = vld [vmem:[%s6594_s18 + $0x60] sm:$0xff] }
  0xa6   : > { %v600_v56 = vld [vmem:[%s6614_s21 + $0x2f8] sm:$0xff] }
  0xa7   : > { %1504 = vmatmul.mubr.bf16.gmra.mrb[8].mxu0 %v6744_v62  ;;  %1577 = vmatmul.mubr.bf16.gmra.mrb[8].mxu1 %v6744_v62  ;;  %v5611_v61 = vcombine.high %v596_v55, %v600_v56 }
  0xa8   : > { %1606 = vmatpush1.bf16.msra.mxu0 %v5552_v1  ;;  %1679 = vmatpush1.bf16.msra.mxu1 %v5554_v2  ;;  %v604_v1 = vld [vmem:[%s6614_s21 + $0x318] sm:$0xff] }
  0xa9   : > { %1607 = vmatprep.subr.bf16.mxu0 %v5561_v3  ;;  %1680 = vmatprep.subr.bf16.mxu1 %v5563_v4  ;;  %v608_v2 = vld [vmem:[%s6614_s21 + $0x338] sm:$0xff]  ;;  %v5608_v3 = vcombine.low %v595_v53, %v599_v54  ;;  %v5610_v4 = vcombine.low %v596_v55, %v600_v56  ;;  %v649_v53 = vld [vmem:[%s6594_s18 + $0x80] sm:$0xff]  ;;  %v650_v55 = vld [vmem:[%s6594_s18 + $0x88] sm:$0xff] }
  0xaa   : > { %1513 = vmatprep.mubr.bf16.mxu0 %v6750_v7  ;;  %1586 = vmatprep.mubr.bf16.mxu1 %v6750_v7  ;;  %v5619_v6 = vcombine.high %v604_v1, %v608_v2  ;;  %v653_v54 = vld [vmem:[%s6594_s18 + $0xa0] sm:$0xff]  ;;  %v654_v56 = vld [vmem:[%s6594_s18 + $0xa8] sm:$0xff] }
  0xac   : > { %1608 = vmatpush1.bf16.msra.mxu0 %v5560_v10  ;;  %1681 = vmatpush1.bf16.msra.mxu1 %v5562_v13  ;;  %v612_v10 = vld [vmem:[%s6614_s21 + $0x358] sm:$0xff]  ;;  %v5618_v13 = vcombine.low %v604_v1, %v608_v2  ;;  %v662_v1 = vld [vmem:[%s6594_s18 + $0xe8] sm:$0xff]  ;;  %v6849_v2 = vcombine.low %v649_v53, %v653_v54  ;;  %s8749_s21 = scalar_lea.vmem %s8958_s1, %s5959_s25 }
  0xad   : > { %1609 = vmatprep.subr.bf16.mxu0 %v5569_v14  ;;  %1682 = vmatprep.subr.bf16.mxu1 %v5571_v16  ;;  %v5625_v14 = vcombine.high %v611_v8, %v615_v9  ;;  %v5627_v16 = vcombine.high %v612_v10, %v616_v11 }
  0xae   : > { %9259 = vst [vmem:[#allocation18_spill] sm:$0xff] %v6849_v2 }
  0xaf   : > { %1514 = vmatmul.mubr.bf16.gmra.mrb[12].mxu0 %v6764_v21  ;;  %1587 = vmatmul.mubr.bf16.gmra.mrb[12].mxu1 %v6764_v21 }
  0xb0   : > { %1610 = vmatpush1.bf16.msra.mxu0 %v5568_v22  ;;  %1683 = vmatpush1.bf16.msra.mxu1 %v5570_v23  ;;  %v5624_v22 = vcombine.low %v611_v8, %v615_v9  ;;  %v5626_v23 = vcombine.low %v612_v10, %v616_v11  ;;  %v666_v8 = vld [vmem:[%s6594_s18 + $0x108] sm:$0xff]  ;;  %v6871_v11 = vcombine.low %v658_v0, %v662_v1 }
  0xb1   : > { %1611 = vmatprep.subr.bf16.mxu0 %v5577_v24  ;;  %1684 = vmatprep.subr.bf16.mxu1 %v5579_v26  ;;  %v5633_v24 = vcombine.high %v619_v17, %v623_v18  ;;  %v5635_v26 = vcombine.high %v620_v19, %v624_v20  ;;  %v670_v9 = vld [vmem:[%s6594_s18 + $0x128] sm:$0xff] }
  0xb2   : > { %1629 = vmatprep.mubr.bf16.mxu0 %v6654_v58  ;;  %1702 = vmatprep.mubr.bf16.mxu1 %v6654_v58  ;;  %v5594_v58 = vcombine.low %v580_v38, %v584_v40  ;;  %v634_v38 = vld [vmem:[%s6594_s18 + $0x8] sm:$0xff]  ;;  %9264 = vst [vmem:[#allocation23_spill] sm:$0xff] %v6871_v11 }
  0xb3   : > { %v638_v40 = vld [vmem:[%s6594_s18 + $0x28] sm:$0xff] }
  0xb4   : > { %1612 = vmatpush1.bf16.msra.mxu0 %v5576_v32  ;;  %1685 = vmatpush1.bf16.msra.mxu1 %v5578_v33  ;;  %v5632_v32 = vcombine.low %v619_v17, %v623_v18  ;;  %v5634_v33 = vcombine.low %v620_v19, %v624_v20  ;;  %v678_v17 = vld [vmem:[%s6594_s18 + $0x168] sm:$0xff]  ;;  %v6889_v19 = vcombine.low %v666_v8, %v670_v9 }
  0xb5   : > { %1613 = vmatprep.subr.bf16.mxu0 %v5585_v34  ;;  %1686 = vmatprep.subr.bf16.mxu1 %v5587_v35  ;;  %v5641_v34 = vcombine.high %v627_v27, %v631_v29  ;;  %v5643_v35 = vcombine.high %v628_v30, %v632_v31 }
  0xb6   : > { %9268 = vst [vmem:[#allocation27_spill] sm:$0xff] %v6889_v19 }
  0xb8   : > { %1614 = vmatpush1.bf16.msra.mxu0 %v5584_v41  ;;  %1687 = vmatpush1.bf16.msra.mxu1 %v5586_v42  ;;  %v5640_v41 = vcombine.low %v627_v27, %v631_v29  ;;  %v5642_v42 = vcombine.low %v628_v30, %v632_v31 }
  0xb9   : > { %1615 = vmatprep.subr.bf16.mxu0 %v5593_v43  ;;  %1688 = vmatprep.subr.bf16.mxu1 %v5595_v44  ;;  %v6806_v43 = vcombine.high %v633_v36, %v637_v37  ;;  %v6808_v44 = vcombine.high %v634_v38, %v638_v40 }
  0xbb   : > { %9249 = vst [vmem:[#allocation8_spill] sm:$0xff] %v6806_v43  ;;  %9250 = vst [vmem:[#allocation9_spill] sm:$0xff] %v6808_v44 }
  0xbc   : > { %1616 = vmatpush1.bf16.msra.mxu0 %v5592_v50  ;;  %1689 = vmatpush1.bf16.msra.mxu1 %v5594_v58  ;;  %v6814_v50 = vcombine.low %v633_v36, %v637_v37  ;;  %v6817_v58 = vcombine.low %v634_v38, %v638_v40  ;;  %v697_v40 = vld [vmem:[%s6594_s18 + $0x200] sm:$0xff] }
  0xbd   : > { %1617 = vmatprep.subr.bf16.mxu0 %v5601_v51  ;;  %1690 = vmatprep.subr.bf16.mxu1 %v5603_v52  ;;  %v6819_v51 = vcombine.high %v641_v45, %v645_v46  ;;  %v6822_v52 = vcombine.high %v642_v47, %v646_v49 }
  0xbe   : > { %9251 = vst [vmem:[#allocation10_spill] sm:$0xff] %v6814_v50  ;;  %9252 = vst [vmem:[#allocation11_spill] sm:$0xff] %v6817_v58 }
  0xbf   : > { %9253 = vst [vmem:[#allocation12_spill] sm:$0xff] %v6819_v51  ;;  %9254 = vst [vmem:[#allocation13_spill] sm:$0xff] %v6822_v52 }
  0xc0   : > { %1618 = vmatpush1.bf16.msra.mxu0 %v5600_v57  ;;  %1691 = vmatpush1.bf16.msra.mxu1 %v5602_v59  ;;  %v6831_v57 = vcombine.low %v641_v45, %v645_v46  ;;  %v6835_v59 = vcombine.low %v642_v47, %v646_v49 }
  0xc1   : > { %1619 = vmatprep.subr.bf16.mxu0 %v5609_v60  ;;  %1692 = vmatprep.subr.bf16.mxu1 %v5611_v61  ;;  %v6837_v60 = vcombine.high %v649_v53, %v653_v54  ;;  %v6840_v61 = vcombine.high %v650_v55, %v654_v56  ;;  %v705_v53 = vld [vmem:[%s6594_s18 + $0x240] sm:$0xff] }
  0xc2   : > { %9255 = vst [vmem:[#allocation14_spill] sm:$0xff] %v6831_v57  ;;  %9256 = vst [vmem:[#allocation15_spill] sm:$0xff] %v6835_v59  ;;  %v709_v54 = vld [vmem:[%s6594_s18 + $0x260] sm:$0xff] }
  0xc3   : > { %9257 = vst [vmem:[#allocation16_spill] sm:$0xff] %v6837_v60  ;;  %9258 = vst [vmem:[#allocation17_spill] sm:$0xff] %v6840_v61 }
  0xc4   : > { %1620 = vmatpush1.bf16.msra.mxu0 %v5608_v3  ;;  %1693 = vmatpush1.bf16.msra.mxu1 %v5610_v4  ;;  %v6853_v3 = vcombine.low %v650_v55, %v654_v56  ;;  %v710_v55 = vld [vmem:[%s6594_s18 + $0x268] sm:$0xff] }
  0xc5   : > { %1621 = vmatprep.subr.bf16.mxu0 %v5617_v5  ;;  %1694 = vmatprep.subr.bf16.mxu1 %v5619_v6  ;;  %v6858_v5 = vcombine.high %v658_v0, %v662_v1  ;;  %v665_v6 = vld [vmem:[%s6594_s18 + $0x100] sm:$0xff] }
  0xc6   : > { %9260 = vst [vmem:[#allocation19_spill] sm:$0xff] %v6853_v3  ;;  %v713_v1 = vld [vmem:[%s6594_s18 + $0x280] sm:$0xff] }
  0xc7   : > { %9262 = vst [vmem:[#allocation21_spill] sm:$0xff] %v6858_v5 }
  0xc8   : > { %1622 = vmatpush1.bf16.msra.mxu0 %v5616_v12  ;;  %1695 = vmatpush1.bf16.msra.mxu1 %v5618_v13  ;;  %v6876_v13 = vcombine.high %v666_v8, %v670_v9  ;;  %v718_v8 = vld [vmem:[%s6594_s18 + $0x2a8] sm:$0xff]  ;;  %v6973_v9 = vcombine.low %v705_v53, %v709_v54 }
  0xc9   : > { %1623 = vmatprep.subr.bf16.mxu0 %v5625_v14  ;;  %1696 = vmatprep.subr.bf16.mxu1 %v5627_v16  ;;  %v673_v14 = vld [vmem:[%s6594_s18 + $0x140] sm:$0xff] }
  0xca   : > { %9266 = vst [vmem:[#allocation25_spill] sm:$0xff] %v6876_v13  ;;  %v677_v16 = vld [vmem:[%s6594_s18 + $0x160] sm:$0xff]  ;;  %9287 = vst [vmem:[#allocation46_spill] sm:$0xff] %v6973_v9 }
  0xcb   : > { %v6891_v20 = vcombine.high %v673_v14, %v677_v16  ;;  %v6902_v27 = vcombine.low %v673_v14, %v677_v16 }
  0xcc   : > { %1624 = vmatpush1.bf16.msra.mxu0 %v5624_v22  ;;  %1697 = vmatpush1.bf16.msra.mxu1 %v5626_v23  ;;  %v681_v23 = vld [vmem:[%s6594_s18 + $0x180] sm:$0xff] }
  0xcd   : > { %1625 = vmatprep.subr.bf16.mxu0 %v5633_v24  ;;  %1698 = vmatprep.subr.bf16.mxu1 %v5635_v26  ;;  %9269 = vst [vmem:[#allocation28_spill] sm:$0xff] %v6891_v20  ;;  %v682_v24 = vld [vmem:[%s6594_s18 + $0x188] sm:$0xff]  ;;  %9271 = vst [vmem:[#allocation30_spill] sm:$0xff] %v6902_v27 }
  0xce   : > { %v686_v26 = vld [vmem:[%s6594_s18 + $0x1a8] sm:$0xff] }
  0xcf   : > { %v6912_v31 = vcombine.high %v682_v24, %v686_v26  ;;  %v6925_v36 = vcombine.low %v682_v24, %v686_v26  ;;  %v726_v24 = vld [vmem:[%s6594_s18 + $0x2e8] sm:$0xff] }
  0xd0   : > { %1626 = vmatpush1.bf16.msra.mxu0 %v5632_v32  ;;  %1699 = vmatpush1.bf16.msra.mxu1 %v5634_v33  ;;  %v689_v32 = vld [vmem:[%s6594_s18 + $0x1c0] sm:$0xff] }
  0xd1   : > { %1627 = vmatprep.subr.bf16.mxu0 %v5641_v34  ;;  %1700 = vmatprep.subr.bf16.mxu1 %v5643_v35  ;;  %9274 = vst [vmem:[#allocation33_spill] sm:$0xff] %v6912_v31  ;;  %v693_v33 = vld [vmem:[%s6594_s18 + $0x1e0] sm:$0xff]  ;;  %v694_v34 = vld [vmem:[%s6594_s18 + $0x1e8] sm:$0xff]  ;;  %9276 = vst [vmem:[#allocation35_spill] sm:$0xff] %v6925_v36 }
  0xd2   : > { %v6927_v37 = vcombine.high %v689_v32, %v693_v33  ;;  %v6938_v45 = vcombine.low %v689_v32, %v693_v33 }
  0xd4   : > { %1628 = vmatpush1.bf16.msra.mxu0 %v5640_v41  ;;  %1701 = vmatpush1.bf16.msra.mxu1 %v5642_v42  ;;  %9277 = vst [vmem:[#allocation36_spill] sm:$0xff] %v6927_v37  ;;  %v698_v41 = vld [vmem:[%s6594_s18 + $0x208] sm:$0xff]  ;;  %9279 = vst [vmem:[#allocation38_spill] sm:$0xff] %v6938_v45 }
  0xd5   : > { %2383 = vmatprep.subr.bf16.mxu0 %v6806_v43  ;;  %2424 = vmatprep.subr.bf16.mxu1 %v6808_v44  ;;  %v702_v42 = vld [vmem:[%s6594_s18 + $0x228] sm:$0xff] }
  0xd6   : > { %v6948_v49 = vcombine.high %v698_v41, %v702_v42 }
  0xd7   : > { %1630 = vmatmul.mubr.bf16.vlgmr.msra.gmra.mrb[16].mxu0 %v6701_v15  ;;  %1703 = vmatmul.mubr.bf16.vlgmr.msra.gmra.mrb[16].mxu1 %v6701_v15  ;;  %v661_v15 = vld [vmem:[%s6594_s18 + $0xe0] sm:$0xff] }
  0xd8   : > { %2384 = vmatpush1.bf16.msra.mxu0 %v6814_v50  ;;  %2425 = vmatpush1.bf16.msra.mxu1 %v6817_v58  ;;  %v6855_v4 = vcombine.high %v657_v63, %v661_v15  ;;  %v6866_v10 = vcombine.low %v657_v63, %v661_v15  ;;  %9282 = vst [vmem:[#allocation41_spill] sm:$0xff] %v6948_v49 }
  0xd9   : > { %2385 = vmatprep.subr.bf16.mxu0 %v6819_v51  ;;  %2426 = vmatprep.subr.bf16.mxu1 %v6822_v52  ;;  %v6961_v63 = vcombine.low %v698_v41, %v702_v42  ;;  %v6963_v15 = vcombine.high %v705_v53, %v709_v54  ;;  %v734_v41 = vld [vmem:[%s6594_s18 + $0x328] sm:$0xff] }
  0xda   : > { %1639 = vmatprep.mubr.bf16.mxu0 %v6708_v25  ;;  %1712 = vmatprep.mubr.bf16.mxu1 %v6708_v25  ;;  %9261 = vst [vmem:[#allocation20_spill] sm:$0xff] %v6855_v4  ;;  %v669_v25 = vld [vmem:[%s6594_s18 + $0x120] sm:$0xff]  ;;  %9263 = vst [vmem:[#allocation22_spill] sm:$0xff] %v6866_v10 }
  0xdb   : > { %v6873_v12 = vcombine.high %v665_v6, %v669_v25  ;;  %v6885_v18 = vcombine.low %v665_v6, %v669_v25  ;;  %9284 = vst [vmem:[#allocation43_spill] sm:$0xff] %v6961_v63  ;;  %9285 = vst [vmem:[#allocation44_spill] sm:$0xff] %v6963_v15  ;;  %v717_v6 = vld [vmem:[%s6594_s18 + $0x2a0] sm:$0xff]  ;;  %v714_v25 = vld [vmem:[%s6594_s18 + $0x288] sm:$0xff] }
  0xdc   : > { %2386 = vmatpush1.bf16.msra.mxu0 %v6831_v57  ;;  %2427 = vmatpush1.bf16.msra.mxu1 %v6835_v59  ;;  %v6979_v16 = vcombine.high %v713_v1, %v717_v6  ;;  %v6989_v26 = vcombine.low %v713_v1, %v717_v6  ;;  %v6993_v32 = vcombine.low %v714_v25, %v718_v8  ;;  %v741_v1 = vld [vmem:[%s6594_s18 + $0x360] sm:$0xff]  ;;  %v738_v6 = vld [vmem:[%s6594_s18 + $0x348] sm:$0xff] }
  0xdd   : > { %2387 = vmatprep.subr.bf16.mxu0 %v6837_v60  ;;  %2428 = vmatprep.subr.bf16.mxu1 %v6840_v61  ;;  %9265 = vst [vmem:[#allocation24_spill] sm:$0xff] %v6873_v12  ;;  %9267 = vst [vmem:[#allocation26_spill] sm:$0xff] %v6885_v18 }
  0xde   : > { %9289 = vst [vmem:[#allocation48_spill] sm:$0xff] %v6979_v16  ;;  %9291 = vst [vmem:[#allocation50_spill] sm:$0xff] %v6989_v26 }
  0xdf   : > { %1640 = vmatmul.mubr.bf16.gmra.mrb[20].mxu0 %v6723_v39  ;;  %1713 = vmatmul.mubr.bf16.gmra.mrb[20].mxu1 %v6723_v39  ;;  %v674_v39 = vld [vmem:[%s6594_s18 + $0x148] sm:$0xff]  ;;  %9292 = vst [vmem:[#allocation51_spill] sm:$0xff] %v6993_v32 }
  0xe0   : > { %2388 = vmatpush1.bf16.msra.mxu0 %v6849_v2  ;;  %2429 = vmatpush1.bf16.msra.mxu1 %v6853_v3  ;;  %v6894_v22 = vcombine.high %v674_v39, %v678_v17  ;;  %v6907_v29 = vcombine.low %v674_v39, %v678_v17  ;;  %v6982_v39 = vcombine.high %v714_v25, %v718_v8  ;;  %v721_v17 = vld [vmem:[%s6594_s18 + $0x2c0] sm:$0xff]  ;;  %v742_v25 = vld [vmem:[%s6594_s18 + $0x368] sm:$0xff] }
  0xe1   : > { %2389 = vmatprep.subr.bf16.mxu0 %v6855_v4  ;;  %2430 = vmatprep.subr.bf16.mxu1 %v6858_v5 }
  0xe2   : > { %1649 = vmatprep.mubr.bf16.mxu0 %v6730_v48  ;;  %1722 = vmatprep.mubr.bf16.mxu1 %v6730_v48  ;;  %9270 = vst [vmem:[#allocation29_spill] sm:$0xff] %v6894_v22  ;;  %v685_v48 = vld [vmem:[%s6594_s18 + $0x1a0] sm:$0xff]  ;;  %9272 = vst [vmem:[#allocation31_spill] sm:$0xff] %v6907_v29 }
  0xe3   : > { %v6909_v30 = vcombine.high %v681_v23, %v685_v48  ;;  %v6921_v35 = vcombine.low %v681_v23, %v685_v48  ;;  %9290 = vst [vmem:[#allocation49_spill] sm:$0xff] %v6982_v39  ;;  %v725_v23 = vld [vmem:[%s6594_s18 + $0x2e0] sm:$0xff]  ;;  %v722_v48 = vld [vmem:[%s6594_s18 + $0x2c8] sm:$0xff] }
  0xe4   : > { %2390 = vmatpush1.bf16.msra.mxu0 %v6866_v10  ;;  %2431 = vmatpush1.bf16.msra.mxu1 %v6871_v11  ;;  %v6995_v33 = vcombine.high %v721_v17, %v725_v23  ;;  %v7005_v42 = vcombine.low %v721_v17, %v725_v23  ;;  %v7009_v53 = vcombine.low %v722_v48, %v726_v24 }
  0xe5   : > { %2391 = vmatprep.subr.bf16.mxu0 %v6873_v12  ;;  %2432 = vmatprep.subr.bf16.mxu1 %v6876_v13  ;;  %9273 = vst [vmem:[#allocation32_spill] sm:$0xff] %v6909_v30  ;;  %9275 = vst [vmem:[#allocation34_spill] sm:$0xff] %v6921_v35 }
  0xe6   : > { %9293 = vst [vmem:[#allocation52_spill] sm:$0xff] %v6995_v33  ;;  %9295 = vst [vmem:[#allocation54_spill] sm:$0xff] %v7005_v42 }
  0xe7   : > { %1650 = vmatmul.mubr.bf16.gmra.mrb[24].mxu0 %v6744_v62  ;;  %1723 = vmatmul.mubr.bf16.gmra.mrb[24].mxu1 %v6744_v62  ;;  %v690_v62 = vld [vmem:[%s6594_s18 + $0x1c8] sm:$0xff]  ;;  %9296 = vst [vmem:[#allocation55_spill] sm:$0xff] %v7009_v53 }
  0xe8   : > { %2392 = vmatpush1.bf16.msra.mxu0 %v6885_v18  ;;  %2433 = vmatpush1.bf16.msra.mxu1 %v6889_v19  ;;  %v6930_v38 = vcombine.high %v690_v62, %v694_v34  ;;  %v6943_v46 = vcombine.low %v690_v62, %v694_v34  ;;  %v6998_v62 = vcombine.high %v722_v48, %v726_v24  ;;  %v729_v34 = vld [vmem:[%s6594_s18 + $0x300] sm:$0xff] }
  0xe9   : > { %2393 = vmatprep.subr.bf16.mxu0 %v6891_v20  ;;  %2434 = vmatprep.subr.bf16.mxu1 %v6894_v22  ;;  %v7030_v48 = vcombine.high %v738_v6, %v742_v25  ;;  %v745_v24 = vld [vmem:[%s6594_s18 + $0x380] sm:$0xff] }
  0xea   : > { %1659 = vmatprep.mubr.bf16.mxu0 %v6750_v7  ;;  %1732 = vmatprep.mubr.bf16.mxu1 %v6750_v7  ;;  %9278 = vst [vmem:[#allocation37_spill] sm:$0xff] %v6930_v38  ;;  %v701_v7 = vld [vmem:[%s6594_s18 + $0x220] sm:$0xff]  ;;  %9280 = vst [vmem:[#allocation39_spill] sm:$0xff] %v6943_v46 }
  0xeb   : > { %v6945_v47 = vcombine.high %v697_v40, %v701_v7  ;;  %v6957_v56 = vcombine.low %v697_v40, %v701_v7  ;;  %9294 = vst [vmem:[#allocation53_spill] sm:$0xff] %v6998_v62  ;;  %v733_v40 = vld [vmem:[%s6594_s18 + $0x320] sm:$0xff]  ;;  %v730_v7 = vld [vmem:[%s6594_s18 + $0x308] sm:$0xff]  ;;  %9302 = vst [vmem:[#allocation61_spill] sm:$0xff] %v7030_v48 }
  0xec   : > { %2394 = vmatpush1.bf16.msra.mxu0 %v6902_v27  ;;  %2435 = vmatpush1.bf16.msra.mxu1 %v6907_v29  ;;  %v7011_v54 = vcombine.high %v729_v34, %v733_v40  ;;  %v7021_v8 = vcombine.low %v729_v34, %v733_v40  ;;  %v7025_v17 = vcombine.low %v730_v7, %v734_v41  ;;  %v746_v34 = vld [vmem:[%s6594_s18 + $0x388] sm:$0xff] }
  0xed   : > { %2395 = vmatprep.subr.bf16.mxu0 %v6909_v30  ;;  %2436 = vmatprep.subr.bf16.mxu1 %v6912_v31  ;;  %9281 = vst [vmem:[#allocation40_spill] sm:$0xff] %v6945_v47  ;;  %9283 = vst [vmem:[#allocation42_spill] sm:$0xff] %v6957_v56  ;;  %v750_v40 = vld [vmem:[%s6594_s18 + $0x3a8] sm:$0xff] }
  0xee   : > { %9297 = vst [vmem:[#allocation56_spill] sm:$0xff] %v7011_v54  ;;  %9299 = vst [vmem:[#allocation58_spill] sm:$0xff] %v7021_v8 }
  0xef   : > { %1660 = vmatmul.mubr.bf16.gmra.mrb[28].mxu0 %v6764_v21  ;;  %1733 = vmatmul.mubr.bf16.gmra.mrb[28].mxu1 %v6764_v21  ;;  %v706_v21 = vld [vmem:[%s6594_s18 + $0x248] sm:$0xff]  ;;  %9300 = vst [vmem:[#allocation59_spill] sm:$0xff] %v7025_v17 }
  0xf0   : > { %2396 = vmatpush1.bf16.msra.mxu0 %v6921_v35  ;;  %2437 = vmatpush1.bf16.msra.mxu1 %v6925_v36  ;;  %v6966_v0 = vcombine.high %v706_v21, %v710_v55  ;;  %v6977_v14 = vcombine.low %v706_v21, %v710_v55  ;;  %v7014_v21 = vcombine.high %v730_v7, %v734_v41  ;;  %v737_v55 = vld [vmem:[%s6594_s18 + $0x340] sm:$0xff] }
  0xf1   : > { %2397 = vmatprep.subr.bf16.mxu0 %v6927_v37  ;;  %2438 = vmatprep.subr.bf16.mxu1 %v6930_v38  ;;  %v7027_v23 = vcombine.high %v737_v55, %v741_v1  ;;  %v7041_v7 = vcombine.low %v738_v6, %v742_v25  ;;  %v7057_v6 = vcombine.low %v746_v34, %v750_v40 }
  0xf2   : > { %2415 = vmatprep.mubr.bf16.mxu0 %v8967_v28  ;;  %2456 = vmatprep.mubr.bf16.mxu1 %v8967_v28  ;;  %9286 = vst [vmem:[#allocation45_spill] sm:$0xff] %v6966_v0  ;;  %9288 = vst [vmem:[#allocation47_spill] sm:$0xff] %v6977_v14  ;;  %v749_v28 = vld [vmem:[%s6594_s18 + $0x3a0] sm:$0xff] }
  0xf3   : > { %9298 = vst [vmem:[#allocation57_spill] sm:$0xff] %v7014_v21  ;;  %9301 = vst [vmem:[#allocation60_spill] sm:$0xff] %v7027_v23  ;;  %v7043_v41 = vcombine.high %v745_v24, %v749_v28 }
  0xf4   : > { %2398 = vmatpush1.bf16.msra.mxu0 %v6938_v45  ;;  %2439 = vmatpush1.bf16.msra.mxu1 %v6943_v46  ;;  %9304 = vst [vmem:[#allocation63_spill] sm:$0xff] %v7041_v7  ;;  %9308 = vst [vmem:[#allocation67_spill] sm:$0xff] %v7057_v6 }
  0xf5   : > { %2399 = vmatprep.subr.bf16.mxu0 %v6945_v47  ;;  %2440 = vmatprep.subr.bf16.mxu1 %v6948_v49  ;;  %9305 = vst [vmem:[#allocation64_spill] sm:$0xff] %v7043_v41 }
  0xf8   : > { %2400 = vmatpush1.bf16.msra.mxu0 %v6957_v56  ;;  %2441 = vmatpush1.bf16.msra.mxu1 %v6961_v63 }
  0xf9   : > { %2401 = vmatprep.subr.bf16.mxu0 %v6963_v15  ;;  %2442 = vmatprep.subr.bf16.mxu1 %v6966_v0 }
  0xfc   : > { %2402 = vmatpush1.bf16.msra.mxu0 %v6973_v9  ;;  %2443 = vmatpush1.bf16.msra.mxu1 %v6977_v14 }
  0xfd   : > { %2403 = vmatprep.subr.bf16.mxu0 %v6979_v16  ;;  %2444 = vmatprep.subr.bf16.mxu1 %v6982_v39 }
 0x100   : > { %2404 = vmatpush1.bf16.msra.mxu0 %v6989_v26  ;;  %2445 = vmatpush1.bf16.msra.mxu1 %v6993_v32  ;;  %v760_v32 = vld [vmem:[%s6594_s18 + $0x3f8] sm:$0xff] }
 0x101   : > { %2405 = vmatprep.subr.bf16.mxu0 %v6995_v33  ;;  %2446 = vmatprep.subr.bf16.mxu1 %v6998_v62  ;;  %v9319_v62 = vmov 0   ;;  %v700_v33 = vld [vmem:[%s6594_s18 + $0x218] sm:$0xff] }
 0x104   : > { %2406 = vmatpush1.bf16.msra.mxu0 %v7005_v42  ;;  %2447 = vmatpush1.bf16.msra.mxu1 %v7009_v53  ;;  %v7037_v53 = vcombine.low %v737_v55, %v741_v1  ;;  %v754_v55 = vld [vmem:[%s6594_s18 + $0x3c8] sm:$0xff]  ;;  %v655_v42 = vld [vmem:[%s6594_s18 + $0xb0] sm:$0xff] }
 0x105   : > { %2407 = vmatprep.subr.bf16.mxu0 %v7011_v54  ;;  %2448 = vmatprep.subr.bf16.mxu1 %v7014_v21  ;;  %v7046_v21 = vcombine.high %v746_v34, %v750_v40  ;;  %v753_v54 = vld [vmem:[%s6594_s18 + $0x3c0] sm:$0xff]  ;;  %v758_v1 = vld [vmem:[%s6594_s18 + $0x3e8] sm:$0xff] }
 0x106   : > { %9303 = vst [vmem:[#allocation62_spill] sm:$0xff] %v7037_v53  ;;  %v7073_v34 = vcombine.low %v754_v55, %v758_v1 }
 0x107   : > { %9306 = vst [vmem:[#allocation65_spill] sm:$0xff] %v7046_v21 }
 0x108   : > { %2408 = vmatpush1.bf16.msra.mxu0 %v7021_v8  ;;  %2449 = vmatpush1.bf16.msra.mxu1 %v7025_v17  ;;  %v757_v8 = vld [vmem:[%s6594_s18 + $0x3e0] sm:$0xff]  ;;  %v7053_v17 = vcombine.low %v745_v24, %v749_v28  ;;  %v636_v28 = vld [vmem:[%s6594_s18 + $0x18] sm:$0xff]  ;;  %9312 = vst [vmem:[#allocation71_spill] sm:$0xff] %v7073_v34 }
 0x109   : > { %2409 = vmatprep.subr.bf16.mxu0 %v7027_v23  ;;  %2450 = vmatprep.subr.bf16.mxu1 %v7030_v48  ;;  %v7059_v25 = vcombine.high %v753_v54, %v757_v8  ;;  %v7062_v48 = vcombine.high %v754_v55, %v758_v1  ;;  %v635_v23 = vld [vmem:[%s6594_s18 + $0x10] sm:$0xff]  ;;  %v640_v24 = vld [vmem:[%s6594_s18 + $0x38] sm:$0xff] }
 0x10a   : > { %9307 = vst [vmem:[#allocation66_spill] sm:$0xff] %v7053_v17  ;;  %v7089_v55 = vcombine.low %v636_v28, %v640_v24 }
 0x10b   : > { %9309 = vst [vmem:[#allocation68_spill] sm:$0xff] %v7059_v25  ;;  %9310 = vst [vmem:[#allocation69_spill] sm:$0xff] %v7062_v48 }
 0x10c   : > { %2410 = vmatpush1.bf16.msra.mxu0 %v7037_v53  ;;  %2451 = vmatpush1.bf16.msra.mxu1 %v7041_v7  ;;  %v639_v53 = vld [vmem:[%s6594_s18 + $0x30] sm:$0xff]  ;;  %v7069_v7 = vcombine.low %v753_v54, %v757_v8  ;;  %v644_v54 = vld [vmem:[%s6594_s18 + $0x58] sm:$0xff]  ;;  %9316 = vst [vmem:[#allocation75_spill] sm:$0xff] %v7089_v55 }
 0x10d   : > { %2411 = vmatprep.subr.bf16.mxu0 %v7043_v41  ;;  %2452 = vmatprep.subr.bf16.mxu1 %v7046_v21  ;;  %v7075_v40 = vcombine.high %v635_v23, %v639_v53  ;;  %v7078_v21 = vcombine.high %v636_v28, %v640_v24  ;;  %v643_v41 = vld [vmem:[%s6594_s18 + $0x50] sm:$0xff]  ;;  %v648_v8 = vld [vmem:[%s6594_s18 + $0x78] sm:$0xff] }
 0x10e   : > { %9311 = vst [vmem:[#allocation70_spill] sm:$0xff] %v7069_v7  ;;  %v7107_v24 = vcombine.low %v644_v54, %v648_v8 }
 0x10f   : > { %9313 = vst [vmem:[#allocation72_spill] sm:$0xff] %v7075_v40  ;;  %9314 = vst [vmem:[#allocation73_spill] sm:$0xff] %v7078_v21 }
 0x110   : > { %2412 = vmatpush1.bf16.msra.mxu0 %v7053_v17  ;;  %2453 = vmatpush1.bf16.msra.mxu1 %v7057_v6  ;;  %v647_v17 = vld [vmem:[%s6594_s18 + $0x70] sm:$0xff]  ;;  %v7085_v6 = vcombine.low %v635_v23, %v639_v53  ;;  %v652_v53 = vld [vmem:[%s6594_s18 + $0x98] sm:$0xff]  ;;  %9321 = vst [vmem:[#allocation79_spill] sm:$0xff] %v7107_v24 }
 0x111   : > { %2413 = vmatprep.subr.bf16.mxu0 %v7059_v25  ;;  %2454 = vmatprep.subr.bf16.mxu1 %v7062_v48  ;;  %v7091_v1 = vcombine.high %v643_v41, %v647_v17  ;;  %v7094_v48 = vcombine.high %v644_v54, %v648_v8  ;;  %v651_v25 = vld [vmem:[%s6594_s18 + $0x90] sm:$0xff]  ;;  %v656_v23 = vld [vmem:[%s6594_s18 + $0xb8] sm:$0xff]  ;;  %v7103_v28 = vcombine.low %v643_v41, %v647_v17 }
 0x112   : > { %9315 = vst [vmem:[#allocation74_spill] sm:$0xff] %v7085_v6  ;;  %v660_v17 = vld [vmem:[%s6594_s18 + $0xd8] sm:$0xff]  ;;  %v7121_v54 = vcombine.low %v651_v25, %v655_v42  ;;  %v7125_v8 = vcombine.low %v652_v53, %v656_v23 }
 0x113   : > { %9317 = vst [vmem:[#allocation76_spill] sm:$0xff] %v7091_v1  ;;  %9318 = vst [vmem:[#allocation77_spill] sm:$0xff] %v7094_v48  ;;  %v664_v41 = vld [vmem:[%s6594_s18 + $0xf8] sm:$0xff] }
 0x114   : > { %2414 = vmatpush1.bf16.msra.mxu0 %v7069_v7  ;;  %2455 = vmatpush1.bf16.msra.mxu1 %v7073_v34  ;;  %9320 = vst [vmem:[#allocation78_spill] sm:$0xff] %v7103_v28  ;;  %v659_v34 = vld [vmem:[%s6594_s18 + $0xd0] sm:$0xff]  ;;  %9324 = vst [vmem:[#allocation82_spill] sm:$0xff] %v7121_v54 }
 0x115   : > { %2465 = vmatprep.subr.bf16.mxu0 %v7075_v40  ;;  %2506 = vmatprep.subr.bf16.mxu1 %v7078_v21  ;;  %v7109_v21 = vcombine.high %v651_v25, %v655_v42  ;;  %v7112_v40 = vcombine.high %v652_v53, %v656_v23  ;;  %v663_v7 = vld [vmem:[%s6594_s18 + $0xf0] sm:$0xff]  ;;  %9325 = vst [vmem:[#allocation83_spill] sm:$0xff] %v7125_v8  ;;  %v668_v42 = vld [vmem:[%s6594_s18 + $0x118] sm:$0xff] }
 0x116   : > { %v672_v25 = vld [vmem:[%s6594_s18 + $0x138] sm:$0xff]  ;;  %v7141_v53 = vcombine.low %v660_v17, %v664_v41 }
 0x117   : > { %2416 = vmatmul.mubr.bf16.vlgmr.msra.gmra.mrb[32].mxu0 %v9319_v62  ;;  %2457 = vmatmul.mubr.bf16.vlgmr.msra.gmra.mrb[32].mxu1 %v9319_v62  ;;  %9322 = vst [vmem:[#allocation80_spill] sm:$0xff] %v7109_v21  ;;  %9323 = vst [vmem:[#allocation81_spill] sm:$0xff] %v7112_v40 }
 0x118   : > { %2466 = vmatpush1.bf16.msra.mxu0 %v7085_v6  ;;  %2507 = vmatpush1.bf16.msra.mxu1 %v7089_v55  ;;  %v667_v55 = vld [vmem:[%s6594_s18 + $0x110] sm:$0xff]  ;;  %9329 = vst [vmem:[#allocation87_spill] sm:$0xff] %v7141_v53 }
 0x119   : > { %2467 = vmatprep.subr.bf16.mxu0 %v7091_v1  ;;  %2508 = vmatprep.subr.bf16.mxu1 %v7094_v48  ;;  %v7127_v48 = vcombine.high %v659_v34, %v663_v7  ;;  %v7130_v1 = vcombine.high %v660_v17, %v664_v41  ;;  %v7157_v17 = vcombine.low %v668_v42, %v672_v25  ;;  %v703_v6 = vld [vmem:[%s6594_s18 + $0x230] sm:$0xff] }
 0x11a   : > { %2497 = vmatprep.mubr.bf16.mxu0 %v9319_v62  ;;  %2538 = vmatprep.mubr.bf16.mxu1 %v9319_v62 }
 0x11b   : > { %9326 = vst [vmem:[#allocation84_spill] sm:$0xff] %v7127_v48  ;;  %9327 = vst [vmem:[#allocation85_spill] sm:$0xff] %v7130_v1 }
 0x11c   : > { %2468 = vmatpush1.bf16.msra.mxu0 %v7103_v28  ;;  %2509 = vmatpush1.bf16.msra.mxu1 %v7107_v24  ;;  %v671_v28 = vld [vmem:[%s6594_s18 + $0x130] sm:$0xff]  ;;  %v7137_v24 = vcombine.low %v659_v34, %v663_v7  ;;  %v676_v7 = vld [vmem:[%s6594_s18 + $0x158] sm:$0xff]  ;;  %9333 = vst [vmem:[#allocation91_spill] sm:$0xff] %v7157_v17 }
 0x11d   : > { %2469 = vmatprep.subr.bf16.mxu0 %v7109_v21  ;;  %2510 = vmatprep.subr.bf16.mxu1 %v7112_v40  ;;  %v7143_v23 = vcombine.high %v667_v55, %v671_v28  ;;  %v7146_v40 = vcombine.high %v668_v42, %v672_v25  ;;  %v675_v21 = vld [vmem:[%s6594_s18 + $0x150] sm:$0xff]  ;;  %v680_v34 = vld [vmem:[%s6594_s18 + $0x178] sm:$0xff] }
 0x11e   : > { %9328 = vst [vmem:[#allocation86_spill] sm:$0xff] %v7137_v24  ;;  %v7173_v42 = vcombine.low %v676_v7, %v680_v34 }
 0x11f   : > { %9330 = vst [vmem:[#allocation88_spill] sm:$0xff] %v7143_v23  ;;  %9331 = vst [vmem:[#allocation89_spill] sm:$0xff] %v7146_v40 }
 0x120   : > { %2470 = vmatpush1.bf16.msra.mxu0 %v7121_v54  ;;  %2511 = vmatpush1.bf16.msra.mxu1 %v7125_v8  ;;  %v679_v54 = vld [vmem:[%s6594_s18 + $0x170] sm:$0xff]  ;;  %v7153_v8 = vcombine.low %v667_v55, %v671_v28  ;;  %v684_v55 = vld [vmem:[%s6594_s18 + $0x198] sm:$0xff]  ;;  %9337 = vst [vmem:[#allocation95_spill] sm:$0xff] %v7173_v42 }
 0x121   : > { %2471 = vmatprep.subr.bf16.mxu0 %v7127_v48  ;;  %2512 = vmatprep.subr.bf16.mxu1 %v7130_v1  ;;  %v7159_v41 = vcombine.high %v675_v21, %v679_v54  ;;  %v7162_v1 = vcombine.high %v676_v7, %v680_v34  ;;  %v683_v48 = vld [vmem:[%s6594_s18 + $0x190] sm:$0xff]  ;;  %v688_v28 = vld [vmem:[%s6594_s18 + $0x1b8] sm:$0xff] }
 0x122   : > { %9332 = vst [vmem:[#allocation90_spill] sm:$0xff] %v7153_v8  ;;  %v7189_v7 = vcombine.low %v684_v55, %v688_v28 }
 0x123   : > { %9334 = vst [vmem:[#allocation92_spill] sm:$0xff] %v7159_v41  ;;  %9335 = vst [vmem:[#allocation93_spill] sm:$0xff] %v7162_v1 }
 0x124   : > { %2472 = vmatpush1.bf16.msra.mxu0 %v7137_v24  ;;  %2513 = vmatpush1.bf16.msra.mxu1 %v7141_v53  ;;  %v687_v24 = vld [vmem:[%s6594_s18 + $0x1b0] sm:$0xff]  ;;  %v7169_v53 = vcombine.low %v675_v21, %v679_v54  ;;  %v692_v54 = vld [vmem:[%s6594_s18 + $0x1d8] sm:$0xff]  ;;  %9341 = vst [vmem:[#allocation99_spill] sm:$0xff] %v7189_v7 }
 0x125   : > { %2473 = vmatprep.subr.bf16.mxu0 %v7143_v23  ;;  %2514 = vmatprep.subr.bf16.mxu1 %v7146_v40  ;;  %v7175_v25 = vcombine.high %v683_v48, %v687_v24  ;;  %v7178_v40 = vcombine.high %v684_v55, %v688_v28  ;;  %v691_v23 = vld [vmem:[%s6594_s18 + $0x1d0] sm:$0xff] }
 0x126   : > { %9336 = vst [vmem:[#allocation94_spill] sm:$0xff] %v7169_v53  ;;  %v695_v21 = vld [vmem:[%s6594_s18 + $0x1f0] sm:$0xff] }
 0x127   : > { %9338 = vst [vmem:[#allocation96_spill] sm:$0xff] %v7175_v25  ;;  %9339 = vst [vmem:[#allocation97_spill] sm:$0xff] %v7178_v40  ;;  %v7191_v34 = vcombine.high %v691_v23, %v695_v21 }
 0x128   : > { %2474 = vmatpush1.bf16.msra.mxu0 %v7153_v8  ;;  %2515 = vmatpush1.bf16.msra.mxu1 %v7157_v17  ;;  %v696_v8 = vld [vmem:[%s6594_s18 + $0x1f8] sm:$0xff]  ;;  %v699_v17 = vld [vmem:[%s6594_s18 + $0x210] sm:$0xff] }
 0x129   : > { %2475 = vmatprep.subr.bf16.mxu0 %v7159_v41  ;;  %2516 = vmatprep.subr.bf16.mxu1 %v7162_v1  ;;  %v7185_v41 = vcombine.low %v683_v48, %v687_v24  ;;  %9342 = vst [vmem:[#allocation100_spill] sm:$0xff] %v7191_v34  ;;  %v7194_v1 = vcombine.high %v692_v54, %v696_v8  ;;  %v704_v48 = vld [vmem:[%s6594_s18 + $0x238] sm:$0xff] }
 0x12a   : > { %v7202_v24 = vcombine.low %v691_v23, %v695_v21  ;;  %v7211_v55 = vcombine.low %v692_v54, %v696_v8  ;;  %v7213_v28 = vcombine.high %v699_v17, %v703_v6  ;;  %v7217_v23 = vcombine.high %v700_v33, %v704_v48  ;;  %v707_v21 = vld [vmem:[%s6594_s18 + $0x250] sm:$0xff] }
 0x12b   : > { %9340 = vst [vmem:[#allocation98_spill] sm:$0xff] %v7185_v41  ;;  %9343 = vst [vmem:[#allocation101_spill] sm:$0xff] %v7194_v1  ;;  %v7225_v8 = vcombine.low %v699_v17, %v703_v6  ;;  %v7229_v54 = vcombine.low %v700_v33, %v704_v48  ;;  %v716_v6 = vld [vmem:[%s6594_s18 + $0x298] sm:$0xff] }
 0x12c   : > { %2476 = vmatpush1.bf16.msra.mxu0 %v7169_v53  ;;  %2517 = vmatpush1.bf16.msra.mxu1 %v7173_v42  ;;  %9344 = vst [vmem:[#allocation102_spill] sm:$0xff] %v7202_v24  ;;  %9345 = vst [vmem:[#allocation103_spill] sm:$0xff] %v7211_v55  ;;  %v715_v42 = vld [vmem:[%s6594_s18 + $0x290] sm:$0xff]  ;;  %v720_v17 = vld [vmem:[%s6594_s18 + $0x2b8] sm:$0xff] }
 0x12d   : > { %2477 = vmatprep.subr.bf16.mxu0 %v7175_v25  ;;  %2518 = vmatprep.subr.bf16.mxu1 %v7178_v40  ;;  %9346 = vst [vmem:[#allocation104_spill] sm:$0xff] %v7213_v28  ;;  %v762_v40 = vld [vmem:[%s7207_s22] sm:$0xff]  ;;  %9347 = vst [vmem:[#allocation105_spill] sm:$0xff] %v7217_v23  ;;  %v708_v25 = vld [vmem:[%s6594_s18 + $0x258] sm:$0xff] }
 0x12e   : > { %2605 = vperm.xlu0 %6010, %v762_v40   ;;  %9348 = vst [vmem:[#allocation106_spill] sm:$0xff] %v7225_v8  ;;  %9349 = vst [vmem:[#allocation107_spill] sm:$0xff] %v7229_v54  ;;  %v719_v53 = vld [vmem:[%s6594_s18 + $0x2b0] sm:$0xff] }
 0x130   : > { %2478 = vmatpush1.bf16.msra.mxu0 %v7185_v41  ;;  %2519 = vmatpush1.bf16.msra.mxu1 %v7189_v7  ;;  %v711_v41 = vld [vmem:[%s6594_s18 + $0x270] sm:$0xff]  ;;  %v712_v7 = vld [vmem:[%s6594_s18 + $0x278] sm:$0xff] }
 0x131   : > { %2479 = vmatprep.subr.bf16.mxu0 %v7191_v34  ;;  %2520 = vmatprep.subr.bf16.mxu1 %v7194_v1  ;;  %v763_v34 = vld [vmem:[%s7207_s22 + $0x8] sm:$0xff]  ;;  %v7231_v1 = vcombine.high %v707_v21, %v711_v41  ;;  %v7234_v40 = vcombine.high %v708_v25, %v712_v7  ;;  %v7242_v33 = vcombine.low %v707_v21, %v711_v41  ;;  %v724_v41 = vld [vmem:[%s6594_s18 + $0x2d8] sm:$0xff] }
 0x132   : > { %2842 = vperm.xlu0 %6010, %v763_v34   ;;  %v7246_v48 = vcombine.low %v708_v25, %v712_v7  ;;  %v7251_v34 = vcombine.high %v716_v6, %v720_v17  ;;  %v728_v21 = vld [vmem:[%s6594_s18 + $0x2f8] sm:$0xff]  ;;  %v7259_v25 = vcombine.low %v715_v42, %v719_v53  ;;  %v7263_v7 = vcombine.low %v716_v6, %v720_v17 }
 0x133   : > { %9350 = vst [vmem:[#allocation108_spill] sm:$0xff] %v7231_v1  ;;  %9351 = vst [vmem:[#allocation109_spill] sm:$0xff] %v7234_v40  ;;  %v7279_v6 = vcombine.low %v724_v41, %v728_v21 }
 0x134   : > { %2480 = vmatpush1.bf16.msra.mxu0 %v7202_v24  ;;  %2521 = vmatpush1.bf16.msra.mxu1 %v7211_v55  ;;  %v766_v55 = vld [vmem:[%s7207_s22 + $0x20] sm:$0xff]  ;;  %9352 = vst [vmem:[#allocation110_spill] sm:$0xff] %v7242_v33  ;;  %9353 = vst [vmem:[#allocation111_spill] sm:$0xff] %v7246_v48  ;;  %v727_v24 = vld [vmem:[%s6594_s18 + $0x2f0] sm:$0xff] }
 0x135   : > { %2481 = vmatprep.subr.bf16.mxu0 %v7213_v28  ;;  %2522 = vmatprep.subr.bf16.mxu1 %v7217_v23  ;;  %v7248_v23 = vcombine.high %v715_v42, %v719_v53  ;;  %9355 = vst [vmem:[#allocation113_spill] sm:$0xff] %v7251_v34  ;;  %v723_v28 = vld [vmem:[%s6594_s18 + $0x2d0] sm:$0xff]  ;;  %9356 = vst [vmem:[#allocation114_spill] sm:$0xff] %v7259_v25  ;;  %v732_v53 = vld [vmem:[%s6594_s18 + $0x318] sm:$0xff] }
 0x136   : > { %3559 = vperm.xlu0 %6010, %v766_v55   ;;  %9357 = vst [vmem:[#allocation115_spill] sm:$0xff] %v7263_v7  ;;  %v7268_v55 = vcombine.high %v724_v41, %v728_v21  ;;  %v736_v42 = vld [vmem:[%s6594_s18 + $0x338] sm:$0xff]  ;;  %9361 = vst [vmem:[#allocation119_spill] sm:$0xff] %v7279_v6 }
 0x137   : > { %9354 = vst [vmem:[#allocation112_spill] sm:$0xff] %v7248_v23  ;;  %v7295_v41 = vcombine.low %v732_v53, %v736_v42 }
 0x138   : > { %2482 = vmatpush1.bf16.msra.mxu0 %v7225_v8  ;;  %2523 = vmatpush1.bf16.msra.mxu1 %v7229_v54  ;;  %v768_v54 = vld [vmem:[%s7207_s22 + $0x30] sm:$0xff]  ;;  %9359 = vst [vmem:[#allocation117_spill] sm:$0xff] %v7268_v55  ;;  %v756_v8 = vld [vmem:[%s6594_s18 + $0x3d8] sm:$0xff] }
 0x139   : > { %2483 = vmatprep.subr.bf16.mxu0 %v7231_v1  ;;  %2524 = vmatprep.subr.bf16.mxu1 %v7234_v40  ;;  %v7265_v40 = vcombine.high %v723_v28, %v727_v24  ;;  %v731_v1 = vld [vmem:[%s6594_s18 + $0x310] sm:$0xff]  ;;  %9365 = vst [vmem:[#allocation123_spill] sm:$0xff] %v7295_v41 }
 0x13a   : > { %4037 = vperm.xlu0 %6010, %v768_v54   ;;  %v7284_v54 = vcombine.high %v732_v53, %v736_v42 }
 0x13b   : > { %9358 = vst [vmem:[#allocation116_spill] sm:$0xff] %v7265_v40 }
 0x13c   : > { %2484 = vmatpush1.bf16.msra.mxu0 %v7242_v33  ;;  %2525 = vmatpush1.bf16.msra.mxu1 %v7246_v48  ;;  %v735_v33 = vld [vmem:[%s6594_s18 + $0x330] sm:$0xff]  ;;  %9363 = vst [vmem:[#allocation121_spill] sm:$0xff] %v7284_v54 }
 0x13d   : > { %2485 = vmatprep.subr.bf16.mxu0 %v7248_v23  ;;  %2526 = vmatprep.subr.bf16.mxu1 %v7251_v34  ;;  %v7275_v23 = vcombine.low %v723_v28, %v727_v24  ;;  %v7281_v17 = vcombine.high %v731_v1, %v735_v33  ;;  %v739_v34 = vld [vmem:[%s6594_s18 + $0x350] sm:$0xff]  ;;  %v740_v24 = vld [vmem:[%s6594_s18 + $0x358] sm:$0xff] }
 0x13e   : > { %v744_v28 = vld [vmem:[%s6594_s18 + $0x378] sm:$0xff]  ;;  %v759_v48 = vld [vmem:[%s6594_s18 + $0x3f0] sm:$0xff] }
 0x13f   : > { %9360 = vst [vmem:[#allocation118_spill] sm:$0xff] %v7275_v23  ;;  %9362 = vst [vmem:[#allocation120_spill] sm:$0xff] %v7281_v17  ;;  %v7311_v53 = vcombine.low %v740_v24, %v744_v28 }
 0x140   : > { %2486 = vmatpush1.bf16.msra.mxu0 %v7259_v25  ;;  %2527 = vmatpush1.bf16.msra.mxu1 %v7263_v7  ;;  %v743_v25 = vld [vmem:[%s6594_s18 + $0x370] sm:$0xff]  ;;  %v7291_v7 = vcombine.low %v731_v1, %v735_v33  ;;  %v748_v1 = vld [vmem:[%s6594_s18 + $0x398] sm:$0xff] }
 0x141   : > { %2487 = vmatprep.subr.bf16.mxu0 %v7265_v40  ;;  %2528 = vmatprep.subr.bf16.mxu1 %v7268_v55  ;;  %v7297_v21 = vcombine.high %v739_v34, %v743_v25  ;;  %v7300_v55 = vcombine.high %v740_v24, %v744_v28  ;;  %v747_v40 = vld [vmem:[%s6594_s18 + $0x390] sm:$0xff]  ;;  %v752_v33 = vld [vmem:[%s6594_s18 + $0x3b8] sm:$0xff]  ;;  %9369 = vst [vmem:[#allocation127_spill] sm:$0xff] %v7311_v53 }
 0x142   : > { %9364 = vst [vmem:[#allocation122_spill] sm:$0xff] %v7291_v7  ;;  %v7332_v28 = vcombine.high %v756_v8, %v760_v32 }
 0x143   : > { %9366 = vst [vmem:[#allocation124_spill] sm:$0xff] %v7297_v21  ;;  %9367 = vst [vmem:[#allocation125_spill] sm:$0xff] %v7300_v55 }
 0x144   : > { %2488 = vmatpush1.bf16.msra.mxu0 %v7275_v23  ;;  %2529 = vmatpush1.bf16.msra.mxu1 %v7279_v6  ;;  %v751_v23 = vld [vmem:[%s6594_s18 + $0x3b0] sm:$0xff]  ;;  %v7307_v6 = vcombine.low %v739_v34, %v743_v25  ;;  %v7327_v25 = vcombine.low %v748_v1, %v752_v33  ;;  %9375 = vst [vmem:[#allocation133_spill] sm:$0xff] %v7332_v28 }
 0x145   : > { %2489 = vmatprep.subr.bf16.mxu0 %v7281_v17  ;;  %2530 = vmatprep.subr.bf16.mxu1 %v7284_v54  ;;  %v7313_v42 = vcombine.high %v747_v40, %v751_v23  ;;  %v7316_v54 = vcombine.high %v748_v1, %v752_v33  ;;  %v755_v17 = vld [vmem:[%s6594_s18 + $0x3d0] sm:$0xff]  ;;  %v7323_v34 = vcombine.low %v747_v40, %v751_v23  ;;  %v7372_v40 = vld [vmem:[%s470_s15] sm:$0xff] }
 0x146   : > { %9368 = vst [vmem:[#allocation126_spill] sm:$0xff] %v7307_v6  ;;  %9373 = vst [vmem:[#allocation131_spill] sm:$0xff] %v7327_v25  ;;  %v7329_v24 = vcombine.high %v755_v17, %v759_v48  ;;  %v7339_v23 = vcombine.low %v756_v8, %v760_v32  ;;  %v771_v32 = vlaneseq }
 0x147   : > { %9370 = vst [vmem:[#allocation128_spill] sm:$0xff] %v7313_v42  ;;  %9371 = vst [vmem:[#allocation129_spill] sm:$0xff] %v7316_v54 }
 0x148   : > { %2490 = vmatpush1.bf16.msra.mxu0 %v7291_v7  ;;  %2531 = vmatpush1.bf16.msra.mxu1 %v7295_v41  ;;  %9372 = vst [vmem:[#allocation130_spill] sm:$0xff] %v7323_v34  ;;  %9374 = vst [vmem:[#allocation132_spill] sm:$0xff] %v7329_v24 }
 0x149   : > { %2491 = vmatprep.subr.bf16.mxu0 %v7297_v21  ;;  %2532 = vmatprep.subr.bf16.mxu1 %v7300_v55  ;;  %v7335_v55 = vcombine.low %v755_v17, %v759_v48  ;;  %9377 = vst [vmem:[#allocation135_spill] sm:$0xff] %v7339_v23 }
 0x14b   : > { %9376 = vst [vmem:[#allocation134_spill] sm:$0xff] %v7335_v55 }
 0x14c   : > { %2492 = vmatpush1.bf16.msra.mxu0 %v7307_v6  ;;  %2533 = vmatpush1.bf16.msra.mxu1 %v7311_v53 }
 0x14d   : > { %2493 = vmatprep.subr.bf16.mxu0 %v7313_v42  ;;  %2534 = vmatprep.subr.bf16.mxu1 %v7316_v54 }
 0x150   : > { %2494 = vmatpush1.bf16.msra.mxu0 %v7323_v34  ;;  %2535 = vmatpush1.bf16.msra.mxu1 %v7327_v25 }
 0x151   : > { %2495 = vmatprep.subr.bf16.mxu0 %v7329_v24  ;;  %2536 = vmatprep.subr.bf16.mxu1 %v7332_v28 }
 0x154   : > { %2496 = vmatpush1.bf16.msra.mxu0 %v7335_v55  ;;  %2537 = vmatpush1.bf16.msra.mxu1 %v7339_v23 }
 0x155   : > { %2618 = vmatprep.subr.bf16.mxu0 %v6806_v43  ;;  %2659 = vmatprep.subr.bf16.mxu1 %v6808_v44 }
 0x157   : > { %2498 = vmatmul.mubr.bf16.vlgmr.msra.gmra.mrb[36].mxu0 %v9319_v62  ;;  %2539 = vmatmul.mubr.bf16.vlgmr.msra.gmra.mrb[36].mxu1 %v9319_v62  ;;  %v7358_v62 = vshrl.u32 %v771_v32, 7 }
 0x158   : > { %2619 = vmatpush1.bf16.msra.mxu0 %v6814_v50  ;;  %2660 = vmatpush1.bf16.msra.mxu1 %v6817_v58 }
 0x159   : > { %2620 = vmatprep.subr.bf16.mxu0 %v6819_v51  ;;  %2661 = vmatprep.subr.bf16.mxu1 %v6822_v52  ;;  %9378 = vst [vmem:[#allocation136_spill] sm:$0xff] %v7358_v62  ;;  %v9117_v8 = vsub.s32 0, %v7358_v62  ;;  %v9124_v48 = vsub.s32 2, %v7358_v62 }
 0x15b   : > { %v7381_v1 = vrot.slane %v7372_v40, %v9117_v8  ;;  %v9379_v8 = vsub.s32 1, %v7358_v62 }
 0x15c   : > { %2621 = vmatpush1.bf16.msra.mxu0 %v6831_v57  ;;  %2662 = vmatpush1.bf16.msra.mxu1 %v6835_v59 }
 0x15d   : > { %2622 = vmatprep.subr.bf16.mxu0 %v6837_v60  ;;  %2663 = vmatprep.subr.bf16.mxu1 %v6840_v61  ;;  %v7401_v33 = vrot.slane %v7372_v40, %v9379_v8 }
 0x160   : > { %2623 = vmatpush1.bf16.msra.mxu0 %v6849_v2  ;;  %2664 = vmatpush1.bf16.msra.mxu1 %v6853_v3 }
 0x161   : > { %2624 = vmatprep.subr.bf16.mxu0 %v6855_v4  ;;  %2665 = vmatprep.subr.bf16.mxu1 %v6858_v5 }
 0x164   : > { %2625 = vmatpush1.bf16.msra.mxu0 %v6866_v10  ;;  %2666 = vmatpush1.bf16.msra.mxu1 %v6871_v11 }
 0x165   : > { %2626 = vmatprep.subr.bf16.mxu0 %v6873_v12  ;;  %2667 = vmatprep.subr.bf16.mxu1 %v6876_v13  ;;  %v7391_v13 = vrot.slane %v7372_v40, %v9124_v48  ;;  %v9380_v12 = vsub.s32 3, %v7358_v62 }
 0x167   : > { %v7409_v48 = vrot.slane %v7372_v40, %v9380_v12 }
 0x168   : > { %2627 = vmatpush1.bf16.msra.mxu0 %v6885_v18  ;;  %2668 = vmatpush1.bf16.msra.mxu1 %v6889_v19 }
 0x169   : > { %2628 = vmatprep.subr.bf16.mxu0 %v6891_v20  ;;  %2669 = vmatprep.subr.bf16.mxu1 %v6894_v22 }
 0x16a   : > { %v7386_v32 = vpop.f32.mrb[0].mxu0  ;;  %v7394_v17 = vpop.f32.mrb[0].mxu1 }
 0x16b   : > { %v7396_v18 = vpop.f32.mrb[1].mxu0  ;;  %v7403_v19 = vpop.f32.mrb[1].mxu1 }
 0x16c   : > { %v1489_v20 = vpop.f32.mrb[2].mxu0  ;;  %2629 = vmatpush1.bf16.msra.mxu0 %v6902_v27  ;;  %v1562_v11 = vpop.f32.mrb[2].mxu1  ;;  %2670 = vmatpush1.bf16.msra.mxu1 %v6907_v29 }
 0x16d   : > { %v7412_v22 = vadd.f32 %v1489_v20, %v7381_v1  ;;  %v1491_v10 = vpop.f32.mrb[3].mxu0  ;;  %2630 = vmatprep.subr.bf16.mxu0 %v6909_v30  ;;  %v7417_v8 = vadd.f32 %v1562_v11, %v7391_v13  ;;  %v1564_v27 = vpop.f32.mrb[3].mxu1  ;;  %2671 = vmatprep.subr.bf16.mxu1 %v6912_v31 }
 0x16e   : > { %v7420_v5 = vadd.f32 %v1491_v10, %v7401_v33  ;;  %v7424_v12 = vadd.f32 %v1564_v27, %v7409_v48 }
 0x16f   : > { %9381 = vst [vmem:[#allocation137_spill] sm:$0xff] %v7412_v22  ;;  %9382 = vst [vmem:[#allocation138_spill] sm:$0xff] %v7417_v8 }
 0x170   : > { %9383 = vst [vmem:[#allocation139_spill] sm:$0xff] %v7420_v5  ;;  %9384 = vst [vmem:[#allocation140_spill] sm:$0xff] %v7424_v12  ;;  %2631 = vmatpush1.bf16.msra.mxu0 %v6921_v35  ;;  %2672 = vmatpush1.bf16.msra.mxu1 %v6925_v36 }
 0x171   : > { %2632 = vmatprep.subr.bf16.mxu0 %v6927_v37  ;;  %2673 = vmatprep.subr.bf16.mxu1 %v6930_v38 }
 0x172   : > { %v1495_v20 = vpop.f32.mrb[4].mxu0  ;;  %v1568_v10 = vpop.f32.mrb[4].mxu1 }
 0x173   : > { %v7431_v11 = vadd.f32 %v1495_v20, %v7381_v1  ;;  %v1497_v5 = vpop.f32.mrb[5].mxu0  ;;  %v7434_v8 = vadd.f32 %v1568_v10, %v7391_v13  ;;  %v1570_v12 = vpop.f32.mrb[5].mxu1 }
 0x174   : > { %v7437_v27 = vadd.f32 %v1497_v5, %v7401_v33  ;;  %v1499_v22 = vpop.f32.mrb[6].mxu0  ;;  %2633 = vmatpush1.bf16.msra.mxu0 %v6938_v45  ;;  %v7441_v37 = vadd.f32 %v1570_v12, %v7409_v48  ;;  %v1572_v20 = vpop.f32.mrb[6].mxu1  ;;  %2674 = vmatpush1.bf16.msra.mxu1 %v6943_v46 }
 0x175   : > { %9385 = vst [vmem:[#allocation141_spill] sm:$0xff] %v7431_v11  ;;  %9386 = vst [vmem:[#allocation142_spill] sm:$0xff] %v7434_v8  ;;  %v7444_v38 = vadd.f32 %v1499_v22, %v7381_v1  ;;  %v1501_v11 = vpop.f32.mrb[7].mxu0  ;;  %2634 = vmatprep.subr.bf16.mxu0 %v6945_v47  ;;  %v7449_v10 = vadd.f32 %v1572_v20, %v7391_v13  ;;  %2675 = vmatprep.subr.bf16.mxu1 %v6948_v49 }
 0x176   : > { %9387 = vst [vmem:[#allocation143_spill] sm:$0xff] %v7437_v27  ;;  %9388 = vst [vmem:[#allocation144_spill] sm:$0xff] %v7441_v37  ;;  %v7452_v5 = vadd.f32 %v1501_v11, %v7401_v33  ;;  %v1574_v27 = vpop.f32.mrb[7].mxu1 }
 0x177   : > { %9389 = vst [vmem:[#allocation145_spill] sm:$0xff] %v7444_v38  ;;  %9390 = vst [vmem:[#allocation146_spill] sm:$0xff] %v7449_v10  ;;  %v7456_v12 = vadd.f32 %v1574_v27, %v7409_v48 }
 0x178   : > { %9391 = vst [vmem:[#allocation147_spill] sm:$0xff] %v7452_v5  ;;  %2635 = vmatpush1.bf16.msra.mxu0 %v6957_v56  ;;  %2676 = vmatpush1.bf16.msra.mxu1 %v6961_v63 }
 0x179   : > { %9392 = vst [vmem:[#allocation148_spill] sm:$0xff] %v7456_v12  ;;  %2636 = vmatprep.subr.bf16.mxu0 %v6963_v15  ;;  %2677 = vmatprep.subr.bf16.mxu1 %v6966_v0 }
 0x17a   : > { %v1505_v22 = vpop.f32.mrb[8].mxu0  ;;  %v1578_v11 = vpop.f32.mrb[8].mxu1 }
 0x17b   : > { %v7463_v20 = vadd.f32 %v1505_v22, %v7381_v1  ;;  %v1507_v5 = vpop.f32.mrb[9].mxu0  ;;  %v7466_v10 = vadd.f32 %v1578_v11, %v7391_v13  ;;  %v1580_v12 = vpop.f32.mrb[9].mxu1 }
 0x17c   : > { %v7469_v27 = vadd.f32 %v1507_v5, %v7401_v33  ;;  %v1509_v38 = vpop.f32.mrb[10].mxu0  ;;  %2637 = vmatpush1.bf16.msra.mxu0 %v6973_v9  ;;  %v7473_v37 = vadd.f32 %v1580_v12, %v7409_v48  ;;  %v1582_v22 = vpop.f32.mrb[10].mxu1  ;;  %2678 = vmatpush1.bf16.msra.mxu1 %v6977_v14 }
 0x17d   : > { %9393 = vst [vmem:[#allocation149_spill] sm:$0xff] %v7463_v20  ;;  %9394 = vst [vmem:[#allocation150_spill] sm:$0xff] %v7466_v10  ;;  %v7476_v8 = vadd.f32 %v1509_v38, %v7381_v1  ;;  %v1511_v20 = vpop.f32.mrb[11].mxu0  ;;  %2638 = vmatprep.subr.bf16.mxu0 %v6979_v16  ;;  %v7481_v11 = vadd.f32 %v1582_v22, %v7391_v13  ;;  %2679 = vmatprep.subr.bf16.mxu1 %v6982_v39  ;;  %v9401_v38 = vld [vmem:[#allocation51_spill] sm:$0xff]  ;;  %v9403_v10 = vld [vmem:[#allocation53_spill] sm:$0xff] }
 0x17e   : > { %9395 = vst [vmem:[#allocation151_spill] sm:$0xff] %v7469_v27  ;;  %9396 = vst [vmem:[#allocation152_spill] sm:$0xff] %v7473_v37  ;;  %v7484_v5 = vadd.f32 %v1511_v20, %v7401_v33  ;;  %v1584_v27 = vpop.f32.mrb[11].mxu1  ;;  %v9407_v39 = vld [vmem:[#allocation54_spill] sm:$0xff]  ;;  %v9411_v16 = vld [vmem:[#allocation56_spill] sm:$0xff] }
 0x17f   : > { %9397 = vst [vmem:[#allocation153_spill] sm:$0xff] %v7476_v8  ;;  %9398 = vst [vmem:[#allocation154_spill] sm:$0xff] %v7481_v11  ;;  %v7488_v12 = vadd.f32 %v1584_v27, %v7409_v48  ;;  %v9402_v8 = vld [vmem:[#allocation52_spill] sm:$0xff] }
 0x180   : > { %9399 = vst [vmem:[#allocation155_spill] sm:$0xff] %v7484_v5  ;;  %2639 = vmatpush1.bf16.msra.mxu0 %v6989_v26  ;;  %2680 = vmatpush1.bf16.msra.mxu1 %v9401_v38  ;;  %v9410_v38 = vld [vmem:[#allocation55_spill] sm:$0xff] }
 0x181   : > { %9400 = vst [vmem:[#allocation156_spill] sm:$0xff] %v7488_v12  ;;  %2640 = vmatprep.subr.bf16.mxu0 %v9402_v8  ;;  %2681 = vmatprep.subr.bf16.mxu1 %v9403_v10 }
 0x182   : > { %v1515_v37 = vpop.f32.mrb[12].mxu0  ;;  %v1588_v20 = vpop.f32.mrb[12].mxu1 }
 0x183   : > { %v7495_v22 = vadd.f32 %v1515_v37, %v7381_v1  ;;  %v1517_v5 = vpop.f32.mrb[13].mxu0  ;;  %v7498_v11 = vadd.f32 %v1588_v20, %v7391_v13  ;;  %v1590_v12 = vpop.f32.mrb[13].mxu1 }
 0x184   : > { %v7501_v27 = vadd.f32 %v1517_v5, %v7401_v33  ;;  %v1519_v26 = vpop.f32.mrb[14].mxu0  ;;  %2641 = vmatpush1.bf16.msra.mxu0 %v9407_v39  ;;  %v7505_v8 = vadd.f32 %v1590_v12, %v7409_v48  ;;  %v1592_v37 = vpop.f32.mrb[14].mxu1  ;;  %2682 = vmatpush1.bf16.msra.mxu1 %v9410_v38  ;;  %v9419_v38 = vld [vmem:[#allocation61_spill] sm:$0xff] }
 0x185   : > { %9404 = vst [vmem:[#allocation157_spill] sm:$0xff] %v7495_v22  ;;  %9405 = vst [vmem:[#allocation158_spill] sm:$0xff] %v7498_v11  ;;  %v7508_v10 = vadd.f32 %v1519_v26, %v7381_v1  ;;  %v1521_v22 = vpop.f32.mrb[15].mxu0  ;;  %2642 = vmatprep.subr.bf16.mxu0 %v9411_v16  ;;  %v7513_v20 = vadd.f32 %v1592_v37, %v7391_v13  ;;  %v9414_v11 = vld [vmem:[#allocation57_spill] sm:$0xff]  ;;  %v9416_v26 = vld [vmem:[#allocation58_spill] sm:$0xff] }
 0x186   : > { %9406 = vst [vmem:[#allocation159_spill] sm:$0xff] %v7501_v27  ;;  %9408 = vst [vmem:[#allocation160_spill] sm:$0xff] %v7505_v8  ;;  %v7516_v5 = vadd.f32 %v1521_v22, %v7401_v33  ;;  %v1594_v27 = vpop.f32.mrb[15].mxu1  ;;  %2683 = vmatprep.subr.bf16.mxu1 %v9414_v11  ;;  %v9418_v8 = vld [vmem:[#allocation60_spill] sm:$0xff]  ;;  %v9420_v16 = vld [vmem:[#allocation62_spill] sm:$0xff] }
 0x187   : > { %9409 = vst [vmem:[#allocation161_spill] sm:$0xff] %v7508_v10  ;;  %9412 = vst [vmem:[#allocation162_spill] sm:$0xff] %v7513_v20  ;;  %v7520_v12 = vadd.f32 %v1594_v27, %v7409_v48  ;;  %v9417_v10 = vld [vmem:[#allocation59_spill] sm:$0xff]  ;;  %v9422_v22 = vld [vmem:[#allocation64_spill] sm:$0xff] }
 0x188   : > { %9413 = vst [vmem:[#allocation163_spill] sm:$0xff] %v7516_v5  ;;  %2643 = vmatpush1.bf16.msra.mxu0 %v9416_v26  ;;  %2684 = vmatpush1.bf16.msra.mxu1 %v9417_v10  ;;  %v9421_v37 = vld [vmem:[#allocation63_spill] sm:$0xff]  ;;  %v9423_v5 = vld [vmem:[#allocation65_spill] sm:$0xff]  ;;  %v9424_v20 = vld [vmem:[#allocation66_spill] sm:$0xff] }
 0x189   : > { %9415 = vst [vmem:[#allocation164_spill] sm:$0xff] %v7520_v12  ;;  %2644 = vmatprep.subr.bf16.mxu0 %v9418_v8  ;;  %2685 = vmatprep.subr.bf16.mxu1 %v9419_v38  ;;  %v9425_v27 = vld [vmem:[#allocation67_spill] sm:$0xff]  ;;  %v9426_v12 = vld [vmem:[#allocation68_spill] sm:$0xff]  ;;  %v9427_v26 = vld [vmem:[#allocation69_spill] sm:$0xff] }
 0x18a   : > { %v9428_v10 = vld [vmem:[#allocation70_spill] sm:$0xff]  ;;  %v9429_v8 = vld [vmem:[#allocation71_spill] sm:$0xff]  ;;  %v9430_v38 = vld [vmem:[#allocation72_spill] sm:$0xff] }
 0x18c   : > { %2645 = vmatpush1.bf16.msra.mxu0 %v9420_v16  ;;  %2686 = vmatpush1.bf16.msra.mxu1 %v9421_v37  ;;  %v9431_v16 = vld [vmem:[#allocation73_spill] sm:$0xff] }
 0x18d   : > { %2646 = vmatprep.subr.bf16.mxu0 %v9422_v22  ;;  %2687 = vmatprep.subr.bf16.mxu1 %v9423_v5  ;;  %v9145_v22 = vsub.s32 4, %v7358_v62  ;;  %v9146_v5 = vsub.s32 6, %v7358_v62 }
 0x190   : > { %2647 = vmatpush1.bf16.msra.mxu0 %v9424_v20  ;;  %2688 = vmatpush1.bf16.msra.mxu1 %v9425_v27  ;;  %v9153_v20 = vsub.s32 5, %v7358_v62 }
 0x191   : > { %2648 = vmatprep.subr.bf16.mxu0 %v9426_v12  ;;  %2689 = vmatprep.subr.bf16.mxu1 %v9427_v26  ;;  %v7544_v12 = vrot.slane %v7372_v40, %v9145_v22  ;;  %v9160_v26 = vsub.s32 7, %v7358_v62 }
 0x192   : > { %v7561_v27 = vrot.slane %v7372_v40, %v9153_v20 }
 0x193   : > { %v7568_v11 = vrot.slane %v7372_v40, %v9160_v26 }
 0x194   : > { %2649 = vmatpush1.bf16.msra.mxu0 %v9428_v10  ;;  %2690 = vmatpush1.bf16.msra.mxu1 %v9429_v8 }
 0x195   : > { %2700 = vmatprep.subr.bf16.mxu0 %v9430_v38  ;;  %2741 = vmatprep.subr.bf16.mxu1 %v9431_v16  ;;  %v7552_v38 = vrot.slane %v7372_v40, %v9146_v5 }
 0x1aa   : > { %v7547_v10 = vpop.f32.mrb[16].mxu0  ;;  %v7554_v16 = vpop.f32.mrb[16].mxu1 }
 0x1ab   : > { %v7556_v8 = vpop.f32.mrb[17].mxu0  ;;  %v7563_v22 = vpop.f32.mrb[17].mxu1 }
 0x1ac   : > { %v1635_v37 = vpop.f32.mrb[18].mxu0  ;;  %v1708_v39 = vpop.f32.mrb[18].mxu1 }
 0x1ad   : > { %v7571_v5 = vadd.f32 %v1635_v37, %v7544_v12  ;;  %v1637_v14 = vpop.f32.mrb[19].mxu0  ;;  %v7574_v9 = vadd.f32 %v1708_v39, %v7552_v38  ;;  %v1710_v20 = vpop.f32.mrb[19].mxu1 }
 0x1ae   : > { %v7577_v0 = vadd.f32 %v1637_v14, %v7561_v27  ;;  %v7580_v15 = vadd.f32 %v1710_v20, %v7568_v11 }
 0x1af   : > { %9432 = vst [vmem:[#allocation165_spill] sm:$0xff] %v7571_v5  ;;  %9433 = vst [vmem:[#allocation166_spill] sm:$0xff] %v7574_v9 }
 0x1b0   : > { %9434 = vst [vmem:[#allocation167_spill] sm:$0xff] %v7577_v0  ;;  %9435 = vst [vmem:[#allocation168_spill] sm:$0xff] %v7580_v15 }
 0x1b2   : > { %v1641_v63 = vpop.f32.mrb[20].mxu0  ;;  %v1714_v40 = vpop.f32.mrb[20].mxu1 }
 0x1b3   : > { %v7583_v62 = vadd.f32 %v1641_v63, %v7544_v12  ;;  %v1643_v26 = vpop.f32.mrb[21].mxu0  ;;  %v7586_v37 = vadd.f32 %v1714_v40, %v7552_v38  ;;  %v1716_v39 = vpop.f32.mrb[21].mxu1 }
 0x1b4   : > { %v7589_v5 = vadd.f32 %v1643_v26, %v7561_v27  ;;  %v1645_v9 = vpop.f32.mrb[22].mxu0  ;;  %v7592_v14 = vadd.f32 %v1716_v39, %v7568_v11  ;;  %v1718_v15 = vpop.f32.mrb[22].mxu1 }
 0x1b5   : > { %9436 = vst [vmem:[#allocation169_spill] sm:$0xff] %v7583_v62  ;;  %9437 = vst [vmem:[#allocation170_spill] sm:$0xff] %v7586_v37  ;;  %v7595_v20 = vadd.f32 %v1645_v9, %v7544_v12  ;;  %v1647_v0 = vpop.f32.mrb[23].mxu0  ;;  %v7598_v63 = vadd.f32 %v1718_v15, %v7552_v38  ;;  %v1720_v40 = vpop.f32.mrb[23].mxu1 }
 0x1b6   : > { %9438 = vst [vmem:[#allocation171_spill] sm:$0xff] %v7589_v5  ;;  %9439 = vst [vmem:[#allocation172_spill] sm:$0xff] %v7592_v14  ;;  %v7601_v62 = vadd.f32 %v1647_v0, %v7561_v27  ;;  %v7604_v26 = vadd.f32 %v1720_v40, %v7568_v11 }
 0x1b7   : > { %9440 = vst [vmem:[#allocation173_spill] sm:$0xff] %v7595_v20  ;;  %9441 = vst [vmem:[#allocation174_spill] sm:$0xff] %v7598_v63 }
 0x1b8   : > { %9442 = vst [vmem:[#allocation175_spill] sm:$0xff] %v7601_v62  ;;  %9443 = vst [vmem:[#allocation176_spill] sm:$0xff] %v7604_v26 }
 0x1ba   : > { %v1651_v5 = vpop.f32.mrb[24].mxu0  ;;  %v1724_v39 = vpop.f32.mrb[24].mxu1 }
 0x1bb   : > { %v7607_v37 = vadd.f32 %v1651_v5, %v7544_v12  ;;  %v1653_v14 = vpop.f32.mrb[25].mxu0  ;;  %v7610_v9 = vadd.f32 %v1724_v39, %v7552_v38  ;;  %v1726_v15 = vpop.f32.mrb[25].mxu1 }
 0x1bc   : > { %v7613_v20 = vadd.f32 %v1653_v14, %v7561_v27  ;;  %v1655_v63 = vpop.f32.mrb[26].mxu0  ;;  %v7616_v0 = vadd.f32 %v1726_v15, %v7568_v11  ;;  %v1728_v26 = vpop.f32.mrb[26].mxu1 }
 0x1bd   : > { %9444 = vst [vmem:[#allocation177_spill] sm:$0xff] %v7607_v37  ;;  %9445 = vst [vmem:[#allocation178_spill] sm:$0xff] %v7610_v9  ;;  %v7619_v40 = vadd.f32 %v1655_v63, %v7544_v12  ;;  %v1657_v62 = vpop.f32.mrb[27].mxu0  ;;  %v7622_v5 = vadd.f32 %v1728_v26, %v7552_v38  ;;  %v1730_v39 = vpop.f32.mrb[27].mxu1 }
 0x1be   : > { %9446 = vst [vmem:[#allocation179_spill] sm:$0xff] %v7613_v20  ;;  %9447 = vst [vmem:[#allocation180_spill] sm:$0xff] %v7616_v0  ;;  %v7625_v37 = vadd.f32 %v1657_v62, %v7561_v27  ;;  %v7628_v14 = vadd.f32 %v1730_v39, %v7568_v11 }
 0x1bf   : > { %9448 = vst [vmem:[#allocation181_spill] sm:$0xff] %v7619_v40  ;;  %9449 = vst [vmem:[#allocation182_spill] sm:$0xff] %v7622_v5 }
 0x1c0   : > { %9450 = vst [vmem:[#allocation183_spill] sm:$0xff] %v7625_v37  ;;  %9451 = vst [vmem:[#allocation184_spill] sm:$0xff] %v7628_v14 }
 0x1c2   : > { %v1661_v20 = vpop.f32.mrb[28].mxu0  ;;  %v1734_v15 = vpop.f32.mrb[28].mxu1 }
 0x1c3   : > { %v7631_v9 = vadd.f32 %v1661_v20, %v7544_v12  ;;  %v1663_v0 = vpop.f32.mrb[29].mxu0  ;;  %v7634_v63 = vadd.f32 %v1734_v15, %v7552_v38  ;;  %v1736_v26 = vpop.f32.mrb[29].mxu1 }
 0x1c4   : > { %v7637_v40 = vadd.f32 %v1663_v0, %v7561_v27  ;;  %v1665_v5 = vpop.f32.mrb[30].mxu0  ;;  %v7640_v62 = vadd.f32 %v1736_v26, %v7568_v11  ;;  %v1738_v14 = vpop.f32.mrb[30].mxu1  ;;  %v1559_v26 = vadd.f32 %v7394_v17, %v7391_v13 }
 0x1c5   : > { %9452 = vst [vmem:[#allocation185_spill] sm:$0xff] %v7631_v9  ;;  %9453 = vst [vmem:[#allocation186_spill] sm:$0xff] %v7634_v63  ;;  %v7643_v39 = vadd.f32 %v1665_v5, %v7544_v12  ;;  %v1667_v37 = vpop.f32.mrb[31].mxu0  ;;  %v7646_v20 = vadd.f32 %v1738_v14, %v7552_v38  ;;  %v1740_v15 = vpop.f32.mrb[31].mxu1  ;;  %v1488_v5 = vadd.f32 %v7396_v18, %v7401_v33 }
 0x1c6   : > { %9454 = vst [vmem:[#allocation187_spill] sm:$0xff] %v7637_v40  ;;  %9455 = vst [vmem:[#allocation188_spill] sm:$0xff] %v7640_v62  ;;  %v7649_v9 = vadd.f32 %v1667_v37, %v7561_v27  ;;  %v7652_v0 = vadd.f32 %v1740_v15, %v7568_v11  ;;  %v1486_v40 = vadd.f32 %v7386_v32, %v7381_v1 }
 0x1c7   : > { %9456 = vst [vmem:[#allocation189_spill] sm:$0xff] %v7643_v39  ;;  %9457 = vst [vmem:[#allocation190_spill] sm:$0xff] %v7646_v20  ;;  %v1561_v14 = vadd.f32 %v7403_v19, %v7409_v48 }
 0x1c8   : > { %9458 = vst [vmem:[#allocation191_spill] sm:$0xff] %v7649_v9  ;;  %9459 = vst [vmem:[#allocation192_spill] sm:$0xff] %v7652_v0 }
 0x1ea   : > { %v2417_v39 = vpop.f32.mrb[32].mxu0  ;;  %v2458_v37 = vpop.f32.mrb[32].mxu1 }
 0x1eb   : > { %v2547_v20 = vadd.f32 %v2417_v39, %v1486_v40  ;;  %v2419_v9 = vpop.f32.mrb[33].mxu0  ;;  %v2549_v62 = vadd.f32 %v2458_v37, %v1559_v26  ;;  %v2460_v15 = vpop.f32.mrb[33].mxu1 }
 0x1ec   : > { %v2548_v63 = vadd.f32 %v2419_v9, %v1488_v5  ;;  %v2421_v0 = vpop.f32.mrb[34].mxu0  ;;  %v2550_v56 = vadd.f32 %v2460_v15, %v1561_v14  ;;  %v2462_v49 = vpop.f32.mrb[34].mxu1 }
 0x1ed   : > { %v2422_v1 = vpop.f32.mrb[35].mxu0  ;;  %v2463_v32 = vpop.f32.mrb[35].mxu1  ;;  %v5772_v47 = vmul.f32 -1.442695, %v2547_v20  ;;  %v5774_v13 = vmul.f32 -1.442695, %v2549_v62  ;;  %v1632_v49 = vadd.f32 %v7547_v10, %v7544_v12 }
 0x1ee   : > { %v5773_v17 = vmul.f32 -1.442695, %v2548_v63  ;;  %v5775_v46 = vmul.f32 -1.442695, %v2550_v56  ;;  %v1705_v63 = vadd.f32 %v7554_v16, %v7552_v38  ;;  %v1707_v56 = vadd.f32 %v7563_v22, %v7568_v11 }
 0x1ef   : > { %6012 = vpow2.f32 %v5772_v47  ;;  %v1634_v47 = vadd.f32 %v7556_v8, %v7561_v27 }
 0x1f0   : > { %6014 = vpow2.f32 %v5774_v13 }
 0x1f1   : > { %6016 = vpow2.f32 %v5773_v17 }
 0x1f2   : > { %6018 = vpow2.f32 %v5775_v46 }
 0x1f9   : > { %v6013_v18 = vpop.eup %6012 }
 0x1fa   : > { %v6015_v19 = vpop.eup %6014  ;;  %v2561_v40 = vadd.f32 1.0, %v6013_v18 }
 0x1fb   : > { %v6017_v48 = vpop.eup %6016  ;;  %v2573_v9 = vadd.f32 1.0, %v6015_v19 }
 0x1fc   : > { %v6019_v33 = vpop.eup %6018  ;;  %v2562_v39 = vadd.f32 1.0, %v6017_v48  ;;  %6020 = vrcp.f32 %v2561_v40 }
 0x1fd   : > { %v2574_v0 = vadd.f32 1.0, %v6019_v33  ;;  %6022 = vrcp.f32 %v2573_v9 }
 0x1fe   : > { %6024 = vrcp.f32 %v2562_v39 }
 0x1ff   : > { %6026 = vrcp.f32 %v2574_v0 }
 0x206   : > { %v6021_v11 = vpop.eup %6020 }
 0x207   : > { %v6023_v22 = vpop.eup %6022 }
 0x208   : > { %v6025_v1 = vpop.eup %6024  ;;  %v2593_v18 = vmul.f32 0.0, %v6023_v22  ;;  %v9466_v22 = vld [vmem:[#allocation80_spill] sm:$0xff] }
 0x209   : > { %v6027_v32 = vpop.eup %6026 }
 0x20a   : > { %v2594_v48 = vmul.f32 0.0, %v6027_v32  ;;  %v9468_v32 = vld [vmem:[#allocation82_spill] sm:$0xff] }
 0x22a   : > { %v2499_v46 = vpop.f32.mrb[36].mxu0  ;;  %v2540_v20 = vpop.f32.mrb[36].mxu1 }
 0x22b   : > { %v2551_v62 = vadd.f32 %v2499_v46, %v1632_v49  ;;  %v2501_v26 = vpop.f32.mrb[37].mxu0  ;;  %v2553_v5 = vadd.f32 %v2540_v20, %v1705_v63  ;;  %v2542_v10 = vpop.f32.mrb[37].mxu1 }
 0x22c   : > { %v2552_v14 = vadd.f32 %v2501_v26, %v1634_v47  ;;  %v2503_v12 = vpop.f32.mrb[38].mxu0  ;;  %v2554_v37 = vadd.f32 %v2542_v10, %v1707_v56  ;;  %v2544_v16 = vpop.f32.mrb[38].mxu1 }
 0x22d   : > { %6028 = vtanh.f32 %v2551_v62  ;;  %v2504_v38 = vpop.f32.mrb[39].mxu0  ;;  %v5776_v15 = vmul.f32 -1.442695, %v2553_v5  ;;  %v2545_v8 = vpop.f32.mrb[39].mxu1  ;;  %v9460_v16 = vld [vmem:[#allocation74_spill] sm:$0xff] }
 0x22e   : > { %6030 = vtanh.f32 %v2552_v14  ;;  %v5777_v27 = vmul.f32 -1.442695, %v2554_v37  ;;  %v7676_v26 = vpop.permute.xlu0 %2605  ;;  %v9461_v38 = vld [vmem:[#allocation75_spill] sm:$0xff]  ;;  %v9463_v8 = vld [vmem:[#allocation77_spill] sm:$0xff] }
 0x22f   : > { %6032 = vpow2.f32 %v5776_v15  ;;  %v9462_v15 = vld [vmem:[#allocation76_spill] sm:$0xff] }
 0x230   : > { %6034 = vpow2.f32 %v5777_v27  ;;  %v9464_v27 = vld [vmem:[#allocation78_spill] sm:$0xff] }
 0x237   : > { %v6029_v13 = vpop.eup %6028 }
 0x238   : > { %v6031_v17 = vpop.eup %6030  ;;  %v2595_v19 = vmul.f32 %v6029_v13, %v6021_v11  ;;  %v9465_v11 = vld [vmem:[#allocation79_spill] sm:$0xff] }
 0x239   : > { %v2596_v33 = vmul.f32 %v6031_v17, %v6025_v1  ;;  %v6033_v40 = vpop.eup %6032  ;;  %v9467_v1 = vld [vmem:[#allocation81_spill] sm:$0xff]  ;;  %v9469_v13 = vld [vmem:[#allocation83_spill] sm:$0xff]  ;;  %v9470_v17 = vld [vmem:[#allocation84_spill] sm:$0xff] }
 0x23a   : > { %v7670_v9 = vadd.f32 %v2595_v19, %v2593_v18  ;;  %v6035_v39 = vpop.eup %6034  ;;  %v2587_v0 = vadd.f32 1.0, %v6033_v40  ;;  %v9471_v18 = vld [vmem:[#allocation85_spill] sm:$0xff]  ;;  %v9472_v19 = vld [vmem:[#allocation86_spill] sm:$0xff] }
 0x23b   : > { %v7672_v49 = vadd.f32 %v2596_v33, %v2594_v48  ;;  %v2588_v63 = vadd.f32 1.0, %v6035_v39  ;;  %v9473_v48 = vld [vmem:[#allocation87_spill] sm:$0xff]  ;;  %v9474_v33 = vld [vmem:[#allocation88_spill] sm:$0xff]  ;;  %v9475_v40 = vld [vmem:[#allocation89_spill] sm:$0xff] }
 0x23c   : > { %6036 = vtanh.f32 %v7670_v9  ;;  %v9476_v39 = vld [vmem:[#allocation90_spill] sm:$0xff] }
 0x23d   : > { %6038 = vrcp.f32 %v2587_v0  ;;  %v9477_v0 = vld [vmem:[#allocation91_spill] sm:$0xff] }
 0x23e   : > { %6040 = vrcp.f32 %v2588_v63  ;;  %v9478_v63 = vld [vmem:[#allocation92_spill] sm:$0xff] }
 0x23f   : > { %6042 = vtanh.f32 %v7672_v49 }
 0x246   : > { %v6037_v47 = vpop.eup %6036 }
 0x247   : > { %v6039_v46 = vpop.eup %6038 }
 0x248   : > { %v6041_v56 = vpop.eup %6040  ;;  %v2601_v62 = vmul.f32 %v6039_v46, %v6037_v47  ;;  %v9479_v47 = vld [vmem:[#allocation93_spill] sm:$0xff]  ;;  %v9480_v46 = vld [vmem:[#allocation94_spill] sm:$0xff] }
 0x249   : > { %v6043_v20 = vpop.eup %6042 }
 0x24a   : > { %v2602_v5 = vmul.f32 %v6043_v20, %v6041_v56  ;;  %v7679_v14 = vmul.f32 %v7676_v26, %v2601_v62  ;;  %v9481_v56 = vld [vmem:[#allocation95_spill] sm:$0xff]  ;;  %v9482_v62 = vld [vmem:[#allocation96_spill] sm:$0xff]  ;;  %v9483_v20 = vld [vmem:[#allocation97_spill] sm:$0xff] }
 0x24c   : > { %v7682_v10 = vmul.f32 %v7676_v26, %v2602_v5  ;;  %v7688_v37 = vpack.c.bf16 %v7679_v14, %v7679_v14  ;;  %v9484_v5 = vld [vmem:[#allocation98_spill] sm:$0xff] }
 0x24e   : > { %v2617_v12 = vpack.c.bf16 %v7682_v10, %v7682_v10 }
 0x250   : > { %2650 = vmatprep.mubr.bf16.mxu0 %v2617_v12  ;;  %2691 = vmatprep.mubr.bf16.mxu1 %v2617_v12 }
 0x251   : > { %2651 = vmatmul.mubr.bf16.vlgmr.msra.gmra.mrb[40].mxu0 %v7688_v37  ;;  %2692 = vmatmul.mubr.bf16.vlgmr.msra.gmra.mrb[40].mxu1 %v7688_v37 }
 0x252   : > { %2701 = vmatpush1.bf16.msra.mxu0 %v9460_v16  ;;  %2742 = vmatpush1.bf16.msra.mxu1 %v9461_v38 }
 0x253   : > { %2732 = vmatprep.mubr.bf16.mxu0 %v2617_v12  ;;  %2773 = vmatprep.mubr.bf16.mxu1 %v2617_v12  ;;  %v9485_v12 = vld [vmem:[#allocation99_spill] sm:$0xff] }
 0x254   : > { %2702 = vmatprep.subr.bf16.mxu0 %v9462_v15  ;;  %2743 = vmatprep.subr.bf16.mxu1 %v9463_v8 }
 0x256   : > { %2703 = vmatpush1.bf16.msra.mxu0 %v9464_v27  ;;  %2744 = vmatpush1.bf16.msra.mxu1 %v9465_v11 }
 0x257   : > { %2704 = vmatprep.subr.bf16.mxu0 %v9466_v22  ;;  %2745 = vmatprep.subr.bf16.mxu1 %v9467_v1 }
 0x25a   : > { %2705 = vmatpush1.bf16.msra.mxu0 %v9468_v32  ;;  %2746 = vmatpush1.bf16.msra.mxu1 %v9469_v13 }
 0x25b   : > { %2706 = vmatprep.subr.bf16.mxu0 %v9470_v17  ;;  %2747 = vmatprep.subr.bf16.mxu1 %v9471_v18 }
 0x25e   : > { %2707 = vmatpush1.bf16.msra.mxu0 %v9472_v19  ;;  %2748 = vmatpush1.bf16.msra.mxu1 %v9473_v48 }
 0x25f   : > { %2708 = vmatprep.subr.bf16.mxu0 %v9474_v33  ;;  %2749 = vmatprep.subr.bf16.mxu1 %v9475_v40  ;;  %v9486_v40 = vld [vmem:[#allocation100_spill] sm:$0xff] }
 0x262   : > { %2709 = vmatpush1.bf16.msra.mxu0 %v9476_v39  ;;  %2750 = vmatpush1.bf16.msra.mxu1 %v9477_v0  ;;  %v9487_v39 = vld [vmem:[#allocation101_spill] sm:$0xff]  ;;  %v9488_v0 = vld [vmem:[#allocation102_spill] sm:$0xff] }
 0x263   : > { %2710 = vmatprep.subr.bf16.mxu0 %v9478_v63  ;;  %2751 = vmatprep.subr.bf16.mxu1 %v9479_v47  ;;  %v9489_v63 = vld [vmem:[#allocation103_spill] sm:$0xff]  ;;  %v9490_v47 = vld [vmem:[#allocation104_spill] sm:$0xff] }
 0x266   : > { %2711 = vmatpush1.bf16.msra.mxu0 %v9480_v46  ;;  %2752 = vmatpush1.bf16.msra.mxu1 %v9481_v56  ;;  %v9491_v46 = vld [vmem:[#allocation105_spill] sm:$0xff]  ;;  %v9492_v56 = vld [vmem:[#allocation106_spill] sm:$0xff] }
 0x267   : > { %2712 = vmatprep.subr.bf16.mxu0 %v9482_v62  ;;  %2753 = vmatprep.subr.bf16.mxu1 %v9483_v20  ;;  %v9493_v62 = vld [vmem:[#allocation107_spill] sm:$0xff]  ;;  %v9494_v20 = vld [vmem:[#allocation108_spill] sm:$0xff] }
 0x26a   : > { %2713 = vmatpush1.bf16.msra.mxu0 %v9484_v5  ;;  %2754 = vmatpush1.bf16.msra.mxu1 %v9485_v12  ;;  %v9495_v5 = vld [vmem:[#allocation109_spill] sm:$0xff]  ;;  %v9496_v12 = vld [vmem:[#allocation110_spill] sm:$0xff] }
 0x26b   : > { %2714 = vmatprep.subr.bf16.mxu0 %v9486_v40  ;;  %2755 = vmatprep.subr.bf16.mxu1 %v9487_v39  ;;  %v9497_v40 = vld [vmem:[#allocation111_spill] sm:$0xff]  ;;  %v9498_v39 = vld [vmem:[#allocation112_spill] sm:$0xff] }
 0x26e   : > { %2715 = vmatpush1.bf16.msra.mxu0 %v9488_v0  ;;  %2756 = vmatpush1.bf16.msra.mxu1 %v9489_v63  ;;  %v9499_v0 = vld [vmem:[#allocation113_spill] sm:$0xff]  ;;  %v9500_v63 = vld [vmem:[#allocation114_spill] sm:$0xff] }
 0x26f   : > { %2716 = vmatprep.subr.bf16.mxu0 %v9490_v47  ;;  %2757 = vmatprep.subr.bf16.mxu1 %v9491_v46  ;;  %v9501_v47 = vld [vmem:[#allocation115_spill] sm:$0xff]  ;;  %v9502_v46 = vld [vmem:[#allocation116_spill] sm:$0xff] }
 0x272   : > { %2717 = vmatpush1.bf16.msra.mxu0 %v9492_v56  ;;  %2758 = vmatpush1.bf16.msra.mxu1 %v9493_v62  ;;  %v9503_v56 = vld [vmem:[#allocation117_spill] sm:$0xff]  ;;  %v9504_v62 = vld [vmem:[#allocation118_spill] sm:$0xff] }
 0x273   : > { %2718 = vmatprep.subr.bf16.mxu0 %v9494_v20  ;;  %2759 = vmatprep.subr.bf16.mxu1 %v9495_v5  ;;  %v9505_v20 = vld [vmem:[#allocation119_spill] sm:$0xff]  ;;  %v9506_v5 = vld [vmem:[#allocation120_spill] sm:$0xff] }
 0x276   : > { %2719 = vmatpush1.bf16.msra.mxu0 %v9496_v12  ;;  %2760 = vmatpush1.bf16.msra.mxu1 %v9497_v40  ;;  %v9507_v12 = vld [vmem:[#allocation121_spill] sm:$0xff] }
 0x277   : > { %2720 = vmatprep.subr.bf16.mxu0 %v9498_v39  ;;  %2761 = vmatprep.subr.bf16.mxu1 %v9499_v0 }
 0x27a   : > { %2721 = vmatpush1.bf16.msra.mxu0 %v9500_v63  ;;  %2762 = vmatpush1.bf16.msra.mxu1 %v9501_v47  ;;  %v9508_v63 = vld [vmem:[#allocation125_spill] sm:$0xff] }
 0x27b   : > { %2722 = vmatprep.subr.bf16.mxu0 %v9502_v46  ;;  %2763 = vmatprep.subr.bf16.mxu1 %v9503_v56 }
 0x27e   : > { %2723 = vmatpush1.bf16.msra.mxu0 %v9504_v62  ;;  %2764 = vmatpush1.bf16.msra.mxu1 %v9505_v20 }
 0x27f   : > { %2724 = vmatprep.subr.bf16.mxu0 %v9506_v5  ;;  %2765 = vmatprep.subr.bf16.mxu1 %v9507_v12 }
 0x282   : > { %2725 = vmatpush1.bf16.msra.mxu0 %v7291_v7  ;;  %2766 = vmatpush1.bf16.msra.mxu1 %v7295_v41 }
 0x283   : > { %2726 = vmatprep.subr.bf16.mxu0 %v7297_v21  ;;  %2767 = vmatprep.subr.bf16.mxu1 %v9508_v63 }
 0x286   : > { %2727 = vmatpush1.bf16.msra.mxu0 %v7307_v6  ;;  %2768 = vmatpush1.bf16.msra.mxu1 %v7311_v53 }
 0x287   : > { %2728 = vmatprep.subr.bf16.mxu0 %v7313_v42  ;;  %2769 = vmatprep.subr.bf16.mxu1 %v7316_v54 }
 0x28a   : > { %2729 = vmatpush1.bf16.msra.mxu0 %v7323_v34  ;;  %2770 = vmatpush1.bf16.msra.mxu1 %v7327_v25 }
 0x28b   : > { %2730 = vmatprep.subr.bf16.mxu0 %v7329_v24  ;;  %2771 = vmatprep.subr.bf16.mxu1 %v7332_v28 }
 0x28e   : > { %2731 = vmatpush1.bf16.msra.mxu0 %v7335_v55  ;;  %2772 = vmatpush1.bf16.msra.mxu1 %v7339_v23 }
 0x28f   : > { %2857 = vmatprep.subr.bf16.mxu0 %v6806_v43  ;;  %2898 = vmatprep.subr.bf16.mxu1 %v6808_v44 }
 0x291   : > { %2733 = vmatmul.mubr.bf16.vlgmr.msra.gmra.mrb[44].mxu0 %v7688_v37  ;;  %2774 = vmatmul.mubr.bf16.vlgmr.msra.gmra.mrb[44].mxu1 %v7688_v37  ;;  %v9509_v37 = vld [vmem:[#allocation21_spill] sm:$0xff] }
 0x292   : > { %2858 = vmatpush1.bf16.msra.mxu0 %v6814_v50  ;;  %2899 = vmatpush1.bf16.msra.mxu1 %v6817_v58  ;;  %v9510_v58 = vld [vmem:[#allocation22_spill] sm:$0xff] }
 0x293   : > { %2859 = vmatprep.subr.bf16.mxu0 %v6819_v51  ;;  %2900 = vmatprep.subr.bf16.mxu1 %v6822_v52  ;;  %v9511_v51 = vld [vmem:[#allocation23_spill] sm:$0xff]  ;;  %v9512_v52 = vld [vmem:[#allocation24_spill] sm:$0xff] }
 0x296   : > { %2860 = vmatpush1.bf16.msra.mxu0 %v6831_v57  ;;  %2901 = vmatpush1.bf16.msra.mxu1 %v6835_v59  ;;  %v9513_v57 = vld [vmem:[#allocation25_spill] sm:$0xff]  ;;  %v9514_v59 = vld [vmem:[#allocation26_spill] sm:$0xff] }
 0x297   : > { %2861 = vmatprep.subr.bf16.mxu0 %v6837_v60  ;;  %2902 = vmatprep.subr.bf16.mxu1 %v6840_v61  ;;  %v9515_v60 = vld [vmem:[#allocation27_spill] sm:$0xff]  ;;  %v9516_v61 = vld [vmem:[#allocation28_spill] sm:$0xff] }
 0x29a   : > { %2862 = vmatpush1.bf16.msra.mxu0 %v6849_v2  ;;  %2903 = vmatpush1.bf16.msra.mxu1 %v6853_v3  ;;  %v9517_v2 = vld [vmem:[#allocation29_spill] sm:$0xff]  ;;  %v9518_v3 = vld [vmem:[#allocation30_spill] sm:$0xff] }
 0x29b   : > { %2863 = vmatprep.subr.bf16.mxu0 %v6855_v4  ;;  %2904 = vmatprep.subr.bf16.mxu1 %v9509_v37  ;;  %v9559_v37 = vld [vmem:[#allocation140_spill] sm:$0xff] }
 0x29e   : > { %2864 = vmatpush1.bf16.msra.mxu0 %v9510_v58  ;;  %2905 = vmatpush1.bf16.msra.mxu1 %v9511_v51  ;;  %v9558_v58 = vld [vmem:[#allocation139_spill] sm:$0xff] }
 0x29f   : > { %2865 = vmatprep.subr.bf16.mxu0 %v9512_v52  ;;  %2906 = vmatprep.subr.bf16.mxu1 %v9513_v57  ;;  %v9519_v57 = vld [vmem:[#allocation36_spill] sm:$0xff]  ;;  %v9557_v52 = vld [vmem:[#allocation138_spill] sm:$0xff] }
 0x2a2   : > { %2866 = vmatpush1.bf16.msra.mxu0 %v9514_v59  ;;  %2907 = vmatpush1.bf16.msra.mxu1 %v9515_v60  ;;  %v9520_v59 = vld [vmem:[#allocation37_spill] sm:$0xff] }
 0x2a3   : > { %2867 = vmatprep.subr.bf16.mxu0 %v9516_v61  ;;  %2908 = vmatprep.subr.bf16.mxu1 %v9517_v2  ;;  %v9521_v61 = vld [vmem:[#allocation39_spill] sm:$0xff]  ;;  %v9522_v2 = vld [vmem:[#allocation40_spill] sm:$0xff]  ;;  %v9556_v60 = vld [vmem:[#allocation137_spill] sm:$0xff] }
 0x2a6   : > { %2868 = vmatpush1.bf16.msra.mxu0 %v9518_v3  ;;  %2909 = vmatpush1.bf16.msra.mxu1 %v6907_v29  ;;  %v9523_v3 = vld [vmem:[#allocation41_spill] sm:$0xff]  ;;  %v9524_v29 = vld [vmem:[#allocation42_spill] sm:$0xff] }
 0x2a7   : > { %2869 = vmatprep.subr.bf16.mxu0 %v6909_v30  ;;  %2910 = vmatprep.subr.bf16.mxu1 %v6912_v31  ;;  %v9525_v30 = vld [vmem:[#allocation43_spill] sm:$0xff]  ;;  %v9526_v31 = vld [vmem:[#allocation44_spill] sm:$0xff] }
 0x2aa   : > { %2870 = vmatpush1.bf16.msra.mxu0 %v6921_v35  ;;  %2911 = vmatpush1.bf16.msra.mxu1 %v6925_v36  ;;  %v9527_v35 = vld [vmem:[#allocation45_spill] sm:$0xff]  ;;  %v9528_v36 = vld [vmem:[#allocation46_spill] sm:$0xff] }
 0x2ab   : > { %2871 = vmatprep.subr.bf16.mxu0 %v9519_v57  ;;  %2912 = vmatprep.subr.bf16.mxu1 %v9520_v59  ;;  %v9529_v57 = vld [vmem:[#allocation47_spill] sm:$0xff]  ;;  %v9530_v59 = vld [vmem:[#allocation48_spill] sm:$0xff] }
 0x2ae   : > { %2872 = vmatpush1.bf16.msra.mxu0 %v6938_v45  ;;  %2913 = vmatpush1.bf16.msra.mxu1 %v9521_v61  ;;  %v9531_v45 = vld [vmem:[#allocation49_spill] sm:$0xff]  ;;  %v9532_v61 = vld [vmem:[#allocation50_spill] sm:$0xff] }
 0x2af   : > { %2873 = vmatprep.subr.bf16.mxu0 %v9522_v2  ;;  %2914 = vmatprep.subr.bf16.mxu1 %v9523_v3  ;;  %v9533_v2 = vld [vmem:[#allocation51_spill] sm:$0xff]  ;;  %v9534_v3 = vld [vmem:[#allocation52_spill] sm:$0xff] }
 0x2b2   : > { %2874 = vmatpush1.bf16.msra.mxu0 %v9524_v29  ;;  %2915 = vmatpush1.bf16.msra.mxu1 %v9525_v30  ;;  %v9535_v29 = vld [vmem:[#allocation53_spill] sm:$0xff]  ;;  %v9536_v30 = vld [vmem:[#allocation54_spill] sm:$0xff] }
 0x2b3   : > { %2875 = vmatprep.subr.bf16.mxu0 %v9526_v31  ;;  %2916 = vmatprep.subr.bf16.mxu1 %v9527_v35  ;;  %v9537_v31 = vld [vmem:[#allocation55_spill] sm:$0xff]  ;;  %v9538_v35 = vld [vmem:[#allocation56_spill] sm:$0xff] }
 0x2b6   : > { %2876 = vmatpush1.bf16.msra.mxu0 %v9528_v36  ;;  %2917 = vmatpush1.bf16.msra.mxu1 %v9529_v57  ;;  %v9539_v36 = vld [vmem:[#allocation57_spill] sm:$0xff]  ;;  %v9540_v57 = vld [vmem:[#allocation58_spill] sm:$0xff] }
 0x2b7   : > { %2877 = vmatprep.subr.bf16.mxu0 %v9530_v59  ;;  %2918 = vmatprep.subr.bf16.mxu1 %v9531_v45  ;;  %v9541_v59 = vld [vmem:[#allocation59_spill] sm:$0xff]  ;;  %v9542_v45 = vld [vmem:[#allocation60_spill] sm:$0xff] }
 0x2ba   : > { %2878 = vmatpush1.bf16.msra.mxu0 %v9532_v61  ;;  %2919 = vmatpush1.bf16.msra.mxu1 %v9533_v2  ;;  %v9543_v61 = vld [vmem:[#allocation61_spill] sm:$0xff]  ;;  %v9544_v2 = vld [vmem:[#allocation62_spill] sm:$0xff] }
 0x2bb   : > { %2879 = vmatprep.subr.bf16.mxu0 %v9534_v3  ;;  %2920 = vmatprep.subr.bf16.mxu1 %v9535_v29  ;;  %v9545_v3 = vld [vmem:[#allocation63_spill] sm:$0xff]  ;;  %v9546_v29 = vld [vmem:[#allocation64_spill] sm:$0xff] }
 0x2be   : > { %2880 = vmatpush1.bf16.msra.mxu0 %v9536_v30  ;;  %2921 = vmatpush1.bf16.msra.mxu1 %v9537_v31  ;;  %v9547_v30 = vld [vmem:[#allocation65_spill] sm:$0xff]  ;;  %v9548_v31 = vld [vmem:[#allocation66_spill] sm:$0xff] }
 0x2bf   : > { %2881 = vmatprep.subr.bf16.mxu0 %v9538_v35  ;;  %2922 = vmatprep.subr.bf16.mxu1 %v9539_v36  ;;  %v9549_v35 = vld [vmem:[#allocation67_spill] sm:$0xff]  ;;  %v9550_v36 = vld [vmem:[#allocation68_spill] sm:$0xff] }
 0x2c2   : > { %2882 = vmatpush1.bf16.msra.mxu0 %v9540_v57  ;;  %2923 = vmatpush1.bf16.msra.mxu1 %v9541_v59  ;;  %v9551_v57 = vld [vmem:[#allocation69_spill] sm:$0xff]  ;;  %v9552_v59 = vld [vmem:[#allocation70_spill] sm:$0xff] }
 0x2c3   : > { %2883 = vmatprep.subr.bf16.mxu0 %v9542_v45  ;;  %2924 = vmatprep.subr.bf16.mxu1 %v9543_v61  ;;  %v9553_v45 = vld [vmem:[#allocation71_spill] sm:$0xff]  ;;  %v9554_v61 = vld [vmem:[#allocation72_spill] sm:$0xff] }
 0x2c6   : > { %2884 = vmatpush1.bf16.msra.mxu0 %v9544_v2  ;;  %2925 = vmatpush1.bf16.msra.mxu1 %v9545_v3  ;;  %v9555_v2 = vld [vmem:[#allocation73_spill] sm:$0xff] }
 0x2c7   : > { %2885 = vmatprep.subr.bf16.mxu0 %v9546_v29  ;;  %2926 = vmatprep.subr.bf16.mxu1 %v9547_v30 }
 0x2ca   : > { %2886 = vmatpush1.bf16.msra.mxu0 %v9548_v31  ;;  %2927 = vmatpush1.bf16.msra.mxu1 %v9549_v35 }
 0x2cb   : > { %2887 = vmatprep.subr.bf16.mxu0 %v9550_v36  ;;  %2928 = vmatprep.subr.bf16.mxu1 %v9551_v57 }
 0x2ce   : > { %2888 = vmatpush1.bf16.msra.mxu0 %v9552_v59  ;;  %2929 = vmatpush1.bf16.msra.mxu1 %v9553_v45 }
 0x2cf   : > { %2939 = vmatprep.subr.bf16.mxu0 %v9554_v61  ;;  %2980 = vmatprep.subr.bf16.mxu1 %v9555_v2 }
 0x324   : > { %v2652_v3 = vpop.f32.mrb[40].mxu0  ;;  %v2693_v29 = vpop.f32.mrb[40].mxu1 }
 0x325   : > { %v2782_v30 = vadd.f32 %v2652_v3, %v9556_v60  ;;  %v2784_v31 = vadd.f32 %v2693_v29, %v9557_v52  ;;  %v2654_v51 = vpop.f32.mrb[41].mxu0  ;;  %v2695_v35 = vpop.f32.mrb[41].mxu1  ;;  %v765_v29 = vld [vmem:[%s7207_s22 + $0x18] sm:$0xff] }
 0x326   : > { %v2783_v36 = vadd.f32 %v2654_v51, %v9558_v58  ;;  %v2785_v57 = vadd.f32 %v2695_v35, %v9559_v37  ;;  %v2656_v4 = vpop.f32.mrb[42].mxu0  ;;  %v2697_v59 = vpop.f32.mrb[42].mxu1  ;;  %v7828_v58 = vmul.f32 %v7676_v26, %v7670_v9  ;;  %v769_v35 = vld [vmem:[%s7207_s22 + $0x38] sm:$0xff] }
 0x327   : > { %v5780_v50 = vmul.f32 -1.442695, %v2784_v31  ;;  %v2657_v45 = vpop.f32.mrb[43].mxu0  ;;  %v2698_v44 = vpop.f32.mrb[43].mxu1  ;;  %v767_v31 = vld [vmem:[%s7207_s22 + $0x28] sm:$0xff] }
 0x328   : > { %v5781_v61 = vmul.f32 -1.442695, %v2785_v57  ;;  %v2613_v44 = vmul.f32 %v7676_v26, %v7672_v49  ;;  %v5779_v4 = vmul.f32 -1.442695, %v2783_v36 }
 0x329   : > { %6044 = vpow2.f32 %v5780_v50 }
 0x32a   : > { %6046 = vpow2.f32 %v5781_v61  ;;  %v764_v61 = vld [vmem:[%s7207_s22 + $0x10] sm:$0xff] }
 0x32b   : > { %3081 = vperm.xlu1 %6011, %v764_v61   ;;  %v9562_v61 = vld [vmem:[#allocation167_spill] sm:$0xff] }
 0x32f   : > { %3320 = vperm.xlu1 %6011, %v765_v29  }
 0x333   : > { %v6045_v2 = vpop.eup %6044  ;;  %3798 = vperm.xlu1 %6011, %v767_v31  }
 0x334   : > { %v2808_v60 = vadd.f32 1.0, %v6045_v2  ;;  %v6047_v3 = vpop.eup %6046  ;;  %v5778_v2 = vmul.f32 -1.442695, %v2782_v30  ;;  %v9561_v30 = vld [vmem:[#allocation166_spill] sm:$0xff] }
 0x335   : > { %v2809_v52 = vadd.f32 1.0, %v6047_v3  ;;  %v9560_v3 = vld [vmem:[#allocation165_spill] sm:$0xff] }
 0x336   : > { %6048 = vrcp.f32 %v2808_v60 }
 0x337   : > { %6050 = vrcp.f32 %v2809_v52  ;;  %4276 = vperm.xlu1 %6011, %v769_v35  }
 0x338   : > { %6052 = vpow2.f32 %v5778_v2 }
 0x339   : > { %6054 = vpow2.f32 %v5779_v4  ;;  %v9563_v4 = vld [vmem:[#allocation168_spill] sm:$0xff] }
 0x340   : > { %v6049_v51 = vpop.eup %6048 }
 0x341   : > { %v2828_v50 = vmul.f32 %v6049_v51, %v7828_v58  ;;  %v6051_v57 = vpop.eup %6050 }
 0x342   : > { %v2829_v59 = vmul.f32 %v6051_v57, %v2613_v44  ;;  %v6053_v45 = vpop.eup %6052 }
 0x343   : > { %v6055_v9 = vpop.eup %6054  ;;  %v2796_v37 = vadd.f32 1.0, %v6053_v45 }
 0x344   : > { %v2797_v49 = vadd.f32 1.0, %v6055_v9 }
 0x345   : > { %6056 = vrcp.f32 %v2796_v37 }
 0x346   : > { %6058 = vrcp.f32 %v2797_v49 }
 0x34f   : > { %v6057_v37 = vpop.eup %6056 }
 0x364   : > { %v2734_v26 = vpop.f32.mrb[44].mxu0  ;;  %v2775_v60 = vpop.f32.mrb[44].mxu1 }
 0x365   : > { %v2786_v52 = vadd.f32 %v2734_v26, %v9560_v3  ;;  %v2788_v51 = vadd.f32 %v2775_v60, %v9561_v30  ;;  %v2736_v36 = vpop.f32.mrb[45].mxu0  ;;  %v2777_v57 = vpop.f32.mrb[45].mxu1 }
 0x366   : > { %v2787_v2 = vadd.f32 %v2736_v36, %v9562_v61  ;;  %v2789_v29 = vadd.f32 %v2777_v57, %v9563_v4  ;;  %v2738_v31 = vpop.f32.mrb[46].mxu0  ;;  %v2779_v35 = vpop.f32.mrb[46].mxu1 }
 0x367   : > { %6060 = vtanh.f32 %v2786_v52  ;;  %v5782_v43 = vmul.f32 -1.442695, %v2788_v51  ;;  %v2739_v45 = vpop.f32.mrb[47].mxu0  ;;  %v2780_v9 = vpop.f32.mrb[47].mxu1 }
 0x368   : > { %6062 = vtanh.f32 %v2787_v2  ;;  %v5783_v23 = vmul.f32 -1.442695, %v2789_v29  ;;  %v6059_v26 = vpop.eup %6058  ;;  %v2843_v51 = vpop.permute.xlu0 %2842 }
 0x369   : > { %6064 = vpow2.f32 %v5782_v43 }
 0x36a   : > { %6066 = vpow2.f32 %v5783_v23 }
 0x371   : > { %v6061_v60 = vpop.eup %6060 }
 0x372   : > { %v6063_v3 = vpop.eup %6062  ;;  %v2830_v30 = vmul.f32 %v6061_v60, %v6057_v37 }
 0x373   : > { %v6065_v49 = vpop.eup %6064  ;;  %v2831_v55 = vmul.f32 %v6063_v3, %v6059_v26 }
 0x374   : > { %v6067_v36 = vpop.eup %6066  ;;  %v2832_v61 = vadd.f32 %v2830_v30, %v2828_v50  ;;  %v2822_v57 = vadd.f32 1.0, %v6065_v49 }
 0x375   : > { %v2833_v4 = vadd.f32 %v2831_v55, %v2829_v59  ;;  %v2823_v31 = vadd.f32 1.0, %v6067_v36 }
 0x376   : > { %6068 = vtanh.f32 %v2832_v61  ;;  %v2849_v52 = vsub.f32 %v2832_v61, %v7828_v58  ;;  %v9566_v61 = vld [vmem:[#allocation91_spill] sm:$0xff] }
 0x377   : > { %6070 = vrcp.f32 %v2822_v57  ;;  %v2850_v2 = vsub.f32 %v2833_v4, %v2613_v44  ;;  %v9567_v57 = vld [vmem:[#allocation92_spill] sm:$0xff] }
 0x378   : > { %6072 = vtanh.f32 %v2833_v4  ;;  %v2851_v43 = vmul.f32 %v2849_v52, %v2843_v51  ;;  %v9568_v4 = vld [vmem:[#allocation93_spill] sm:$0xff]  ;;  %v9570_v52 = vld [vmem:[#allocation95_spill] sm:$0xff] }
 0x379   : > { %6074 = vrcp.f32 %v2823_v31  ;;  %v2852_v23 = vmul.f32 %v2850_v2, %v2843_v51  ;;  %v9569_v31 = vld [vmem:[#allocation94_spill] sm:$0xff]  ;;  %v9572_v2 = vld [vmem:[#allocation97_spill] sm:$0xff] }
 0x37a   : > { %v7843_v29 = vadd.f32 %v2851_v43, %v7828_v58  ;;  %v9573_v43 = vld [vmem:[#allocation98_spill] sm:$0xff] }
 0x37b   : > { %v7845_v35 = vadd.f32 %v2852_v23, %v2613_v44  ;;  %v9574_v23 = vld [vmem:[#allocation99_spill] sm:$0xff] }
 0x380   : > { %v6069_v45 = vpop.eup %6068 }
 0x381   : > { %v6071_v50 = vpop.eup %6070 }
 0x382   : > { %v6073_v9 = vpop.eup %6072  ;;  %v2836_v55 = vmul.f32 %v6071_v50, %v6069_v45  ;;  %v9575_v45 = vld [vmem:[#allocation100_spill] sm:$0xff]  ;;  %v9576_v50 = vld [vmem:[#allocation101_spill] sm:$0xff] }
 0x383   : > { %v6075_v59 = vpop.eup %6074 }
 0x384   : > { %v2837_v37 = vmul.f32 %v6075_v59, %v6073_v9  ;;  %v2838_v26 = vsub.f32 %v2836_v55, %v7679_v14  ;;  %v9577_v9 = vld [vmem:[#allocation102_spill] sm:$0xff]  ;;  %v9578_v55 = vld [vmem:[#allocation103_spill] sm:$0xff]  ;;  %v9579_v59 = vld [vmem:[#allocation104_spill] sm:$0xff] }
 0x386   : > { %v2839_v60 = vsub.f32 %v2837_v37, %v7682_v10  ;;  %v2845_v3 = vmul.f32 %v2843_v51, %v2838_v26  ;;  %v9580_v37 = vld [vmem:[#allocation105_spill] sm:$0xff]  ;;  %v9581_v26 = vld [vmem:[#allocation106_spill] sm:$0xff] }
 0x388   : > { %v2846_v30 = vmul.f32 %v2843_v51, %v2839_v60  ;;  %v7850_v49 = vadd.f32 %v2845_v3, %v7679_v14  ;;  %v9564_v14 = vld [vmem:[#allocation89_spill] sm:$0xff]  ;;  %v9571_v51 = vld [vmem:[#allocation96_spill] sm:$0xff]  ;;  %v9582_v60 = vld [vmem:[#allocation107_spill] sm:$0xff] }
 0x389   : > { %v9583_v3 = vld [vmem:[#allocation108_spill] sm:$0xff] }
 0x38a   : > { %v7853_v58 = vadd.f32 %v2846_v30, %v7682_v10  ;;  %v7859_v36 = vpack.c.bf16 %v7850_v49, %v7850_v49  ;;  %v9565_v10 = vld [vmem:[#allocation90_spill] sm:$0xff]  ;;  %v9584_v30 = vld [vmem:[#allocation109_spill] sm:$0xff] }
 0x38c   : > { %v2856_v44 = vpack.c.bf16 %v7853_v58, %v7853_v58 }
 0x38e   : > { %2889 = vmatprep.mubr.bf16.mxu0 %v2856_v44  ;;  %2930 = vmatprep.mubr.bf16.mxu1 %v2856_v44 }
 0x38f   : > { %2890 = vmatmul.mubr.bf16.vlgmr.msra.gmra.mrb[48].mxu0 %v7859_v36  ;;  %2931 = vmatmul.mubr.bf16.vlgmr.msra.gmra.mrb[48].mxu1 %v7859_v36 }
 0x390   : > { %2940 = vmatpush1.bf16.msra.mxu0 %v9460_v16  ;;  %2981 = vmatpush1.bf16.msra.mxu1 %v9461_v38 }
 0x391   : > { %2971 = vmatprep.mubr.bf16.mxu0 %v2856_v44  ;;  %3012 = vmatprep.mubr.bf16.mxu1 %v2856_v44  ;;  %v9585_v44 = vld [vmem:[#allocation110_spill] sm:$0xff] }
 0x392   : > { %2941 = vmatprep.subr.bf16.mxu0 %v9462_v15  ;;  %2982 = vmatprep.subr.bf16.mxu1 %v9463_v8 }
 0x394   : > { %2942 = vmatpush1.bf16.msra.mxu0 %v9464_v27  ;;  %2983 = vmatpush1.bf16.msra.mxu1 %v9465_v11 }
 0x395   : > { %2943 = vmatprep.subr.bf16.mxu0 %v9466_v22  ;;  %2984 = vmatprep.subr.bf16.mxu1 %v9467_v1 }
 0x398   : > { %2944 = vmatpush1.bf16.msra.mxu0 %v9468_v32  ;;  %2985 = vmatpush1.bf16.msra.mxu1 %v9469_v13 }
 0x399   : > { %2945 = vmatprep.subr.bf16.mxu0 %v9470_v17  ;;  %2986 = vmatprep.subr.bf16.mxu1 %v9471_v18 }
 0x39c   : > { %2946 = vmatpush1.bf16.msra.mxu0 %v9472_v19  ;;  %2987 = vmatpush1.bf16.msra.mxu1 %v9473_v48 }
 0x39d   : > { %2947 = vmatprep.subr.bf16.mxu0 %v9474_v33  ;;  %2988 = vmatprep.subr.bf16.mxu1 %v9564_v14 }
 0x3a0   : > { %2948 = vmatpush1.bf16.msra.mxu0 %v9565_v10  ;;  %2989 = vmatpush1.bf16.msra.mxu1 %v9566_v61 }
 0x3a1   : > { %2949 = vmatprep.subr.bf16.mxu0 %v9567_v57  ;;  %2990 = vmatprep.subr.bf16.mxu1 %v9568_v4 }
 0x3a4   : > { %2950 = vmatpush1.bf16.msra.mxu0 %v9569_v31  ;;  %2991 = vmatpush1.bf16.msra.mxu1 %v9570_v52 }
 0x3a5   : > { %2951 = vmatprep.subr.bf16.mxu0 %v9571_v51  ;;  %2992 = vmatprep.subr.bf16.mxu1 %v9572_v2 }
 0x3a8   : > { %2952 = vmatpush1.bf16.msra.mxu0 %v9573_v43  ;;  %2993 = vmatpush1.bf16.msra.mxu1 %v9574_v23 }
 0x3a9   : > { %2953 = vmatprep.subr.bf16.mxu0 %v9575_v45  ;;  %2994 = vmatprep.subr.bf16.mxu1 %v9576_v50 }
 0x3ac   : > { %2954 = vmatpush1.bf16.msra.mxu0 %v9577_v9  ;;  %2995 = vmatpush1.bf16.msra.mxu1 %v9578_v55  ;;  %v9586_v55 = vld [vmem:[#allocation114_spill] sm:$0xff] }
 0x3ad   : > { %2955 = vmatprep.subr.bf16.mxu0 %v9579_v59  ;;  %2996 = vmatprep.subr.bf16.mxu1 %v9580_v37 }
 0x3b0   : > { %2956 = vmatpush1.bf16.msra.mxu0 %v9581_v26  ;;  %2997 = vmatpush1.bf16.msra.mxu1 %v9582_v60 }
 0x3b1   : > { %2957 = vmatprep.subr.bf16.mxu0 %v9583_v3  ;;  %2998 = vmatprep.subr.bf16.mxu1 %v9584_v30 }
 0x3b4   : > { %2958 = vmatpush1.bf16.msra.mxu0 %v9585_v44  ;;  %2999 = vmatpush1.bf16.msra.mxu1 %v9497_v40 }
 0x3b5   : > { %2959 = vmatprep.subr.bf16.mxu0 %v9498_v39  ;;  %3000 = vmatprep.subr.bf16.mxu1 %v9499_v0 }
 0x3b8   : > { %2960 = vmatpush1.bf16.msra.mxu0 %v9586_v55  ;;  %3001 = vmatpush1.bf16.msra.mxu1 %v9501_v47 }
 0x3b9   : > { %2961 = vmatprep.subr.bf16.mxu0 %v9502_v46  ;;  %3002 = vmatprep.subr.bf16.mxu1 %v9503_v56 }
 0x3bc   : > { %2962 = vmatpush1.bf16.msra.mxu0 %v9504_v62  ;;  %3003 = vmatpush1.bf16.msra.mxu1 %v9505_v20  ;;  %v9658_v20 = vld [vmem:[#allocation144_spill] sm:$0xff] }
 0x3bd   : > { %2963 = vmatprep.subr.bf16.mxu0 %v9506_v5  ;;  %3004 = vmatprep.subr.bf16.mxu1 %v9507_v12  ;;  %v9657_v5 = vld [vmem:[#allocation143_spill] sm:$0xff] }
 0x3c0   : > { %2964 = vmatpush1.bf16.msra.mxu0 %v7291_v7  ;;  %3005 = vmatpush1.bf16.msra.mxu1 %v7295_v41  ;;  %v9587_v41 = vld [vmem:[#allocation134_spill] sm:$0xff] }
 0x3c1   : > { %2965 = vmatprep.subr.bf16.mxu0 %v7297_v21  ;;  %3006 = vmatprep.subr.bf16.mxu1 %v9508_v63  ;;  %v9588_v21 = vld [vmem:[#allocation135_spill] sm:$0xff]  ;;  %v9589_v63 = vld [vmem:[#allocation8_spill] sm:$0xff]  ;;  %v9656_v7 = vld [vmem:[#allocation142_spill] sm:$0xff] }
 0x3c4   : > { %2966 = vmatpush1.bf16.msra.mxu0 %v7307_v6  ;;  %3007 = vmatpush1.bf16.msra.mxu1 %v7311_v53  ;;  %v9590_v6 = vld [vmem:[#allocation9_spill] sm:$0xff] }
 0x3c5   : > { %2967 = vmatprep.subr.bf16.mxu0 %v7313_v42  ;;  %3008 = vmatprep.subr.bf16.mxu1 %v7316_v54  ;;  %v9591_v54 = vld [vmem:[#allocation10_spill] sm:$0xff]  ;;  %v9600_v42 = vld [vmem:[#allocation19_spill] sm:$0xff]  ;;  %v9655_v53 = vld [vmem:[#allocation141_spill] sm:$0xff] }
 0x3c8   : > { %2968 = vmatpush1.bf16.msra.mxu0 %v7323_v34  ;;  %3009 = vmatpush1.bf16.msra.mxu1 %v7327_v25  ;;  %v9592_v34 = vld [vmem:[#allocation11_spill] sm:$0xff]  ;;  %v9593_v25 = vld [vmem:[#allocation12_spill] sm:$0xff] }
 0x3c9   : > { %2969 = vmatprep.subr.bf16.mxu0 %v7329_v24  ;;  %3010 = vmatprep.subr.bf16.mxu1 %v7332_v28  ;;  %v9594_v24 = vld [vmem:[#allocation13_spill] sm:$0xff]  ;;  %v9595_v28 = vld [vmem:[#allocation14_spill] sm:$0xff] }
 0x3cc   : > { %2970 = vmatpush1.bf16.msra.mxu0 %v9587_v41  ;;  %3011 = vmatpush1.bf16.msra.mxu1 %v9588_v21  ;;  %v9596_v41 = vld [vmem:[#allocation15_spill] sm:$0xff]  ;;  %v9597_v21 = vld [vmem:[#allocation16_spill] sm:$0xff] }
 0x3cd   : > { %3096 = vmatprep.subr.bf16.mxu0 %v9589_v63  ;;  %3137 = vmatprep.subr.bf16.mxu1 %v9590_v6  ;;  %v9598_v63 = vld [vmem:[#allocation17_spill] sm:$0xff]  ;;  %v9599_v6 = vld [vmem:[#allocation18_spill] sm:$0xff] }
 0x3cf   : > { %2972 = vmatmul.mubr.bf16.vlgmr.msra.gmra.mrb[52].mxu0 %v7859_v36  ;;  %3013 = vmatmul.mubr.bf16.vlgmr.msra.gmra.mrb[52].mxu1 %v7859_v36  ;;  %v9601_v36 = vld [vmem:[#allocation20_spill] sm:$0xff] }
 0x3d0   : > { %3097 = vmatpush1.bf16.msra.mxu0 %v9591_v54  ;;  %3138 = vmatpush1.bf16.msra.mxu1 %v9592_v34  ;;  %v9602_v54 = vld [vmem:[#allocation21_spill] sm:$0xff]  ;;  %v9603_v34 = vld [vmem:[#allocation22_spill] sm:$0xff] }
 0x3d1   : > { %3098 = vmatprep.subr.bf16.mxu0 %v9593_v25  ;;  %3139 = vmatprep.subr.bf16.mxu1 %v9594_v24  ;;  %v9604_v25 = vld [vmem:[#allocation23_spill] sm:$0xff]  ;;  %v9605_v24 = vld [vmem:[#allocation24_spill] sm:$0xff] }
 0x3d4   : > { %3099 = vmatpush1.bf16.msra.mxu0 %v9595_v28  ;;  %3140 = vmatpush1.bf16.msra.mxu1 %v9596_v41  ;;  %v9606_v28 = vld [vmem:[#allocation25_spill] sm:$0xff]  ;;  %v9607_v41 = vld [vmem:[#allocation26_spill] sm:$0xff] }
 0x3d5   : > { %3100 = vmatprep.subr.bf16.mxu0 %v9597_v21  ;;  %3141 = vmatprep.subr.bf16.mxu1 %v9598_v63  ;;  %v9608_v21 = vld [vmem:[#allocation27_spill] sm:$0xff]  ;;  %v9609_v63 = vld [vmem:[#allocation28_spill] sm:$0xff] }
 0x3d8   : > { %3101 = vmatpush1.bf16.msra.mxu0 %v9599_v6  ;;  %3142 = vmatpush1.bf16.msra.mxu1 %v9600_v42  ;;  %v9610_v6 = vld [vmem:[#allocation29_spill] sm:$0xff]  ;;  %v9611_v42 = vld [vmem:[#allocation30_spill] sm:$0xff] }
 0x3d9   : > { %3102 = vmatprep.subr.bf16.mxu0 %v9601_v36  ;;  %3143 = vmatprep.subr.bf16.mxu1 %v9602_v54  ;;  %v9612_v36 = vld [vmem:[#allocation31_spill] sm:$0xff]  ;;  %v9613_v54 = vld [vmem:[#allocation32_spill] sm:$0xff] }
 0x3dc   : > { %3103 = vmatpush1.bf16.msra.mxu0 %v9603_v34  ;;  %3144 = vmatpush1.bf16.msra.mxu1 %v9604_v25  ;;  %v9614_v34 = vld [vmem:[#allocation33_spill] sm:$0xff]  ;;  %v9615_v25 = vld [vmem:[#allocation34_spill] sm:$0xff] }
 0x3dd   : > { %3104 = vmatprep.subr.bf16.mxu0 %v9605_v24  ;;  %3145 = vmatprep.subr.bf16.mxu1 %v9606_v28  ;;  %v9616_v24 = vld [vmem:[#allocation35_spill] sm:$0xff]  ;;  %v9617_v28 = vld [vmem:[#allocation36_spill] sm:$0xff] }
 0x3e0   : > { %3105 = vmatpush1.bf16.msra.mxu0 %v9607_v41  ;;  %3146 = vmatpush1.bf16.msra.mxu1 %v9608_v21  ;;  %v9618_v41 = vld [vmem:[#allocation37_spill] sm:$0xff]  ;;  %v9619_v21 = vld [vmem:[#allocation38_spill] sm:$0xff] }
 0x3e1   : > { %3106 = vmatprep.subr.bf16.mxu0 %v9609_v63  ;;  %3147 = vmatprep.subr.bf16.mxu1 %v9610_v6  ;;  %v9620_v63 = vld [vmem:[#allocation39_spill] sm:$0xff]  ;;  %v9621_v6 = vld [vmem:[#allocation40_spill] sm:$0xff] }
 0x3e4   : > { %3107 = vmatpush1.bf16.msra.mxu0 %v9611_v42  ;;  %3148 = vmatpush1.bf16.msra.mxu1 %v9612_v36  ;;  %v9622_v42 = vld [vmem:[#allocation41_spill] sm:$0xff]  ;;  %v9623_v36 = vld [vmem:[#allocation42_spill] sm:$0xff] }
 0x3e5   : > { %3108 = vmatprep.subr.bf16.mxu0 %v9613_v54  ;;  %3149 = vmatprep.subr.bf16.mxu1 %v9614_v34  ;;  %v9624_v54 = vld [vmem:[#allocation43_spill] sm:$0xff]  ;;  %v9625_v34 = vld [vmem:[#allocation44_spill] sm:$0xff] }
 0x3e8   : > { %3109 = vmatpush1.bf16.msra.mxu0 %v9615_v25  ;;  %3150 = vmatpush1.bf16.msra.mxu1 %v9616_v24  ;;  %v9626_v25 = vld [vmem:[#allocation45_spill] sm:$0xff]  ;;  %v9627_v24 = vld [vmem:[#allocation46_spill] sm:$0xff] }
 0x3e9   : > { %3110 = vmatprep.subr.bf16.mxu0 %v9617_v28  ;;  %3151 = vmatprep.subr.bf16.mxu1 %v9618_v41  ;;  %v9628_v28 = vld [vmem:[#allocation47_spill] sm:$0xff]  ;;  %v9629_v41 = vld [vmem:[#allocation48_spill] sm:$0xff] }
 0x3ec   : > { %3111 = vmatpush1.bf16.msra.mxu0 %v9619_v21  ;;  %3152 = vmatpush1.bf16.msra.mxu1 %v9620_v63  ;;  %v9630_v21 = vld [vmem:[#allocation49_spill] sm:$0xff]  ;;  %v9631_v63 = vld [vmem:[#allocation50_spill] sm:$0xff] }
 0x3ed   : > { %3112 = vmatprep.subr.bf16.mxu0 %v9621_v6  ;;  %3153 = vmatprep.subr.bf16.mxu1 %v9622_v42  ;;  %v9632_v6 = vld [vmem:[#allocation51_spill] sm:$0xff]  ;;  %v9633_v42 = vld [vmem:[#allocation52_spill] sm:$0xff] }
 0x3f0   : > { %3113 = vmatpush1.bf16.msra.mxu0 %v9623_v36  ;;  %3154 = vmatpush1.bf16.msra.mxu1 %v9624_v54  ;;  %v9634_v36 = vld [vmem:[#allocation53_spill] sm:$0xff]  ;;  %v9635_v54 = vld [vmem:[#allocation54_spill] sm:$0xff] }
 0x3f1   : > { %3114 = vmatprep.subr.bf16.mxu0 %v9625_v34  ;;  %3155 = vmatprep.subr.bf16.mxu1 %v9626_v25  ;;  %v9636_v34 = vld [vmem:[#allocation55_spill] sm:$0xff]  ;;  %v9637_v25 = vld [vmem:[#allocation56_spill] sm:$0xff] }
 0x3f4   : > { %3115 = vmatpush1.bf16.msra.mxu0 %v9627_v24  ;;  %3156 = vmatpush1.bf16.msra.mxu1 %v9628_v28  ;;  %v9638_v24 = vld [vmem:[#allocation57_spill] sm:$0xff]  ;;  %v9639_v28 = vld [vmem:[#allocation58_spill] sm:$0xff] }
 0x3f5   : > { %3116 = vmatprep.subr.bf16.mxu0 %v9629_v41  ;;  %3157 = vmatprep.subr.bf16.mxu1 %v9630_v21  ;;  %v9640_v41 = vld [vmem:[#allocation59_spill] sm:$0xff]  ;;  %v9641_v21 = vld [vmem:[#allocation60_spill] sm:$0xff] }
 0x3f8   : > { %3117 = vmatpush1.bf16.msra.mxu0 %v9631_v63  ;;  %3158 = vmatpush1.bf16.msra.mxu1 %v9632_v6  ;;  %v9642_v63 = vld [vmem:[#allocation61_spill] sm:$0xff]  ;;  %v9643_v6 = vld [vmem:[#allocation62_spill] sm:$0xff] }
 0x3f9   : > { %3118 = vmatprep.subr.bf16.mxu0 %v9633_v42  ;;  %3159 = vmatprep.subr.bf16.mxu1 %v9634_v36  ;;  %v9644_v42 = vld [vmem:[#allocation63_spill] sm:$0xff]  ;;  %v9645_v36 = vld [vmem:[#allocation64_spill] sm:$0xff] }
 0x3fc   : > { %3119 = vmatpush1.bf16.msra.mxu0 %v9635_v54  ;;  %3160 = vmatpush1.bf16.msra.mxu1 %v9636_v34  ;;  %v9646_v54 = vld [vmem:[#allocation65_spill] sm:$0xff]  ;;  %v9647_v34 = vld [vmem:[#allocation66_spill] sm:$0xff] }
 0x3fd   : > { %3120 = vmatprep.subr.bf16.mxu0 %v9637_v25  ;;  %3161 = vmatprep.subr.bf16.mxu1 %v9638_v24  ;;  %v9648_v25 = vld [vmem:[#allocation67_spill] sm:$0xff]  ;;  %v9649_v24 = vld [vmem:[#allocation68_spill] sm:$0xff] }
 0x400   : > { %3121 = vmatpush1.bf16.msra.mxu0 %v9639_v28  ;;  %3162 = vmatpush1.bf16.msra.mxu1 %v9640_v41  ;;  %v9650_v28 = vld [vmem:[#allocation69_spill] sm:$0xff]  ;;  %v9651_v41 = vld [vmem:[#allocation70_spill] sm:$0xff] }
 0x401   : > { %3122 = vmatprep.subr.bf16.mxu0 %v9641_v21  ;;  %3163 = vmatprep.subr.bf16.mxu1 %v9642_v63  ;;  %v9652_v21 = vld [vmem:[#allocation71_spill] sm:$0xff]  ;;  %v9653_v63 = vld [vmem:[#allocation72_spill] sm:$0xff] }
 0x404   : > { %3123 = vmatpush1.bf16.msra.mxu0 %v9643_v6  ;;  %3164 = vmatpush1.bf16.msra.mxu1 %v9644_v42  ;;  %v9654_v6 = vld [vmem:[#allocation73_spill] sm:$0xff] }
 0x405   : > { %3124 = vmatprep.subr.bf16.mxu0 %v9645_v36  ;;  %3165 = vmatprep.subr.bf16.mxu1 %v9646_v54 }
 0x408   : > { %3125 = vmatpush1.bf16.msra.mxu0 %v9647_v34  ;;  %3166 = vmatpush1.bf16.msra.mxu1 %v9648_v25 }
 0x409   : > { %3126 = vmatprep.subr.bf16.mxu0 %v9649_v24  ;;  %3167 = vmatprep.subr.bf16.mxu1 %v9650_v28 }
 0x40c   : > { %3127 = vmatpush1.bf16.msra.mxu0 %v9651_v41  ;;  %3168 = vmatpush1.bf16.msra.mxu1 %v9652_v21 }
 0x40d   : > { %3178 = vmatprep.subr.bf16.mxu0 %v9653_v63  ;;  %3219 = vmatprep.subr.bf16.mxu1 %v9654_v6 }
 0x462   : > { %v2891_v42 = vpop.f32.mrb[48].mxu0  ;;  %v2932_v36 = vpop.f32.mrb[48].mxu1 }
 0x463   : > { %v3021_v54 = vadd.f32 %v2891_v42, %v9655_v53  ;;  %v3023_v34 = vadd.f32 %v2932_v36, %v9656_v7  ;;  %v2893_v12 = vpop.f32.mrb[49].mxu0  ;;  %v2934_v25 = vpop.f32.mrb[49].mxu1 }
 0x464   : > { %v3022_v24 = vadd.f32 %v2893_v12, %v9657_v5  ;;  %v3024_v28 = vadd.f32 %v2934_v25, %v9658_v20  ;;  %v2895_v62 = vpop.f32.mrb[50].mxu0  ;;  %v2936_v41 = vpop.f32.mrb[50].mxu1  ;;  %v9660_v20 = vld [vmem:[#allocation170_spill] sm:$0xff] }
 0x465   : > { %v5786_v56 = vmul.f32 -1.442695, %v3023_v34  ;;  %v2896_v21 = vpop.f32.mrb[51].mxu0  ;;  %v2937_v46 = vpop.f32.mrb[51].mxu1  ;;  %v5784_v62 = vmul.f32 -1.442695, %v3021_v54 }
 0x466   : > { %v5787_v63 = vmul.f32 -1.442695, %v3024_v28  ;;  %v5785_v41 = vmul.f32 -1.442695, %v3022_v24  ;;  %v9662_v54 = vld [vmem:[#allocation172_spill] sm:$0xff] }
 0x467   : > { %6076 = vpow2.f32 %v5786_v56 }
 0x468   : > { %6078 = vpow2.f32 %v5787_v63 }
 0x471   : > { %v6077_v6 = vpop.eup %6076 }
 0x472   : > { %v3047_v47 = vadd.f32 1.0, %v6077_v6  ;;  %v6079_v55 = vpop.eup %6078 }
 0x473   : > { %v3048_v53 = vadd.f32 1.0, %v6079_v55 }
 0x474   : > { %6080 = vrcp.f32 %v3047_v47  ;;  %v9659_v47 = vld [vmem:[#allocation169_spill] sm:$0xff] }
 0x475   : > { %6082 = vrcp.f32 %v3048_v53  ;;  %v9661_v53 = vld [vmem:[#allocation171_spill] sm:$0xff] }
 0x476   : > { %6084 = vpow2.f32 %v5784_v62 }
 0x477   : > { %6086 = vpow2.f32 %v5785_v41 }
 0x47e   : > { %v6081_v7 = vpop.eup %6080 }
 0x47f   : > { %v3067_v42 = vmul.f32 %v6081_v7, %v7843_v29  ;;  %v6083_v5 = vpop.eup %6082 }
 0x480   : > { %v3068_v25 = vmul.f32 %v6083_v5, %v7845_v35  ;;  %v6085_v21 = vpop.eup %6084 }
 0x481   : > { %v6087_v34 = vpop.eup %6086  ;;  %v3035_v28 = vadd.f32 1.0, %v6085_v21 }
 0x482   : > { %v3036_v63 = vadd.f32 1.0, %v6087_v34 }
 0x483   : > { %6088 = vrcp.f32 %v3035_v28 }
 0x484   : > { %6090 = vrcp.f32 %v3036_v63 }
 0x48d   : > { %v6089_v28 = vpop.eup %6088 }
 0x4a2   : > { %v2973_v46 = vpop.f32.mrb[52].mxu0  ;;  %v3014_v6 = vpop.f32.mrb[52].mxu1 }
 0x4a3   : > { %v3025_v56 = vadd.f32 %v2973_v46, %v9659_v47  ;;  %v3027_v12 = vadd.f32 %v3014_v6, %v9660_v20  ;;  %v2975_v55 = vpop.f32.mrb[53].mxu0  ;;  %v3016_v36 = vpop.f32.mrb[53].mxu1 }
 0x4a4   : > { %v3026_v7 = vadd.f32 %v2975_v55, %v9661_v53  ;;  %v3028_v24 = vadd.f32 %v3016_v36, %v9662_v54  ;;  %v2977_v5 = vpop.f32.mrb[54].mxu0  ;;  %v3018_v62 = vpop.f32.mrb[54].mxu1 }
 0x4a5   : > { %6092 = vtanh.f32 %v3025_v56  ;;  %v5788_v41 = vmul.f32 -1.442695, %v3027_v12  ;;  %v2978_v21 = vpop.f32.mrb[55].mxu0  ;;  %v3019_v34 = vpop.f32.mrb[55].mxu1 }
 0x4a6   : > { %6094 = vtanh.f32 %v3026_v7  ;;  %v5789_v0 = vmul.f32 -1.442695, %v3028_v24  ;;  %v6091_v46 = vpop.eup %6090  ;;  %v3082_v5 = vpop.permute.xlu1 %3081 }
 0x4a7   : > { %6096 = vpow2.f32 %v5788_v41 }
 0x4a8   : > { %6098 = vpow2.f32 %v5789_v0 }
 0x4af   : > { %v6093_v6 = vpop.eup %6092 }
 0x4b0   : > { %v6095_v47 = vpop.eup %6094  ;;  %v3069_v20 = vmul.f32 %v6093_v6, %v6089_v28 }
 0x4b1   : > { %v6097_v63 = vpop.eup %6096  ;;  %v3070_v39 = vmul.f32 %v6095_v47, %v6091_v46 }
 0x4b2   : > { %v6099_v55 = vpop.eup %6098  ;;  %v3061_v53 = vadd.f32 1.0, %v6097_v63  ;;  %v3071_v36 = vadd.f32 %v3069_v20, %v3067_v42 }
 0x4b3   : > { %v3062_v54 = vadd.f32 1.0, %v6099_v55  ;;  %v3072_v56 = vadd.f32 %v3070_v39, %v3068_v25 }
 0x4b4   : > { %6100 = vrcp.f32 %v3061_v53  ;;  %v3088_v12 = vsub.f32 %v3071_v36, %v7843_v29  ;;  %v9665_v53 = vld [vmem:[#allocation113_spill] sm:$0xff] }
 0x4b5   : > { %6102 = vrcp.f32 %v3062_v54  ;;  %v3089_v7 = vsub.f32 %v3072_v56, %v7845_v35  ;;  %v9667_v54 = vld [vmem:[#allocation115_spill] sm:$0xff] }
 0x4b6   : > { %6104 = vtanh.f32 %v3071_v36  ;;  %v3090_v0 = vmul.f32 %v3088_v12, %v3082_v5  ;;  %v9666_v36 = vld [vmem:[#allocation114_spill] sm:$0xff] }
 0x4b7   : > { %6106 = vtanh.f32 %v3072_v56  ;;  %v3091_v24 = vmul.f32 %v3089_v7, %v3082_v5  ;;  %v9669_v56 = vld [vmem:[#allocation117_spill] sm:$0xff]  ;;  %v9670_v12 = vld [vmem:[#allocation118_spill] sm:$0xff]  ;;  %v9671_v7 = vld [vmem:[#allocation119_spill] sm:$0xff] }
 0x4b8   : > { %v8006_v62 = vadd.f32 %v3090_v0, %v7843_v29  ;;  %v9672_v0 = vld [vmem:[#allocation120_spill] sm:$0xff] }
 0x4b9   : > { %v8009_v41 = vadd.f32 %v3091_v24, %v7845_v35  ;;  %v9673_v24 = vld [vmem:[#allocation121_spill] sm:$0xff] }
 0x4be   : > { %v6101_v42 = vpop.eup %6100 }
 0x4bf   : > { %v6103_v21 = vpop.eup %6102 }
 0x4c0   : > { %v6105_v34 = vpop.eup %6104 }
 0x4c1   : > { %v6107_v39 = vpop.eup %6106  ;;  %v3075_v25 = vmul.f32 %v6105_v34, %v6101_v42  ;;  %v9674_v42 = vld [vmem:[#allocation122_spill] sm:$0xff]  ;;  %v9676_v34 = vld [vmem:[#allocation124_spill] sm:$0xff] }
 0x4c2   : > { %v3076_v28 = vmul.f32 %v6107_v39, %v6103_v21  ;;  %v9675_v21 = vld [vmem:[#allocation123_spill] sm:$0xff]  ;;  %v9677_v39 = vld [vmem:[#allocation125_spill] sm:$0xff] }
 0x4c3   : > { %v3077_v46 = vsub.f32 %v3075_v25, %v7850_v49  ;;  %v9678_v25 = vld [vmem:[#allocation126_spill] sm:$0xff] }
 0x4c4   : > { %v3078_v6 = vsub.f32 %v3076_v28, %v7853_v58  ;;  %v9679_v28 = vld [vmem:[#allocation127_spill] sm:$0xff] }
 0x4c5   : > { %v3084_v47 = vmul.f32 %v3082_v5, %v3077_v46  ;;  %v9680_v46 = vld [vmem:[#allocation128_spill] sm:$0xff] }
 0x4c6   : > { %v3085_v20 = vmul.f32 %v3082_v5, %v3078_v6  ;;  %v9668_v5 = vld [vmem:[#allocation116_spill] sm:$0xff]  ;;  %v9681_v6 = vld [vmem:[#allocation129_spill] sm:$0xff] }
 0x4c7   : > { %v8014_v63 = vadd.f32 %v3084_v47, %v7850_v49  ;;  %v9663_v49 = vld [vmem:[#allocation103_spill] sm:$0xff]  ;;  %v9682_v47 = vld [vmem:[#allocation130_spill] sm:$0xff] }
 0x4c8   : > { %v8017_v29 = vadd.f32 %v3085_v20, %v7853_v58  ;;  %v9664_v58 = vld [vmem:[#allocation112_spill] sm:$0xff]  ;;  %v9683_v20 = vld [vmem:[#allocation131_spill] sm:$0xff] }
 0x4c9   : > { %v8023_v55 = vpack.c.bf16 %v8014_v63, %v8014_v63 }
 0x4ca   : > { %v3095_v35 = vpack.c.bf16 %v8017_v29, %v8017_v29 }
 0x4cc   : > { %3128 = vmatprep.mubr.bf16.mxu0 %v3095_v35  ;;  %3169 = vmatprep.mubr.bf16.mxu1 %v3095_v35 }
 0x4cd   : > { %3129 = vmatmul.mubr.bf16.vlgmr.msra.gmra.mrb[56].mxu0 %v8023_v55  ;;  %3170 = vmatmul.mubr.bf16.vlgmr.msra.gmra.mrb[56].mxu1 %v8023_v55 }
 0x4ce   : > { %3179 = vmatpush1.bf16.msra.mxu0 %v9460_v16  ;;  %3220 = vmatpush1.bf16.msra.mxu1 %v9461_v38 }
 0x4cf   : > { %3210 = vmatprep.mubr.bf16.mxu0 %v3095_v35  ;;  %3251 = vmatprep.mubr.bf16.mxu1 %v3095_v35  ;;  %v9684_v35 = vld [vmem:[#allocation132_spill] sm:$0xff] }
 0x4d0   : > { %3180 = vmatprep.subr.bf16.mxu0 %v9462_v15  ;;  %3221 = vmatprep.subr.bf16.mxu1 %v9463_v8 }
 0x4d2   : > { %3181 = vmatpush1.bf16.msra.mxu0 %v9464_v27  ;;  %3222 = vmatpush1.bf16.msra.mxu1 %v9465_v11 }
 0x4d3   : > { %3182 = vmatprep.subr.bf16.mxu0 %v9466_v22  ;;  %3223 = vmatprep.subr.bf16.mxu1 %v9467_v1 }
 0x4d6   : > { %3183 = vmatpush1.bf16.msra.mxu0 %v9468_v32  ;;  %3224 = vmatpush1.bf16.msra.mxu1 %v9469_v13 }
 0x4d7   : > { %3184 = vmatprep.subr.bf16.mxu0 %v9470_v17  ;;  %3225 = vmatprep.subr.bf16.mxu1 %v9471_v18 }
 0x4da   : > { %3185 = vmatpush1.bf16.msra.mxu0 %v9472_v19  ;;  %3226 = vmatpush1.bf16.msra.mxu1 %v9473_v48 }
 0x4db   : > { %3186 = vmatprep.subr.bf16.mxu0 %v9474_v33  ;;  %3227 = vmatprep.subr.bf16.mxu1 %v9564_v14 }
 0x4de   : > { %3187 = vmatpush1.bf16.msra.mxu0 %v9565_v10  ;;  %3228 = vmatpush1.bf16.msra.mxu1 %v9566_v61 }
 0x4df   : > { %3188 = vmatprep.subr.bf16.mxu0 %v9567_v57  ;;  %3229 = vmatprep.subr.bf16.mxu1 %v9568_v4 }
 0x4e2   : > { %3189 = vmatpush1.bf16.msra.mxu0 %v9569_v31  ;;  %3230 = vmatpush1.bf16.msra.mxu1 %v9570_v52 }
 0x4e3   : > { %3190 = vmatprep.subr.bf16.mxu0 %v9571_v51  ;;  %3231 = vmatprep.subr.bf16.mxu1 %v9572_v2 }
 0x4e6   : > { %3191 = vmatpush1.bf16.msra.mxu0 %v9573_v43  ;;  %3232 = vmatpush1.bf16.msra.mxu1 %v9574_v23 }
 0x4e7   : > { %3192 = vmatprep.subr.bf16.mxu0 %v9575_v45  ;;  %3233 = vmatprep.subr.bf16.mxu1 %v9576_v50 }
 0x4ea   : > { %3193 = vmatpush1.bf16.msra.mxu0 %v9577_v9  ;;  %3234 = vmatpush1.bf16.msra.mxu1 %v9663_v49 }
 0x4eb   : > { %3194 = vmatprep.subr.bf16.mxu0 %v9579_v59  ;;  %3235 = vmatprep.subr.bf16.mxu1 %v9580_v37 }
 0x4ee   : > { %3195 = vmatpush1.bf16.msra.mxu0 %v9581_v26  ;;  %3236 = vmatpush1.bf16.msra.mxu1 %v9582_v60 }
 0x4ef   : > { %3196 = vmatprep.subr.bf16.mxu0 %v9583_v3  ;;  %3237 = vmatprep.subr.bf16.mxu1 %v9584_v30 }
 0x4f2   : > { %3197 = vmatpush1.bf16.msra.mxu0 %v9585_v44  ;;  %3238 = vmatpush1.bf16.msra.mxu1 %v9497_v40 }
 0x4f3   : > { %3198 = vmatprep.subr.bf16.mxu0 %v9664_v58  ;;  %3239 = vmatprep.subr.bf16.mxu1 %v9665_v53 }
 0x4f6   : > { %3199 = vmatpush1.bf16.msra.mxu0 %v9666_v36  ;;  %3240 = vmatpush1.bf16.msra.mxu1 %v9667_v54 }
 0x4f7   : > { %3200 = vmatprep.subr.bf16.mxu0 %v9668_v5  ;;  %3241 = vmatprep.subr.bf16.mxu1 %v9669_v56 }
 0x4fa   : > { %3201 = vmatpush1.bf16.msra.mxu0 %v9670_v12  ;;  %3242 = vmatpush1.bf16.msra.mxu1 %v9671_v7  ;;  %v9756_v7 = vld [vmem:[#allocation147_spill] sm:$0xff]  ;;  %v9757_v12 = vld [vmem:[#allocation148_spill] sm:$0xff] }
 0x4fb   : > { %3202 = vmatprep.subr.bf16.mxu0 %v9672_v0  ;;  %3243 = vmatprep.subr.bf16.mxu1 %v9673_v24  ;;  %v9755_v24 = vld [vmem:[#allocation146_spill] sm:$0xff] }
 0x4fe   : > { %3203 = vmatpush1.bf16.msra.mxu0 %v9674_v42  ;;  %3244 = vmatpush1.bf16.msra.mxu1 %v9675_v21  ;;  %v9685_v42 = vld [vmem:[#allocation133_spill] sm:$0xff]  ;;  %v9686_v21 = vld [vmem:[#allocation134_spill] sm:$0xff] }
 0x4ff   : > { %3204 = vmatprep.subr.bf16.mxu0 %v9676_v34  ;;  %3245 = vmatprep.subr.bf16.mxu1 %v9677_v39  ;;  %v9687_v34 = vld [vmem:[#allocation135_spill] sm:$0xff]  ;;  %v9688_v39 = vld [vmem:[#allocation8_spill] sm:$0xff] }
 0x502   : > { %3205 = vmatpush1.bf16.msra.mxu0 %v9678_v25  ;;  %3246 = vmatpush1.bf16.msra.mxu1 %v9679_v28  ;;  %v9689_v25 = vld [vmem:[#allocation9_spill] sm:$0xff] }
 0x503   : > { %3206 = vmatprep.subr.bf16.mxu0 %v9680_v46  ;;  %3247 = vmatprep.subr.bf16.mxu1 %v9681_v6  ;;  %v9690_v6 = vld [vmem:[#allocation10_spill] sm:$0xff]  ;;  %v9699_v46 = vld [vmem:[#allocation19_spill] sm:$0xff]  ;;  %v9754_v28 = vld [vmem:[#allocation145_spill] sm:$0xff] }
 0x506   : > { %3207 = vmatpush1.bf16.msra.mxu0 %v9682_v47  ;;  %3248 = vmatpush1.bf16.msra.mxu1 %v9683_v20  ;;  %v9691_v47 = vld [vmem:[#allocation11_spill] sm:$0xff]  ;;  %v9692_v20 = vld [vmem:[#allocation12_spill] sm:$0xff] }
 0x507   : > { %3208 = vmatprep.subr.bf16.mxu0 %v9684_v35  ;;  %3249 = vmatprep.subr.bf16.mxu1 %v9685_v42  ;;  %v9693_v35 = vld [vmem:[#allocation13_spill] sm:$0xff]  ;;  %v9694_v42 = vld [vmem:[#allocation14_spill] sm:$0xff] }
 0x50a   : > { %3209 = vmatpush1.bf16.msra.mxu0 %v9686_v21  ;;  %3250 = vmatpush1.bf16.msra.mxu1 %v9687_v34  ;;  %v9695_v21 = vld [vmem:[#allocation15_spill] sm:$0xff]  ;;  %v9696_v34 = vld [vmem:[#allocation16_spill] sm:$0xff] }
 0x50b   : > { %3335 = vmatprep.subr.bf16.mxu0 %v9688_v39  ;;  %3376 = vmatprep.subr.bf16.mxu1 %v9689_v25  ;;  %v9697_v39 = vld [vmem:[#allocation17_spill] sm:$0xff]  ;;  %v9698_v25 = vld [vmem:[#allocation18_spill] sm:$0xff] }
 0x50d   : > { %3211 = vmatmul.mubr.bf16.vlgmr.msra.gmra.mrb[60].mxu0 %v8023_v55  ;;  %3252 = vmatmul.mubr.bf16.vlgmr.msra.gmra.mrb[60].mxu1 %v8023_v55  ;;  %v9700_v55 = vld [vmem:[#allocation20_spill] sm:$0xff] }
 0x50e   : > { %3336 = vmatpush1.bf16.msra.mxu0 %v9690_v6  ;;  %3377 = vmatpush1.bf16.msra.mxu1 %v9691_v47  ;;  %v9701_v6 = vld [vmem:[#allocation21_spill] sm:$0xff]  ;;  %v9702_v47 = vld [vmem:[#allocation22_spill] sm:$0xff] }
 0x50f   : > { %3337 = vmatprep.subr.bf16.mxu0 %v9692_v20  ;;  %3378 = vmatprep.subr.bf16.mxu1 %v9693_v35  ;;  %v9703_v20 = vld [vmem:[#allocation23_spill] sm:$0xff]  ;;  %v9704_v35 = vld [vmem:[#allocation24_spill] sm:$0xff] }
 0x512   : > { %3338 = vmatpush1.bf16.msra.mxu0 %v9694_v42  ;;  %3379 = vmatpush1.bf16.msra.mxu1 %v9695_v21  ;;  %v9705_v42 = vld [vmem:[#allocation25_spill] sm:$0xff]  ;;  %v9706_v21 = vld [vmem:[#allocation26_spill] sm:$0xff] }
 0x513   : > { %3339 = vmatprep.subr.bf16.mxu0 %v9696_v34  ;;  %3380 = vmatprep.subr.bf16.mxu1 %v9697_v39  ;;  %v9707_v34 = vld [vmem:[#allocation27_spill] sm:$0xff]  ;;  %v9708_v39 = vld [vmem:[#allocation28_spill] sm:$0xff] }
 0x516   : > { %3340 = vmatpush1.bf16.msra.mxu0 %v9698_v25  ;;  %3381 = vmatpush1.bf16.msra.mxu1 %v9699_v46  ;;  %v9709_v25 = vld [vmem:[#allocation29_spill] sm:$0xff]  ;;  %v9710_v46 = vld [vmem:[#allocation30_spill] sm:$0xff] }
 0x517   : > { %3341 = vmatprep.subr.bf16.mxu0 %v9700_v55  ;;  %3382 = vmatprep.subr.bf16.mxu1 %v9701_v6  ;;  %v9711_v55 = vld [vmem:[#allocation31_spill] sm:$0xff]  ;;  %v9712_v6 = vld [vmem:[#allocation32_spill] sm:$0xff] }
 0x51a   : > { %3342 = vmatpush1.bf16.msra.mxu0 %v9702_v47  ;;  %3383 = vmatpush1.bf16.msra.mxu1 %v9703_v20  ;;  %v9713_v47 = vld [vmem:[#allocation33_spill] sm:$0xff]  ;;  %v9714_v20 = vld [vmem:[#allocation34_spill] sm:$0xff] }
 0x51b   : > { %3343 = vmatprep.subr.bf16.mxu0 %v9704_v35  ;;  %3384 = vmatprep.subr.bf16.mxu1 %v9705_v42  ;;  %v9715_v35 = vld [vmem:[#allocation35_spill] sm:$0xff]  ;;  %v9716_v42 = vld [vmem:[#allocation36_spill] sm:$0xff] }
 0x51e   : > { %3344 = vmatpush1.bf16.msra.mxu0 %v9706_v21  ;;  %3385 = vmatpush1.bf16.msra.mxu1 %v9707_v34  ;;  %v9717_v21 = vld [vmem:[#allocation37_spill] sm:$0xff]  ;;  %v9718_v34 = vld [vmem:[#allocation38_spill] sm:$0xff] }
 0x51f   : > { %3345 = vmatprep.subr.bf16.mxu0 %v9708_v39  ;;  %3386 = vmatprep.subr.bf16.mxu1 %v9709_v25  ;;  %v9719_v39 = vld [vmem:[#allocation39_spill] sm:$0xff]  ;;  %v9720_v25 = vld [vmem:[#allocation40_spill] sm:$0xff] }
 0x522   : > { %3346 = vmatpush1.bf16.msra.mxu0 %v9710_v46  ;;  %3387 = vmatpush1.bf16.msra.mxu1 %v9711_v55  ;;  %v9721_v46 = vld [vmem:[#allocation41_spill] sm:$0xff]  ;;  %v9722_v55 = vld [vmem:[#allocation42_spill] sm:$0xff] }
 0x523   : > { %3347 = vmatprep.subr.bf16.mxu0 %v9712_v6  ;;  %3388 = vmatprep.subr.bf16.mxu1 %v9713_v47  ;;  %v9723_v6 = vld [vmem:[#allocation43_spill] sm:$0xff]  ;;  %v9724_v47 = vld [vmem:[#allocation44_spill] sm:$0xff] }
 0x526   : > { %3348 = vmatpush1.bf16.msra.mxu0 %v9714_v20  ;;  %3389 = vmatpush1.bf16.msra.mxu1 %v9715_v35  ;;  %v9725_v20 = vld [vmem:[#allocation45_spill] sm:$0xff]  ;;  %v9726_v35 = vld [vmem:[#allocation46_spill] sm:$0xff] }
 0x527   : > { %3349 = vmatprep.subr.bf16.mxu0 %v9716_v42  ;;  %3390 = vmatprep.subr.bf16.mxu1 %v9717_v21  ;;  %v9727_v42 = vld [vmem:[#allocation47_spill] sm:$0xff]  ;;  %v9728_v21 = vld [vmem:[#allocation48_spill] sm:$0xff] }
 0x52a   : > { %3350 = vmatpush1.bf16.msra.mxu0 %v9718_v34  ;;  %3391 = vmatpush1.bf16.msra.mxu1 %v9719_v39  ;;  %v9729_v34 = vld [vmem:[#allocation49_spill] sm:$0xff]  ;;  %v9730_v39 = vld [vmem:[#allocation50_spill] sm:$0xff] }
 0x52b   : > { %3351 = vmatprep.subr.bf16.mxu0 %v9720_v25  ;;  %3392 = vmatprep.subr.bf16.mxu1 %v9721_v46  ;;  %v9731_v25 = vld [vmem:[#allocation51_spill] sm:$0xff]  ;;  %v9732_v46 = vld [vmem:[#allocation52_spill] sm:$0xff] }
 0x52e   : > { %3352 = vmatpush1.bf16.msra.mxu0 %v9722_v55  ;;  %3393 = vmatpush1.bf16.msra.mxu1 %v9723_v6  ;;  %v9733_v55 = vld [vmem:[#allocation53_spill] sm:$0xff]  ;;  %v9734_v6 = vld [vmem:[#allocation54_spill] sm:$0xff] }
 0x52f   : > { %3353 = vmatprep.subr.bf16.mxu0 %v9724_v47  ;;  %3394 = vmatprep.subr.bf16.mxu1 %v9725_v20  ;;  %v9735_v47 = vld [vmem:[#allocation55_spill] sm:$0xff]  ;;  %v9736_v20 = vld [vmem:[#allocation56_spill] sm:$0xff] }
 0x532   : > { %3354 = vmatpush1.bf16.msra.mxu0 %v9726_v35  ;;  %3395 = vmatpush1.bf16.msra.mxu1 %v9727_v42  ;;  %v9737_v35 = vld [vmem:[#allocation57_spill] sm:$0xff]  ;;  %v9738_v42 = vld [vmem:[#allocation58_spill] sm:$0xff] }
 0x533   : > { %3355 = vmatprep.subr.bf16.mxu0 %v9728_v21  ;;  %3396 = vmatprep.subr.bf16.mxu1 %v9729_v34  ;;  %v9739_v21 = vld [vmem:[#allocation59_spill] sm:$0xff]  ;;  %v9740_v34 = vld [vmem:[#allocation60_spill] sm:$0xff] }
 0x536   : > { %3356 = vmatpush1.bf16.msra.mxu0 %v9730_v39  ;;  %3397 = vmatpush1.bf16.msra.mxu1 %v9731_v25  ;;  %v9741_v39 = vld [vmem:[#allocation61_spill] sm:$0xff]  ;;  %v9742_v25 = vld [vmem:[#allocation62_spill] sm:$0xff] }
 0x537   : > { %3357 = vmatprep.subr.bf16.mxu0 %v9732_v46  ;;  %3398 = vmatprep.subr.bf16.mxu1 %v9733_v55  ;;  %v9743_v46 = vld [vmem:[#allocation63_spill] sm:$0xff]  ;;  %v9744_v55 = vld [vmem:[#allocation64_spill] sm:$0xff] }
 0x53a   : > { %3358 = vmatpush1.bf16.msra.mxu0 %v9734_v6  ;;  %3399 = vmatpush1.bf16.msra.mxu1 %v9735_v47  ;;  %v9745_v6 = vld [vmem:[#allocation65_spill] sm:$0xff]  ;;  %v9746_v47 = vld [vmem:[#allocation66_spill] sm:$0xff] }
 0x53b   : > { %3359 = vmatprep.subr.bf16.mxu0 %v9736_v20  ;;  %3400 = vmatprep.subr.bf16.mxu1 %v9737_v35  ;;  %v9747_v20 = vld [vmem:[#allocation67_spill] sm:$0xff]  ;;  %v9748_v35 = vld [vmem:[#allocation68_spill] sm:$0xff] }
 0x53e   : > { %3360 = vmatpush1.bf16.msra.mxu0 %v9738_v42  ;;  %3401 = vmatpush1.bf16.msra.mxu1 %v9739_v21  ;;  %v9749_v42 = vld [vmem:[#allocation69_spill] sm:$0xff]  ;;  %v9750_v21 = vld [vmem:[#allocation70_spill] sm:$0xff] }
 0x53f   : > { %3361 = vmatprep.subr.bf16.mxu0 %v9740_v34  ;;  %3402 = vmatprep.subr.bf16.mxu1 %v9741_v39  ;;  %v9751_v34 = vld [vmem:[#allocation71_spill] sm:$0xff]  ;;  %v9752_v39 = vld [vmem:[#allocation72_spill] sm:$0xff] }
 0x542   : > { %3362 = vmatpush1.bf16.msra.mxu0 %v9742_v25  ;;  %3403 = vmatpush1.bf16.msra.mxu1 %v9743_v46  ;;  %v9753_v25 = vld [vmem:[#allocation73_spill] sm:$0xff] }
 0x543   : > { %3363 = vmatprep.subr.bf16.mxu0 %v9744_v55  ;;  %3404 = vmatprep.subr.bf16.mxu1 %v9745_v6 }
 0x546   : > { %3364 = vmatpush1.bf16.msra.mxu0 %v9746_v47  ;;  %3405 = vmatpush1.bf16.msra.mxu1 %v9747_v20 }
 0x547   : > { %3365 = vmatprep.subr.bf16.mxu0 %v9748_v35  ;;  %3406 = vmatprep.subr.bf16.mxu1 %v9749_v42 }
 0x54a   : > { %3366 = vmatpush1.bf16.msra.mxu0 %v9750_v21  ;;  %3407 = vmatpush1.bf16.msra.mxu1 %v9751_v34 }
 0x54b   : > { %3417 = vmatprep.subr.bf16.mxu0 %v9752_v39  ;;  %3458 = vmatprep.subr.bf16.mxu1 %v9753_v25 }
 0x5a0   : > { %v3130_v46 = vpop.f32.mrb[56].mxu0  ;;  %v3171_v55 = vpop.f32.mrb[56].mxu1 }
 0x5a1   : > { %v3260_v6 = vadd.f32 %v3130_v46, %v9754_v28  ;;  %v3262_v47 = vadd.f32 %v3171_v55, %v9755_v24  ;;  %v3132_v0 = vpop.f32.mrb[57].mxu0  ;;  %v3173_v20 = vpop.f32.mrb[57].mxu1 }
 0x5a2   : > { %v3261_v35 = vadd.f32 %v3132_v0, %v9756_v7  ;;  %v3263_v42 = vadd.f32 %v3173_v20, %v9757_v12  ;;  %v3134_v56 = vpop.f32.mrb[58].mxu0  ;;  %v3175_v21 = vpop.f32.mrb[58].mxu1 }
 0x5a3   : > { %v5792_v5 = vmul.f32 -1.442695, %v3262_v47  ;;  %v3135_v34 = vpop.f32.mrb[59].mxu0  ;;  %v3176_v54 = vpop.f32.mrb[59].mxu1  ;;  %v5790_v56 = vmul.f32 -1.442695, %v3260_v6 }
 0x5a4   : > { %v5793_v39 = vmul.f32 -1.442695, %v3263_v42  ;;  %v5791_v0 = vmul.f32 -1.442695, %v3261_v35  ;;  %v9761_v6 = vld [vmem:[#allocation176_spill] sm:$0xff] }
 0x5a5   : > { %6108 = vpow2.f32 %v5792_v5 }
 0x5a6   : > { %6110 = vpow2.f32 %v5793_v39 }
 0x5af   : > { %v6109_v25 = vpop.eup %6108 }
 0x5b0   : > { %v3286_v36 = vadd.f32 1.0, %v6109_v25  ;;  %v6111_v53 = vpop.eup %6110  ;;  %v9759_v25 = vld [vmem:[#allocation174_spill] sm:$0xff] }
 0x5b1   : > { %v3287_v28 = vadd.f32 1.0, %v6111_v53 }
 0x5b2   : > { %6112 = vrcp.f32 %v3286_v36  ;;  %v9758_v36 = vld [vmem:[#allocation173_spill] sm:$0xff] }
 0x5b3   : > { %6114 = vrcp.f32 %v3287_v28  ;;  %v9760_v28 = vld [vmem:[#allocation175_spill] sm:$0xff] }
 0x5b4   : > { %6116 = vpow2.f32 %v5790_v56 }
 0x5b5   : > { %6118 = vpow2.f32 %v5791_v0 }
 0x5bc   : > { %v6113_v24 = vpop.eup %6112 }
 0x5bd   : > { %v3306_v46 = vmul.f32 %v6113_v24, %v8006_v62  ;;  %v6115_v7 = vpop.eup %6114 }
 0x5be   : > { %v3307_v12 = vmul.f32 %v6115_v7, %v8009_v41  ;;  %v6117_v54 = vpop.eup %6116 }
 0x5bf   : > { %v6119_v42 = vpop.eup %6118  ;;  %v3274_v5 = vadd.f32 1.0, %v6117_v54 }
 0x5c0   : > { %v3275_v21 = vadd.f32 1.0, %v6119_v42 }
 0x5c1   : > { %6120 = vrcp.f32 %v3274_v5 }
 0x5c2   : > { %6122 = vrcp.f32 %v3275_v21 }
 0x5cb   : > { %v6121_v5 = vpop.eup %6120 }
 0x5e0   : > { %v3212_v34 = vpop.f32.mrb[60].mxu0  ;;  %v3253_v39 = vpop.f32.mrb[60].mxu1 }
 0x5e1   : > { %v3264_v53 = vadd.f32 %v3212_v34, %v9758_v36  ;;  %v3266_v47 = vadd.f32 %v3253_v39, %v9759_v25  ;;  %v3214_v20 = vpop.f32.mrb[61].mxu0  ;;  %v3255_v55 = vpop.f32.mrb[61].mxu1 }
 0x5e2   : > { %v3265_v24 = vadd.f32 %v3214_v20, %v9760_v28  ;;  %v3267_v35 = vadd.f32 %v3255_v55, %v9761_v6  ;;  %v3216_v7 = vpop.f32.mrb[62].mxu0  ;;  %v3257_v56 = vpop.f32.mrb[62].mxu1 }
 0x5e3   : > { %6124 = vtanh.f32 %v3264_v53  ;;  %v5794_v0 = vmul.f32 -1.442695, %v3266_v47  ;;  %v3217_v54 = vpop.f32.mrb[63].mxu0  ;;  %v3258_v42 = vpop.f32.mrb[63].mxu1 }
 0x5e4   : > { %6126 = vtanh.f32 %v3265_v24  ;;  %v5795_v58 = vmul.f32 -1.442695, %v3267_v35  ;;  %v6123_v34 = vpop.eup %6122  ;;  %v3321_v47 = vpop.permute.xlu1 %3320 }
 0x5e5   : > { %6128 = vpow2.f32 %v5794_v0 }
 0x5e6   : > { %6130 = vpow2.f32 %v5795_v58 }
 0x5ed   : > { %v6125_v39 = vpop.eup %6124 }
 0x5ee   : > { %v6127_v36 = vpop.eup %6126  ;;  %v3308_v25 = vmul.f32 %v6125_v39, %v6121_v5 }
 0x5ef   : > { %v6129_v21 = vpop.eup %6128  ;;  %v3309_v40 = vmul.f32 %v6127_v36, %v6123_v34 }
 0x5f0   : > { %v6131_v20 = vpop.eup %6130  ;;  %v3310_v28 = vadd.f32 %v3308_v25, %v3306_v46  ;;  %v3300_v55 = vadd.f32 1.0, %v6129_v21 }
 0x5f1   : > { %v3311_v6 = vadd.f32 %v3309_v40, %v3307_v12  ;;  %v3301_v7 = vadd.f32 1.0, %v6131_v20 }
 0x5f2   : > { %6132 = vtanh.f32 %v3310_v28  ;;  %v3327_v53 = vsub.f32 %v3310_v28, %v8006_v62  ;;  %v9764_v28 = vld [vmem:[#allocation113_spill] sm:$0xff] }
 0x5f3   : > { %6134 = vrcp.f32 %v3300_v55  ;;  %v3328_v24 = vsub.f32 %v3311_v6, %v8009_v41  ;;  %v9765_v55 = vld [vmem:[#allocation114_spill] sm:$0xff] }
 0x5f4   : > { %v3329_v58 = vmul.f32 %v3327_v53, %v3321_v47  ;;  %6136 = vtanh.f32 %v3311_v6  ;;  %v9766_v6 = vld [vmem:[#allocation115_spill] sm:$0xff]  ;;  %v9768_v53 = vld [vmem:[#allocation117_spill] sm:$0xff] }
 0x5f5   : > { %v3330_v35 = vmul.f32 %v3328_v24, %v3321_v47  ;;  %6138 = vrcp.f32 %v3301_v7  ;;  %v9767_v7 = vld [vmem:[#allocation116_spill] sm:$0xff]  ;;  %v9770_v24 = vld [vmem:[#allocation119_spill] sm:$0xff] }
 0x5f6   : > { %v8170_v56 = vadd.f32 %v3329_v58, %v8006_v62  ;;  %v9771_v58 = vld [vmem:[#allocation120_spill] sm:$0xff] }
 0x5f7   : > { %v8173_v0 = vadd.f32 %v3330_v35, %v8009_v41  ;;  %v9772_v35 = vld [vmem:[#allocation121_spill] sm:$0xff] }
 0x5fc   : > { %v6133_v46 = vpop.eup %6132 }
 0x5fd   : > { %v6135_v40 = vpop.eup %6134 }
 0x5fe   : > { %v6137_v12 = vpop.eup %6136  ;;  %v3314_v54 = vmul.f32 %v6135_v40, %v6133_v46  ;;  %v9773_v46 = vld [vmem:[#allocation122_spill] sm:$0xff]  ;;  %v9774_v40 = vld [vmem:[#allocation123_spill] sm:$0xff] }
 0x5ff   : > { %v6139_v42 = vpop.eup %6138 }
 0x600   : > { %v3315_v5 = vmul.f32 %v6139_v42, %v6137_v12  ;;  %v3316_v34 = vsub.f32 %v3314_v54, %v8014_v63  ;;  %v9775_v12 = vld [vmem:[#allocation124_spill] sm:$0xff]  ;;  %v9776_v54 = vld [vmem:[#allocation125_spill] sm:$0xff]  ;;  %v9777_v42 = vld [vmem:[#allocation126_spill] sm:$0xff] }
 0x602   : > { %v3317_v39 = vsub.f32 %v3315_v5, %v8017_v29  ;;  %v3323_v36 = vmul.f32 %v3321_v47, %v3316_v34  ;;  %v9778_v5 = vld [vmem:[#allocation127_spill] sm:$0xff]  ;;  %v9779_v34 = vld [vmem:[#allocation128_spill] sm:$0xff] }
 0x604   : > { %v3324_v25 = vmul.f32 %v3321_v47, %v3317_v39  ;;  %v8178_v21 = vadd.f32 %v3323_v36, %v8014_v63  ;;  %v9762_v63 = vld [vmem:[#allocation111_spill] sm:$0xff]  ;;  %v9769_v47 = vld [vmem:[#allocation118_spill] sm:$0xff]  ;;  %v9780_v39 = vld [vmem:[#allocation129_spill] sm:$0xff] }
 0x605   : > { %v9781_v36 = vld [vmem:[#allocation130_spill] sm:$0xff] }
 0x606   : > { %v8181_v62 = vadd.f32 %v3324_v25, %v8017_v29  ;;  %v8187_v20 = vpack.c.bf16 %v8178_v21, %v8178_v21  ;;  %v9763_v29 = vld [vmem:[#allocation112_spill] sm:$0xff]  ;;  %v9782_v25 = vld [vmem:[#allocation131_spill] sm:$0xff] }
 0x608   : > { %v3334_v41 = vpack.c.bf16 %v8181_v62, %v8181_v62 }
 0x60a   : > { %3367 = vmatprep.mubr.bf16.mxu0 %v3334_v41  ;;  %3408 = vmatprep.mubr.bf16.mxu1 %v3334_v41 }
 0x60b   : > { %3368 = vmatmul.mubr.bf16.vlgmr.msra.gmra.mrb[64].mxu0 %v8187_v20  ;;  %3409 = vmatmul.mubr.bf16.vlgmr.msra.gmra.mrb[64].mxu1 %v8187_v20 }
 0x60c   : > { %3418 = vmatpush1.bf16.msra.mxu0 %v9460_v16  ;;  %3459 = vmatpush1.bf16.msra.mxu1 %v9461_v38 }
 0x60d   : > { %3449 = vmatprep.mubr.bf16.mxu0 %v3334_v41  ;;  %3490 = vmatprep.mubr.bf16.mxu1 %v3334_v41  ;;  %v9783_v41 = vld [vmem:[#allocation132_spill] sm:$0xff] }
 0x60e   : > { %3419 = vmatprep.subr.bf16.mxu0 %v9462_v15  ;;  %3460 = vmatprep.subr.bf16.mxu1 %v9463_v8 }
 0x610   : > { %3420 = vmatpush1.bf16.msra.mxu0 %v9464_v27  ;;  %3461 = vmatpush1.bf16.msra.mxu1 %v9465_v11 }
 0x611   : > { %3421 = vmatprep.subr.bf16.mxu0 %v9466_v22  ;;  %3462 = vmatprep.subr.bf16.mxu1 %v9467_v1 }
 0x614   : > { %3422 = vmatpush1.bf16.msra.mxu0 %v9468_v32  ;;  %3463 = vmatpush1.bf16.msra.mxu1 %v9469_v13 }
 0x615   : > { %3423 = vmatprep.subr.bf16.mxu0 %v9470_v17  ;;  %3464 = vmatprep.subr.bf16.mxu1 %v9471_v18 }
 0x618   : > { %3424 = vmatpush1.bf16.msra.mxu0 %v9472_v19  ;;  %3465 = vmatpush1.bf16.msra.mxu1 %v9473_v48 }
 0x619   : > { %3425 = vmatprep.subr.bf16.mxu0 %v9474_v33  ;;  %3466 = vmatprep.subr.bf16.mxu1 %v9564_v14 }
 0x61c   : > { %3426 = vmatpush1.bf16.msra.mxu0 %v9565_v10  ;;  %3467 = vmatpush1.bf16.msra.mxu1 %v9566_v61 }
 0x61d   : > { %3427 = vmatprep.subr.bf16.mxu0 %v9567_v57  ;;  %3468 = vmatprep.subr.bf16.mxu1 %v9568_v4 }
 0x620   : > { %3428 = vmatpush1.bf16.msra.mxu0 %v9569_v31  ;;  %3469 = vmatpush1.bf16.msra.mxu1 %v9570_v52 }
 0x621   : > { %3429 = vmatprep.subr.bf16.mxu0 %v9571_v51  ;;  %3470 = vmatprep.subr.bf16.mxu1 %v9572_v2 }
 0x624   : > { %3430 = vmatpush1.bf16.msra.mxu0 %v9573_v43  ;;  %3471 = vmatpush1.bf16.msra.mxu1 %v9574_v23 }
 0x625   : > { %3431 = vmatprep.subr.bf16.mxu0 %v9575_v45  ;;  %3472 = vmatprep.subr.bf16.mxu1 %v9576_v50 }
 0x628   : > { %3432 = vmatpush1.bf16.msra.mxu0 %v9577_v9  ;;  %3473 = vmatpush1.bf16.msra.mxu1 %v9663_v49 }
 0x629   : > { %3433 = vmatprep.subr.bf16.mxu0 %v9579_v59  ;;  %3474 = vmatprep.subr.bf16.mxu1 %v9580_v37 }
 0x62c   : > { %3434 = vmatpush1.bf16.msra.mxu0 %v9581_v26  ;;  %3475 = vmatpush1.bf16.msra.mxu1 %v9582_v60 }
 0x62d   : > { %3435 = vmatprep.subr.bf16.mxu0 %v9583_v3  ;;  %3476 = vmatprep.subr.bf16.mxu1 %v9584_v30 }
 0x630   : > { %3436 = vmatpush1.bf16.msra.mxu0 %v9585_v44  ;;  %3477 = vmatpush1.bf16.msra.mxu1 %v9762_v63 }
 0x631   : > { %3437 = vmatprep.subr.bf16.mxu0 %v9763_v29  ;;  %3478 = vmatprep.subr.bf16.mxu1 %v9764_v28 }
 0x634   : > { %3438 = vmatpush1.bf16.msra.mxu0 %v9765_v55  ;;  %3479 = vmatpush1.bf16.msra.mxu1 %v9766_v6 }
 0x635   : > { %3439 = vmatprep.subr.bf16.mxu0 %v9767_v7  ;;  %3480 = vmatprep.subr.bf16.mxu1 %v9768_v53 }
 0x638   : > { %3440 = vmatpush1.bf16.msra.mxu0 %v9769_v47  ;;  %3481 = vmatpush1.bf16.msra.mxu1 %v9770_v24  ;;  %v9855_v24 = vld [vmem:[#allocation151_spill] sm:$0xff]  ;;  %v9856_v47 = vld [vmem:[#allocation152_spill] sm:$0xff] }
 0x639   : > { %3441 = vmatprep.subr.bf16.mxu0 %v9771_v58  ;;  %3482 = vmatprep.subr.bf16.mxu1 %v9772_v35  ;;  %v9854_v35 = vld [vmem:[#allocation150_spill] sm:$0xff] }
 0x63c   : > { %3442 = vmatpush1.bf16.msra.mxu0 %v9773_v46  ;;  %3483 = vmatpush1.bf16.msra.mxu1 %v9774_v40  ;;  %v9784_v46 = vld [vmem:[#allocation133_spill] sm:$0xff]  ;;  %v9785_v40 = vld [vmem:[#allocation134_spill] sm:$0xff] }
 0x63d   : > { %3443 = vmatprep.subr.bf16.mxu0 %v9775_v12  ;;  %3484 = vmatprep.subr.bf16.mxu1 %v9776_v54  ;;  %v9786_v12 = vld [vmem:[#allocation135_spill] sm:$0xff]  ;;  %v9787_v54 = vld [vmem:[#allocation8_spill] sm:$0xff] }
 0x640   : > { %3444 = vmatpush1.bf16.msra.mxu0 %v9777_v42  ;;  %3485 = vmatpush1.bf16.msra.mxu1 %v9778_v5  ;;  %v9788_v42 = vld [vmem:[#allocation9_spill] sm:$0xff] }
 0x641   : > { %3445 = vmatprep.subr.bf16.mxu0 %v9779_v34  ;;  %3486 = vmatprep.subr.bf16.mxu1 %v9780_v39  ;;  %v9789_v39 = vld [vmem:[#allocation10_spill] sm:$0xff]  ;;  %v9798_v34 = vld [vmem:[#allocation19_spill] sm:$0xff]  ;;  %v9853_v5 = vld [vmem:[#allocation149_spill] sm:$0xff] }
 0x644   : > { %3446 = vmatpush1.bf16.msra.mxu0 %v9781_v36  ;;  %3487 = vmatpush1.bf16.msra.mxu1 %v9782_v25  ;;  %v9790_v36 = vld [vmem:[#allocation11_spill] sm:$0xff]  ;;  %v9791_v25 = vld [vmem:[#allocation12_spill] sm:$0xff] }
 0x645   : > { %3447 = vmatprep.subr.bf16.mxu0 %v9783_v41  ;;  %3488 = vmatprep.subr.bf16.mxu1 %v9784_v46  ;;  %v9792_v41 = vld [vmem:[#allocation13_spill] sm:$0xff]  ;;  %v9793_v46 = vld [vmem:[#allocation14_spill] sm:$0xff] }
 0x648   : > { %3448 = vmatpush1.bf16.msra.mxu0 %v9785_v40  ;;  %3489 = vmatpush1.bf16.msra.mxu1 %v9786_v12  ;;  %v9794_v40 = vld [vmem:[#allocation15_spill] sm:$0xff]  ;;  %v9795_v12 = vld [vmem:[#allocation16_spill] sm:$0xff] }
 0x649   : > { %3574 = vmatprep.subr.bf16.mxu0 %v9787_v54  ;;  %3615 = vmatprep.subr.bf16.mxu1 %v9788_v42  ;;  %v9796_v54 = vld [vmem:[#allocation17_spill] sm:$0xff]  ;;  %v9797_v42 = vld [vmem:[#allocation18_spill] sm:$0xff] }
 0x64b   : > { %3450 = vmatmul.mubr.bf16.vlgmr.msra.gmra.mrb[68].mxu0 %v8187_v20  ;;  %3491 = vmatmul.mubr.bf16.vlgmr.msra.gmra.mrb[68].mxu1 %v8187_v20  ;;  %v9799_v20 = vld [vmem:[#allocation20_spill] sm:$0xff] }
 0x64c   : > { %3575 = vmatpush1.bf16.msra.mxu0 %v9789_v39  ;;  %3616 = vmatpush1.bf16.msra.mxu1 %v9790_v36  ;;  %v9800_v39 = vld [vmem:[#allocation21_spill] sm:$0xff]  ;;  %v9801_v36 = vld [vmem:[#allocation22_spill] sm:$0xff] }
 0x64d   : > { %3576 = vmatprep.subr.bf16.mxu0 %v9791_v25  ;;  %3617 = vmatprep.subr.bf16.mxu1 %v9792_v41  ;;  %v9802_v25 = vld [vmem:[#allocation23_spill] sm:$0xff]  ;;  %v9803_v41 = vld [vmem:[#allocation24_spill] sm:$0xff] }
 0x650   : > { %3577 = vmatpush1.bf16.msra.mxu0 %v9793_v46  ;;  %3618 = vmatpush1.bf16.msra.mxu1 %v9794_v40  ;;  %v9804_v46 = vld [vmem:[#allocation25_spill] sm:$0xff]  ;;  %v9805_v40 = vld [vmem:[#allocation26_spill] sm:$0xff] }
 0x651   : > { %3578 = vmatprep.subr.bf16.mxu0 %v9795_v12  ;;  %3619 = vmatprep.subr.bf16.mxu1 %v9796_v54  ;;  %v9806_v12 = vld [vmem:[#allocation27_spill] sm:$0xff]  ;;  %v9807_v54 = vld [vmem:[#allocation28_spill] sm:$0xff] }
 0x654   : > { %3579 = vmatpush1.bf16.msra.mxu0 %v9797_v42  ;;  %3620 = vmatpush1.bf16.msra.mxu1 %v9798_v34  ;;  %v9808_v42 = vld [vmem:[#allocation29_spill] sm:$0xff]  ;;  %v9809_v34 = vld [vmem:[#allocation30_spill] sm:$0xff] }
 0x655   : > { %3580 = vmatprep.subr.bf16.mxu0 %v9799_v20  ;;  %3621 = vmatprep.subr.bf16.mxu1 %v9800_v39  ;;  %v9810_v20 = vld [vmem:[#allocation31_spill] sm:$0xff]  ;;  %v9811_v39 = vld [vmem:[#allocation32_spill] sm:$0xff] }
 0x658   : > { %3581 = vmatpush1.bf16.msra.mxu0 %v9801_v36  ;;  %3622 = vmatpush1.bf16.msra.mxu1 %v9802_v25  ;;  %v9812_v36 = vld [vmem:[#allocation33_spill] sm:$0xff]  ;;  %v9813_v25 = vld [vmem:[#allocation34_spill] sm:$0xff] }
 0x659   : > { %3582 = vmatprep.subr.bf16.mxu0 %v9803_v41  ;;  %3623 = vmatprep.subr.bf16.mxu1 %v9804_v46  ;;  %v9814_v41 = vld [vmem:[#allocation35_spill] sm:$0xff]  ;;  %v9815_v46 = vld [vmem:[#allocation36_spill] sm:$0xff] }
 0x65c   : > { %3583 = vmatpush1.bf16.msra.mxu0 %v9805_v40  ;;  %3624 = vmatpush1.bf16.msra.mxu1 %v9806_v12  ;;  %v9816_v40 = vld [vmem:[#allocation37_spill] sm:$0xff]  ;;  %v9817_v12 = vld [vmem:[#allocation38_spill] sm:$0xff] }
 0x65d   : > { %3584 = vmatprep.subr.bf16.mxu0 %v9807_v54  ;;  %3625 = vmatprep.subr.bf16.mxu1 %v9808_v42  ;;  %v9818_v54 = vld [vmem:[#allocation39_spill] sm:$0xff]  ;;  %v9819_v42 = vld [vmem:[#allocation40_spill] sm:$0xff] }
 0x660   : > { %3585 = vmatpush1.bf16.msra.mxu0 %v9809_v34  ;;  %3626 = vmatpush1.bf16.msra.mxu1 %v9810_v20  ;;  %v9820_v34 = vld [vmem:[#allocation41_spill] sm:$0xff]  ;;  %v9821_v20 = vld [vmem:[#allocation42_spill] sm:$0xff] }
 0x661   : > { %3586 = vmatprep.subr.bf16.mxu0 %v9811_v39  ;;  %3627 = vmatprep.subr.bf16.mxu1 %v9812_v36  ;;  %v9822_v39 = vld [vmem:[#allocation43_spill] sm:$0xff]  ;;  %v9823_v36 = vld [vmem:[#allocation44_spill] sm:$0xff] }
 0x664   : > { %3587 = vmatpush1.bf16.msra.mxu0 %v9813_v25  ;;  %3628 = vmatpush1.bf16.msra.mxu1 %v9814_v41  ;;  %v9824_v25 = vld [vmem:[#allocation45_spill] sm:$0xff]  ;;  %v9825_v41 = vld [vmem:[#allocation46_spill] sm:$0xff] }
 0x665   : > { %3588 = vmatprep.subr.bf16.mxu0 %v9815_v46  ;;  %3629 = vmatprep.subr.bf16.mxu1 %v9816_v40  ;;  %v9826_v46 = vld [vmem:[#allocation47_spill] sm:$0xff]  ;;  %v9827_v40 = vld [vmem:[#allocation48_spill] sm:$0xff] }
 0x668   : > { %3589 = vmatpush1.bf16.msra.mxu0 %v9817_v12  ;;  %3630 = vmatpush1.bf16.msra.mxu1 %v9818_v54  ;;  %v9828_v12 = vld [vmem:[#allocation49_spill] sm:$0xff]  ;;  %v9829_v54 = vld [vmem:[#allocation50_spill] sm:$0xff] }
 0x669   : > { %3590 = vmatprep.subr.bf16.mxu0 %v9819_v42  ;;  %3631 = vmatprep.subr.bf16.mxu1 %v9820_v34  ;;  %v9830_v42 = vld [vmem:[#allocation51_spill] sm:$0xff]  ;;  %v9831_v34 = vld [vmem:[#allocation52_spill] sm:$0xff] }
 0x66c   : > { %3591 = vmatpush1.bf16.msra.mxu0 %v9821_v20  ;;  %3632 = vmatpush1.bf16.msra.mxu1 %v9822_v39  ;;  %v9832_v20 = vld [vmem:[#allocation53_spill] sm:$0xff]  ;;  %v9833_v39 = vld [vmem:[#allocation54_spill] sm:$0xff] }
 0x66d   : > { %3592 = vmatprep.subr.bf16.mxu0 %v9823_v36  ;;  %3633 = vmatprep.subr.bf16.mxu1 %v9824_v25  ;;  %v9834_v36 = vld [vmem:[#allocation55_spill] sm:$0xff]  ;;  %v9835_v25 = vld [vmem:[#allocation56_spill] sm:$0xff] }
 0x670   : > { %3593 = vmatpush1.bf16.msra.mxu0 %v9825_v41  ;;  %3634 = vmatpush1.bf16.msra.mxu1 %v9826_v46  ;;  %v9836_v41 = vld [vmem:[#allocation57_spill] sm:$0xff]  ;;  %v9837_v46 = vld [vmem:[#allocation58_spill] sm:$0xff] }
 0x671   : > { %3594 = vmatprep.subr.bf16.mxu0 %v9827_v40  ;;  %3635 = vmatprep.subr.bf16.mxu1 %v9828_v12  ;;  %v9838_v40 = vld [vmem:[#allocation59_spill] sm:$0xff]  ;;  %v9839_v12 = vld [vmem:[#allocation60_spill] sm:$0xff] }
 0x674   : > { %3595 = vmatpush1.bf16.msra.mxu0 %v9829_v54  ;;  %3636 = vmatpush1.bf16.msra.mxu1 %v9830_v42  ;;  %v9840_v54 = vld [vmem:[#allocation61_spill] sm:$0xff]  ;;  %v9841_v42 = vld [vmem:[#allocation62_spill] sm:$0xff] }
 0x675   : > { %3596 = vmatprep.subr.bf16.mxu0 %v9831_v34  ;;  %3637 = vmatprep.subr.bf16.mxu1 %v9832_v20  ;;  %v9842_v34 = vld [vmem:[#allocation63_spill] sm:$0xff]  ;;  %v9843_v20 = vld [vmem:[#allocation64_spill] sm:$0xff] }
 0x678   : > { %3597 = vmatpush1.bf16.msra.mxu0 %v9833_v39  ;;  %3638 = vmatpush1.bf16.msra.mxu1 %v9834_v36  ;;  %v9844_v39 = vld [vmem:[#allocation65_spill] sm:$0xff]  ;;  %v9845_v36 = vld [vmem:[#allocation66_spill] sm:$0xff] }
 0x679   : > { %3598 = vmatprep.subr.bf16.mxu0 %v9835_v25  ;;  %3639 = vmatprep.subr.bf16.mxu1 %v9836_v41  ;;  %v9846_v25 = vld [vmem:[#allocation67_spill] sm:$0xff]  ;;  %v9847_v41 = vld [vmem:[#allocation68_spill] sm:$0xff] }
 0x67c   : > { %3599 = vmatpush1.bf16.msra.mxu0 %v9837_v46  ;;  %3640 = vmatpush1.bf16.msra.mxu1 %v9838_v40  ;;  %v9848_v46 = vld [vmem:[#allocation69_spill] sm:$0xff]  ;;  %v9849_v40 = vld [vmem:[#allocation70_spill] sm:$0xff] }
 0x67d   : > { %3600 = vmatprep.subr.bf16.mxu0 %v9839_v12  ;;  %3641 = vmatprep.subr.bf16.mxu1 %v9840_v54  ;;  %v9850_v12 = vld [vmem:[#allocation71_spill] sm:$0xff]  ;;  %v9851_v54 = vld [vmem:[#allocation72_spill] sm:$0xff] }
 0x680   : > { %3601 = vmatpush1.bf16.msra.mxu0 %v9841_v42  ;;  %3642 = vmatpush1.bf16.msra.mxu1 %v9842_v34  ;;  %v9852_v42 = vld [vmem:[#allocation73_spill] sm:$0xff] }
 0x681   : > { %3602 = vmatprep.subr.bf16.mxu0 %v9843_v20  ;;  %3643 = vmatprep.subr.bf16.mxu1 %v9844_v39 }
 0x684   : > { %3603 = vmatpush1.bf16.msra.mxu0 %v9845_v36  ;;  %3644 = vmatpush1.bf16.msra.mxu1 %v9846_v25 }
 0x685   : > { %3604 = vmatprep.subr.bf16.mxu0 %v9847_v41  ;;  %3645 = vmatprep.subr.bf16.mxu1 %v9848_v46 }
 0x688   : > { %3605 = vmatpush1.bf16.msra.mxu0 %v9849_v40  ;;  %3646 = vmatpush1.bf16.msra.mxu1 %v9850_v12 }
 0x689   : > { %3656 = vmatprep.subr.bf16.mxu0 %v9851_v54  ;;  %3697 = vmatprep.subr.bf16.mxu1 %v9852_v42 }
 0x6de   : > { %v3369_v34 = vpop.f32.mrb[64].mxu0  ;;  %v3410_v20 = vpop.f32.mrb[64].mxu1 }
 0x6df   : > { %v3499_v39 = vadd.f32 %v3369_v34, %v9853_v5  ;;  %v3501_v36 = vadd.f32 %v3410_v20, %v9854_v35  ;;  %v3371_v58 = vpop.f32.mrb[65].mxu0  ;;  %v3412_v25 = vpop.f32.mrb[65].mxu1 }
 0x6e0   : > { %v3500_v41 = vadd.f32 %v3371_v58, %v9855_v24  ;;  %v3502_v46 = vadd.f32 %v3412_v25, %v9856_v47  ;;  %v3373_v53 = vpop.f32.mrb[66].mxu0  ;;  %v3414_v40 = vpop.f32.mrb[66].mxu1 }
 0x6e1   : > { %v5798_v7 = vmul.f32 -1.442695, %v3501_v36  ;;  %v3374_v12 = vpop.f32.mrb[67].mxu0  ;;  %v3415_v6 = vpop.f32.mrb[67].mxu1  ;;  %v5796_v53 = vmul.f32 -1.442695, %v3499_v39 }
 0x6e2   : > { %v5799_v54 = vmul.f32 -1.442695, %v3502_v46  ;;  %v5797_v58 = vmul.f32 -1.442695, %v3500_v41  ;;  %v9860_v39 = vld [vmem:[#allocation180_spill] sm:$0xff] }
 0x6e3   : > { %6140 = vpow2.f32 %v5798_v7 }
 0x6e4   : > { %6142 = vpow2.f32 %v5799_v54 }
 0x6ed   : > { %v6141_v42 = vpop.eup %6140 }
 0x6ee   : > { %v3525_v55 = vadd.f32 1.0, %v6141_v42  ;;  %v6143_v28 = vpop.eup %6142  ;;  %v9858_v42 = vld [vmem:[#allocation178_spill] sm:$0xff] }
 0x6ef   : > { %v3526_v5 = vadd.f32 1.0, %v6143_v28 }
 0x6f0   : > { %6144 = vrcp.f32 %v3525_v55  ;;  %v9857_v55 = vld [vmem:[#allocation177_spill] sm:$0xff] }
 0x6f1   : > { %6146 = vrcp.f32 %v3526_v5  ;;  %v9859_v5 = vld [vmem:[#allocation179_spill] sm:$0xff] }
 0x6f2   : > { %6148 = vpow2.f32 %v5796_v53 }
 0x6f3   : > { %6150 = vpow2.f32 %v5797_v58 }
 0x6fa   : > { %v6145_v35 = vpop.eup %6144 }
 0x6fb   : > { %v3545_v34 = vmul.f32 %v6145_v35, %v8170_v56  ;;  %v6147_v24 = vpop.eup %6146 }
 0x6fc   : > { %v3546_v47 = vmul.f32 %v6147_v24, %v8173_v0  ;;  %v6149_v6 = vpop.eup %6148 }
 0x6fd   : > { %v6151_v46 = vpop.eup %6150  ;;  %v3513_v7 = vadd.f32 1.0, %v6149_v6 }
 0x6fe   : > { %v3514_v40 = vadd.f32 1.0, %v6151_v46 }
 0x6ff   : > { %6152 = vrcp.f32 %v3513_v7 }
 0x700   : > { %6154 = vrcp.f32 %v3514_v40 }
 0x709   : > { %v6153_v7 = vpop.eup %6152 }
 0x71e   : > { %v3451_v12 = vpop.f32.mrb[68].mxu0  ;;  %v3492_v54 = vpop.f32.mrb[68].mxu1 }
 0x71f   : > { %v3503_v28 = vadd.f32 %v3451_v12, %v9857_v55  ;;  %v3505_v36 = vadd.f32 %v3492_v54, %v9858_v42  ;;  %v3453_v25 = vpop.f32.mrb[69].mxu0  ;;  %v3494_v20 = vpop.f32.mrb[69].mxu1 }
 0x720   : > { %v3504_v35 = vadd.f32 %v3453_v25, %v9859_v5  ;;  %v3506_v41 = vadd.f32 %v3494_v20, %v9860_v39  ;;  %v3455_v24 = vpop.f32.mrb[70].mxu0  ;;  %v3496_v53 = vpop.f32.mrb[70].mxu1 }
 0x721   : > { %6156 = vtanh.f32 %v3503_v28  ;;  %v5800_v58 = vmul.f32 -1.442695, %v3505_v36  ;;  %v3456_v6 = vpop.f32.mrb[71].mxu0  ;;  %v3497_v46 = vpop.f32.mrb[71].mxu1 }
 0x722   : > { %6158 = vtanh.f32 %v3504_v35  ;;  %v5801_v29 = vmul.f32 -1.442695, %v3506_v41  ;;  %v6155_v12 = vpop.eup %6154  ;;  %v3560_v36 = vpop.permute.xlu0 %3559 }
 0x723   : > { %6160 = vpow2.f32 %v5800_v58 }
 0x724   : > { %6162 = vpow2.f32 %v5801_v29 }
 0x72b   : > { %v6157_v54 = vpop.eup %6156 }
 0x72c   : > { %v6159_v55 = vpop.eup %6158  ;;  %v3547_v42 = vmul.f32 %v6157_v54, %v6153_v7 }
 0x72d   : > { %v6161_v40 = vpop.eup %6160  ;;  %v3548_v63 = vmul.f32 %v6159_v55, %v6155_v12 }
 0x72e   : > { %v6163_v25 = vpop.eup %6162  ;;  %v3549_v5 = vadd.f32 %v3547_v42, %v3545_v34  ;;  %v3539_v20 = vadd.f32 1.0, %v6161_v40 }
 0x72f   : > { %v3550_v39 = vadd.f32 %v3548_v63, %v3546_v47  ;;  %v3540_v24 = vadd.f32 1.0, %v6163_v25 }
 0x730   : > { %6164 = vtanh.f32 %v3549_v5  ;;  %v3566_v28 = vsub.f32 %v3549_v5, %v8170_v56  ;;  %v9863_v5 = vld [vmem:[#allocation113_spill] sm:$0xff] }
 0x731   : > { %6166 = vrcp.f32 %v3539_v20  ;;  %v3567_v35 = vsub.f32 %v3550_v39, %v8173_v0  ;;  %v9864_v20 = vld [vmem:[#allocation114_spill] sm:$0xff] }
 0x732   : > { %v3568_v29 = vmul.f32 %v3566_v28, %v3560_v36  ;;  %6168 = vtanh.f32 %v3550_v39  ;;  %v9865_v39 = vld [vmem:[#allocation115_spill] sm:$0xff]  ;;  %v9867_v28 = vld [vmem:[#allocation117_spill] sm:$0xff] }
 0x733   : > { %v3569_v41 = vmul.f32 %v3567_v35, %v3560_v36  ;;  %6170 = vrcp.f32 %v3540_v24  ;;  %v9866_v24 = vld [vmem:[#allocation116_spill] sm:$0xff]  ;;  %v9869_v35 = vld [vmem:[#allocation119_spill] sm:$0xff] }
 0x734   : > { %v8334_v53 = vadd.f32 %v3568_v29, %v8170_v56  ;;  %v9870_v29 = vld [vmem:[#allocation120_spill] sm:$0xff] }
 0x735   : > { %v8337_v58 = vadd.f32 %v3569_v41, %v8173_v0  ;;  %v9871_v41 = vld [vmem:[#allocation121_spill] sm:$0xff] }
 0x73a   : > { %v6165_v34 = vpop.eup %6164 }
 0x73b   : > { %v6167_v63 = vpop.eup %6166 }
 0x73c   : > { %v6169_v47 = vpop.eup %6168  ;;  %v3553_v6 = vmul.f32 %v6167_v63, %v6165_v34  ;;  %v9872_v34 = vld [vmem:[#allocation122_spill] sm:$0xff]  ;;  %v9873_v63 = vld [vmem:[#allocation123_spill] sm:$0xff] }
 0x73d   : > { %v6171_v46 = vpop.eup %6170 }
 0x73e   : > { %v3554_v7 = vmul.f32 %v6171_v46, %v6169_v47  ;;  %v3555_v12 = vsub.f32 %v3553_v6, %v8178_v21  ;;  %v9874_v47 = vld [vmem:[#allocation124_spill] sm:$0xff]  ;;  %v9875_v6 = vld [vmem:[#allocation125_spill] sm:$0xff]  ;;  %v9876_v46 = vld [vmem:[#allocation126_spill] sm:$0xff] }
 0x740   : > { %v3556_v54 = vsub.f32 %v3554_v7, %v8181_v62  ;;  %v3562_v55 = vmul.f32 %v3560_v36, %v3555_v12  ;;  %v9877_v7 = vld [vmem:[#allocation127_spill] sm:$0xff]  ;;  %v9878_v12 = vld [vmem:[#allocation128_spill] sm:$0xff] }
 0x742   : > { %v3563_v42 = vmul.f32 %v3560_v36, %v3556_v54  ;;  %v8342_v40 = vadd.f32 %v3562_v55, %v8178_v21  ;;  %v9861_v21 = vld [vmem:[#allocation111_spill] sm:$0xff]  ;;  %v9868_v36 = vld [vmem:[#allocation118_spill] sm:$0xff]  ;;  %v9879_v54 = vld [vmem:[#allocation129_spill] sm:$0xff] }
 0x743   : > { %v9880_v55 = vld [vmem:[#allocation130_spill] sm:$0xff] }
 0x744   : > { %v8345_v56 = vadd.f32 %v3563_v42, %v8181_v62  ;;  %v8351_v25 = vpack.c.bf16 %v8342_v40, %v8342_v40  ;;  %v9862_v62 = vld [vmem:[#allocation112_spill] sm:$0xff]  ;;  %v9881_v42 = vld [vmem:[#allocation131_spill] sm:$0xff] }
 0x746   : > { %v3573_v0 = vpack.c.bf16 %v8345_v56, %v8345_v56 }
 0x748   : > { %3606 = vmatprep.mubr.bf16.mxu0 %v3573_v0  ;;  %3647 = vmatprep.mubr.bf16.mxu1 %v3573_v0 }
 0x749   : > { %3607 = vmatmul.mubr.bf16.vlgmr.msra.gmra.mrb[72].mxu0 %v8351_v25  ;;  %3648 = vmatmul.mubr.bf16.vlgmr.msra.gmra.mrb[72].mxu1 %v8351_v25 }
 0x74a   : > { %3657 = vmatpush1.bf16.msra.mxu0 %v9460_v16  ;;  %3698 = vmatpush1.bf16.msra.mxu1 %v9461_v38 }
 0x74b   : > { %3688 = vmatprep.mubr.bf16.mxu0 %v3573_v0  ;;  %3729 = vmatprep.mubr.bf16.mxu1 %v3573_v0  ;;  %v9882_v0 = vld [vmem:[#allocation132_spill] sm:$0xff] }
 0x74c   : > { %3658 = vmatprep.subr.bf16.mxu0 %v9462_v15  ;;  %3699 = vmatprep.subr.bf16.mxu1 %v9463_v8 }
 0x74e   : > { %3659 = vmatpush1.bf16.msra.mxu0 %v9464_v27  ;;  %3700 = vmatpush1.bf16.msra.mxu1 %v9465_v11 }
 0x74f   : > { %3660 = vmatprep.subr.bf16.mxu0 %v9466_v22  ;;  %3701 = vmatprep.subr.bf16.mxu1 %v9467_v1 }
 0x752   : > { %3661 = vmatpush1.bf16.msra.mxu0 %v9468_v32  ;;  %3702 = vmatpush1.bf16.msra.mxu1 %v9469_v13 }
 0x753   : > { %3662 = vmatprep.subr.bf16.mxu0 %v9470_v17  ;;  %3703 = vmatprep.subr.bf16.mxu1 %v9471_v18 }
 0x756   : > { %3663 = vmatpush1.bf16.msra.mxu0 %v9472_v19  ;;  %3704 = vmatpush1.bf16.msra.mxu1 %v9473_v48 }
 0x757   : > { %3664 = vmatprep.subr.bf16.mxu0 %v9474_v33  ;;  %3705 = vmatprep.subr.bf16.mxu1 %v9564_v14 }
 0x75a   : > { %3665 = vmatpush1.bf16.msra.mxu0 %v9565_v10  ;;  %3706 = vmatpush1.bf16.msra.mxu1 %v9566_v61 }
 0x75b   : > { %3666 = vmatprep.subr.bf16.mxu0 %v9567_v57  ;;  %3707 = vmatprep.subr.bf16.mxu1 %v9568_v4 }
 0x75e   : > { %3667 = vmatpush1.bf16.msra.mxu0 %v9569_v31  ;;  %3708 = vmatpush1.bf16.msra.mxu1 %v9570_v52 }
 0x75f   : > { %3668 = vmatprep.subr.bf16.mxu0 %v9571_v51  ;;  %3709 = vmatprep.subr.bf16.mxu1 %v9572_v2 }
 0x762   : > { %3669 = vmatpush1.bf16.msra.mxu0 %v9573_v43  ;;  %3710 = vmatpush1.bf16.msra.mxu1 %v9574_v23 }
 0x763   : > { %3670 = vmatprep.subr.bf16.mxu0 %v9575_v45  ;;  %3711 = vmatprep.subr.bf16.mxu1 %v9576_v50 }
 0x766   : > { %3671 = vmatpush1.bf16.msra.mxu0 %v9577_v9  ;;  %3712 = vmatpush1.bf16.msra.mxu1 %v9663_v49 }
 0x767   : > { %3672 = vmatprep.subr.bf16.mxu0 %v9579_v59  ;;  %3713 = vmatprep.subr.bf16.mxu1 %v9580_v37 }
 0x76a   : > { %3673 = vmatpush1.bf16.msra.mxu0 %v9581_v26  ;;  %3714 = vmatpush1.bf16.msra.mxu1 %v9582_v60 }
 0x76b   : > { %3674 = vmatprep.subr.bf16.mxu0 %v9583_v3  ;;  %3715 = vmatprep.subr.bf16.mxu1 %v9584_v30 }
 0x76e   : > { %3675 = vmatpush1.bf16.msra.mxu0 %v9585_v44  ;;  %3716 = vmatpush1.bf16.msra.mxu1 %v9861_v21 }
 0x76f   : > { %3676 = vmatprep.subr.bf16.mxu0 %v9862_v62  ;;  %3717 = vmatprep.subr.bf16.mxu1 %v9863_v5 }
 0x772   : > { %3677 = vmatpush1.bf16.msra.mxu0 %v9864_v20  ;;  %3718 = vmatpush1.bf16.msra.mxu1 %v9865_v39 }
 0x773   : > { %3678 = vmatprep.subr.bf16.mxu0 %v9866_v24  ;;  %3719 = vmatprep.subr.bf16.mxu1 %v9867_v28 }
 0x776   : > { %3679 = vmatpush1.bf16.msra.mxu0 %v9868_v36  ;;  %3720 = vmatpush1.bf16.msra.mxu1 %v9869_v35  ;;  %v9954_v35 = vld [vmem:[#allocation155_spill] sm:$0xff]  ;;  %v9955_v36 = vld [vmem:[#allocation156_spill] sm:$0xff] }
 0x777   : > { %3680 = vmatprep.subr.bf16.mxu0 %v9870_v29  ;;  %3721 = vmatprep.subr.bf16.mxu1 %v9871_v41  ;;  %v9953_v41 = vld [vmem:[#allocation154_spill] sm:$0xff] }
 0x77a   : > { %3681 = vmatpush1.bf16.msra.mxu0 %v9872_v34  ;;  %3722 = vmatpush1.bf16.msra.mxu1 %v9873_v63  ;;  %v9883_v34 = vld [vmem:[#allocation133_spill] sm:$0xff]  ;;  %v9884_v63 = vld [vmem:[#allocation134_spill] sm:$0xff] }
 0x77b   : > { %3682 = vmatprep.subr.bf16.mxu0 %v9874_v47  ;;  %3723 = vmatprep.subr.bf16.mxu1 %v9875_v6  ;;  %v9885_v47 = vld [vmem:[#allocation135_spill] sm:$0xff]  ;;  %v9886_v6 = vld [vmem:[#allocation8_spill] sm:$0xff] }
 0x77e   : > { %3683 = vmatpush1.bf16.msra.mxu0 %v9876_v46  ;;  %3724 = vmatpush1.bf16.msra.mxu1 %v9877_v7  ;;  %v9887_v46 = vld [vmem:[#allocation9_spill] sm:$0xff] }
 0x77f   : > { %3684 = vmatprep.subr.bf16.mxu0 %v9878_v12  ;;  %3725 = vmatprep.subr.bf16.mxu1 %v9879_v54  ;;  %v9888_v54 = vld [vmem:[#allocation10_spill] sm:$0xff]  ;;  %v9897_v12 = vld [vmem:[#allocation19_spill] sm:$0xff]  ;;  %v9952_v7 = vld [vmem:[#allocation153_spill] sm:$0xff] }
 0x782   : > { %3685 = vmatpush1.bf16.msra.mxu0 %v9880_v55  ;;  %3726 = vmatpush1.bf16.msra.mxu1 %v9881_v42  ;;  %v9889_v55 = vld [vmem:[#allocation11_spill] sm:$0xff]  ;;  %v9890_v42 = vld [vmem:[#allocation12_spill] sm:$0xff] }
 0x783   : > { %3686 = vmatprep.subr.bf16.mxu0 %v9882_v0  ;;  %3727 = vmatprep.subr.bf16.mxu1 %v9883_v34  ;;  %v9891_v0 = vld [vmem:[#allocation13_spill] sm:$0xff]  ;;  %v9892_v34 = vld [vmem:[#allocation14_spill] sm:$0xff] }
 0x786   : > { %3687 = vmatpush1.bf16.msra.mxu0 %v9884_v63  ;;  %3728 = vmatpush1.bf16.msra.mxu1 %v9885_v47  ;;  %v9893_v63 = vld [vmem:[#allocation15_spill] sm:$0xff]  ;;  %v9894_v47 = vld [vmem:[#allocation16_spill] sm:$0xff] }
 0x787   : > { %3813 = vmatprep.subr.bf16.mxu0 %v9886_v6  ;;  %3854 = vmatprep.subr.bf16.mxu1 %v9887_v46  ;;  %v9895_v6 = vld [vmem:[#allocation17_spill] sm:$0xff]  ;;  %v9896_v46 = vld [vmem:[#allocation18_spill] sm:$0xff] }
 0x789   : > { %3689 = vmatmul.mubr.bf16.vlgmr.msra.gmra.mrb[76].mxu0 %v8351_v25  ;;  %3730 = vmatmul.mubr.bf16.vlgmr.msra.gmra.mrb[76].mxu1 %v8351_v25  ;;  %v9898_v25 = vld [vmem:[#allocation20_spill] sm:$0xff] }
 0x78a   : > { %3814 = vmatpush1.bf16.msra.mxu0 %v9888_v54  ;;  %3855 = vmatpush1.bf16.msra.mxu1 %v9889_v55  ;;  %v9899_v54 = vld [vmem:[#allocation21_spill] sm:$0xff]  ;;  %v9900_v55 = vld [vmem:[#allocation22_spill] sm:$0xff] }
 0x78b   : > { %3815 = vmatprep.subr.bf16.mxu0 %v9890_v42  ;;  %3856 = vmatprep.subr.bf16.mxu1 %v9891_v0  ;;  %v9901_v42 = vld [vmem:[#allocation23_spill] sm:$0xff]  ;;  %v9902_v0 = vld [vmem:[#allocation24_spill] sm:$0xff] }
 0x78e   : > { %3816 = vmatpush1.bf16.msra.mxu0 %v9892_v34  ;;  %3857 = vmatpush1.bf16.msra.mxu1 %v9893_v63  ;;  %v9903_v34 = vld [vmem:[#allocation25_spill] sm:$0xff]  ;;  %v9904_v63 = vld [vmem:[#allocation26_spill] sm:$0xff] }
 0x78f   : > { %3817 = vmatprep.subr.bf16.mxu0 %v9894_v47  ;;  %3858 = vmatprep.subr.bf16.mxu1 %v9895_v6  ;;  %v9905_v47 = vld [vmem:[#allocation27_spill] sm:$0xff]  ;;  %v9906_v6 = vld [vmem:[#allocation28_spill] sm:$0xff] }
 0x792   : > { %3818 = vmatpush1.bf16.msra.mxu0 %v9896_v46  ;;  %3859 = vmatpush1.bf16.msra.mxu1 %v9897_v12  ;;  %v9907_v46 = vld [vmem:[#allocation29_spill] sm:$0xff]  ;;  %v9908_v12 = vld [vmem:[#allocation30_spill] sm:$0xff] }
 0x793   : > { %3819 = vmatprep.subr.bf16.mxu0 %v9898_v25  ;;  %3860 = vmatprep.subr.bf16.mxu1 %v9899_v54  ;;  %v9909_v25 = vld [vmem:[#allocation31_spill] sm:$0xff]  ;;  %v9910_v54 = vld [vmem:[#allocation32_spill] sm:$0xff] }
 0x796   : > { %3820 = vmatpush1.bf16.msra.mxu0 %v9900_v55  ;;  %3861 = vmatpush1.bf16.msra.mxu1 %v9901_v42  ;;  %v9911_v55 = vld [vmem:[#allocation33_spill] sm:$0xff]  ;;  %v9912_v42 = vld [vmem:[#allocation34_spill] sm:$0xff] }
 0x797   : > { %3821 = vmatprep.subr.bf16.mxu0 %v9902_v0  ;;  %3862 = vmatprep.subr.bf16.mxu1 %v9903_v34  ;;  %v9913_v0 = vld [vmem:[#allocation35_spill] sm:$0xff]  ;;  %v9914_v34 = vld [vmem:[#allocation36_spill] sm:$0xff] }
 0x79a   : > { %3822 = vmatpush1.bf16.msra.mxu0 %v9904_v63  ;;  %3863 = vmatpush1.bf16.msra.mxu1 %v9905_v47  ;;  %v9915_v63 = vld [vmem:[#allocation37_spill] sm:$0xff]  ;;  %v9916_v47 = vld [vmem:[#allocation38_spill] sm:$0xff] }
 0x79b   : > { %3823 = vmatprep.subr.bf16.mxu0 %v9906_v6  ;;  %3864 = vmatprep.subr.bf16.mxu1 %v9907_v46  ;;  %v9917_v6 = vld [vmem:[#allocation39_spill] sm:$0xff]  ;;  %v9918_v46 = vld [vmem:[#allocation40_spill] sm:$0xff] }
 0x79e   : > { %3824 = vmatpush1.bf16.msra.mxu0 %v9908_v12  ;;  %3865 = vmatpush1.bf16.msra.mxu1 %v9909_v25  ;;  %v9919_v12 = vld [vmem:[#allocation41_spill] sm:$0xff]  ;;  %v9920_v25 = vld [vmem:[#allocation42_spill] sm:$0xff] }
 0x79f   : > { %3825 = vmatprep.subr.bf16.mxu0 %v9910_v54  ;;  %3866 = vmatprep.subr.bf16.mxu1 %v9911_v55  ;;  %v9921_v54 = vld [vmem:[#allocation43_spill] sm:$0xff]  ;;  %v9922_v55 = vld [vmem:[#allocation44_spill] sm:$0xff] }
 0x7a2   : > { %3826 = vmatpush1.bf16.msra.mxu0 %v9912_v42  ;;  %3867 = vmatpush1.bf16.msra.mxu1 %v9913_v0  ;;  %v9923_v42 = vld [vmem:[#allocation45_spill] sm:$0xff]  ;;  %v9924_v0 = vld [vmem:[#allocation46_spill] sm:$0xff] }
 0x7a3   : > { %3827 = vmatprep.subr.bf16.mxu0 %v9914_v34  ;;  %3868 = vmatprep.subr.bf16.mxu1 %v9915_v63  ;;  %v9925_v34 = vld [vmem:[#allocation47_spill] sm:$0xff]  ;;  %v9926_v63 = vld [vmem:[#allocation48_spill] sm:$0xff] }
 0x7a6   : > { %3828 = vmatpush1.bf16.msra.mxu0 %v9916_v47  ;;  %3869 = vmatpush1.bf16.msra.mxu1 %v9917_v6  ;;  %v9927_v47 = vld [vmem:[#allocation49_spill] sm:$0xff]  ;;  %v9928_v6 = vld [vmem:[#allocation50_spill] sm:$0xff] }
 0x7a7   : > { %3829 = vmatprep.subr.bf16.mxu0 %v9918_v46  ;;  %3870 = vmatprep.subr.bf16.mxu1 %v9919_v12  ;;  %v9929_v46 = vld [vmem:[#allocation51_spill] sm:$0xff]  ;;  %v9930_v12 = vld [vmem:[#allocation52_spill] sm:$0xff] }
 0x7aa   : > { %3830 = vmatpush1.bf16.msra.mxu0 %v9920_v25  ;;  %3871 = vmatpush1.bf16.msra.mxu1 %v9921_v54  ;;  %v9931_v25 = vld [vmem:[#allocation53_spill] sm:$0xff]  ;;  %v9932_v54 = vld [vmem:[#allocation54_spill] sm:$0xff] }
 0x7ab   : > { %3831 = vmatprep.subr.bf16.mxu0 %v9922_v55  ;;  %3872 = vmatprep.subr.bf16.mxu1 %v9923_v42  ;;  %v9933_v55 = vld [vmem:[#allocation55_spill] sm:$0xff]  ;;  %v9934_v42 = vld [vmem:[#allocation56_spill] sm:$0xff] }
 0x7ae   : > { %3832 = vmatpush1.bf16.msra.mxu0 %v9924_v0  ;;  %3873 = vmatpush1.bf16.msra.mxu1 %v9925_v34  ;;  %v9935_v0 = vld [vmem:[#allocation57_spill] sm:$0xff]  ;;  %v9936_v34 = vld [vmem:[#allocation58_spill] sm:$0xff] }
 0x7af   : > { %3833 = vmatprep.subr.bf16.mxu0 %v9926_v63  ;;  %3874 = vmatprep.subr.bf16.mxu1 %v9927_v47  ;;  %v9937_v63 = vld [vmem:[#allocation59_spill] sm:$0xff]  ;;  %v9938_v47 = vld [vmem:[#allocation60_spill] sm:$0xff] }
 0x7b2   : > { %3834 = vmatpush1.bf16.msra.mxu0 %v9928_v6  ;;  %3875 = vmatpush1.bf16.msra.mxu1 %v9929_v46  ;;  %v9939_v6 = vld [vmem:[#allocation61_spill] sm:$0xff]  ;;  %v9940_v46 = vld [vmem:[#allocation62_spill] sm:$0xff] }
 0x7b3   : > { %3835 = vmatprep.subr.bf16.mxu0 %v9930_v12  ;;  %3876 = vmatprep.subr.bf16.mxu1 %v9931_v25  ;;  %v9941_v12 = vld [vmem:[#allocation63_spill] sm:$0xff]  ;;  %v9942_v25 = vld [vmem:[#allocation64_spill] sm:$0xff] }
 0x7b6   : > { %3836 = vmatpush1.bf16.msra.mxu0 %v9932_v54  ;;  %3877 = vmatpush1.bf16.msra.mxu1 %v9933_v55  ;;  %v9943_v54 = vld [vmem:[#allocation65_spill] sm:$0xff]  ;;  %v9944_v55 = vld [vmem:[#allocation66_spill] sm:$0xff] }
 0x7b7   : > { %3837 = vmatprep.subr.bf16.mxu0 %v9934_v42  ;;  %3878 = vmatprep.subr.bf16.mxu1 %v9935_v0  ;;  %v9945_v42 = vld [vmem:[#allocation67_spill] sm:$0xff]  ;;  %v9946_v0 = vld [vmem:[#allocation68_spill] sm:$0xff] }
 0x7ba   : > { %3838 = vmatpush1.bf16.msra.mxu0 %v9936_v34  ;;  %3879 = vmatpush1.bf16.msra.mxu1 %v9937_v63  ;;  %v9947_v34 = vld [vmem:[#allocation69_spill] sm:$0xff]  ;;  %v9948_v63 = vld [vmem:[#allocation70_spill] sm:$0xff] }
 0x7bb   : > { %3839 = vmatprep.subr.bf16.mxu0 %v9938_v47  ;;  %3880 = vmatprep.subr.bf16.mxu1 %v9939_v6  ;;  %v9949_v47 = vld [vmem:[#allocation71_spill] sm:$0xff]  ;;  %v9950_v6 = vld [vmem:[#allocation72_spill] sm:$0xff] }
 0x7be   : > { %3840 = vmatpush1.bf16.msra.mxu0 %v9940_v46  ;;  %3881 = vmatpush1.bf16.msra.mxu1 %v9941_v12  ;;  %v9951_v46 = vld [vmem:[#allocation73_spill] sm:$0xff] }
 0x7bf   : > { %3841 = vmatprep.subr.bf16.mxu0 %v9942_v25  ;;  %3882 = vmatprep.subr.bf16.mxu1 %v9943_v54 }
 0x7c2   : > { %3842 = vmatpush1.bf16.msra.mxu0 %v9944_v55  ;;  %3883 = vmatpush1.bf16.msra.mxu1 %v9945_v42 }
 0x7c3   : > { %3843 = vmatprep.subr.bf16.mxu0 %v9946_v0  ;;  %3884 = vmatprep.subr.bf16.mxu1 %v9947_v34 }
 0x7c6   : > { %3844 = vmatpush1.bf16.msra.mxu0 %v9948_v63  ;;  %3885 = vmatpush1.bf16.msra.mxu1 %v9949_v47 }
 0x7c7   : > { %3895 = vmatprep.subr.bf16.mxu0 %v9950_v6  ;;  %3936 = vmatprep.subr.bf16.mxu1 %v9951_v46 }
 0x81c   : > { %v3608_v12 = vpop.f32.mrb[72].mxu0  ;;  %v3649_v25 = vpop.f32.mrb[72].mxu1 }
 0x81d   : > { %v3738_v54 = vadd.f32 %v3608_v12, %v9952_v7  ;;  %v3740_v55 = vadd.f32 %v3649_v25, %v9953_v41  ;;  %v3610_v29 = vpop.f32.mrb[73].mxu0  ;;  %v3651_v42 = vpop.f32.mrb[73].mxu1 }
 0x81e   : > { %v3739_v0 = vadd.f32 %v3610_v29, %v9954_v35  ;;  %v3741_v34 = vadd.f32 %v3651_v42, %v9955_v36  ;;  %v3612_v28 = vpop.f32.mrb[74].mxu0  ;;  %v3653_v63 = vpop.f32.mrb[74].mxu1 }
 0x81f   : > { %v5804_v24 = vmul.f32 -1.442695, %v3740_v55  ;;  %v3613_v47 = vpop.f32.mrb[75].mxu0  ;;  %v3654_v39 = vpop.f32.mrb[75].mxu1  ;;  %v5802_v28 = vmul.f32 -1.442695, %v3738_v54 }
 0x820   : > { %v5805_v6 = vmul.f32 -1.442695, %v3741_v34  ;;  %v5803_v29 = vmul.f32 -1.442695, %v3739_v0  ;;  %v9959_v54 = vld [vmem:[#allocation184_spill] sm:$0xff] }
 0x821   : > { %6172 = vpow2.f32 %v5804_v24 }
 0x822   : > { %6174 = vpow2.f32 %v5805_v6 }
 0x82b   : > { %v6173_v46 = vpop.eup %6172 }
 0x82c   : > { %v3764_v20 = vadd.f32 1.0, %v6173_v46  ;;  %v6175_v5 = vpop.eup %6174  ;;  %v9957_v46 = vld [vmem:[#allocation182_spill] sm:$0xff] }
 0x82d   : > { %v3765_v7 = vadd.f32 1.0, %v6175_v5 }
 0x82e   : > { %6176 = vrcp.f32 %v3764_v20  ;;  %v9956_v20 = vld [vmem:[#allocation181_spill] sm:$0xff] }
 0x82f   : > { %6178 = vrcp.f32 %v3765_v7  ;;  %v9958_v7 = vld [vmem:[#allocation183_spill] sm:$0xff] }
 0x830   : > { %6180 = vpow2.f32 %v5802_v28 }
 0x831   : > { %6182 = vpow2.f32 %v5803_v29 }
 0x838   : > { %v6177_v41 = vpop.eup %6176 }
 0x839   : > { %v3784_v12 = vmul.f32 %v6177_v41, %v8334_v53  ;;  %v6179_v35 = vpop.eup %6178 }
 0x83a   : > { %v3785_v36 = vmul.f32 %v6179_v35, %v8337_v58  ;;  %v6181_v39 = vpop.eup %6180 }
 0x83b   : > { %v6183_v34 = vpop.eup %6182  ;;  %v3752_v24 = vadd.f32 1.0, %v6181_v39 }
 0x83c   : > { %v3753_v63 = vadd.f32 1.0, %v6183_v34 }
 0x83d   : > { %6184 = vrcp.f32 %v3752_v24 }
 0x83e   : > { %6186 = vrcp.f32 %v3753_v63 }
 0x847   : > { %v6185_v24 = vpop.eup %6184 }
 0x85c   : > { %v3690_v47 = vpop.f32.mrb[76].mxu0  ;;  %v3731_v6 = vpop.f32.mrb[76].mxu1 }
 0x85d   : > { %v3742_v5 = vadd.f32 %v3690_v47, %v9956_v20  ;;  %v3744_v55 = vadd.f32 %v3731_v6, %v9957_v46  ;;  %v3692_v42 = vpop.f32.mrb[77].mxu0  ;;  %v3733_v25 = vpop.f32.mrb[77].mxu1 }
 0x85e   : > { %v3743_v41 = vadd.f32 %v3692_v42, %v9958_v7  ;;  %v3745_v0 = vadd.f32 %v3733_v25, %v9959_v54  ;;  %v3694_v35 = vpop.f32.mrb[78].mxu0  ;;  %v3735_v28 = vpop.f32.mrb[78].mxu1 }
 0x85f   : > { %6188 = vtanh.f32 %v3742_v5  ;;  %v5806_v29 = vmul.f32 -1.442695, %v3744_v55  ;;  %v3695_v39 = vpop.f32.mrb[79].mxu0  ;;  %v3736_v34 = vpop.f32.mrb[79].mxu1 }
 0x860   : > { %6190 = vtanh.f32 %v3743_v41  ;;  %v5807_v62 = vmul.f32 -1.442695, %v3745_v0  ;;  %v6187_v47 = vpop.eup %6186  ;;  %v3799_v55 = vpop.permute.xlu1 %3798 }
 0x861   : > { %6192 = vpow2.f32 %v5806_v29 }
 0x862   : > { %6194 = vpow2.f32 %v5807_v62 }
 0x869   : > { %v6189_v6 = vpop.eup %6188 }
 0x86a   : > { %v6191_v20 = vpop.eup %6190  ;;  %v3786_v46 = vmul.f32 %v6189_v6, %v6185_v24 }
 0x86b   : > { %v6193_v63 = vpop.eup %6192  ;;  %v3787_v21 = vmul.f32 %v6191_v20, %v6187_v47 }
 0x86c   : > { %v6195_v42 = vpop.eup %6194  ;;  %v3788_v7 = vadd.f32 %v3786_v46, %v3784_v12  ;;  %v3778_v25 = vadd.f32 1.0, %v6193_v63 }
 0x86d   : > { %v3789_v54 = vadd.f32 %v3787_v21, %v3785_v36  ;;  %v3779_v35 = vadd.f32 1.0, %v6195_v42 }
 0x86e   : > { %6196 = vtanh.f32 %v3788_v7  ;;  %v3805_v5 = vsub.f32 %v3788_v7, %v8334_v53  ;;  %v9962_v7 = vld [vmem:[#allocation113_spill] sm:$0xff] }
 0x86f   : > { %6198 = vrcp.f32 %v3778_v25  ;;  %v3806_v41 = vsub.f32 %v3789_v54, %v8337_v58  ;;  %v9963_v25 = vld [vmem:[#allocation114_spill] sm:$0xff] }
 0x870   : > { %v3807_v62 = vmul.f32 %v3805_v5, %v3799_v55  ;;  %6200 = vtanh.f32 %v3789_v54  ;;  %v9964_v54 = vld [vmem:[#allocation115_spill] sm:$0xff]  ;;  %v9966_v5 = vld [vmem:[#allocation117_spill] sm:$0xff] }
 0x871   : > { %v3808_v0 = vmul.f32 %v3806_v41, %v3799_v55  ;;  %6202 = vrcp.f32 %v3779_v35  ;;  %v9965_v35 = vld [vmem:[#allocation116_spill] sm:$0xff]  ;;  %v9968_v41 = vld [vmem:[#allocation119_spill] sm:$0xff] }
 0x872   : > { %v8498_v28 = vadd.f32 %v3807_v62, %v8334_v53  ;;  %v9969_v62 = vld [vmem:[#allocation120_spill] sm:$0xff] }
 0x873   : > { %v8501_v29 = vadd.f32 %v3808_v0, %v8337_v58  ;;  %v9970_v0 = vld [vmem:[#allocation121_spill] sm:$0xff] }
 0x878   : > { %v6197_v12 = vpop.eup %6196 }
 0x879   : > { %v6199_v21 = vpop.eup %6198 }
 0x87a   : > { %v6201_v36 = vpop.eup %6200  ;;  %v3792_v39 = vmul.f32 %v6199_v21, %v6197_v12  ;;  %v9971_v12 = vld [vmem:[#allocation122_spill] sm:$0xff]  ;;  %v9972_v21 = vld [vmem:[#allocation123_spill] sm:$0xff] }
 0x87b   : > { %v6203_v34 = vpop.eup %6202 }
 0x87c   : > { %v3793_v24 = vmul.f32 %v6203_v34, %v6201_v36  ;;  %v3794_v47 = vsub.f32 %v3792_v39, %v8342_v40  ;;  %v9973_v36 = vld [vmem:[#allocation124_spill] sm:$0xff]  ;;  %v9974_v39 = vld [vmem:[#allocation125_spill] sm:$0xff]  ;;  %v9975_v34 = vld [vmem:[#allocation126_spill] sm:$0xff] }
 0x87e   : > { %v3795_v6 = vsub.f32 %v3793_v24, %v8345_v56  ;;  %v3801_v20 = vmul.f32 %v3799_v55, %v3794_v47  ;;  %v9976_v24 = vld [vmem:[#allocation127_spill] sm:$0xff]  ;;  %v9977_v47 = vld [vmem:[#allocation128_spill] sm:$0xff] }
 0x880   : > { %v3802_v46 = vmul.f32 %v3799_v55, %v3795_v6  ;;  %v8506_v63 = vadd.f32 %v3801_v20, %v8342_v40  ;;  %v9960_v40 = vld [vmem:[#allocation111_spill] sm:$0xff]  ;;  %v9967_v55 = vld [vmem:[#allocation118_spill] sm:$0xff]  ;;  %v9978_v6 = vld [vmem:[#allocation129_spill] sm:$0xff] }
 0x881   : > { %v9979_v20 = vld [vmem:[#allocation130_spill] sm:$0xff] }
 0x882   : > { %v8509_v53 = vadd.f32 %v3802_v46, %v8345_v56  ;;  %v8515_v42 = vpack.c.bf16 %v8506_v63, %v8506_v63  ;;  %v9961_v56 = vld [vmem:[#allocation112_spill] sm:$0xff]  ;;  %v9980_v46 = vld [vmem:[#allocation131_spill] sm:$0xff] }
 0x884   : > { %v3812_v58 = vpack.c.bf16 %v8509_v53, %v8509_v53 }
 0x886   : > { %3845 = vmatprep.mubr.bf16.mxu0 %v3812_v58  ;;  %3886 = vmatprep.mubr.bf16.mxu1 %v3812_v58 }
 0x887   : > { %3846 = vmatmul.mubr.bf16.vlgmr.msra.gmra.mrb[80].mxu0 %v8515_v42  ;;  %3887 = vmatmul.mubr.bf16.vlgmr.msra.gmra.mrb[80].mxu1 %v8515_v42 }
 0x888   : > { %3896 = vmatpush1.bf16.msra.mxu0 %v9460_v16  ;;  %3937 = vmatpush1.bf16.msra.mxu1 %v9461_v38 }
 0x889   : > { %3927 = vmatprep.mubr.bf16.mxu0 %v3812_v58  ;;  %3968 = vmatprep.mubr.bf16.mxu1 %v3812_v58  ;;  %v9981_v58 = vld [vmem:[#allocation132_spill] sm:$0xff] }
 0x88a   : > { %3897 = vmatprep.subr.bf16.mxu0 %v9462_v15  ;;  %3938 = vmatprep.subr.bf16.mxu1 %v9463_v8 }
 0x88c   : > { %3898 = vmatpush1.bf16.msra.mxu0 %v9464_v27  ;;  %3939 = vmatpush1.bf16.msra.mxu1 %v9465_v11 }
 0x88d   : > { %3899 = vmatprep.subr.bf16.mxu0 %v9466_v22  ;;  %3940 = vmatprep.subr.bf16.mxu1 %v9467_v1 }
 0x890   : > { %3900 = vmatpush1.bf16.msra.mxu0 %v9468_v32  ;;  %3941 = vmatpush1.bf16.msra.mxu1 %v9469_v13 }
 0x891   : > { %3901 = vmatprep.subr.bf16.mxu0 %v9470_v17  ;;  %3942 = vmatprep.subr.bf16.mxu1 %v9471_v18 }
 0x894   : > { %3902 = vmatpush1.bf16.msra.mxu0 %v9472_v19  ;;  %3943 = vmatpush1.bf16.msra.mxu1 %v9473_v48 }
 0x895   : > { %3903 = vmatprep.subr.bf16.mxu0 %v9474_v33  ;;  %3944 = vmatprep.subr.bf16.mxu1 %v9564_v14 }
 0x898   : > { %3904 = vmatpush1.bf16.msra.mxu0 %v9565_v10  ;;  %3945 = vmatpush1.bf16.msra.mxu1 %v9566_v61 }
 0x899   : > { %3905 = vmatprep.subr.bf16.mxu0 %v9567_v57  ;;  %3946 = vmatprep.subr.bf16.mxu1 %v9568_v4 }
 0x89c   : > { %3906 = vmatpush1.bf16.msra.mxu0 %v9569_v31  ;;  %3947 = vmatpush1.bf16.msra.mxu1 %v9570_v52 }
 0x89d   : > { %3907 = vmatprep.subr.bf16.mxu0 %v9571_v51  ;;  %3948 = vmatprep.subr.bf16.mxu1 %v9572_v2 }
 0x8a0   : > { %3908 = vmatpush1.bf16.msra.mxu0 %v9573_v43  ;;  %3949 = vmatpush1.bf16.msra.mxu1 %v9574_v23 }
 0x8a1   : > { %3909 = vmatprep.subr.bf16.mxu0 %v9575_v45  ;;  %3950 = vmatprep.subr.bf16.mxu1 %v9576_v50 }
 0x8a4   : > { %3910 = vmatpush1.bf16.msra.mxu0 %v9577_v9  ;;  %3951 = vmatpush1.bf16.msra.mxu1 %v9663_v49 }
 0x8a5   : > { %3911 = vmatprep.subr.bf16.mxu0 %v9579_v59  ;;  %3952 = vmatprep.subr.bf16.mxu1 %v9580_v37 }
 0x8a8   : > { %3912 = vmatpush1.bf16.msra.mxu0 %v9581_v26  ;;  %3953 = vmatpush1.bf16.msra.mxu1 %v9582_v60 }
 0x8a9   : > { %3913 = vmatprep.subr.bf16.mxu0 %v9583_v3  ;;  %3954 = vmatprep.subr.bf16.mxu1 %v9584_v30 }
 0x8ac   : > { %3914 = vmatpush1.bf16.msra.mxu0 %v9585_v44  ;;  %3955 = vmatpush1.bf16.msra.mxu1 %v9960_v40 }
 0x8ad   : > { %3915 = vmatprep.subr.bf16.mxu0 %v9961_v56  ;;  %3956 = vmatprep.subr.bf16.mxu1 %v9962_v7 }
 0x8b0   : > { %3916 = vmatpush1.bf16.msra.mxu0 %v9963_v25  ;;  %3957 = vmatpush1.bf16.msra.mxu1 %v9964_v54 }
 0x8b1   : > { %3917 = vmatprep.subr.bf16.mxu0 %v9965_v35  ;;  %3958 = vmatprep.subr.bf16.mxu1 %v9966_v5 }
 0x8b4   : > { %3918 = vmatpush1.bf16.msra.mxu0 %v9967_v55  ;;  %3959 = vmatpush1.bf16.msra.mxu1 %v9968_v41  ;;  %v10053_v41 = vld [vmem:[#allocation159_spill] sm:$0xff]  ;;  %v10054_v55 = vld [vmem:[#allocation160_spill] sm:$0xff] }
 0x8b5   : > { %3919 = vmatprep.subr.bf16.mxu0 %v9969_v62  ;;  %3960 = vmatprep.subr.bf16.mxu1 %v9970_v0  ;;  %v10052_v0 = vld [vmem:[#allocation158_spill] sm:$0xff] }
 0x8b8   : > { %3920 = vmatpush1.bf16.msra.mxu0 %v9971_v12  ;;  %3961 = vmatpush1.bf16.msra.mxu1 %v9972_v21  ;;  %v9982_v12 = vld [vmem:[#allocation133_spill] sm:$0xff]  ;;  %v9983_v21 = vld [vmem:[#allocation134_spill] sm:$0xff] }
 0x8b9   : > { %3921 = vmatprep.subr.bf16.mxu0 %v9973_v36  ;;  %3962 = vmatprep.subr.bf16.mxu1 %v9974_v39  ;;  %v9984_v36 = vld [vmem:[#allocation135_spill] sm:$0xff]  ;;  %v9985_v39 = vld [vmem:[#allocation8_spill] sm:$0xff] }
 0x8bc   : > { %3922 = vmatpush1.bf16.msra.mxu0 %v9975_v34  ;;  %3963 = vmatpush1.bf16.msra.mxu1 %v9976_v24  ;;  %v9986_v34 = vld [vmem:[#allocation9_spill] sm:$0xff] }
 0x8bd   : > { %3923 = vmatprep.subr.bf16.mxu0 %v9977_v47  ;;  %3964 = vmatprep.subr.bf16.mxu1 %v9978_v6  ;;  %v9987_v6 = vld [vmem:[#allocation10_spill] sm:$0xff]  ;;  %v9996_v47 = vld [vmem:[#allocation19_spill] sm:$0xff]  ;;  %v10051_v24 = vld [vmem:[#allocation157_spill] sm:$0xff] }
 0x8c0   : > { %3924 = vmatpush1.bf16.msra.mxu0 %v9979_v20  ;;  %3965 = vmatpush1.bf16.msra.mxu1 %v9980_v46  ;;  %v9988_v20 = vld [vmem:[#allocation11_spill] sm:$0xff]  ;;  %v9989_v46 = vld [vmem:[#allocation12_spill] sm:$0xff] }
 0x8c1   : > { %3925 = vmatprep.subr.bf16.mxu0 %v9981_v58  ;;  %3966 = vmatprep.subr.bf16.mxu1 %v9982_v12  ;;  %v9990_v58 = vld [vmem:[#allocation13_spill] sm:$0xff]  ;;  %v9991_v12 = vld [vmem:[#allocation14_spill] sm:$0xff] }
 0x8c4   : > { %3926 = vmatpush1.bf16.msra.mxu0 %v9983_v21  ;;  %3967 = vmatpush1.bf16.msra.mxu1 %v9984_v36  ;;  %v9992_v21 = vld [vmem:[#allocation15_spill] sm:$0xff]  ;;  %v9993_v36 = vld [vmem:[#allocation16_spill] sm:$0xff] }
 0x8c5   : > { %4052 = vmatprep.subr.bf16.mxu0 %v9985_v39  ;;  %4093 = vmatprep.subr.bf16.mxu1 %v9986_v34  ;;  %v9994_v39 = vld [vmem:[#allocation17_spill] sm:$0xff]  ;;  %v9995_v34 = vld [vmem:[#allocation18_spill] sm:$0xff] }
 0x8c7   : > { %3928 = vmatmul.mubr.bf16.vlgmr.msra.gmra.mrb[84].mxu0 %v8515_v42  ;;  %3969 = vmatmul.mubr.bf16.vlgmr.msra.gmra.mrb[84].mxu1 %v8515_v42  ;;  %v9997_v42 = vld [vmem:[#allocation20_spill] sm:$0xff] }
 0x8c8   : > { %4053 = vmatpush1.bf16.msra.mxu0 %v9987_v6  ;;  %4094 = vmatpush1.bf16.msra.mxu1 %v9988_v20  ;;  %v9998_v6 = vld [vmem:[#allocation21_spill] sm:$0xff]  ;;  %v9999_v20 = vld [vmem:[#allocation22_spill] sm:$0xff] }
 0x8c9   : > { %4054 = vmatprep.subr.bf16.mxu0 %v9989_v46  ;;  %4095 = vmatprep.subr.bf16.mxu1 %v9990_v58  ;;  %v10000_v46 = vld [vmem:[#allocation23_spill] sm:$0xff]  ;;  %v10001_v58 = vld [vmem:[#allocation24_spill] sm:$0xff] }
 0x8cc   : > { %4055 = vmatpush1.bf16.msra.mxu0 %v9991_v12  ;;  %4096 = vmatpush1.bf16.msra.mxu1 %v9992_v21  ;;  %v10002_v12 = vld [vmem:[#allocation25_spill] sm:$0xff]  ;;  %v10003_v21 = vld [vmem:[#allocation26_spill] sm:$0xff] }
 0x8cd   : > { %4056 = vmatprep.subr.bf16.mxu0 %v9993_v36  ;;  %4097 = vmatprep.subr.bf16.mxu1 %v9994_v39  ;;  %v10004_v36 = vld [vmem:[#allocation27_spill] sm:$0xff]  ;;  %v10005_v39 = vld [vmem:[#allocation28_spill] sm:$0xff] }
 0x8d0   : > { %4057 = vmatpush1.bf16.msra.mxu0 %v9995_v34  ;;  %4098 = vmatpush1.bf16.msra.mxu1 %v9996_v47  ;;  %v10006_v34 = vld [vmem:[#allocation29_spill] sm:$0xff]  ;;  %v10007_v47 = vld [vmem:[#allocation30_spill] sm:$0xff] }
 0x8d1   : > { %4058 = vmatprep.subr.bf16.mxu0 %v9997_v42  ;;  %4099 = vmatprep.subr.bf16.mxu1 %v9998_v6  ;;  %v10008_v42 = vld [vmem:[#allocation31_spill] sm:$0xff]  ;;  %v10009_v6 = vld [vmem:[#allocation32_spill] sm:$0xff] }
 0x8d4   : > { %4059 = vmatpush1.bf16.msra.mxu0 %v9999_v20  ;;  %4100 = vmatpush1.bf16.msra.mxu1 %v10000_v46  ;;  %v10010_v20 = vld [vmem:[#allocation33_spill] sm:$0xff]  ;;  %v10011_v46 = vld [vmem:[#allocation34_spill] sm:$0xff] }
 0x8d5   : > { %4060 = vmatprep.subr.bf16.mxu0 %v10001_v58  ;;  %4101 = vmatprep.subr.bf16.mxu1 %v10002_v12  ;;  %v10012_v58 = vld [vmem:[#allocation35_spill] sm:$0xff]  ;;  %v10013_v12 = vld [vmem:[#allocation36_spill] sm:$0xff] }
 0x8d8   : > { %4061 = vmatpush1.bf16.msra.mxu0 %v10003_v21  ;;  %4102 = vmatpush1.bf16.msra.mxu1 %v10004_v36  ;;  %v10014_v21 = vld [vmem:[#allocation37_spill] sm:$0xff]  ;;  %v10015_v36 = vld [vmem:[#allocation38_spill] sm:$0xff] }
 0x8d9   : > { %4062 = vmatprep.subr.bf16.mxu0 %v10005_v39  ;;  %4103 = vmatprep.subr.bf16.mxu1 %v10006_v34  ;;  %v10016_v39 = vld [vmem:[#allocation39_spill] sm:$0xff]  ;;  %v10017_v34 = vld [vmem:[#allocation40_spill] sm:$0xff] }
 0x8dc   : > { %4063 = vmatpush1.bf16.msra.mxu0 %v10007_v47  ;;  %4104 = vmatpush1.bf16.msra.mxu1 %v10008_v42  ;;  %v10018_v47 = vld [vmem:[#allocation41_spill] sm:$0xff]  ;;  %v10019_v42 = vld [vmem:[#allocation42_spill] sm:$0xff] }
 0x8dd   : > { %4064 = vmatprep.subr.bf16.mxu0 %v10009_v6  ;;  %4105 = vmatprep.subr.bf16.mxu1 %v10010_v20  ;;  %v10020_v6 = vld [vmem:[#allocation43_spill] sm:$0xff]  ;;  %v10021_v20 = vld [vmem:[#allocation44_spill] sm:$0xff] }
 0x8e0   : > { %4065 = vmatpush1.bf16.msra.mxu0 %v10011_v46  ;;  %4106 = vmatpush1.bf16.msra.mxu1 %v10012_v58  ;;  %v10022_v46 = vld [vmem:[#allocation45_spill] sm:$0xff]  ;;  %v10023_v58 = vld [vmem:[#allocation46_spill] sm:$0xff] }
 0x8e1   : > { %4066 = vmatprep.subr.bf16.mxu0 %v10013_v12  ;;  %4107 = vmatprep.subr.bf16.mxu1 %v10014_v21  ;;  %v10024_v12 = vld [vmem:[#allocation47_spill] sm:$0xff]  ;;  %v10025_v21 = vld [vmem:[#allocation48_spill] sm:$0xff] }
 0x8e4   : > { %4067 = vmatpush1.bf16.msra.mxu0 %v10015_v36  ;;  %4108 = vmatpush1.bf16.msra.mxu1 %v10016_v39  ;;  %v10026_v36 = vld [vmem:[#allocation49_spill] sm:$0xff]  ;;  %v10027_v39 = vld [vmem:[#allocation50_spill] sm:$0xff] }
 0x8e5   : > { %4068 = vmatprep.subr.bf16.mxu0 %v10017_v34  ;;  %4109 = vmatprep.subr.bf16.mxu1 %v10018_v47  ;;  %v10028_v34 = vld [vmem:[#allocation51_spill] sm:$0xff]  ;;  %v10029_v47 = vld [vmem:[#allocation52_spill] sm:$0xff] }
 0x8e8   : > { %4069 = vmatpush1.bf16.msra.mxu0 %v10019_v42  ;;  %4110 = vmatpush1.bf16.msra.mxu1 %v10020_v6  ;;  %v10030_v42 = vld [vmem:[#allocation53_spill] sm:$0xff]  ;;  %v10031_v6 = vld [vmem:[#allocation54_spill] sm:$0xff] }
 0x8e9   : > { %4070 = vmatprep.subr.bf16.mxu0 %v10021_v20  ;;  %4111 = vmatprep.subr.bf16.mxu1 %v10022_v46  ;;  %v10032_v20 = vld [vmem:[#allocation55_spill] sm:$0xff]  ;;  %v10033_v46 = vld [vmem:[#allocation56_spill] sm:$0xff] }
 0x8ec   : > { %4071 = vmatpush1.bf16.msra.mxu0 %v10023_v58  ;;  %4112 = vmatpush1.bf16.msra.mxu1 %v10024_v12  ;;  %v10034_v58 = vld [vmem:[#allocation57_spill] sm:$0xff]  ;;  %v10035_v12 = vld [vmem:[#allocation58_spill] sm:$0xff] }
 0x8ed   : > { %4072 = vmatprep.subr.bf16.mxu0 %v10025_v21  ;;  %4113 = vmatprep.subr.bf16.mxu1 %v10026_v36  ;;  %v10036_v21 = vld [vmem:[#allocation59_spill] sm:$0xff]  ;;  %v10037_v36 = vld [vmem:[#allocation60_spill] sm:$0xff] }
 0x8f0   : > { %4073 = vmatpush1.bf16.msra.mxu0 %v10027_v39  ;;  %4114 = vmatpush1.bf16.msra.mxu1 %v10028_v34  ;;  %v10038_v39 = vld [vmem:[#allocation61_spill] sm:$0xff]  ;;  %v10039_v34 = vld [vmem:[#allocation62_spill] sm:$0xff] }
 0x8f1   : > { %4074 = vmatprep.subr.bf16.mxu0 %v10029_v47  ;;  %4115 = vmatprep.subr.bf16.mxu1 %v10030_v42  ;;  %v10040_v47 = vld [vmem:[#allocation63_spill] sm:$0xff]  ;;  %v10041_v42 = vld [vmem:[#allocation64_spill] sm:$0xff] }
 0x8f4   : > { %4075 = vmatpush1.bf16.msra.mxu0 %v10031_v6  ;;  %4116 = vmatpush1.bf16.msra.mxu1 %v10032_v20  ;;  %v10042_v6 = vld [vmem:[#allocation65_spill] sm:$0xff]  ;;  %v10043_v20 = vld [vmem:[#allocation66_spill] sm:$0xff] }
 0x8f5   : > { %4076 = vmatprep.subr.bf16.mxu0 %v10033_v46  ;;  %4117 = vmatprep.subr.bf16.mxu1 %v10034_v58  ;;  %v10044_v46 = vld [vmem:[#allocation67_spill] sm:$0xff]  ;;  %v10045_v58 = vld [vmem:[#allocation68_spill] sm:$0xff] }
 0x8f8   : > { %4077 = vmatpush1.bf16.msra.mxu0 %v10035_v12  ;;  %4118 = vmatpush1.bf16.msra.mxu1 %v10036_v21  ;;  %v10046_v12 = vld [vmem:[#allocation69_spill] sm:$0xff]  ;;  %v10047_v21 = vld [vmem:[#allocation70_spill] sm:$0xff] }
 0x8f9   : > { %4078 = vmatprep.subr.bf16.mxu0 %v10037_v36  ;;  %4119 = vmatprep.subr.bf16.mxu1 %v10038_v39  ;;  %v10048_v36 = vld [vmem:[#allocation71_spill] sm:$0xff]  ;;  %v10049_v39 = vld [vmem:[#allocation72_spill] sm:$0xff] }
 0x8fc   : > { %4079 = vmatpush1.bf16.msra.mxu0 %v10039_v34  ;;  %4120 = vmatpush1.bf16.msra.mxu1 %v10040_v47  ;;  %v10050_v34 = vld [vmem:[#allocation73_spill] sm:$0xff] }
 0x8fd   : > { %4080 = vmatprep.subr.bf16.mxu0 %v10041_v42  ;;  %4121 = vmatprep.subr.bf16.mxu1 %v10042_v6 }
 0x900   : > { %4081 = vmatpush1.bf16.msra.mxu0 %v10043_v20  ;;  %4122 = vmatpush1.bf16.msra.mxu1 %v10044_v46 }
 0x901   : > { %4082 = vmatprep.subr.bf16.mxu0 %v10045_v58  ;;  %4123 = vmatprep.subr.bf16.mxu1 %v10046_v12 }
 0x904   : > { %4083 = vmatpush1.bf16.msra.mxu0 %v10047_v21  ;;  %4124 = vmatpush1.bf16.msra.mxu1 %v10048_v36 }
 0x905   : > { %4134 = vmatprep.subr.bf16.mxu0 %v10049_v39  ;;  %4175 = vmatprep.subr.bf16.mxu1 %v10050_v34 }
 0x95a   : > { %v3847_v47 = vpop.f32.mrb[80].mxu0  ;;  %v3888_v42 = vpop.f32.mrb[80].mxu1 }
 0x95b   : > { %v3977_v6 = vadd.f32 %v3847_v47, %v10051_v24  ;;  %v3979_v20 = vadd.f32 %v3888_v42, %v10052_v0  ;;  %v3849_v62 = vpop.f32.mrb[81].mxu0  ;;  %v3890_v46 = vpop.f32.mrb[81].mxu1 }
 0x95c   : > { %v3978_v58 = vadd.f32 %v3849_v62, %v10053_v41  ;;  %v3980_v12 = vadd.f32 %v3890_v46, %v10054_v55  ;;  %v3851_v5 = vpop.f32.mrb[82].mxu0  ;;  %v3892_v21 = vpop.f32.mrb[82].mxu1 }
 0x95d   : > { %v5810_v35 = vmul.f32 -1.442695, %v3979_v20  ;;  %v3852_v36 = vpop.f32.mrb[83].mxu0  ;;  %v3893_v54 = vpop.f32.mrb[83].mxu1  ;;  %v5808_v5 = vmul.f32 -1.442695, %v3977_v6 }
 0x95e   : > { %v5811_v39 = vmul.f32 -1.442695, %v3980_v12  ;;  %v5809_v62 = vmul.f32 -1.442695, %v3978_v58  ;;  %v10056_v21 = vld [vmem:[#allocation186_spill] sm:$0xff]  ;;  %v10058_v6 = vld [vmem:[#allocation188_spill] sm:$0xff] }
 0x95f   : > { %6204 = vpow2.f32 %v5810_v35 }
 0x960   : > { %6206 = vpow2.f32 %v5811_v39 }
 0x969   : > { %v6205_v34 = vpop.eup %6204 }
 0x96a   : > { %v4003_v25 = vadd.f32 1.0, %v6205_v34  ;;  %v6207_v7 = vpop.eup %6206 }
 0x96b   : > { %v4004_v24 = vadd.f32 1.0, %v6207_v7 }
 0x96c   : > { %6208 = vrcp.f32 %v4003_v25  ;;  %v10055_v25 = vld [vmem:[#allocation185_spill] sm:$0xff] }
 0x96d   : > { %6210 = vrcp.f32 %v4004_v24  ;;  %v10057_v24 = vld [vmem:[#allocation187_spill] sm:$0xff] }
 0x96e   : > { %6212 = vpow2.f32 %v5808_v5 }
 0x96f   : > { %6214 = vpow2.f32 %v5809_v62 }
 0x976   : > { %v6209_v0 = vpop.eup %6208 }
 0x977   : > { %v4023_v47 = vmul.f32 %v6209_v0, %v8498_v28  ;;  %v6211_v41 = vpop.eup %6210 }
 0x978   : > { %v4024_v55 = vmul.f32 %v6211_v41, %v8501_v29  ;;  %v6213_v54 = vpop.eup %6212 }
 0x979   : > { %v6215_v42 = vpop.eup %6214  ;;  %v3991_v35 = vadd.f32 1.0, %v6213_v54 }
 0x97a   : > { %v3992_v20 = vadd.f32 1.0, %v6215_v42 }
 0x97b   : > { %6216 = vrcp.f32 %v3991_v35 }
 0x97c   : > { %6218 = vrcp.f32 %v3992_v20 }
 0x985   : > { %v6217_v35 = vpop.eup %6216 }
 0x99a   : > { %v3929_v46 = vpop.f32.mrb[84].mxu0  ;;  %v3970_v12 = vpop.f32.mrb[84].mxu1 }
 0x99b   : > { %v3981_v7 = vadd.f32 %v3929_v46, %v10055_v25  ;;  %v3983_v36 = vadd.f32 %v3970_v12, %v10056_v21  ;;  %v3931_v39 = vpop.f32.mrb[85].mxu0  ;;  %v3972_v34 = vpop.f32.mrb[85].mxu1 }
 0x99c   : > { %v3982_v0 = vadd.f32 %v3931_v39, %v10057_v24  ;;  %v3984_v58 = vadd.f32 %v3972_v34, %v10058_v6  ;;  %v3933_v41 = vpop.f32.mrb[86].mxu0  ;;  %v3974_v5 = vpop.f32.mrb[86].mxu1 }
 0x99d   : > { %6220 = vtanh.f32 %v3981_v7  ;;  %v5812_v62 = vmul.f32 -1.442695, %v3983_v36  ;;  %v3934_v54 = vpop.f32.mrb[87].mxu0  ;;  %v3975_v42 = vpop.f32.mrb[87].mxu1 }
 0x99e   : > { %6222 = vtanh.f32 %v3982_v0  ;;  %v5813_v56 = vmul.f32 -1.442695, %v3984_v58  ;;  %v6219_v46 = vpop.eup %6218  ;;  %v4038_v36 = vpop.permute.xlu0 %4037 }
 0x99f   : > { %6224 = vpow2.f32 %v5812_v62 }
 0x9a0   : > { %6226 = vpow2.f32 %v5813_v56 }
 0x9a7   : > { %v6221_v12 = vpop.eup %6220 }
 0x9a8   : > { %v6223_v25 = vpop.eup %6222  ;;  %v4025_v21 = vmul.f32 %v6221_v12, %v6217_v35 }
 0x9a9   : > { %v6225_v20 = vpop.eup %6224  ;;  %v4026_v40 = vmul.f32 %v6223_v25, %v6219_v46 }
 0x9aa   : > { %v6227_v39 = vpop.eup %6226  ;;  %v4027_v24 = vadd.f32 %v4025_v21, %v4023_v47  ;;  %v4017_v34 = vadd.f32 1.0, %v6225_v20 }
 0x9ab   : > { %v4028_v6 = vadd.f32 %v4026_v40, %v4024_v55  ;;  %v4018_v41 = vadd.f32 1.0, %v6227_v39 }
 0x9ac   : > { %6228 = vtanh.f32 %v4027_v24  ;;  %v4044_v7 = vsub.f32 %v4027_v24, %v8498_v28 }
 0x9ad   : > { %6230 = vrcp.f32 %v4017_v34  ;;  %v4045_v0 = vsub.f32 %v4028_v6, %v8501_v29  ;;  %v4303_v34 = vld [vmem:[%s6600_s23 + $0x80] sm:$0xff] }
 0x9ae   : > { %v4046_v56 = vmul.f32 %v4044_v7, %v4038_v36  ;;  %6232 = vtanh.f32 %v4028_v6  ;;  %v4307_v6 = vld [vmem:[%s6600_s23 + $0xa0] sm:$0xff]  ;;  %v4308_v7 = vld [vmem:[%s6600_s23 + $0xa8] sm:$0xff] }
 0x9af   : > { %v4047_v58 = vmul.f32 %v4045_v0, %v4038_v36  ;;  %6234 = vrcp.f32 %v4018_v41  ;;  %v4304_v41 = vld [vmem:[%s6600_s23 + $0x88] sm:$0xff] }
 0x9b0   : > { %v8662_v5 = vadd.f32 %v4046_v56, %v8498_v28 }
 0x9b1   : > { %v8665_v62 = vadd.f32 %v4047_v58, %v8501_v29  ;;  %v5837_v58 = vcombine.high %v4303_v34, %v4307_v6 }
 0x9b6   : > { %v6229_v47 = vpop.eup %6228 }
 0x9b7   : > { %v6231_v40 = vpop.eup %6230 }
 0x9b8   : > { %v6233_v55 = vpop.eup %6232  ;;  %v4031_v54 = vmul.f32 %v6231_v40, %v6229_v47  ;;  %v5839_v47 = vcombine.high %v4304_v41, %v4308_v7  ;;  %v4311_v40 = vld [vmem:[%s6600_s23 + $0xc0] sm:$0xff] }
 0x9b9   : > { %v6235_v42 = vpop.eup %6234 }
 0x9ba   : > { %v4032_v35 = vmul.f32 %v6235_v42, %v6233_v55  ;;  %v4033_v46 = vsub.f32 %v4031_v54, %v8506_v63  ;;  %v4315_v55 = vld [vmem:[%s6600_s23 + $0xe0] sm:$0xff]  ;;  %v4312_v54 = vld [vmem:[%s6600_s23 + $0xc8] sm:$0xff] }
 0x9bb   : > { %v4316_v42 = vld [vmem:[%s6600_s23 + $0xe8] sm:$0xff] }
 0x9bc   : > { %v4034_v12 = vsub.f32 %v4032_v35, %v8509_v53  ;;  %v4040_v25 = vmul.f32 %v4038_v36, %v4033_v46  ;;  %v5836_v35 = vcombine.low %v4303_v34, %v4307_v6  ;;  %v5838_v46 = vcombine.low %v4304_v41, %v4308_v7  ;;  %v4364_v34 = vld [vmem:[%s6600_s23 + $0x268] sm:$0xff] }
 0x9be   : > { %v4041_v21 = vmul.f32 %v4038_v36, %v4034_v12  ;;  %v8670_v20 = vadd.f32 %v4040_v25, %v8506_v63  ;;  %v5845_v12 = vcombine.high %v4311_v40, %v4315_v55  ;;  %v5847_v25 = vcombine.high %v4312_v54, %v4316_v42 }
 0x9c0   : > { %v8673_v28 = vadd.f32 %v4041_v21, %v8509_v53  ;;  %v8679_v39 = vpack.c.bf16 %v8670_v20, %v8670_v20  ;;  %v4319_v21 = vld [vmem:[%s6600_s23 + $0x100] sm:$0xff] }
 0x9c2   : > { %v4051_v29 = vpack.c.bf16 %v8673_v28, %v8673_v28 }
 0x9c4   : > { %4084 = vmatprep.mubr.bf16.mxu0 %v4051_v29  ;;  %4125 = vmatprep.mubr.bf16.mxu1 %v4051_v29 }
 0x9c5   : > { %4085 = vmatmul.mubr.bf16.vlgmr.msra.gmra.mrb[88].mxu0 %v8679_v39  ;;  %4126 = vmatmul.mubr.bf16.vlgmr.msra.gmra.mrb[88].mxu1 %v8679_v39 }
 0x9c6   : > { %4135 = vmatpush1.bf16.msra.mxu0 %v9460_v16  ;;  %4176 = vmatpush1.bf16.msra.mxu1 %v9461_v38  ;;  %v10059_v16 = vld [vmem:[#allocation111_spill] sm:$0xff]  ;;  %v10060_v38 = vld [vmem:[#allocation112_spill] sm:$0xff] }
 0x9c7   : > { %4166 = vmatprep.mubr.bf16.mxu0 %v4051_v29  ;;  %4207 = vmatprep.mubr.bf16.mxu1 %v4051_v29  ;;  %v4323_v29 = vld [vmem:[%s6600_s23 + $0x120] sm:$0xff] }
 0x9c8   : > { %4136 = vmatprep.subr.bf16.mxu0 %v9462_v15  ;;  %4177 = vmatprep.subr.bf16.mxu1 %v9463_v8  ;;  %v10061_v15 = vld [vmem:[#allocation113_spill] sm:$0xff]  ;;  %v10062_v8 = vld [vmem:[#allocation114_spill] sm:$0xff] }
 0x9ca   : > { %4137 = vmatpush1.bf16.msra.mxu0 %v9464_v27  ;;  %4178 = vmatpush1.bf16.msra.mxu1 %v9465_v11  ;;  %v10063_v27 = vld [vmem:[#allocation115_spill] sm:$0xff]  ;;  %v10064_v11 = vld [vmem:[#allocation116_spill] sm:$0xff] }
 0x9cb   : > { %4138 = vmatprep.subr.bf16.mxu0 %v9466_v22  ;;  %4179 = vmatprep.subr.bf16.mxu1 %v9467_v1  ;;  %v10065_v22 = vld [vmem:[#allocation117_spill] sm:$0xff]  ;;  %v10066_v1 = vld [vmem:[#allocation118_spill] sm:$0xff] }
 0x9ce   : > { %4139 = vmatpush1.bf16.msra.mxu0 %v9468_v32  ;;  %4180 = vmatpush1.bf16.msra.mxu1 %v9469_v13  ;;  %v10067_v32 = vld [vmem:[#allocation119_spill] sm:$0xff]  ;;  %v10068_v13 = vld [vmem:[#allocation120_spill] sm:$0xff] }
 0x9cf   : > { %4140 = vmatprep.subr.bf16.mxu0 %v9470_v17  ;;  %4181 = vmatprep.subr.bf16.mxu1 %v9471_v18  ;;  %v10069_v17 = vld [vmem:[#allocation121_spill] sm:$0xff]  ;;  %v10070_v18 = vld [vmem:[#allocation122_spill] sm:$0xff] }
 0x9d2   : > { %4141 = vmatpush1.bf16.msra.mxu0 %v9472_v19  ;;  %4182 = vmatpush1.bf16.msra.mxu1 %v9473_v48  ;;  %v10071_v19 = vld [vmem:[#allocation123_spill] sm:$0xff]  ;;  %v10072_v48 = vld [vmem:[#allocation124_spill] sm:$0xff] }
 0x9d3   : > { %4142 = vmatprep.subr.bf16.mxu0 %v9474_v33  ;;  %4183 = vmatprep.subr.bf16.mxu1 %v9564_v14  ;;  %v10073_v33 = vld [vmem:[#allocation125_spill] sm:$0xff]  ;;  %v10074_v14 = vld [vmem:[#allocation126_spill] sm:$0xff] }
 0x9d6   : > { %4143 = vmatpush1.bf16.msra.mxu0 %v9565_v10  ;;  %4184 = vmatpush1.bf16.msra.mxu1 %v9566_v61  ;;  %v10075_v10 = vld [vmem:[#allocation127_spill] sm:$0xff]  ;;  %v10076_v61 = vld [vmem:[#allocation128_spill] sm:$0xff] }
 0x9d7   : > { %4144 = vmatprep.subr.bf16.mxu0 %v9567_v57  ;;  %4185 = vmatprep.subr.bf16.mxu1 %v9568_v4  ;;  %v10077_v57 = vld [vmem:[#allocation129_spill] sm:$0xff]  ;;  %v4287_v4 = vld [vmem:[%s6600_s23] sm:$0xff] }
 0x9da   : > { %4145 = vmatpush1.bf16.msra.mxu0 %v9569_v31  ;;  %4186 = vmatpush1.bf16.msra.mxu1 %v9570_v52  ;;  %v4291_v31 = vld [vmem:[%s6600_s23 + $0x20] sm:$0xff]  ;;  %v4288_v52 = vld [vmem:[%s6600_s23 + $0x8] sm:$0xff] }
 0x9db   : > { %4146 = vmatprep.subr.bf16.mxu0 %v9571_v51  ;;  %4187 = vmatprep.subr.bf16.mxu1 %v9572_v2  ;;  %v4292_v51 = vld [vmem:[%s6600_s23 + $0x28] sm:$0xff]  ;;  %v10078_v2 = vld [vmem:[#allocation130_spill] sm:$0xff] }
 0x9dc   : > { %v5822_v63 = vcombine.low %v4288_v52, %v4292_v51 }
 0x9de   : > { %4147 = vmatpush1.bf16.msra.mxu0 %v9573_v43  ;;  %4188 = vmatpush1.bf16.msra.mxu1 %v9574_v23  ;;  %v10079_v43 = vld [vmem:[#allocation131_spill] sm:$0xff]  ;;  %v10080_v23 = vld [vmem:[#allocation132_spill] sm:$0xff] }
 0x9df   : > { %4148 = vmatprep.subr.bf16.mxu0 %v9575_v45  ;;  %4189 = vmatprep.subr.bf16.mxu1 %v9576_v50  ;;  %v10081_v45 = vld [vmem:[#allocation133_spill] sm:$0xff]  ;;  %v5821_v50 = vcombine.high %v4287_v4, %v4291_v31 }
 0x9e2   : > { %4149 = vmatpush1.bf16.msra.mxu0 %v9577_v9  ;;  %4190 = vmatpush1.bf16.msra.mxu1 %v9663_v49  ;;  %v5823_v9 = vcombine.high %v4288_v52, %v4292_v51  ;;  %v5820_v49 = vcombine.low %v4287_v4, %v4291_v31  ;;  %v4343_v52 = vld [vmem:[%s6600_s23 + $0x1c0] sm:$0xff] }
 0x9e3   : > { %4150 = vmatprep.subr.bf16.mxu0 %v9579_v59  ;;  %4191 = vmatprep.subr.bf16.mxu1 %v9580_v37  ;;  %v4295_v59 = vld [vmem:[%s6600_s23 + $0x40] sm:$0xff] }
 0x9e4   : > { %v4299_v37 = vld [vmem:[%s6600_s23 + $0x60] sm:$0xff] }
 0x9e5   : > { %v5829_v53 = vcombine.high %v4295_v59, %v4299_v37  ;;  %v5828_v0 = vcombine.low %v4295_v59, %v4299_v37  ;;  %v4347_v51 = vld [vmem:[%s6600_s23 + $0x1e0] sm:$0xff] }
 0x9e6   : > { %4151 = vmatpush1.bf16.msra.mxu0 %v9581_v26  ;;  %4192 = vmatpush1.bf16.msra.mxu1 %v9582_v60  ;;  %v4296_v26 = vld [vmem:[%s6600_s23 + $0x48] sm:$0xff]  ;;  %v4351_v59 = vld [vmem:[%s6600_s23 + $0x200] sm:$0xff] }
 0x9e7   : > { %4152 = vmatprep.subr.bf16.mxu0 %v9583_v3  ;;  %4193 = vmatprep.subr.bf16.mxu1 %v9584_v30  ;;  %v4300_v60 = vld [vmem:[%s6600_s23 + $0x68] sm:$0xff]  ;;  %v10082_v30 = vld [vmem:[#allocation134_spill] sm:$0xff]  ;;  %v4355_v37 = vld [vmem:[%s6600_s23 + $0x220] sm:$0xff] }
 0x9e8   : > { %v4284_v3 = vld [vmem:[%s8749_s21 + $0x8] sm:$0xff]  ;;  %v5831_v24 = vcombine.high %v4296_v26, %v4300_v60  ;;  %v5830_v56 = vcombine.low %v4296_v26, %v4300_v60  ;;  %v5884_v6 = vcombine.low %v4351_v59, %v4355_v37 }
 0x9e9   : > { %v8764_v36 = vpack.c.bf16 %v4284_v3, %v4284_v3  ;;  %v4352_v26 = vld [vmem:[%s6600_s23 + $0x208] sm:$0xff]  ;;  %v5876_v3 = vcombine.low %v4343_v52, %v4347_v51 }
 0x9ea   : > { %4153 = vmatpush1.bf16.msra.mxu0 %v9585_v44  ;;  %4194 = vmatpush1.bf16.msra.mxu1 %v10059_v16  ;;  %v10083_v44 = vld [vmem:[#allocation135_spill] sm:$0xff]  ;;  %v4324_v16 = vld [vmem:[%s6600_s23 + $0x128] sm:$0xff] }
 0x9eb   : > { %4154 = vmatprep.subr.bf16.mxu0 %v10060_v38  ;;  %4195 = vmatprep.subr.bf16.mxu1 %v10061_v15  ;;  %v5844_v38 = vcombine.low %v4311_v40, %v4315_v55  ;;  %v5846_v15 = vcombine.low %v4312_v54, %v4316_v42  ;;  %v4356_v60 = vld [vmem:[%s6600_s23 + $0x228] sm:$0xff] }
 0x9ec   : > { %v5886_v41 = vcombine.low %v4352_v26, %v4356_v60  ;;  %v4372_v40 = vld [vmem:[%s6600_s23 + $0x2a8] sm:$0xff] }
 0x9ee   : > { %4155 = vmatpush1.bf16.msra.mxu0 %v10062_v8  ;;  %4196 = vmatpush1.bf16.msra.mxu1 %v10063_v27  ;;  %v5853_v8 = vcombine.high %v4319_v21, %v4323_v29 }
 0x9ef   : > { %4156 = vmatprep.subr.bf16.mxu0 %v10064_v11  ;;  %4197 = vmatprep.subr.bf16.mxu1 %v10065_v22  ;;  %v4327_v11 = vld [vmem:[%s6600_s23 + $0x140] sm:$0xff] }
 0x9f0   : > { %v4331_v22 = vld [vmem:[%s6600_s23 + $0x160] sm:$0xff] }
 0x9f2   : > { %4157 = vmatpush1.bf16.msra.mxu0 %v10066_v1  ;;  %4198 = vmatpush1.bf16.msra.mxu1 %v10067_v32  ;;  %v4328_v1 = vld [vmem:[%s6600_s23 + $0x148] sm:$0xff] }
 0x9f3   : > { %4158 = vmatprep.subr.bf16.mxu0 %v10068_v13  ;;  %4199 = vmatprep.subr.bf16.mxu1 %v10069_v17  ;;  %v4332_v32 = vld [vmem:[%s6600_s23 + $0x168] sm:$0xff]  ;;  %v5852_v13 = vcombine.low %v4319_v21, %v4323_v29 }
 0x9f4   : > { %v4380_v21 = vld [vmem:[%s6600_s23 + $0x2e8] sm:$0xff] }
 0x9f6   : > { %4159 = vmatpush1.bf16.msra.mxu0 %v10070_v18  ;;  %4200 = vmatpush1.bf16.msra.mxu1 %v10071_v19  ;;  %v5861_v18 = vcombine.high %v4327_v11, %v4331_v22  ;;  %v5863_v19 = vcombine.high %v4328_v1, %v4332_v32 }
 0x9f7   : > { %4160 = vmatprep.subr.bf16.mxu0 %v10072_v48  ;;  %4201 = vmatprep.subr.bf16.mxu1 %v10073_v33  ;;  %v4335_v48 = vld [vmem:[%s6600_s23 + $0x180] sm:$0xff] }
 0x9f8   : > { %v4339_v33 = vld [vmem:[%s6600_s23 + $0x1a0] sm:$0xff] }
 0x9f9   : > { %v5869_v4 = vcombine.high %v4335_v48, %v4339_v33 }
 0x9fa   : > { %4161 = vmatpush1.bf16.msra.mxu0 %v10074_v14  ;;  %4202 = vmatpush1.bf16.msra.mxu1 %v10075_v10  ;;  %v4336_v14 = vld [vmem:[%s6600_s23 + $0x188] sm:$0xff] }
 0x9fb   : > { %4162 = vmatprep.subr.bf16.mxu0 %v10076_v61  ;;  %4203 = vmatprep.subr.bf16.mxu1 %v10077_v57  ;;  %v4340_v10 = vld [vmem:[%s6600_s23 + $0x1a8] sm:$0xff]  ;;  %v5860_v61 = vcombine.low %v4327_v11, %v4331_v22  ;;  %v5862_v57 = vcombine.low %v4328_v1, %v4332_v32 }
 0x9fc   : > { %v5871_v31 = vcombine.high %v4336_v14, %v4340_v10  ;;  %v4388_v11 = vld [vmem:[%s6600_s23 + $0x328] sm:$0xff] }
 0x9fe   : > { %4163 = vmatpush1.bf16.msra.mxu0 %v10078_v2  ;;  %4204 = vmatpush1.bf16.msra.mxu1 %v10079_v43  ;;  %v4344_v2 = vld [vmem:[%s6600_s23 + $0x1c8] sm:$0xff] }
 0x9ff   : > { %4164 = vmatprep.subr.bf16.mxu0 %v10080_v23  ;;  %4205 = vmatprep.subr.bf16.mxu1 %v10081_v45  ;;  %v4348_v43 = vld [vmem:[%s6600_s23 + $0x1e8] sm:$0xff]  ;;  %v5868_v23 = vcombine.low %v4335_v48, %v4339_v33  ;;  %v5870_v45 = vcombine.low %v4336_v14, %v4340_v10 }
 0xa00   : > { %v4396_v48 = vld [vmem:[%s6600_s23 + $0x368] sm:$0xff] }
 0xa02   : > { %4165 = vmatpush1.bf16.msra.mxu0 %v10082_v30  ;;  %4206 = vmatpush1.bf16.msra.mxu1 %v10083_v44  ;;  %v5878_v30 = vcombine.low %v4344_v2, %v4348_v43  ;;  %v5885_v44 = vcombine.high %v4351_v59, %v4355_v37  ;;  %v4412_v59 = vld [vmem:[%s6600_s23 + $0x3e8] sm:$0xff] }
 0xa03   : > { %5097 = vmatprep.subr.bf16.mxu0 %v5821_v50  ;;  %5138 = vmatprep.subr.bf16.mxu1 %v5823_v9  ;;  %v5877_v50 = vcombine.high %v4343_v52, %v4347_v51  ;;  %v5879_v9 = vcombine.high %v4344_v2, %v4348_v43  ;;  %v4404_v52 = vld [vmem:[%s6600_s23 + $0x3a8] sm:$0xff] }
 0xa05   : > { %4167 = vmatmul.mubr.bf16.vlgmr.msra.gmra.mrb[92].mxu0 %v8679_v39  ;;  %4208 = vmatmul.mubr.bf16.vlgmr.msra.gmra.mrb[92].mxu1 %v8679_v39  ;;  %v4320_v39 = vld [vmem:[%s6600_s23 + $0x108] sm:$0xff] }
 0xa06   : > { %5098 = vmatpush1.bf16.msra.mxu0 %v5820_v49  ;;  %5139 = vmatpush1.bf16.msra.mxu1 %v5822_v63  ;;  %v5855_v27 = vcombine.high %v4320_v39, %v4324_v16  ;;  %v5854_v17 = vcombine.low %v4320_v39, %v4324_v16  ;;  %v5887_v49 = vcombine.high %v4352_v26, %v4356_v60  ;;  %v4359_v63 = vld [vmem:[%s6600_s23 + $0x240] sm:$0xff] }
 0xa07   : > { %5099 = vmatprep.subr.bf16.mxu0 %v5829_v53  ;;  %5140 = vmatprep.subr.bf16.mxu1 %v5831_v24  ;;  %v4363_v53 = vld [vmem:[%s6600_s23 + $0x260] sm:$0xff]  ;;  %v4360_v24 = vld [vmem:[%s6600_s23 + $0x248] sm:$0xff] }
 0xa08   : > { %5129 = vmatprep.mubr.bf16.mxu0 %v8764_v36  ;;  %5170 = vmatprep.mubr.bf16.mxu1 %v8764_v36  ;;  %v5893_v7 = vcombine.high %v4359_v63, %v4363_v53  ;;  %v5892_v55 = vcombine.low %v4359_v63, %v4363_v53  ;;  %v5894_v54 = vcombine.low %v4360_v24, %v4364_v34  ;;  %v4294_v63 = vld [vmem:[%s6600_s23 + $0x38] sm:$0xff] }
 0xa0a   : > { %5100 = vmatpush1.bf16.msra.mxu0 %v5828_v0  ;;  %5141 = vmatpush1.bf16.msra.mxu1 %v5830_v56  ;;  %v5895_v0 = vcombine.high %v4360_v24, %v4364_v34  ;;  %v4367_v56 = vld [vmem:[%s6600_s23 + $0x280] sm:$0xff] }
 0xa0b   : > { %5101 = vmatprep.subr.bf16.mxu0 %v5837_v58  ;;  %5142 = vmatprep.subr.bf16.mxu1 %v5839_v47  ;;  %v4371_v58 = vld [vmem:[%s6600_s23 + $0x2a0] sm:$0xff]  ;;  %v4368_v47 = vld [vmem:[%s6600_s23 + $0x288] sm:$0xff] }
 0xa0c   : > { %v5901_v42 = vcombine.high %v4367_v56, %v4371_v58  ;;  %v5900_v29 = vcombine.low %v4367_v56, %v4371_v58  ;;  %v5902_v39 = vcombine.low %v4368_v47, %v4372_v40  ;;  %v4283_v34 = vld [vmem:[%s8749_s21] sm:$0xff]  ;;  %v4298_v56 = vld [vmem:[%s6600_s23 + $0x58] sm:$0xff] }
 0xa0d   : > { %v4302_v58 = vld [vmem:[%s6600_s23 + $0x78] sm:$0xff] }
 0xa0e   : > { %5102 = vmatpush1.bf16.msra.mxu0 %v5836_v35  ;;  %5143 = vmatpush1.bf16.msra.mxu1 %v5838_v46  ;;  %v5903_v35 = vcombine.high %v4368_v47, %v4372_v40  ;;  %v4375_v46 = vld [vmem:[%s6600_s23 + $0x2c0] sm:$0xff]  ;;  %v8831_v47 = vpack.c.bf16 %v4283_v34, %v4283_v34  ;;  %v4353_v34 = vld [vmem:[%s6600_s23 + $0x210] sm:$0xff] }
 0xa0f   : > { %5103 = vmatprep.subr.bf16.mxu0 %v5845_v12  ;;  %5144 = vmatprep.subr.bf16.mxu1 %v5847_v25  ;;  %v4379_v12 = vld [vmem:[%s6600_s23 + $0x2e0] sm:$0xff]  ;;  %v4376_v25 = vld [vmem:[%s6600_s23 + $0x2c8] sm:$0xff] }
 0xa10   : > { %v5909_v16 = vcombine.high %v4375_v46, %v4379_v12  ;;  %v5908_v22 = vcombine.low %v4375_v46, %v4379_v12  ;;  %v5910_v1 = vcombine.low %v4376_v25, %v4380_v21  ;;  %v4309_v46 = vld [vmem:[%s6600_s23 + $0xb0] sm:$0xff]  ;;  %v4306_v12 = vld [vmem:[%s6600_s23 + $0x98] sm:$0xff] }
 0xa12   : > { %5104 = vmatpush1.bf16.msra.mxu0 %v5844_v38  ;;  %5145 = vmatpush1.bf16.msra.mxu1 %v5846_v15  ;;  %v5911_v38 = vcombine.high %v4376_v25, %v4380_v21  ;;  %v4383_v15 = vld [vmem:[%s6600_s23 + $0x300] sm:$0xff]  ;;  %v4310_v25 = vld [vmem:[%s6600_s23 + $0xb8] sm:$0xff] }
 0xa13   : > { %5105 = vmatprep.subr.bf16.mxu0 %v5853_v8  ;;  %5146 = vmatprep.subr.bf16.mxu1 %v5855_v27  ;;  %v4387_v8 = vld [vmem:[%s6600_s23 + $0x320] sm:$0xff]  ;;  %v4384_v27 = vld [vmem:[%s6600_s23 + $0x308] sm:$0xff] }
 0xa14   : > { %v5917_v32 = vcombine.high %v4383_v15, %v4387_v8  ;;  %v5916_v33 = vcombine.low %v4383_v15, %v4387_v8  ;;  %v5918_v14 = vcombine.low %v4384_v27, %v4388_v11  ;;  %v4317_v15 = vld [vmem:[%s6600_s23 + $0xf0] sm:$0xff]  ;;  %v4314_v8 = vld [vmem:[%s6600_s23 + $0xd8] sm:$0xff] }
 0xa16   : > { %5106 = vmatpush1.bf16.msra.mxu0 %v5852_v13  ;;  %5147 = vmatpush1.bf16.msra.mxu1 %v5854_v17  ;;  %v5919_v13 = vcombine.high %v4384_v27, %v4388_v11  ;;  %v4391_v17 = vld [vmem:[%s6600_s23 + $0x340] sm:$0xff]  ;;  %v4318_v27 = vld [vmem:[%s6600_s23 + $0xf8] sm:$0xff] }
 0xa17   : > { %5107 = vmatprep.subr.bf16.mxu0 %v5861_v18  ;;  %5148 = vmatprep.subr.bf16.mxu1 %v5863_v19  ;;  %v4395_v18 = vld [vmem:[%s6600_s23 + $0x360] sm:$0xff]  ;;  %v4392_v19 = vld [vmem:[%s6600_s23 + $0x348] sm:$0xff] }
 0xa18   : > { %v5925_v10 = vcombine.high %v4391_v17, %v4395_v18  ;;  %v5924_v51 = vcombine.low %v4391_v17, %v4395_v18  ;;  %v5926_v2 = vcombine.low %v4392_v19, %v4396_v48  ;;  %v4325_v17 = vld [vmem:[%s6600_s23 + $0x130] sm:$0xff]  ;;  %v4322_v18 = vld [vmem:[%s6600_s23 + $0x118] sm:$0xff] }
 0xa1a   : > { %5108 = vmatpush1.bf16.msra.mxu0 %v5860_v61  ;;  %5149 = vmatpush1.bf16.msra.mxu1 %v5862_v57  ;;  %v5927_v61 = vcombine.high %v4392_v19, %v4396_v48  ;;  %v4399_v57 = vld [vmem:[%s6600_s23 + $0x380] sm:$0xff]  ;;  %v4326_v19 = vld [vmem:[%s6600_s23 + $0x138] sm:$0xff] }
 0xa1b   : > { %5109 = vmatprep.subr.bf16.mxu0 %v5869_v4  ;;  %5150 = vmatprep.subr.bf16.mxu1 %v5871_v31  ;;  %v4403_v4 = vld [vmem:[%s6600_s23 + $0x3a0] sm:$0xff]  ;;  %v4400_v31 = vld [vmem:[%s6600_s23 + $0x388] sm:$0xff] }
 0xa1c   : > { %v5933_v43 = vcombine.high %v4399_v57, %v4403_v4  ;;  %v5932_v37 = vcombine.low %v4399_v57, %v4403_v4  ;;  %v5934_v26 = vcombine.low %v4400_v31, %v4404_v52  ;;  %v4330_v57 = vld [vmem:[%s6600_s23 + $0x158] sm:$0xff] }
 0xa1d   : > { %v4334_v4 = vld [vmem:[%s6600_s23 + $0x178] sm:$0xff] }
 0xa1e   : > { %5110 = vmatpush1.bf16.msra.mxu0 %v5868_v23  ;;  %5151 = vmatpush1.bf16.msra.mxu1 %v5870_v45  ;;  %v5935_v23 = vcombine.high %v4400_v31, %v4404_v52  ;;  %v4407_v45 = vld [vmem:[%s6600_s23 + $0x3c0] sm:$0xff]  ;;  %v5858_v52 = vcombine.low %v4322_v18, %v4326_v19 }
 0xa1f   : > { %5111 = vmatprep.subr.bf16.mxu0 %v5877_v50  ;;  %5152 = vmatprep.subr.bf16.mxu1 %v5879_v9  ;;  %v4411_v50 = vld [vmem:[%s6600_s23 + $0x3e0] sm:$0xff]  ;;  %v4408_v9 = vld [vmem:[%s6600_s23 + $0x3c8] sm:$0xff] }
 0xa20   : > { %v5941_v60 = vcombine.high %v4407_v45, %v4411_v50  ;;  %v5940_v53 = vcombine.low %v4407_v45, %v4411_v50  ;;  %v5942_v24 = vcombine.low %v4408_v9, %v4412_v59  ;;  %v4338_v45 = vld [vmem:[%s6600_s23 + $0x198] sm:$0xff] }
 0xa21   : > { %v4342_v50 = vld [vmem:[%s6600_s23 + $0x1b8] sm:$0xff] }
 0xa22   : > { %5112 = vmatpush1.bf16.msra.mxu0 %v5876_v3  ;;  %5153 = vmatpush1.bf16.msra.mxu1 %v5878_v30  ;;  %v5943_v3 = vcombine.high %v4408_v9, %v4412_v59  ;;  %v4289_v30 = vld [vmem:[%s6600_s23 + $0x10] sm:$0xff]  ;;  %v5866_v59 = vcombine.low %v4330_v57, %v4334_v4 }
 0xa23   : > { %5113 = vmatprep.subr.bf16.mxu0 %v5885_v44  ;;  %5154 = vmatprep.subr.bf16.mxu1 %v5887_v49  ;;  %v4293_v44 = vld [vmem:[%s6600_s23 + $0x30] sm:$0xff]  ;;  %v4290_v49 = vld [vmem:[%s6600_s23 + $0x18] sm:$0xff] }
 0xa24   : > { %v5824_v40 = vcombine.low %v4289_v30, %v4293_v44 }
 0xa26   : > { %5114 = vmatpush1.bf16.msra.mxu0 %v5884_v6  ;;  %5155 = vmatpush1.bf16.msra.mxu1 %v5886_v41  ;;  %v5825_v6 = vcombine.high %v4289_v30, %v4293_v44  ;;  %v5827_v41 = vcombine.high %v4290_v49, %v4294_v63  ;;  %v4346_v30 = vld [vmem:[%s6600_s23 + $0x1d8] sm:$0xff] }
 0xa27   : > { %5115 = vmatprep.subr.bf16.mxu0 %v5893_v7  ;;  %5156 = vmatprep.subr.bf16.mxu1 %v5895_v0  ;;  %v4297_v7 = vld [vmem:[%s6600_s23 + $0x50] sm:$0xff]  ;;  %v4350_v44 = vld [vmem:[%s6600_s23 + $0x1f8] sm:$0xff] }
 0xa28   : > { %v4301_v0 = vld [vmem:[%s6600_s23 + $0x70] sm:$0xff] }
 0xa29   : > { %v5832_v21 = vcombine.low %v4297_v7, %v4301_v0 }
 0xa2a   : > { %5116 = vmatpush1.bf16.msra.mxu0 %v5892_v55  ;;  %5157 = vmatpush1.bf16.msra.mxu1 %v5894_v54  ;;  %v5826_v55 = vcombine.low %v4290_v49, %v4294_v63  ;;  %v5833_v54 = vcombine.high %v4297_v7, %v4301_v0  ;;  %v5874_v63 = vcombine.low %v4338_v45, %v4342_v50  ;;  %v4358_v7 = vld [vmem:[%s6600_s23 + $0x238] sm:$0xff] }
 0xa2b   : > { %5117 = vmatprep.subr.bf16.mxu0 %v5901_v42  ;;  %5158 = vmatprep.subr.bf16.mxu1 %v5903_v35  ;;  %v5835_v42 = vcombine.high %v4298_v56, %v4302_v58  ;;  %v4305_v35 = vld [vmem:[%s6600_s23 + $0x90] sm:$0xff] }
 0xa2c   : > { %v5840_v11 = vcombine.low %v4305_v35, %v4309_v46 }
 0xa2e   : > { %5118 = vmatpush1.bf16.msra.mxu0 %v5900_v29  ;;  %5159 = vmatpush1.bf16.msra.mxu1 %v5902_v39  ;;  %v5834_v29 = vcombine.low %v4298_v56, %v4302_v58  ;;  %v5841_v39 = vcombine.high %v4305_v35, %v4309_v46  ;;  %v5882_v56 = vcombine.low %v4346_v30, %v4350_v44  ;;  %v4366_v35 = vld [vmem:[%s6600_s23 + $0x278] sm:$0xff] }
 0xa2f   : > { %5119 = vmatprep.subr.bf16.mxu0 %v5909_v16  ;;  %5160 = vmatprep.subr.bf16.mxu1 %v5911_v38  ;;  %v5843_v16 = vcombine.high %v4306_v12, %v4310_v25  ;;  %v4313_v38 = vld [vmem:[%s6600_s23 + $0xd0] sm:$0xff] }
 0xa30   : > { %v5848_v48 = vcombine.low %v4313_v38, %v4317_v15 }
 0xa32   : > { %5120 = vmatpush1.bf16.msra.mxu0 %v5908_v22  ;;  %5161 = vmatpush1.bf16.msra.mxu1 %v5910_v1  ;;  %v5842_v22 = vcombine.low %v4306_v12, %v4310_v25  ;;  %v5849_v1 = vcombine.high %v4313_v38, %v4317_v15  ;;  %v4374_v38 = vld [vmem:[%s6600_s23 + $0x2b8] sm:$0xff] }
 0xa33   : > { %5121 = vmatprep.subr.bf16.mxu0 %v5917_v32  ;;  %5162 = vmatprep.subr.bf16.mxu1 %v5919_v13  ;;  %v5851_v32 = vcombine.high %v4314_v8, %v4318_v27  ;;  %v4321_v13 = vld [vmem:[%s6600_s23 + $0x110] sm:$0xff] }
 0xa34   : > { %v5856_v31 = vcombine.low %v4321_v13, %v4325_v17 }
 0xa36   : > { %5122 = vmatpush1.bf16.msra.mxu0 %v5916_v33  ;;  %5163 = vmatpush1.bf16.msra.mxu1 %v5918_v14  ;;  %v5857_v33 = vcombine.high %v4321_v13, %v4325_v17  ;;  %v5859_v14 = vcombine.high %v4322_v18, %v4326_v19  ;;  %v4382_v13 = vld [vmem:[%s6600_s23 + $0x2f8] sm:$0xff] }
 0xa37   : > { %5123 = vmatprep.subr.bf16.mxu0 %v5925_v10  ;;  %5164 = vmatprep.subr.bf16.mxu1 %v5927_v61  ;;  %v4329_v10 = vld [vmem:[%s6600_s23 + $0x150] sm:$0xff] }
 0xa38   : > { %v4333_v61 = vld [vmem:[%s6600_s23 + $0x170] sm:$0xff] }
 0xa39   : > { %v5864_v9 = vcombine.low %v4329_v10, %v4333_v61 }
 0xa3a   : > { %5124 = vmatpush1.bf16.msra.mxu0 %v5924_v51  ;;  %5165 = vmatpush1.bf16.msra.mxu1 %v5926_v2  ;;  %v5865_v51 = vcombine.high %v4329_v10, %v4333_v61  ;;  %v5867_v2 = vcombine.high %v4330_v57, %v4334_v4  ;;  %v4390_v10 = vld [vmem:[%s6600_s23 + $0x338] sm:$0xff] }
 0xa3b   : > { %5125 = vmatprep.subr.bf16.mxu0 %v5933_v43  ;;  %5166 = vmatprep.subr.bf16.mxu1 %v5935_v23  ;;  %v4337_v43 = vld [vmem:[%s6600_s23 + $0x190] sm:$0xff] }
 0xa3c   : > { %v4341_v23 = vld [vmem:[%s6600_s23 + $0x1b0] sm:$0xff] }
 0xa3d   : > { %v5872_v49 = vcombine.low %v4337_v43, %v4341_v23 }
 0xa3e   : > { %5126 = vmatpush1.bf16.msra.mxu0 %v5932_v37  ;;  %5167 = vmatpush1.bf16.msra.mxu1 %v5934_v26  ;;  %v5873_v37 = vcombine.high %v4337_v43, %v4341_v23  ;;  %v5875_v26 = vcombine.high %v4338_v45, %v4342_v50  ;;  %v4398_v43 = vld [vmem:[%s6600_s23 + $0x378] sm:$0xff] }
 0xa3f   : > { %5127 = vmatprep.subr.bf16.mxu0 %v5941_v60  ;;  %5168 = vmatprep.subr.bf16.mxu1 %v5943_v3  ;;  %v4345_v60 = vld [vmem:[%s6600_s23 + $0x1d0] sm:$0xff] }
 0xa40   : > { %v4349_v3 = vld [vmem:[%s6600_s23 + $0x1f0] sm:$0xff] }
 0xa41   : > { %v5880_v0 = vcombine.low %v4345_v60, %v4349_v3 }
 0xa42   : > { %5128 = vmatpush1.bf16.msra.mxu0 %v5940_v53  ;;  %5169 = vmatpush1.bf16.msra.mxu1 %v5942_v24  ;;  %v5881_v53 = vcombine.high %v4345_v60, %v4349_v3  ;;  %v5883_v24 = vcombine.high %v4346_v30, %v4350_v44  ;;  %v4406_v60 = vld [vmem:[%s6600_s23 + $0x3b8] sm:$0xff] }
 0xa43   : > { %5179 = vmatprep.subr.bf16.mxu0 %v5825_v6  ;;  %5220 = vmatprep.subr.bf16.mxu1 %v5827_v41  ;;  %v4357_v6 = vld [vmem:[%s6600_s23 + $0x230] sm:$0xff]  ;;  %v4354_v41 = vld [vmem:[%s6600_s23 + $0x218] sm:$0xff] }
 0xa44   : > { %v5889_v58 = vcombine.high %v4353_v34, %v4357_v6  ;;  %v5888_v46 = vcombine.low %v4353_v34, %v4357_v6  ;;  %v5890_v12 = vcombine.low %v4354_v41, %v4358_v7  ;;  %v4414_v34 = vld [vmem:[%s6600_s23 + $0x3f8] sm:$0xff] }
 0xa45   : > { %5130 = vmatmul.mubr.bf16.vlgmr.msra.gmra.mrb[96].mxu0 %v8831_v47  ;;  %5171 = vmatmul.mubr.bf16.vlgmr.msra.gmra.mrb[96].mxu1 %v8831_v47 }
 0xa46   : > { %5180 = vmatpush1.bf16.msra.mxu0 %v5824_v40  ;;  %5221 = vmatpush1.bf16.msra.mxu1 %v5826_v55  ;;  %v5891_v40 = vcombine.high %v4354_v41, %v4358_v7  ;;  %v4361_v55 = vld [vmem:[%s6600_s23 + $0x250] sm:$0xff] }
 0xa47   : > { %5181 = vmatprep.subr.bf16.mxu0 %v5833_v54  ;;  %5222 = vmatprep.subr.bf16.mxu1 %v5835_v42  ;;  %v4365_v54 = vld [vmem:[%s6600_s23 + $0x270] sm:$0xff]  ;;  %v4362_v42 = vld [vmem:[%s6600_s23 + $0x258] sm:$0xff] }
 0xa48   : > { %5211 = vmatprep.mubr.bf16.mxu0 %v8764_v36  ;;  %5252 = vmatprep.mubr.bf16.mxu1 %v8764_v36  ;;  %v5850_v36 = vcombine.low %v4314_v8, %v4318_v27  ;;  %v5897_v25 = vcombine.high %v4361_v55, %v4365_v54  ;;  %v5896_v15 = vcombine.low %v4361_v55, %v4365_v54  ;;  %v10084_v54 = vld [vmem:[#allocation161_spill] sm:$0xff] }
 0xa49   : > { %v5898_v8 = vcombine.low %v4362_v42, %v4366_v35 }
 0xa4a   : > { %5182 = vmatpush1.bf16.msra.mxu0 %v5832_v21  ;;  %5223 = vmatpush1.bf16.msra.mxu1 %v5834_v29  ;;  %v5899_v21 = vcombine.high %v4362_v42, %v4366_v35  ;;  %v4369_v29 = vld [vmem:[%s6600_s23 + $0x290] sm:$0xff] }
 0xa4b   : > { %5183 = vmatprep.subr.bf16.mxu0 %v5841_v39  ;;  %5224 = vmatprep.subr.bf16.mxu1 %v5843_v16  ;;  %v4373_v39 = vld [vmem:[%s6600_s23 + $0x2b0] sm:$0xff]  ;;  %v4370_v16 = vld [vmem:[%s6600_s23 + $0x298] sm:$0xff] }
 0xa4c   : > { %v5905_v27 = vcombine.high %v4369_v29, %v4373_v39  ;;  %v5904_v17 = vcombine.low %v4369_v29, %v4373_v39  ;;  %v5906_v18 = vcombine.low %v4370_v16, %v4374_v38  ;;  %v10085_v35 = vld [vmem:[#allocation162_spill] sm:$0xff]  ;;  %v10087_v39 = vld [vmem:[#allocation164_spill] sm:$0xff] }
 0xa4e   : > { %5184 = vmatpush1.bf16.msra.mxu0 %v5840_v11  ;;  %5225 = vmatpush1.bf16.msra.mxu1 %v5842_v22  ;;  %v5907_v11 = vcombine.high %v4370_v16, %v4374_v38  ;;  %v4377_v22 = vld [vmem:[%s6600_s23 + $0x2d0] sm:$0xff] }
 0xa4f   : > { %5185 = vmatprep.subr.bf16.mxu0 %v5849_v1  ;;  %5226 = vmatprep.subr.bf16.mxu1 %v5851_v32  ;;  %v4381_v1 = vld [vmem:[%s6600_s23 + $0x2f0] sm:$0xff]  ;;  %v4378_v32 = vld [vmem:[%s6600_s23 + $0x2d8] sm:$0xff] }
 0xa50   : > { %v5913_v19 = vcombine.high %v4377_v22, %v4381_v1  ;;  %v5912_v61 = vcombine.low %v4377_v22, %v4381_v1  ;;  %v5914_v57 = vcombine.low %v4378_v32, %v4382_v13 }
 0xa52   : > { %5186 = vmatpush1.bf16.msra.mxu0 %v5848_v48  ;;  %5227 = vmatpush1.bf16.msra.mxu1 %v5850_v36  ;;  %v5915_v48 = vcombine.high %v4378_v32, %v4382_v13  ;;  %v4385_v36 = vld [vmem:[%s6600_s23 + $0x310] sm:$0xff] }
 0xa53   : > { %5187 = vmatprep.subr.bf16.mxu0 %v5857_v33  ;;  %5228 = vmatprep.subr.bf16.mxu1 %v5859_v14  ;;  %v4389_v33 = vld [vmem:[%s6600_s23 + $0x330] sm:$0xff]  ;;  %v4386_v14 = vld [vmem:[%s6600_s23 + $0x318] sm:$0xff] }
 0xa54   : > { %v5921_v4 = vcombine.high %v4385_v36, %v4389_v33  ;;  %v5920_v23 = vcombine.low %v4385_v36, %v4389_v33  ;;  %v5922_v45 = vcombine.low %v4386_v14, %v4390_v10 }
 0xa56   : > { %5188 = vmatpush1.bf16.msra.mxu0 %v5856_v31  ;;  %5229 = vmatpush1.bf16.msra.mxu1 %v5858_v52  ;;  %v5923_v31 = vcombine.high %v4386_v14, %v4390_v10  ;;  %v4393_v52 = vld [vmem:[%s6600_s23 + $0x350] sm:$0xff] }
 0xa57   : > { %5189 = vmatprep.subr.bf16.mxu0 %v5865_v51  ;;  %5230 = vmatprep.subr.bf16.mxu1 %v5867_v2  ;;  %v4397_v51 = vld [vmem:[%s6600_s23 + $0x370] sm:$0xff]  ;;  %v4394_v2 = vld [vmem:[%s6600_s23 + $0x358] sm:$0xff] }
 0xa58   : > { %v5929_v50 = vcombine.high %v4393_v52, %v4397_v51  ;;  %v5928_v3 = vcombine.low %v4393_v52, %v4397_v51  ;;  %v5930_v30 = vcombine.low %v4394_v2, %v4398_v43  ;;  %v10088_v52 = vld [vmem:[#allocation189_spill] sm:$0xff] }
 0xa5a   : > { %5190 = vmatpush1.bf16.msra.mxu0 %v5864_v9  ;;  %5231 = vmatpush1.bf16.msra.mxu1 %v5866_v59  ;;  %v5931_v9 = vcombine.high %v4394_v2, %v4398_v43  ;;  %v4401_v59 = vld [vmem:[%s6600_s23 + $0x390] sm:$0xff] }
 0xa5b   : > { %5191 = vmatprep.subr.bf16.mxu0 %v5873_v37  ;;  %5232 = vmatprep.subr.bf16.mxu1 %v5875_v26  ;;  %v4405_v37 = vld [vmem:[%s6600_s23 + $0x3b0] sm:$0xff]  ;;  %v4402_v26 = vld [vmem:[%s6600_s23 + $0x398] sm:$0xff] }
 0xa5c   : > { %v5937_v44 = vcombine.high %v4401_v59, %v4405_v37  ;;  %v5936_v6 = vcombine.low %v4401_v59, %v4405_v37  ;;  %v5938_v41 = vcombine.low %v4402_v26, %v4406_v60  ;;  %v10089_v2 = vld [vmem:[#allocation190_spill] sm:$0xff] }
 0xa5e   : > { %5192 = vmatpush1.bf16.msra.mxu0 %v5872_v49  ;;  %5233 = vmatpush1.bf16.msra.mxu1 %v5874_v63  ;;  %v5939_v49 = vcombine.high %v4402_v26, %v4406_v60  ;;  %v4409_v63 = vld [vmem:[%s6600_s23 + $0x3d0] sm:$0xff] }
 0xa5f   : > { %5193 = vmatprep.subr.bf16.mxu0 %v5881_v53  ;;  %5234 = vmatprep.subr.bf16.mxu1 %v5883_v24  ;;  %v4413_v53 = vld [vmem:[%s6600_s23 + $0x3f0] sm:$0xff]  ;;  %v4410_v24 = vld [vmem:[%s6600_s23 + $0x3d8] sm:$0xff] }
 0xa60   : > { %v5945_v7 = vcombine.high %v4409_v63, %v4413_v53 }
 0xa62   : > { %5194 = vmatpush1.bf16.msra.mxu0 %v5880_v0  ;;  %5235 = vmatpush1.bf16.msra.mxu1 %v5882_v56  ;;  %v5947_v0 = vcombine.high %v4410_v24, %v4414_v34  ;;  %v5944_v56 = vcombine.low %v4409_v63, %v4413_v53 }
 0xa63   : > { %5195 = vmatprep.subr.bf16.mxu0 %v5889_v58  ;;  %5236 = vmatprep.subr.bf16.mxu1 %v5891_v40  ;;  %v5946_v58 = vcombine.low %v4410_v24, %v4414_v34 }
 0xa66   : > { %5196 = vmatpush1.bf16.msra.mxu0 %v5888_v46  ;;  %5237 = vmatpush1.bf16.msra.mxu1 %v5890_v12 }
 0xa67   : > { %5197 = vmatprep.subr.bf16.mxu0 %v5897_v25  ;;  %5238 = vmatprep.subr.bf16.mxu1 %v5899_v21  ;;  %v10086_v21 = vld [vmem:[#allocation163_spill] sm:$0xff] }
 0xa6a   : > { %5198 = vmatpush1.bf16.msra.mxu0 %v5896_v15  ;;  %5239 = vmatpush1.bf16.msra.mxu1 %v5898_v8 }
 0xa6b   : > { %5199 = vmatprep.subr.bf16.mxu0 %v5905_v27  ;;  %5240 = vmatprep.subr.bf16.mxu1 %v5907_v11 }
 0xa6e   : > { %5200 = vmatpush1.bf16.msra.mxu0 %v5904_v17  ;;  %5241 = vmatpush1.bf16.msra.mxu1 %v5906_v18 }
 0xa6f   : > { %5201 = vmatprep.subr.bf16.mxu0 %v5913_v19  ;;  %5242 = vmatprep.subr.bf16.mxu1 %v5915_v48 }
 0xa72   : > { %5202 = vmatpush1.bf16.msra.mxu0 %v5912_v61  ;;  %5243 = vmatpush1.bf16.msra.mxu1 %v5914_v57 }
 0xa73   : > { %5203 = vmatprep.subr.bf16.mxu0 %v5921_v4  ;;  %5244 = vmatprep.subr.bf16.mxu1 %v5923_v31 }
 0xa76   : > { %5204 = vmatpush1.bf16.msra.mxu0 %v5920_v23  ;;  %5245 = vmatpush1.bf16.msra.mxu1 %v5922_v45  ;;  %v10090_v45 = vld [vmem:[#allocation191_spill] sm:$0xff] }
 0xa77   : > { %5205 = vmatprep.subr.bf16.mxu0 %v5929_v50  ;;  %5246 = vmatprep.subr.bf16.mxu1 %v5931_v9  ;;  %v10091_v50 = vld [vmem:[#allocation192_spill] sm:$0xff] }
 0xa7a   : > { %5206 = vmatpush1.bf16.msra.mxu0 %v5928_v3  ;;  %5247 = vmatpush1.bf16.msra.mxu1 %v5930_v30 }
 0xa7b   : > { %5207 = vmatprep.subr.bf16.mxu0 %v5937_v44  ;;  %5248 = vmatprep.subr.bf16.mxu1 %v5939_v49 }
 0xa7e   : > { %5208 = vmatpush1.bf16.msra.mxu0 %v5936_v6  ;;  %5249 = vmatpush1.bf16.msra.mxu1 %v5938_v41 }
 0xa7f   : > { %5209 = vmatprep.subr.bf16.mxu0 %v5945_v7  ;;  %5250 = vmatprep.subr.bf16.mxu1 %v5947_v0 }
 0xa82   : > { %5210 = vmatpush1.bf16.msra.mxu0 %v5944_v56  ;;  %5251 = vmatpush1.bf16.msra.mxu1 %v5946_v58 }
 0xa85   : > { %5212 = vmatmul.mubr.bf16.vlgmr.msra.gmra.mrb[100].mxu0 %v8831_v47  ;;  %5253 = vmatmul.mubr.bf16.vlgmr.msra.gmra.mrb[100].mxu1 %v8831_v47 }
 0xa98   : > { %v4086_v40 = vpop.f32.mrb[88].mxu0  ;;  %v4127_v55 = vpop.f32.mrb[88].mxu1 }
 0xa99   : > { %v4216_v42 = vadd.f32 %v4086_v40, %v10084_v54  ;;  %v4218_v46 = vadd.f32 %v4127_v55, %v10085_v35  ;;  %v4088_v12 = vpop.f32.mrb[89].mxu0  ;;  %v4129_v25 = vpop.f32.mrb[89].mxu1 }
 0xa9a   : > { %v4217_v29 = vadd.f32 %v4088_v12, %v10086_v21  ;;  %v4219_v16 = vadd.f32 %v4129_v25, %v10087_v39  ;;  %v4090_v38 = vpop.f32.mrb[90].mxu0  ;;  %v4131_v15 = vpop.f32.mrb[90].mxu1 }
 0xa9b   : > { %v5816_v8 = vmul.f32 -1.442695, %v4218_v46  ;;  %v4091_v27 = vpop.f32.mrb[91].mxu0  ;;  %v4132_v11 = vpop.f32.mrb[91].mxu1  ;;  %v5814_v36 = vmul.f32 -1.442695, %v4216_v42 }
 0xa9c   : > { %v5817_v22 = vmul.f32 -1.442695, %v4219_v16  ;;  %v5815_v33 = vmul.f32 -1.442695, %v4217_v29  ;;  %v4277_v25 = vpop.permute.xlu1 %4276 }
 0xa9d   : > { %6236 = vpow2.f32 %v5816_v8 }
 0xa9e   : > { %6238 = vpow2.f32 %v5817_v22 }
 0xaa7   : > { %v6237_v47 = vpop.eup %6236 }
 0xaa8   : > { %v4242_v1 = vadd.f32 1.0, %v6237_v47  ;;  %v6239_v32 = vpop.eup %6238 }
 0xaa9   : > { %v4243_v13 = vadd.f32 1.0, %v6239_v32 }
 0xaaa   : > { %6240 = vrcp.f32 %v4242_v1 }
 0xaab   : > { %6242 = vrcp.f32 %v4243_v13 }
 0xaac   : > { %6244 = vpow2.f32 %v5814_v36 }
 0xaad   : > { %6246 = vpow2.f32 %v5815_v33 }
 0xab4   : > { %v6241_v17 = vpop.eup %6240 }
 0xab5   : > { %v4262_v18 = vmul.f32 %v6241_v17, %v8662_v5  ;;  %v6243_v19 = vpop.eup %6242 }
 0xab6   : > { %v4263_v48 = vmul.f32 %v6243_v19, %v8665_v62  ;;  %v6245_v14 = vpop.eup %6244 }
 0xab7   : > { %v6247_v10 = vpop.eup %6246  ;;  %v4230_v61 = vadd.f32 1.0, %v6245_v14 }
 0xab8   : > { %v4231_v57 = vadd.f32 1.0, %v6247_v10 }
 0xab9   : > { %6248 = vrcp.f32 %v4230_v61 }
 0xaba   : > { %6250 = vrcp.f32 %v4231_v57 }
 0xac3   : > { %v6249_v44 = vpop.eup %6248 }
 0xac4   : > { %v6251_v49 = vpop.eup %6250 }
 0xad8   : > { %v4168_v4 = vpop.f32.mrb[92].mxu0  ;;  %v4209_v31 = vpop.f32.mrb[92].mxu1 }
 0xad9   : > { %v4220_v51 = vadd.f32 %v4168_v4, %v10088_v52  ;;  %v4222_v43 = vadd.f32 %v4209_v31, %v10089_v2  ;;  %v4170_v23 = vpop.f32.mrb[93].mxu0  ;;  %v4211_v5 = vpop.f32.mrb[93].mxu1 }
 0xada   : > { %v4221_v62 = vadd.f32 %v4170_v23, %v10090_v45  ;;  %v4223_v9 = vadd.f32 %v4211_v5, %v10091_v50  ;;  %v4172_v59 = vpop.f32.mrb[94].mxu0  ;;  %v4213_v37 = vpop.f32.mrb[94].mxu1 }
 0xadb   : > { %6252 = vtanh.f32 %v4220_v51  ;;  %v5818_v26 = vmul.f32 -1.442695, %v4222_v43  ;;  %v4173_v60 = vpop.f32.mrb[95].mxu0  ;;  %v4214_v3 = vpop.f32.mrb[95].mxu1 }
 0xadc   : > { %6254 = vtanh.f32 %v4221_v62  ;;  %v5819_v30 = vmul.f32 -1.442695, %v4223_v9 }
 0xadd   : > { %6256 = vpow2.f32 %v5818_v26 }
 0xade   : > { %6258 = vpow2.f32 %v5819_v30 }
 0xae5   : > { %v6253_v63 = vpop.eup %6252 }
 0xae6   : > { %v6255_v53 = vpop.eup %6254  ;;  %v4264_v24 = vmul.f32 %v6253_v63, %v6249_v44 }
 0xae7   : > { %v6257_v34 = vpop.eup %6256  ;;  %v4265_v6 = vmul.f32 %v6255_v53, %v6251_v49 }
 0xae8   : > { %v6259_v41 = vpop.eup %6258  ;;  %v4266_v7 = vadd.f32 %v4264_v24, %v4262_v18  ;;  %v4256_v0 = vadd.f32 1.0, %v6257_v34  ;;  %v10092_v18 = vld [vmem:[#allocation136_spill] sm:$0xff] }
 0xae9   : > { %v4267_v56 = vadd.f32 %v4265_v6, %v4263_v48  ;;  %v4257_v58 = vadd.f32 1.0, %v6259_v41  ;;  %v10093_v19 = vsub.s32 0, %v10092_v18  ;;  %v10094_v36 = vsub.s32 2, %v10092_v18 }
 0xaea   : > { %6260 = vtanh.f32 %v4266_v7  ;;  %v10095_v14 = vsub.s32 1, %v10092_v18  ;;  %v10096_v61 = vsub.s32 3, %v10092_v18  ;;  %v10097_v60 = vsub.s32 4, %v10092_v18 }
 0xaeb   : > { %6262 = vrcp.f32 %v4256_v0  ;;  %v10098_v30 = vsub.s32 6, %v10092_v18  ;;  %v10099_v63 = vsub.s32 5, %v10092_v18  ;;  %v10100_v24 = vsub.s32 7, %v10092_v18 }
 0xaec   : > { %6264 = vtanh.f32 %v4267_v56 }
 0xaed   : > { %6266 = vrcp.f32 %v4257_v58 }
 0xaf4   : > { %v6261_v40 = vpop.eup %6260 }
 0xaf5   : > { %v6263_v55 = vpop.eup %6262 }
 0xaf6   : > { %v6265_v54 = vpop.eup %6264  ;;  %v4270_v42 = vmul.f32 %v6263_v55, %v6261_v40 }
 0xaf7   : > { %v6267_v35 = vpop.eup %6266 }
 0xaf8   : > { %v4271_v46 = vmul.f32 %v6267_v35, %v6265_v54  ;;  %v4272_v12 = vsub.f32 %v4270_v42, %v8670_v20 }
 0xafa   : > { %v4273_v21 = vsub.f32 %v4271_v46, %v8673_v28  ;;  %v4279_v29 = vmul.f32 %v4277_v25, %v4272_v12 }
 0xafc   : > { %v4280_v39 = vmul.f32 %v4277_v25, %v4273_v21  ;;  %v8908_v16 = vadd.f32 %v4279_v29, %v8670_v20 }
 0xafe   : > { %v8911_v38 = vadd.f32 %v4280_v39, %v8673_v28  ;;  %v5309_v15 = vmul.f32 %v8908_v16, %v8908_v16  ;;  %v4415_v28 = vld [vmem:[%s474_s27] sm:$0xff] }
 0xaff   : > { %v4420_v48 = vrot.slane %v4415_v28, %v10093_v19  ;;  %v4428_v33 = vrot.slane %v4415_v28, %v10094_v36  ;;  %v4424_v10 = vrot.slane %v4415_v28, %v10095_v14  ;;  %v4432_v57 = vrot.slane %v4415_v28, %v10096_v61 }
 0xb00   : > { %v5310_v8 = vmul.f32 %v8911_v38, %v8911_v38  ;;  %v4436_v3 = vrot.slane %v4415_v28, %v10097_v60  ;;  %v4444_v44 = vrot.slane %v4415_v28, %v10098_v30  ;;  %v4440_v53 = vrot.slane %v4415_v28, %v10099_v63 }
 0xb01   : > { %v4448_v34 = vrot.slane %v4415_v28, %v10100_v24 }
 0xb02   : > { %v5311_v27 = vadd.f32 %v5310_v8, %v5309_v15 }
 0xb04   : > { %5312 = vadd.xlane.f32.xlu0 %v5311_v27 }
 0xb18   : > { %v5131_v11 = vpop.f32.mrb[96].mxu0  ;;  %v5172_v22 = vpop.f32.mrb[96].mxu1 }
 0xb19   : > { %v5133_v47 = vpop.f32.mrb[97].mxu0  ;;  %v5174_v1 = vpop.f32.mrb[97].mxu1  ;;  %v5132_v4 = vadd.f32 %v5131_v11, %v4420_v48  ;;  %v5173_v31 = vadd.f32 %v5172_v22, %v4428_v33 }
 0xb1a   : > { %v5135_v32 = vpop.f32.mrb[98].mxu0  ;;  %v5176_v13 = vpop.f32.mrb[98].mxu1  ;;  %v5134_v52 = vadd.f32 %v5133_v47, %v4424_v10  ;;  %v5175_v51 = vadd.f32 %v5174_v1, %v4432_v57 }
 0xb1b   : > { %v5136_v17 = vpop.f32.mrb[99].mxu0  ;;  %v5177_v20 = vpop.f32.mrb[99].mxu1  ;;  %v5948_v2 = vmul.f32 -1.442695, %v5132_v4  ;;  %v5950_v43 = vmul.f32 -1.442695, %v5173_v31 }
 0xb1c   : > { %v5949_v23 = vmul.f32 -1.442695, %v5134_v52  ;;  %v5951_v5 = vmul.f32 -1.442695, %v5175_v51 }
 0xb1d   : > { %6268 = vpow2.f32 %v5948_v2 }
 0xb1e   : > { %6270 = vpow2.f32 %v5950_v43 }
 0xb1f   : > { %6272 = vpow2.f32 %v5949_v23 }
 0xb20   : > { %6274 = vpow2.f32 %v5951_v5 }
 0xb27   : > { %v6269_v45 = vpop.eup %6268 }
 0xb28   : > { %v6271_v62 = vpop.eup %6270  ;;  %v5267_v59 = vadd.f32 1.0, %v6269_v45 }
 0xb29   : > { %v6273_v50 = vpop.eup %6272  ;;  %v5279_v37 = vadd.f32 1.0, %v6271_v62 }
 0xb2a   : > { %v6275_v9 = vpop.eup %6274  ;;  %v5268_v26 = vadd.f32 1.0, %v6273_v50  ;;  %6276 = vrcp.f32 %v5267_v59 }
 0xb2b   : > { %v5280_v49 = vadd.f32 1.0, %v6275_v9  ;;  %6278 = vrcp.f32 %v5279_v37 }
 0xb2c   : > { %6280 = vrcp.f32 %v5268_v26 }
 0xb2d   : > { %6282 = vrcp.f32 %v5280_v49 }
 0xb34   : > { %v6277_v21 = vpop.eup %6276 }
 0xb35   : > { %v6279_v29 = vpop.eup %6278 }
 0xb36   : > { %v6281_v39 = vpop.eup %6280  ;;  %v5299_v11 = vmul.f32 0.0, %v6279_v29 }
 0xb37   : > { %v6283_v15 = vpop.eup %6282 }
 0xb38   : > { %v5300_v1 = vmul.f32 0.0, %v6283_v15 }
 0xb58   : > { %v5213_v6 = vpop.f32.mrb[100].mxu0  ;;  %v5254_v41 = vpop.f32.mrb[100].mxu1 }
 0xb59   : > { %v5214_v7 = vadd.f32 %v5213_v6, %v4436_v3  ;;  %v5255_v0 = vadd.f32 %v5254_v41, %v4444_v44  ;;  %v5215_v56 = vpop.f32.mrb[101].mxu0  ;;  %v5256_v58 = vpop.f32.mrb[101].mxu1 }
 0xb5a   : > { %v5216_v40 = vadd.f32 %v5215_v56, %v4440_v53  ;;  %v5257_v55 = vadd.f32 %v5256_v58, %v4448_v34  ;;  %v5217_v54 = vpop.f32.mrb[102].mxu0  ;;  %v5258_v42 = vpop.f32.mrb[102].mxu1 }
 0xb5b   : > { %6284 = vtanh.f32 %v5214_v7  ;;  %v5952_v35 = vmul.f32 -1.442695, %v5255_v0  ;;  %v5218_v46 = vpop.f32.mrb[103].mxu0  ;;  %v5259_v12 = vpop.f32.mrb[103].mxu1 }
 0xb5c   : > { %6286 = vtanh.f32 %v5216_v40  ;;  %v5953_v25 = vmul.f32 -1.442695, %v5257_v55 }
 0xb5d   : > { %6288 = vpow2.f32 %v5952_v35 }
 0xb5e   : > { %6290 = vpow2.f32 %v5953_v25 }
 0xb65   : > { %v6285_v8 = vpop.eup %6284 }
 0xb66   : > { %v6287_v27 = vpop.eup %6286  ;;  %v5301_v22 = vmul.f32 %v6285_v8, %v6277_v21 }
 0xb67   : > { %v6289_v47 = vpop.eup %6288  ;;  %v5302_v32 = vmul.f32 %v6287_v27, %v6281_v39 }
 0xb68   : > { %v6291_v13 = vpop.eup %6290  ;;  %v5303_v17 = vadd.f32 %v5301_v22, %v5299_v11  ;;  %v5293_v20 = vadd.f32 1.0, %v6289_v47 }
 0xb69   : > { %v5304_v28 = vadd.f32 %v5302_v32, %v5300_v1  ;;  %v5294_v18 = vadd.f32 1.0, %v6291_v13 }
 0xb6a   : > { %6292 = vtanh.f32 %v5303_v17 }
 0xb6b   : > { %6294 = vrcp.f32 %v5293_v20 }
 0xb6c   : > { %6296 = vtanh.f32 %v5304_v28 }
 0xb6d   : > { %6298 = vrcp.f32 %v5294_v18 }
 0xb74   : > { %v6293_v19 = vpop.eup %6292 }
 0xb75   : > { %v6295_v48 = vpop.eup %6294 }
 0xb76   : > { %v6297_v36 = vpop.eup %6296  ;;  %v5307_v33 = vmul.f32 %v6295_v48, %v6293_v19 }
 0xb77   : > { %v6299_v14 = vpop.eup %6298 }
 0xb78   : > { %v5308_v10 = vmul.f32 %v6299_v14, %v6297_v36  ;;  %v5314_v61 = vmul.f32 %v5307_v33, %v5307_v33 }
 0xb7a   : > { %v5315_v57 = vmul.f32 %v5308_v10, %v5308_v10 }
 0xb7c   : > { %v5316_v4 = vadd.f32 %v5315_v57, %v5314_v61 }
 0xb7e   : > { %5317 = vadd.xlane.f32.xlu1 %v5316_v4 }
 0xb91   : > { %v5313_v31 = vpop.xlane.xlu0 %5312 }
 0xc0b   : > { %v5318_v52 = vpop.xlane.xlu1 %5317 }
 0xc0c   : > { %v5319_v51 = vadd.f32 %v5318_v52, %v5313_v31 }
 0xc0e   : > { %v5320_v2 = vmax.f32 %v5319_v51, 1e-24 }
 0xc10   : > { %6300 = vrsqrt.f32 %v5320_v2 }
 0xc1a   : > { %v6301_v43 = vpop.eup %6300 }
 0xc1b   : > { %v5322_v23 = vmul.f32 %v6301_v43, %v8908_v16  ;;  %v5323_v5 = vmul.f32 %v6301_v43, %v8911_v38  ;;  %v5326_v45 = vmul.f32 %v6301_v43, %v5307_v33  ;;  %v5327_v62 = vmul.f32 %v6301_v43, %v5308_v10 }
 0xc1d   : > { %5324 = vst [vmem:[%s479_s30] sm:$0xff] %v5322_v23  ;;  %5325 = vst [vmem:[%s479_s30 + $0x8] sm:$0xff] %v5323_v5 }
 0xc1e   : > { %5328 = vst [vmem:[%s479_s30 + $0x10] sm:$0xff] %v5326_v45  ;;  %5329 = vst [vmem:[%s479_s30 + $0x18] sm:$0xff] %v5327_v62 }
 0xc1f PF: > { %p21_p11 = scmp.ge.s32.totalorder %s6474_s10, 4   ;;  %s10101_s27 = smov %s6392_s28 }
 0xc20   : > { %s10102_s28 = smov %s6396_s29  ;;  %s10103_s29 = smov %s6484_s13 }
 0xc21   : > { %s10104_s30 = smov %s6474_s10  ;;  %23 = sbr.rel (!%p21_p11) target bundleno = 5 (0x5), region = 123 }
 0xc28   :  { %5351 = vsyncpa [#allocation3], 1 }
 0xc29   :  { %5353 = vsyncpa [#allocation3 + $0x1], 1 }
 0xc2a   :  { %5354 = vsyncpa [#allocation5], 1 }
 0xc2b   :  { %5356 = vsyncpa [#allocation5 + $0x1], 1 }

</bundles_post_ra>
